<compile_context>
chip_gen: v5e
topology: v5e:2x2
jax: 0.10.0
libtpu: 0.0.40
codegen_flags: <defaults>
</compile_context>

<pallas_src>
import functools

import jax
import jax.numpy as jnp
from jax import lax
from jax.experimental import pallas as pl
from jax.experimental.pallas import tpu as pltpu

# ----------------------- model hyper-parameters (small) -----------------------
INPUT_SIZE = 16          # "height" of the input == LSTM feature size
WIDTH = 20               # "width" of the input  == sequence length
OUTPUT_SIZE = 10
LSTM_SIZE = 32
KERN_1 = 5
KERN_2 = 3
STRIDE_1 = (KERN_1 - 1) // 2     # = 2
C1_OUT = 64
C2_OUT = 128
BATCH = 2

# derived conv shapes (NHWC; H = WIDTH (seq len), W = LSTM_SIZE)
OH1 = (WIDTH - KERN_1) // STRIDE_1 + 1          # conv1 H out = 8
OW1 = (LSTM_SIZE - KERN_1) // STRIDE_1 + 1      # conv1 W out = 14
OH2 = OH1 - 2                                   # maxpool 3x3 stride 1 -> 6
OW2 = OW1 - 2                                   # -> 12
OH3 = OH2 - (KERN_2 - 1)                        # conv2 (stride 1) -> 4
OW3 = OW2 - (KERN_2 - 1)                        # -> 10
assert OH3 > 0 and OW3 > 0


# ------------------------------- kernel ---------------------------------------
def lstm_cnn_kernel(x_ref, wih1T_ref, whh1T_ref, b1_ref,
                    wih2T_ref, whh2T_ref, b2_ref,
                    pscale_ref, pbias_ref,
                    m1_ref, b1t_ref, w2cat_ref, b2c_ref,
                    gamma_ref, beta_ref, fcWT_ref, fcb_ref,
                    o_ref, h2win_ref, *, b_real):
    # x_ref: (T*Bp, DIN) time-major flat (bf16).  o_ref: (Bp, OUTPUT_SIZE) f32.
    # h2win_ref: (KERN_1, OH1*Bp, H) f32 VMEM scratch holding the conv1 kh-windows.
    Bp = o_ref.shape[0]
    T = x_ref.shape[0] // Bp
    H = whh1T_ref.shape[0]

    # ---------------- 2-layer LSTM ----------------
    # Input projection for ALL timesteps in one MXU matmul (no recurrence dep).
    # Weights/biases carry the folded per-gate 0.5 pre-scale of the tanh-form sigmoid.
    xg = jnp.dot(x_ref[...], wih1T_ref[...],
                 preferred_element_type=jnp.float32) + b1_ref[...]        # (T*Bp, 4H)

    # Hoist loop-invariant weights / lane-constant vectors out of the recurrence.
    whh1T = whh1T_ref[...]
    wih2T = wih2T_ref[...]
    whh2T = whh2T_ref[...]
    b2 = b2_ref[...]
    ps = pscale_ref[...]       # (1, 4H) post-scale  [0.5, 0.5, 1.0, 0.5] per gate
    pb = pbias_ref[...]        # (1, 4H) post-bias   [0.5, 0.5, 0.0, 0.5] per gate

    def gates(pre, c_prev):
        # ONE full-width tanh over the (Bp, 4H) pre-activations (pre-scale already
        # folded into the weights), then a lane-constant FMA; PyTorch order i,f,g,o.
        a = jnp.tanh(pre) * ps + pb
        i = a[:, 0 * H:1 * H]
        f = a[:, 1 * H:2 * H]
        g = a[:, 2 * H:3 * H]
        o = a[:, 3 * H:4 * H]
        c = f * c_prev + i * g
        h = o * jnp.tanh(c)
        return h, c

    zf = jnp.zeros((Bp, H), jnp.float32)
    zb = jnp.zeros((Bp, H), jnp.bfloat16)
    c1, c2 = zf, zf
    h1b, h2b = zb, zb          # bf16 copies feeding the MXU (cast once per step)
    for t in range(T):         # fully unrolled (T is small & static)
        g1 = xg[t * Bp:(t + 1) * Bp, :] + jnp.dot(
            h1b, whh1T, preferred_element_type=jnp.float32)
        h1, c1 = gates(g1, c1)
        h1b = h1.astype(jnp.bfloat16)
        # layer-2: two dots (no per-step concatenate)
        g2 = (jnp.dot(h1b, wih2T, preferred_element_type=jnp.float32)
              + jnp.dot(h2b, whh2T, preferred_element_type=jnp.float32) + b2)
        h2, c2 = gates(g2, c2)
        h2b = h2.astype(jnp.bfloat16)
        # Scatter this timestep's layer-2 output into its conv1 (kh, oh) windows:
        # whole-sublane static stores, a side effect of the serial loop.
        for kh in range(KERN_1):
            d = t - kh
            if d >= 0 and d % STRIDE_1 == 0:
                oh = d // STRIDE_1
                if oh < OH1:
                    h2win_ref[kh, oh * Bp:(oh + 1) * Bp, :] = h2

    # ---------------- conv1 (5x5, stride 2): 5 MXU matmuls summed over kh ------
    # m1[kh, w, ow*64+co] = W1[co,0,kh, w-2*ow] (kw/stride selection pre-folded).
    acc = jnp.zeros((OH1 * Bp, OW1 * C1_OUT), jnp.float32)
    for kh in range(KERN_1):
        acc = acc + jnp.dot(h2win_ref[kh].astype(jnp.bfloat16), m1_ref[kh],
                            preferred_element_type=jnp.float32)
    conv1 = acc + b1t_ref[...]                                            # (OH1*Bp, OW1*64)

    # ---------------- 3x3 stride-1 maxpool (lane-flat NHWC: lane = ow*64+c) ----
    L = C1_OUT
    mw = jnp.maximum(jnp.maximum(conv1[:, 0:OW2 * L],
                                 conv1[:, L:(OW2 + 1) * L]),
                     conv1[:, 2 * L:(OW2 + 2) * L])                       # (OH1*Bp, OW2*64)
    mh = jnp.maximum(jnp.maximum(mw[0:OH2 * Bp, :],
                                 mw[Bp:(OH2 + 1) * Bp, :]),
                     mw[2 * Bp:(OH2 + 2) * Bp, :])                        # (OH2*Bp, OW2*64)

    # ---------------- conv2 (3x3, 64->128) fused with global avg pool ---------
    # Avg-pool commutes with the conv sum: per-kh row-window sums, then one
    # matmul per kh against the kw/ow-folded weight slice (no lane concat).
    gap = jnp.zeros((Bp, C2_OUT), jnp.float32)
    for kh in range(KERN_2):
        s = mh[kh * Bp:(kh + 1) * Bp, :]
        for j in range(1, OH3):
            s = s + mh[(kh + j) * Bp:(kh + j + 1) * Bp, :]
        gap = gap + jnp.dot(s.astype(jnp.bfloat16), w2cat_ref[kh],
                            preferred_element_type=jnp.float32)
    gap = gap * (1.0 / float(OH3 * OW3)) + b2c_ref[...]                   # (Bp, 128)

    # -------- BatchNorm1d (training batch stats over REAL rows) + FC + softmax --
    row = lax.broadcasted_iota(jnp.int32, (Bp, 1), 0)
    mask = (row < b_real).astype(jnp.float32)
    inv_b = 1.0 / float(b_real)
    mean = jnp.sum(gap * mask, axis=0, keepdims=True) * inv_b
    diff = gap - mean
    var = jnp.sum(diff * diff * mask, axis=0, keepdims=True) * inv_b
    y = diff * lax.rsqrt(var + 1e-5) * gamma_ref[...] + beta_ref[...]
    logits = jnp.dot(y.astype(jnp.bfloat16), fcWT_ref[...],
                     preferred_element_type=jnp.float32) + fcb_ref[...]
    mx = jnp.max(logits, axis=1, keepdims=True)
    e = jnp.exp(logits - mx)
    o_ref[...] = e / jnp.sum(e, axis=1, keepdims=True)


# ------------------------------- wrapper ---------------------------------------
def _vmem():
    return pl.BlockSpec(memory_space=pltpu.MemorySpace.VMEM)


@jax.jit
def lstm_cnn_forward(x, params):
    # torch: x = squeeze(x); b, height, width = x.shape; x = x.reshape(b, width, height)
    x = jnp.squeeze(x, axis=1)
    B, height, width = x.shape
    xs = jnp.reshape(x, (B, width, height)).astype(jnp.float32)   # (B, T, DIN)

    Bp = ((B + 7) // 8) * 8                      # pad batch to a sublane multiple
    x_tm = jnp.transpose(xs, (1, 0, 2))          # time-major (T, B, DIN)
    x_tm = jnp.pad(x_tm, ((0, 0), (0, Bp - B), (0, 0)))
    x_tm = x_tm.reshape(width * Bp, height).astype(jnp.bfloat16)

    cost = pl.CostEstimate(flops=28_000_000, transcendentals=52_000,
                           bytes_accessed=1_000_000)
    kernel = functools.partial(lstm_cnn_kernel, b_real=B)
    out = pl.pallas_call(
        kernel,
        out_shape=jax.ShapeDtypeStruct((Bp, OUTPUT_SIZE), jnp.float32),
        in_specs=[_vmem()] * 17,
        out_specs=_vmem(),
        scratch_shapes=[pltpu.VMEM((KERN_1, OH1 * Bp, LSTM_SIZE), jnp.float32)],
        cost_estimate=cost,
    )(x_tm,
      params["wih1T"], params["whh1T"], params["b1"],
      params["wih2T"], params["whh2T"], params["b2"],
      params["post_scale"], params["post_bias"],
      params["m1"], params["bias1t"], params["w2cat"], params["bias2"],
      params["bn_gamma"], params["bn_beta"], params["fcWT"], params["fcb"])
    return out[:B]


# ------------------------------ parameters -------------------------------------
def init_params(key):
    ks = jax.random.split(key, 14)

    def u(k, shape, fan_in):
        bound = float(fan_in) ** -0.5
        return jax.random.uniform(k, shape, jnp.float32, -bound, bound)

    H = LSTM_SIZE
    # nn.LSTM(input_size, H, num_layers=2): torch layouts (4H, in), (4H, H), (4H,)
    wih1 = u(ks[0], (4 * H, INPUT_SIZE), H)
    whh1 = u(ks[1], (4 * H, H), H)
    bih1 = u(ks[2], (4 * H,), H)
    bhh1 = u(ks[3], (4 * H,), H)
    wih2 = u(ks[4], (4 * H, H), H)
    whh2 = u(ks[5], (4 * H, H), H)
    bih2 = u(ks[6], (4 * H,), H)
    bhh2 = u(ks[7], (4 * H,), H)
    # nn.Conv2d(1, 64, 5, stride=2): (64, 1, 5, 5), bias (64,)
    w1 = u(ks[8], (C1_OUT, 1, KERN_1, KERN_1), KERN_1 * KERN_1)
    bias1 = u(ks[9], (C1_OUT,), KERN_1 * KERN_1)
    # nn.Conv2d(64, 128, 3): (128, 64, 3, 3), bias (128,)
    w2 = u(ks[10], (C2_OUT, C1_OUT, KERN_2, KERN_2), C1_OUT * KERN_2 * KERN_2)
    bias2 = u(ks[11], (C2_OUT,), C1_OUT * KERN_2 * KERN_2)
    # nn.BatchNorm1d(128)
    gamma = jnp.ones((C2_OUT,), jnp.float32)
    beta = jnp.zeros((C2_OUT,), jnp.float32)
    # nn.Linear(128, OUTPUT_SIZE)
    fcw = u(ks[12], (OUTPUT_SIZE, C2_OUT), C2_OUT)
    fcb = u(ks[13], (OUTPUT_SIZE,), C2_OUT)

    # --- tanh-form sigmoid folding: sigmoid(v)=0.5*tanh(0.5v)+0.5 (gate order i,f,g,o)
    ones = jnp.ones((H,), jnp.float32)
    pre = jnp.concatenate([0.5 * ones, 0.5 * ones, 1.0 * ones, 0.5 * ones])   # (4H,)
    post_scale = jnp.concatenate([0.5 * ones, 0.5 * ones, 1.0 * ones, 0.5 * ones])[None, :]
    post_bias = jnp.concatenate([0.5 * ones, 0.5 * ones, 0.0 * ones, 0.5 * ones])[None, :]

    # Fold the pre-scale into the (transposed) LSTM weights/biases; cast MXU weights bf16.
    wih1T = (wih1.T * pre[None, :]).astype(jnp.bfloat16)     # (DIN, 4H)
    whh1T = (whh1.T * pre[None, :]).astype(jnp.bfloat16)     # (H, 4H)
    b1 = ((bih1 + bhh1) * pre)[None, :]                      # (1, 4H) f32
    wih2T = (wih2.T * pre[None, :]).astype(jnp.bfloat16)     # (H, 4H)
    whh2T = (whh2.T * pre[None, :]).astype(jnp.bfloat16)     # (H, 4H)
    b2 = ((bih2 + bhh2) * pre)[None, :]                      # (1, 4H) f32

    # --- conv1 folded weight: M1[kh, w, ow*64+co] = W1[co,0,kh, w-2*ow] ---------
    kh_i = jnp.arange(KERN_1)[:, None, None, None]
    w_i = jnp.arange(LSTM_SIZE)[None, :, None, None]
    ow_i = jnp.arange(OW1)[None, None, :, None]
    co_i = jnp.arange(C1_OUT)[None, None, None, :]
    kw_i = w_i - STRIDE_1 * ow_i
    valid = (kw_i >= 0) & (kw_i < KERN_1)
    m1 = jnp.where(valid, w1[co_i, 0, kh_i, jnp.clip(kw_i, 0, KERN_1 - 1)], 0.0)
    m1 = m1.reshape(KERN_1, LSTM_SIZE, OW1 * C1_OUT).astype(jnp.bfloat16)  # (5, 32, 896)
    bias1t = jnp.tile(bias1, OW1)[None, :]                                 # (1, 896) f32

    # --- conv2+GAP folded weight: sum over kw of shifted W2 -> (3, 12*64, 128) ---
    kh2 = jnp.arange(KERN_2)[:, None, None, None]
    wpos = jnp.arange(OW2)[None, :, None, None]
    ci_i = jnp.arange(C1_OUT)[None, None, :, None]
    co2 = jnp.arange(C2_OUT)[None, None, None, :]
    acc = jnp.zeros((KERN_2, OW2, C1_OUT, C2_OUT), jnp.float32)
    for kw in range(KERN_2):
        ow = wpos - kw
        ok = (ow >= 0) & (ow < OW3)
        acc = acc + jnp.where(ok, w2[co2, ci_i, kh2, kw], 0.0)
    w2cat = acc.reshape(KERN_2, OW2 * C1_OUT, C2_OUT).astype(jnp.bfloat16)  # (3, 768, 128)

    return dict(
        wih1T=wih1T, whh1T=whh1T, b1=b1,
        wih2T=wih2T, whh2T=whh2T, b2=b2,
        post_scale=post_scale, post_bias=post_bias,
        m1=m1, bias1t=bias1t, w2cat=w2cat, bias2=bias2[None, :],
        bn_gamma=gamma[None, :], bn_beta=beta[None, :],
        fcWT=fcw.T.astype(jnp.bfloat16), fcb=fcb[None, :],
    )


if __name__ == "__main__":
    key = jax.random.PRNGKey(0)
    pkey, xkey = jax.random.split(key)
    params = init_params(pkey)
    # Input mirrors a (B, 1, height, width) NCHW tensor; torch.squeeze drops the 1.
    x = jax.random.normal(xkey, (BATCH, 1, INPUT_SIZE, WIDTH), jnp.float32)
    out = jax.block_until_ready(lstm_cnn_forward(x, params))
    assert out.shape == (BATCH, OUTPUT_SIZE)
    assert bool(jnp.all(jnp.isfinite(out)))
    # softmax rows should sum to ~1
    assert bool(jnp.all(jnp.abs(jnp.sum(out, axis=1) - 1.0) < 1e-4))
    print("KERNEL_OK")
</pallas_src>

<mosaic_0001>
module attributes {stable_mosaic.version = 11 : i64} {
  func.func @lstm_cnn_kernel(%arg0: memref<160x16xbf16, #tpu.memory_space<vmem>>, %arg1: memref<16x128xbf16, #tpu.memory_space<vmem>>, %arg2: memref<32x128xbf16, #tpu.memory_space<vmem>>, %arg3: memref<1x128xf32, #tpu.memory_space<vmem>>, %arg4: memref<32x128xbf16, #tpu.memory_space<vmem>>, %arg5: memref<32x128xbf16, #tpu.memory_space<vmem>>, %arg6: memref<1x128xf32, #tpu.memory_space<vmem>>, %arg7: memref<1x128xf32, #tpu.memory_space<vmem>>, %arg8: memref<1x128xf32, #tpu.memory_space<vmem>>, %arg9: memref<5x32x896xbf16, #tpu.memory_space<vmem>>, %arg10: memref<1x896xf32, #tpu.memory_space<vmem>>, %arg11: memref<3x768x128xbf16, #tpu.memory_space<vmem>>, %arg12: memref<1x128xf32, #tpu.memory_space<vmem>>, %arg13: memref<1x128xf32, #tpu.memory_space<vmem>>, %arg14: memref<1x128xf32, #tpu.memory_space<vmem>>, %arg15: memref<128x10xbf16, #tpu.memory_space<vmem>>, %arg16: memref<1x10xf32, #tpu.memory_space<vmem>>, %arg17: memref<8x10xf32, #tpu.memory_space<vmem>>, %arg18: memref<5x64x32xf32, #tpu.memory_space<vmem>>) attributes {dimension_semantics = [], scalar_prefetch = 0 : i64, scratch_operands = 1 : i64, tpu.core_type = #tpu.core_type<tc>} {
    %c0 = arith.constant 0 : index
    %c0_0 = arith.constant 0 : index
    %0 = vector.load %arg0[%c0, %c0_0] : memref<160x16xbf16, #tpu.memory_space<vmem>>, vector<160x16xbf16>
    %c0_1 = arith.constant 0 : index
    %c0_2 = arith.constant 0 : index
    %1 = vector.load %arg1[%c0_1, %c0_2] : memref<16x128xbf16, #tpu.memory_space<vmem>>, vector<16x128xbf16>
    %cst = arith.constant dense<0.000000e+00> : vector<160x128xf32>
    %2 = tpu.matmul %0, %1, %cst {dimension_numbers = #tpu.dot_dimension_numbers<[1], [0], [0], [1], [0, 0, 1, 1], [], []>} : vector<160x16xbf16>, vector<16x128xbf16>, vector<160x128xf32> -> vector<160x128xf32>
    %c0_3 = arith.constant 0 : index
    %c0_4 = arith.constant 0 : index
    %3 = vector.load %arg3[%c0_3, %c0_4] : memref<1x128xf32, #tpu.memory_space<vmem>>, vector<1x128xf32>
    %4 = vector.broadcast %3 : vector<1x128xf32> to vector<160x128xf32>
    %5 = arith.addf %2, %4 : vector<160x128xf32>
    %c0_5 = arith.constant 0 : index
    %c0_6 = arith.constant 0 : index
    %6 = vector.load %arg2[%c0_5, %c0_6] : memref<32x128xbf16, #tpu.memory_space<vmem>>, vector<32x128xbf16>
    %c0_7 = arith.constant 0 : index
    %c0_8 = arith.constant 0 : index
    %7 = vector.load %arg4[%c0_7, %c0_8] : memref<32x128xbf16, #tpu.memory_space<vmem>>, vector<32x128xbf16>
    %c0_9 = arith.constant 0 : index
    %c0_10 = arith.constant 0 : index
    %8 = vector.load %arg5[%c0_9, %c0_10] : memref<32x128xbf16, #tpu.memory_space<vmem>>, vector<32x128xbf16>
    %c0_11 = arith.constant 0 : index
    %c0_12 = arith.constant 0 : index
    %9 = vector.load %arg6[%c0_11, %c0_12] : memref<1x128xf32, #tpu.memory_space<vmem>>, vector<1x128xf32>
    %c0_13 = arith.constant 0 : index
    %c0_14 = arith.constant 0 : index
    %10 = vector.load %arg7[%c0_13, %c0_14] : memref<1x128xf32, #tpu.memory_space<vmem>>, vector<1x128xf32>
    %c0_15 = arith.constant 0 : index
    %c0_16 = arith.constant 0 : index
    %11 = vector.load %arg8[%c0_15, %c0_16] : memref<1x128xf32, #tpu.memory_space<vmem>>, vector<1x128xf32>
    %cst_17 = arith.constant 0.000000e+00 : f32
    %12 = vector.broadcast %cst_17 : f32 to vector<8x32xf32>
    %cst_18 = arith.constant 0.000000e+00 : bf16
    %13 = vector.broadcast %cst_18 : bf16 to vector<8x32xbf16>
    %14 = vector.extract_strided_slice %5 {offsets = [0, 0], sizes = [8, 128], strides = [1, 1]} : vector<160x128xf32> to vector<8x128xf32>
    %cst_19 = arith.constant dense<0.000000e+00> : vector<8x128xf32>
    %15 = tpu.matmul %13, %6, %cst_19 {dimension_numbers = #tpu.dot_dimension_numbers<[1], [0], [0], [1], [0, 0, 1, 1], [], []>} : vector<8x32xbf16>, vector<32x128xbf16>, vector<8x128xf32> -> vector<8x128xf32>
    %16 = arith.addf %14, %15 : vector<8x128xf32>
    %17 = math.tanh %16 : vector<8x128xf32>
    %18 = vector.broadcast %10 : vector<1x128xf32> to vector<8x128xf32>
    %19 = arith.mulf %17, %18 : vector<8x128xf32>
    %20 = vector.broadcast %11 : vector<1x128xf32> to vector<8x128xf32>
    %21 = arith.addf %19, %20 : vector<8x128xf32>
    %22 = vector.extract_strided_slice %21 {offsets = [0, 0], sizes = [8, 32], strides = [1, 1]} : vector<8x128xf32> to vector<8x32xf32>
    %23 = vector.extract_strided_slice %21 {offsets = [0, 32], sizes = [8, 32], strides = [1, 1]} : vector<8x128xf32> to vector<8x32xf32>
    %24 = vector.extract_strided_slice %21 {offsets = [0, 64], sizes = [8, 32], strides = [1, 1]} : vector<8x128xf32> to vector<8x32xf32>
    %25 = vector.extract_strided_slice %21 {offsets = [0, 96], sizes = [8, 32], strides = [1, 1]} : vector<8x128xf32> to vector<8x32xf32>
    %26 = arith.mulf %23, %12 : vector<8x32xf32>
    %27 = arith.mulf %22, %24 : vector<8x32xf32>
    %28 = arith.addf %26, %27 : vector<8x32xf32>
    %29 = math.tanh %28 : vector<8x32xf32>
    %30 = arith.mulf %25, %29 : vector<8x32xf32>
    %31 = arith.truncf %30 : vector<8x32xf32> to vector<8x32xbf16>
    %cst_20 = arith.constant dense<0.000000e+00> : vector<8x128xf32>
    %32 = tpu.matmul %31, %7, %cst_20 {dimension_numbers = #tpu.dot_dimension_numbers<[1], [0], [0], [1], [0, 0, 1, 1], [], []>} : vector<8x32xbf16>, vector<32x128xbf16>, vector<8x128xf32> -> vector<8x128xf32>
    %cst_21 = arith.constant dense<0.000000e+00> : vector<8x128xf32>
    %33 = tpu.matmul %13, %8, %cst_21 {dimension_numbers = #tpu.dot_dimension_numbers<[1], [0], [0], [1], [0, 0, 1, 1], [], []>} : vector<8x32xbf16>, vector<32x128xbf16>, vector<8x128xf32> -> vector<8x128xf32>
    %34 = arith.addf %32, %33 : vector<8x128xf32>
    %35 = vector.broadcast %9 : vector<1x128xf32> to vector<8x128xf32>
    %36 = arith.addf %34, %35 : vector<8x128xf32>
    %37 = math.tanh %36 : vector<8x128xf32>
    %38 = vector.broadcast %10 : vector<1x128xf32> to vector<8x128xf32>
    %39 = arith.mulf %37, %38 : vector<8x128xf32>
    %40 = vector.broadcast %11 : vector<1x128xf32> to vector<8x128xf32>
    %41 = arith.addf %39, %40 : vector<8x128xf32>
    %42 = vector.extract_strided_slice %41 {offsets = [0, 0], sizes = [8, 32], strides = [1, 1]} : vector<8x128xf32> to vector<8x32xf32>
    %43 = vector.extract_strided_slice %41 {offsets = [0, 32], sizes = [8, 32], strides = [1, 1]} : vector<8x128xf32> to vector<8x32xf32>
    %44 = vector.extract_strided_slice %41 {offsets = [0, 64], sizes = [8, 32], strides = [1, 1]} : vector<8x128xf32> to vector<8x32xf32>
    %45 = vector.extract_strided_slice %41 {offsets = [0, 96], sizes = [8, 32], strides = [1, 1]} : vector<8x128xf32> to vector<8x32xf32>
    %46 = arith.mulf %43, %12 : vector<8x32xf32>
    %47 = arith.mulf %42, %44 : vector<8x32xf32>
    %48 = arith.addf %46, %47 : vector<8x32xf32>
    %49 = math.tanh %48 : vector<8x32xf32>
    %50 = arith.mulf %45, %49 : vector<8x32xf32>
    %51 = arith.truncf %50 : vector<8x32xf32> to vector<8x32xbf16>
    %c0_22 = arith.constant 0 : index
    %c0_23 = arith.constant 0 : index
    %c0_24 = arith.constant 0 : index
    %52 = vector.load %arg18[%c0_22, %c0_23, %c0_24] : memref<5x64x32xf32, #tpu.memory_space<vmem>>, vector<1x8x32xf32>
    %53 = vector.shape_cast %52 : vector<1x8x32xf32> to vector<8x32xf32>
    %54 = vector.shape_cast %50 : vector<8x32xf32> to vector<1x8x32xf32>
    tpu.vector_store %arg18[%c0_22, %c0_23, %c0_24], %54 {strides = array<i32>} : memref<5x64x32xf32, #tpu.memory_space<vmem>>, vector<1x8x32xf32>,
    %55 = vector.extract_strided_slice %5 {offsets = [8, 0], sizes = [8, 128], strides = [1, 1]} : vector<160x128xf32> to vector<8x128xf32>
    %cst_25 = arith.constant dense<0.000000e+00> : vector<8x128xf32>
    %56 = tpu.matmul %31, %6, %cst_25 {dimension_numbers = #tpu.dot_dimension_numbers<[1], [0], [0], [1], [0, 0, 1, 1], [], []>} : vector<8x32xbf16>, vector<32x128xbf16>, vector<8x128xf32> -> vector<8x128xf32>
    %57 = arith.addf %55, %56 : vector<8x128xf32>
    %58 = math.tanh %57 : vector<8x128xf32>
    %59 = vector.broadcast %10 : vector<1x128xf32> to vector<8x128xf32>
    %60 = arith.mulf %58, %59 : vector<8x128xf32>
    %61 = vector.broadcast %11 : vector<1x128xf32> to vector<8x128xf32>
    %62 = arith.addf %60, %61 : vector<8x128xf32>
    %63 = vector.extract_strided_slice %62 {offsets = [0, 0], sizes = [8, 32], strides = [1, 1]} : vector<8x128xf32> to vector<8x32xf32>
    %64 = vector.extract_strided_slice %62 {offsets = [0, 32], sizes = [8, 32], strides = [1, 1]} : vector<8x128xf32> to vector<8x32xf32>
    %65 = vector.extract_strided_slice %62 {offsets = [0, 64], sizes = [8, 32], strides = [1, 1]} : vector<8x128xf32> to vector<8x32xf32>
    %66 = vector.extract_strided_slice %62 {offsets = [0, 96], sizes = [8, 32], strides = [1, 1]} : vector<8x128xf32> to vector<8x32xf32>
    %67 = arith.mulf %64, %28 : vector<8x32xf32>
    %68 = arith.mulf %63, %65 : vector<8x32xf32>
    %69 = arith.addf %67, %68 : vector<8x32xf32>
    %70 = math.tanh %69 : vector<8x32xf32>
    %71 = arith.mulf %66, %70 : vector<8x32xf32>
    %72 = arith.truncf %71 : vector<8x32xf32> to vector<8x32xbf16>
    %cst_26 = arith.constant dense<0.000000e+00> : vector<8x128xf32>
    %73 = tpu.matmul %72, %7, %cst_26 {dimension_numbers = #tpu.dot_dimension_numbers<[1], [0], [0], [1], [0, 0, 1, 1], [], []>} : vector<8x32xbf16>, vector<32x128xbf16>, vector<8x128xf32> -> vector<8x128xf32>
    %cst_27 = arith.constant dense<0.000000e+00> : vector<8x128xf32>
    %74 = tpu.matmul %51, %8, %cst_27 {dimension_numbers = #tpu.dot_dimension_numbers<[1], [0], [0], [1], [0, 0, 1, 1], [], []>} : vector<8x32xbf16>, vector<32x128xbf16>, vector<8x128xf32> -> vector<8x128xf32>
    %75 = arith.addf %73, %74 : vector<8x128xf32>
    %76 = vector.broadcast %9 : vector<1x128xf32> to vector<8x128xf32>
    %77 = arith.addf %75, %76 : vector<8x128xf32>
    %78 = math.tanh %77 : vector<8x128xf32>
    %79 = vector.broadcast %10 : vector<1x128xf32> to vector<8x128xf32>
    %80 = arith.mulf %78, %79 : vector<8x128xf32>
    %81 = vector.broadcast %11 : vector<1x128xf32> to vector<8x128xf32>
    %82 = arith.addf %80, %81 : vector<8x128xf32>
    %83 = vector.extract_strided_slice %82 {offsets = [0, 0], sizes = [8, 32], strides = [1, 1]} : vector<8x128xf32> to vector<8x32xf32>
    %84 = vector.extract_strided_slice %82 {offsets = [0, 32], sizes = [8, 32], strides = [1, 1]} : vector<8x128xf32> to vector<8x32xf32>
    %85 = vector.extract_strided_slice %82 {offsets = [0, 64], sizes = [8, 32], strides = [1, 1]} : vector<8x128xf32> to vector<8x32xf32>
    %86 = vector.extract_strided_slice %82 {offsets = [0, 96], sizes = [8, 32], strides = [1, 1]} : vector<8x128xf32> to vector<8x32xf32>
    %87 = arith.mulf %84, %48 : vector<8x32xf32>
    %88 = arith.mulf %83, %85 : vector<8x32xf32>
    %89 = arith.addf %87, %88 : vector<8x32xf32>
    %90 = math.tanh %89 : vector<8x32xf32>
    %91 = arith.mulf %86, %90 : vector<8x32xf32>
    %92 = arith.truncf %91 : vector<8x32xf32> to vector<8x32xbf16>
    %c1 = arith.constant 1 : index
    %c0_28 = arith.constant 0 : index
    %c0_29 = arith.constant 0 : index
    %93 = vector.load %arg18[%c1, %c0_28, %c0_29] : memref<5x64x32xf32, #tpu.memory_space<vmem>>, vector<1x8x32xf32>
    %94 = vector.shape_cast %93 : vector<1x8x32xf32> to vector<8x32xf32>
    %95 = vector.shape_cast %91 : vector<8x32xf32> to vector<1x8x32xf32>
    tpu.vector_store %arg18[%c1, %c0_28, %c0_29], %95 {strides = array<i32>} : memref<5x64x32xf32, #tpu.memory_space<vmem>>, vector<1x8x32xf32>,
    %96 = vector.extract_strided_slice %5 {offsets = [16, 0], sizes = [8, 128], strides = [1, 1]} : vector<160x128xf32> to vector<8x128xf32>
    %cst_30 = arith.constant dense<0.000000e+00> : vector<8x128xf32>
    %97 = tpu.matmul %72, %6, %cst_30 {dimension_numbers = #tpu.dot_dimension_numbers<[1], [0], [0], [1], [0, 0, 1, 1], [], []>} : vector<8x32xbf16>, vector<32x128xbf16>, vector<8x128xf32> -> vector<8x128xf32>
    %98 = arith.addf %96, %97 : vector<8x128xf32>
    %99 = math.tanh %98 : vector<8x128xf32>
    %100 = vector.broadcast %10 : vector<1x128xf32> to vector<8x128xf32>
    %101 = arith.mulf %99, %100 : vector<8x128xf32>
    %102 = vector.broadcast %11 : vector<1x128xf32> to vector<8x128xf32>
    %103 = arith.addf %101, %102 : vector<8x128xf32>
    %104 = vector.extract_strided_slice %103 {offsets = [0, 0], sizes = [8, 32], strides = [1, 1]} : vector<8x128xf32> to vector<8x32xf32>
    %105 = vector.extract_strided_slice %103 {offsets = [0, 32], sizes = [8, 32], strides = [1, 1]} : vector<8x128xf32> to vector<8x32xf32>
    %106 = vector.extract_strided_slice %103 {offsets = [0, 64], sizes = [8, 32], strides = [1, 1]} : vector<8x128xf32> to vector<8x32xf32>
    %107 = vector.extract_strided_slice %103 {offsets = [0, 96], sizes = [8, 32], strides = [1, 1]} : vector<8x128xf32> to vector<8x32xf32>
    %108 = arith.mulf %105, %69 : vector<8x32xf32>
    %109 = arith.mulf %104, %106 : vector<8x32xf32>
    %110 = arith.addf %108, %109 : vector<8x32xf32>
    %111 = math.tanh %110 : vector<8x32xf32>
    %112 = arith.mulf %107, %111 : vector<8x32xf32>
    %113 = arith.truncf %112 : vector<8x32xf32> to vector<8x32xbf16>
    %cst_31 = arith.constant dense<0.000000e+00> : vector<8x128xf32>
    %114 = tpu.matmul %113, %7, %cst_31 {dimension_numbers = #tpu.dot_dimension_numbers<[1], [0], [0], [1], [0, 0, 1, 1], [], []>} : vector<8x32xbf16>, vector<32x128xbf16>, vector<8x128xf32> -> vector<8x128xf32>
    %cst_32 = arith.constant dense<0.000000e+00> : vector<8x128xf32>
    %115 = tpu.matmul %92, %8, %cst_32 {dimension_numbers = #tpu.dot_dimension_numbers<[1], [0], [0], [1], [0, 0, 1, 1], [], []>} : vector<8x32xbf16>, vector<32x128xbf16>, vector<8x128xf32> -> vector<8x128xf32>
    %116 = arith.addf %114, %115 : vector<8x128xf32>
    %117 = vector.broadcast %9 : vector<1x128xf32> to vector<8x128xf32>
    %118 = arith.addf %116, %117 : vector<8x128xf32>
    %119 = math.tanh %118 : vector<8x128xf32>
    %120 = vector.broadcast %10 : vector<1x128xf32> to vector<8x128xf32>
    %121 = arith.mulf %119, %120 : vector<8x128xf32>
    %122 = vector.broadcast %11 : vector<1x128xf32> to vector<8x128xf32>
    %123 = arith.addf %121, %122 : vector<8x128xf32>
    %124 = vector.extract_strided_slice %123 {offsets = [0, 0], sizes = [8, 32], strides = [1, 1]} : vector<8x128xf32> to vector<8x32xf32>
    %125 = vector.extract_strided_slice %123 {offsets = [0, 32], sizes = [8, 32], strides = [1, 1]} : vector<8x128xf32> to vector<8x32xf32>
    %126 = vector.extract_strided_slice %123 {offsets = [0, 64], sizes = [8, 32], strides = [1, 1]} : vector<8x128xf32> to vector<8x32xf32>
    %127 = vector.extract_strided_slice %123 {offsets = [0, 96], sizes = [8, 32], strides = [1, 1]} : vector<8x128xf32> to vector<8x32xf32>
    %128 = arith.mulf %125, %89 : vector<8x32xf32>
    %129 = arith.mulf %124, %126 : vector<8x32xf32>
    %130 = arith.addf %128, %129 : vector<8x32xf32>
    %131 = math.tanh %130 : vector<8x32xf32>
    %132 = arith.mulf %127, %131 : vector<8x32xf32>
    %133 = arith.truncf %132 : vector<8x32xf32> to vector<8x32xbf16>
    %c0_33 = arith.constant 0 : index
    %c8 = arith.constant 8 : index
    %c0_34 = arith.constant 0 : index
    %134 = vector.load %arg18[%c0_33, %c8, %c0_34] : memref<5x64x32xf32, #tpu.memory_space<vmem>>, vector<1x8x32xf32>
    %135 = vector.shape_cast %134 : vector<1x8x32xf32> to vector<8x32xf32>
    %136 = vector.shape_cast %132 : vector<8x32xf32> to vector<1x8x32xf32>
    tpu.vector_store %arg18[%c0_33, %c8, %c0_34], %136 {strides = array<i32>} : memref<5x64x32xf32, #tpu.memory_space<vmem>>, vector<1x8x32xf32>,
    %c2 = arith.constant 2 : index
    %c0_35 = arith.constant 0 : index
    %c0_36 = arith.constant 0 : index
    %137 = vector.load %arg18[%c2, %c0_35, %c0_36] : memref<5x64x32xf32, #tpu.memory_space<vmem>>, vector<1x8x32xf32>
    %138 = vector.shape_cast %137 : vector<1x8x32xf32> to vector<8x32xf32>
    %139 = vector.shape_cast %132 : vector<8x32xf32> to vector<1x8x32xf32>
    tpu.vector_store %arg18[%c2, %c0_35, %c0_36], %139 {strides = array<i32>} : memref<5x64x32xf32, #tpu.memory_space<vmem>>, vector<1x8x32xf32>,
    %140 = vector.extract_strided_slice %5 {offsets = [24, 0], sizes = [8, 128], strides = [1, 1]} : vector<160x128xf32> to vector<8x128xf32>
    %cst_37 = arith.constant dense<0.000000e+00> : vector<8x128xf32>
    %141 = tpu.matmul %113, %6, %cst_37 {dimension_numbers = #tpu.dot_dimension_numbers<[1], [0], [0], [1], [0, 0, 1, 1], [], []>} : vector<8x32xbf16>, vector<32x128xbf16>, vector<8x128xf32> -> vector<8x128xf32>
    %142 = arith.addf %140, %141 : vector<8x128xf32>
    %143 = math.tanh %142 : vector<8x128xf32>
    %144 = vector.broadcast %10 : vector<1x128xf32> to vector<8x128xf32>
    %145 = arith.mulf %143, %144 : vector<8x128xf32>
    %146 = vector.broadcast %11 : vector<1x128xf32> to vector<8x128xf32>
    %147 = arith.addf %145, %146 : vector<8x128xf32>
    %148 = vector.extract_strided_slice %147 {offsets = [0, 0], sizes = [8, 32], strides = [1, 1]} : vector<8x128xf32> to vector<8x32xf32>
    %149 = vector.extract_strided_slice %147 {offsets = [0, 32], sizes = [8, 32], strides = [1, 1]} : vector<8x128xf32> to vector<8x32xf32>
    %150 = vector.extract_strided_slice %147 {offsets = [0, 64], sizes = [8, 32], strides = [1, 1]} : vector<8x128xf32> to vector<8x32xf32>
    %151 = vector.extract_strided_slice %147 {offsets = [0, 96], sizes = [8, 32], strides = [1, 1]} : vector<8x128xf32> to vector<8x32xf32>
    %152 = arith.mulf %149, %110 : vector<8x32xf32>
    %153 = arith.mulf %148, %150 : vector<8x32xf32>
    %154 = arith.addf %152, %153 : vector<8x32xf32>
    %155 = math.tanh %154 : vector<8x32xf32>
    %156 = arith.mulf %151, %155 : vector<8x32xf32>
    %157 = arith.truncf %156 : vector<8x32xf32> to vector<8x32xbf16>
    %cst_38 = arith.constant dense<0.000000e+00> : vector<8x128xf32>
    %158 = tpu.matmul %157, %7, %cst_38 {dimension_numbers = #tpu.dot_dimension_numbers<[1], [0], [0], [1], [0, 0, 1, 1], [], []>} : vector<8x32xbf16>, vector<32x128xbf16>, vector<8x128xf32> -> vector<8x128xf32>
    %cst_39 = arith.constant dense<0.000000e+00> : vector<8x128xf32>
    %159 = tpu.matmul %133, %8, %cst_39 {dimension_numbers = #tpu.dot_dimension_numbers<[1], [0], [0], [1], [0, 0, 1, 1], [], []>} : vector<8x32xbf16>, vector<32x128xbf16>, vector<8x128xf32> -> vector<8x128xf32>
    %160 = arith.addf %158, %159 : vector<8x128xf32>
    %161 = vector.broadcast %9 : vector<1x128xf32> to vector<8x128xf32>
    %162 = arith.addf %160, %161 : vector<8x128xf32>
    %163 = math.tanh %162 : vector<8x128xf32>
    %164 = vector.broadcast %10 : vector<1x128xf32> to vector<8x128xf32>
    %165 = arith.mulf %163, %164 : vector<8x128xf32>
    %166 = vector.broadcast %11 : vector<1x128xf32> to vector<8x128xf32>
    %167 = arith.addf %165, %166 : vector<8x128xf32>
    %168 = vector.extract_strided_slice %167 {offsets = [0, 0], sizes = [8, 32], strides = [1, 1]} : vector<8x128xf32> to vector<8x32xf32>
    %169 = vector.extract_strided_slice %167 {offsets = [0, 32], sizes = [8, 32], strides = [1, 1]} : vector<8x128xf32> to vector<8x32xf32>
    %170 = vector.extract_strided_slice %167 {offsets = [0, 64], sizes = [8, 32], strides = [1, 1]} : vector<8x128xf32> to vector<8x32xf32>
    %171 = vector.extract_strided_slice %167 {offsets = [0, 96], sizes = [8, 32], strides = [1, 1]} : vector<8x128xf32> to vector<8x32xf32>
    %172 = arith.mulf %169, %130 : vector<8x32xf32>
    %173 = arith.mulf %168, %170 : vector<8x32xf32>
    %174 = arith.addf %172, %173 : vector<8x32xf32>
    %175 = math.tanh %174 : vector<8x32xf32>
    %176 = arith.mulf %171, %175 : vector<8x32xf32>
    %177 = arith.truncf %176 : vector<8x32xf32> to vector<8x32xbf16>
    %c1_40 = arith.constant 1 : index
    %c8_41 = arith.constant 8 : index
    %c0_42 = arith.constant 0 : index
    %178 = vector.load %arg18[%c1_40, %c8_41, %c0_42] : memref<5x64x32xf32, #tpu.memory_space<vmem>>, vector<1x8x32xf32>
    %179 = vector.shape_cast %178 : vector<1x8x32xf32> to vector<8x32xf32>
    %180 = vector.shape_cast %176 : vector<8x32xf32> to vector<1x8x32xf32>
    tpu.vector_store %arg18[%c1_40, %c8_41, %c0_42], %180 {strides = array<i32>} : memref<5x64x32xf32, #tpu.memory_space<vmem>>, vector<1x8x32xf32>,
    %c3 = arith.constant 3 : index
    %c0_43 = arith.constant 0 : index
    %c0_44 = arith.constant 0 : index
    %181 = vector.load %arg18[%c3, %c0_43, %c0_44] : memref<5x64x32xf32, #tpu.memory_space<vmem>>, vector<1x8x32xf32>
    %182 = vector.shape_cast %181 : vector<1x8x32xf32> to vector<8x32xf32>
    %183 = vector.shape_cast %176 : vector<8x32xf32> to vector<1x8x32xf32>
    tpu.vector_store %arg18[%c3, %c0_43, %c0_44], %183 {strides = array<i32>} : memref<5x64x32xf32, #tpu.memory_space<vmem>>, vector<1x8x32xf32>,
    %184 = vector.extract_strided_slice %5 {offsets = [32, 0], sizes = [8, 128], strides = [1, 1]} : vector<160x128xf32> to vector<8x128xf32>
    %cst_45 = arith.constant dense<0.000000e+00> : vector<8x128xf32>
    %185 = tpu.matmul %157, %6, %cst_45 {dimension_numbers = #tpu.dot_dimension_numbers<[1], [0], [0], [1], [0, 0, 1, 1], [], []>} : vector<8x32xbf16>, vector<32x128xbf16>, vector<8x128xf32> -> vector<8x128xf32>
    %186 = arith.addf %184, %185 : vector<8x128xf32>
    %187 = math.tanh %186 : vector<8x128xf32>
    %188 = vector.broadcast %10 : vector<1x128xf32> to vector<8x128xf32>
    %189 = arith.mulf %187, %188 : vector<8x128xf32>
    %190 = vector.broadcast %11 : vector<1x128xf32> to vector<8x128xf32>
    %191 = arith.addf %189, %190 : vector<8x128xf32>
    %192 = vector.extract_strided_slice %191 {offsets = [0, 0], sizes = [8, 32], strides = [1, 1]} : vector<8x128xf32> to vector<8x32xf32>
    %193 = vector.extract_strided_slice %191 {offsets = [0, 32], sizes = [8, 32], strides = [1, 1]} : vector<8x128xf32> to vector<8x32xf32>
    %194 = vector.extract_strided_slice %191 {offsets = [0, 64], sizes = [8, 32], strides = [1, 1]} : vector<8x128xf32> to vector<8x32xf32>
    %195 = vector.extract_strided_slice %191 {offsets = [0, 96], sizes = [8, 32], strides = [1, 1]} : vector<8x128xf32> to vector<8x32xf32>
    %196 = arith.mulf %193, %154 : vector<8x32xf32>
    %197 = arith.mulf %192, %194 : vector<8x32xf32>
    %198 = arith.addf %196, %197 : vector<8x32xf32>
    %199 = math.tanh %198 : vector<8x32xf32>
    %200 = arith.mulf %195, %199 : vector<8x32xf32>
    %201 = arith.truncf %200 : vector<8x32xf32> to vector<8x32xbf16>
    %cst_46 = arith.constant dense<0.000000e+00> : vector<8x128xf32>
    %202 = tpu.matmul %201, %7, %cst_46 {dimension_numbers = #tpu.dot_dimension_numbers<[1], [0], [0], [1], [0, 0, 1, 1], [], []>} : vector<8x32xbf16>, vector<32x128xbf16>, vector<8x128xf32> -> vector<8x128xf32>
    %cst_47 = arith.constant dense<0.000000e+00> : vector<8x128xf32>
    %203 = tpu.matmul %177, %8, %cst_47 {dimension_numbers = #tpu.dot_dimension_numbers<[1], [0], [0], [1], [0, 0, 1, 1], [], []>} : vector<8x32xbf16>, vector<32x128xbf16>, vector<8x128xf32> -> vector<8x128xf32>
    %204 = arith.addf %202, %203 : vector<8x128xf32>
    %205 = vector.broadcast %9 : vector<1x128xf32> to vector<8x128xf32>
    %206 = arith.addf %204, %205 : vector<8x128xf32>
    %207 = math.tanh %206 : vector<8x128xf32>
    %208 = vector.broadcast %10 : vector<1x128xf32> to vector<8x128xf32>
    %209 = arith.mulf %207, %208 : vector<8x128xf32>
    %210 = vector.broadcast %11 : vector<1x128xf32> to vector<8x128xf32>
    %211 = arith.addf %209, %210 : vector<8x128xf32>
    %212 = vector.extract_strided_slice %211 {offsets = [0, 0], sizes = [8, 32], strides = [1, 1]} : vector<8x128xf32> to vector<8x32xf32>
    %213 = vector.extract_strided_slice %211 {offsets = [0, 32], sizes = [8, 32], strides = [1, 1]} : vector<8x128xf32> to vector<8x32xf32>
    %214 = vector.extract_strided_slice %211 {offsets = [0, 64], sizes = [8, 32], strides = [1, 1]} : vector<8x128xf32> to vector<8x32xf32>
    %215 = vector.extract_strided_slice %211 {offsets = [0, 96], sizes = [8, 32], strides = [1, 1]} : vector<8x128xf32> to vector<8x32xf32>
    %216 = arith.mulf %213, %174 : vector<8x32xf32>
    %217 = arith.mulf %212, %214 : vector<8x32xf32>
    %218 = arith.addf %216, %217 : vector<8x32xf32>
    %219 = math.tanh %218 : vector<8x32xf32>
    %220 = arith.mulf %215, %219 : vector<8x32xf32>
    %221 = arith.truncf %220 : vector<8x32xf32> to vector<8x32xbf16>
    %c0_48 = arith.constant 0 : index
    %c16 = arith.constant 16 : index
    %c0_49 = arith.constant 0 : index
    %222 = vector.load %arg18[%c0_48, %c16, %c0_49] : memref<5x64x32xf32, #tpu.memory_space<vmem>>, vector<1x8x32xf32>
    %223 = vector.shape_cast %222 : vector<1x8x32xf32> to vector<8x32xf32>
    %224 = vector.shape_cast %220 : vector<8x32xf32> to vector<1x8x32xf32>
    tpu.vector_store %arg18[%c0_48, %c16, %c0_49], %224 {strides = array<i32>} : memref<5x64x32xf32, #tpu.memory_space<vmem>>, vector<1x8x32xf32>,
    %c2_50 = arith.constant 2 : index
    %c8_51 = arith.constant 8 : index
    %c0_52 = arith.constant 0 : index
    %225 = vector.load %arg18[%c2_50, %c8_51, %c0_52] : memref<5x64x32xf32, #tpu.memory_space<vmem>>, vector<1x8x32xf32>
    %226 = vector.shape_cast %225 : vector<1x8x32xf32> to vector<8x32xf32>
    %227 = vector.shape_cast %220 : vector<8x32xf32> to vector<1x8x32xf32>
    tpu.vector_store %arg18[%c2_50, %c8_51, %c0_52], %227 {strides = array<i32>} : memref<5x64x32xf32, #tpu.memory_space<vmem>>, vector<1x8x32xf32>,
    %c4 = arith.constant 4 : index
    %c0_53 = arith.constant 0 : index
    %c0_54 = arith.constant 0 : index
    %228 = vector.load %arg18[%c4, %c0_53, %c0_54] : memref<5x64x32xf32, #tpu.memory_space<vmem>>, vector<1x8x32xf32>
    %229 = vector.shape_cast %228 : vector<1x8x32xf32> to vector<8x32xf32>
    %230 = vector.shape_cast %220 : vector<8x32xf32> to vector<1x8x32xf32>
    tpu.vector_store %arg18[%c4, %c0_53, %c0_54], %230 {strides = array<i32>} : memref<5x64x32xf32, #tpu.memory_space<vmem>>, vector<1x8x32xf32>,
    %231 = vector.extract_strided_slice %5 {offsets = [40, 0], sizes = [8, 128], strides = [1, 1]} : vector<160x128xf32> to vector<8x128xf32>
    %cst_55 = arith.constant dense<0.000000e+00> : vector<8x128xf32>
    %232 = tpu.matmul %201, %6, %cst_55 {dimension_numbers = #tpu.dot_dimension_numbers<[1], [0], [0], [1], [0, 0, 1, 1], [], []>} : vector<8x32xbf16>, vector<32x128xbf16>, vector<8x128xf32> -> vector<8x128xf32>
    %233 = arith.addf %231, %232 : vector<8x128xf32>
    %234 = math.tanh %233 : vector<8x128xf32>
    %235 = vector.broadcast %10 : vector<1x128xf32> to vector<8x128xf32>
    %236 = arith.mulf %234, %235 : vector<8x128xf32>
    %237 = vector.broadcast %11 : vector<1x128xf32> to vector<8x128xf32>
    %238 = arith.addf %236, %237 : vector<8x128xf32>
    %239 = vector.extract_strided_slice %238 {offsets = [0, 0], sizes = [8, 32], strides = [1, 1]} : vector<8x128xf32> to vector<8x32xf32>
    %240 = vector.extract_strided_slice %238 {offsets = [0, 32], sizes = [8, 32], strides = [1, 1]} : vector<8x128xf32> to vector<8x32xf32>
    %241 = vector.extract_strided_slice %238 {offsets = [0, 64], sizes = [8, 32], strides = [1, 1]} : vector<8x128xf32> to vector<8x32xf32>
    %242 = vector.extract_strided_slice %238 {offsets = [0, 96], sizes = [8, 32], strides = [1, 1]} : vector<8x128xf32> to vector<8x32xf32>
    %243 = arith.mulf %240, %198 : vector<8x32xf32>
    %244 = arith.mulf %239, %241 : vector<8x32xf32>
    %245 = arith.addf %243, %244 : vector<8x32xf32>
    %246 = math.tanh %245 : vector<8x32xf32>
    %247 = arith.mulf %242, %246 : vector<8x32xf32>
    %248 = arith.truncf %247 : vector<8x32xf32> to vector<8x32xbf16>
    %cst_56 = arith.constant dense<0.000000e+00> : vector<8x128xf32>
    %249 = tpu.matmul %248, %7, %cst_56 {dimension_numbers = #tpu.dot_dimension_numbers<[1], [0], [0], [1], [0, 0, 1, 1], [], []>} : vector<8x32xbf16>, vector<32x128xbf16>, vector<8x128xf32> -> vector<8x128xf32>
    %cst_57 = arith.constant dense<0.000000e+00> : vector<8x128xf32>
    %250 = tpu.matmul %221, %8, %cst_57 {dimension_numbers = #tpu.dot_dimension_numbers<[1], [0], [0], [1], [0, 0, 1, 1], [], []>} : vector<8x32xbf16>, vector<32x128xbf16>, vector<8x128xf32> -> vector<8x128xf32>
    %251 = arith.addf %249, %250 : vector<8x128xf32>
    %252 = vector.broadcast %9 : vector<1x128xf32> to vector<8x128xf32>
    %253 = arith.addf %251, %252 : vector<8x128xf32>
    %254 = math.tanh %253 : vector<8x128xf32>
    %255 = vector.broadcast %10 : vector<1x128xf32> to vector<8x128xf32>
    %256 = arith.mulf %254, %255 : vector<8x128xf32>
    %257 = vector.broadcast %11 : vector<1x128xf32> to vector<8x128xf32>
    %258 = arith.addf %256, %257 : vector<8x128xf32>
    %259 = vector.extract_strided_slice %258 {offsets = [0, 0], sizes = [8, 32], strides = [1, 1]} : vector<8x128xf32> to vector<8x32xf32>
    %260 = vector.extract_strided_slice %258 {offsets = [0, 32], sizes = [8, 32], strides = [1, 1]} : vector<8x128xf32> to vector<8x32xf32>
    %261 = vector.extract_strided_slice %258 {offsets = [0, 64], sizes = [8, 32], strides = [1, 1]} : vector<8x128xf32> to vector<8x32xf32>
    %262 = vector.extract_strided_slice %258 {offsets = [0, 96], sizes = [8, 32], strides = [1, 1]} : vector<8x128xf32> to vector<8x32xf32>
    %263 = arith.mulf %260, %218 : vector<8x32xf32>
    %264 = arith.mulf %259, %261 : vector<8x32xf32>
    %265 = arith.addf %263, %264 : vector<8x32xf32>
    %266 = math.tanh %265 : vector<8x32xf32>
    %267 = arith.mulf %262, %266 : vector<8x32xf32>
    %268 = arith.truncf %267 : vector<8x32xf32> to vector<8x32xbf16>
    %c1_58 = arith.constant 1 : index
    %c16_59 = arith.constant 16 : index
    %c0_60 = arith.constant 0 : index
    %269 = vector.load %arg18[%c1_58, %c16_59, %c0_60] : memref<5x64x32xf32, #tpu.memory_space<vmem>>, vector<1x8x32xf32>
    %270 = vector.shape_cast %269 : vector<1x8x32xf32> to vector<8x32xf32>
    %271 = vector.shape_cast %267 : vector<8x32xf32> to vector<1x8x32xf32>
    tpu.vector_store %arg18[%c1_58, %c16_59, %c0_60], %271 {strides = array<i32>} : memref<5x64x32xf32, #tpu.memory_space<vmem>>, vector<1x8x32xf32>,
    %c3_61 = arith.constant 3 : index
    %c8_62 = arith.constant 8 : index
    %c0_63 = arith.constant 0 : index
    %272 = vector.load %arg18[%c3_61, %c8_62, %c0_63] : memref<5x64x32xf32, #tpu.memory_space<vmem>>, vector<1x8x32xf32>
    %273 = vector.shape_cast %272 : vector<1x8x32xf32> to vector<8x32xf32>
    %274 = vector.shape_cast %267 : vector<8x32xf32> to vector<1x8x32xf32>
    tpu.vector_store %arg18[%c3_61, %c8_62, %c0_63], %274 {strides = array<i32>} : memref<5x64x32xf32, #tpu.memory_space<vmem>>, vector<1x8x32xf32>,
    %275 = vector.extract_strided_slice %5 {offsets = [48, 0], sizes = [8, 128], strides = [1, 1]} : vector<160x128xf32> to vector<8x128xf32>
    %cst_64 = arith.constant dense<0.000000e+00> : vector<8x128xf32>
    %276 = tpu.matmul %248, %6, %cst_64 {dimension_numbers = #tpu.dot_dimension_numbers<[1], [0], [0], [1], [0, 0, 1, 1], [], []>} : vector<8x32xbf16>, vector<32x128xbf16>, vector<8x128xf32> -> vector<8x128xf32>
    %277 = arith.addf %275, %276 : vector<8x128xf32>
    %278 = math.tanh %277 : vector<8x128xf32>
    %279 = vector.broadcast %10 : vector<1x128xf32> to vector<8x128xf32>
    %280 = arith.mulf %278, %279 : vector<8x128xf32>
    %281 = vector.broadcast %11 : vector<1x128xf32> to vector<8x128xf32>
    %282 = arith.addf %280, %281 : vector<8x128xf32>
    %283 = vector.extract_strided_slice %282 {offsets = [0, 0], sizes = [8, 32], strides = [1, 1]} : vector<8x128xf32> to vector<8x32xf32>
    %284 = vector.extract_strided_slice %282 {offsets = [0, 32], sizes = [8, 32], strides = [1, 1]} : vector<8x128xf32> to vector<8x32xf32>
    %285 = vector.extract_strided_slice %282 {offsets = [0, 64], sizes = [8, 32], strides = [1, 1]} : vector<8x128xf32> to vector<8x32xf32>
    %286 = vector.extract_strided_slice %282 {offsets = [0, 96], sizes = [8, 32], strides = [1, 1]} : vector<8x128xf32> to vector<8x32xf32>
    %287 = arith.mulf %284, %245 : vector<8x32xf32>
    %288 = arith.mulf %283, %285 : vector<8x32xf32>
    %289 = arith.addf %287, %288 : vector<8x32xf32>
    %290 = math.tanh %289 : vector<8x32xf32>
    %291 = arith.mulf %286, %290 : vector<8x32xf32>
    %292 = arith.truncf %291 : vector<8x32xf32> to vector<8x32xbf16>
    %cst_65 = arith.constant dense<0.000000e+00> : vector<8x128xf32>
    %293 = tpu.matmul %292, %7, %cst_65 {dimension_numbers = #tpu.dot_dimension_numbers<[1], [0], [0], [1], [0, 0, 1, 1], [], []>} : vector<8x32xbf16>, vector<32x128xbf16>, vector<8x128xf32> -> vector<8x128xf32>
    %cst_66 = arith.constant dense<0.000000e+00> : vector<8x128xf32>
    %294 = tpu.matmul %268, %8, %cst_66 {dimension_numbers = #tpu.dot_dimension_numbers<[1], [0], [0], [1], [0, 0, 1, 1], [], []>} : vector<8x32xbf16>, vector<32x128xbf16>, vector<8x128xf32> -> vector<8x128xf32>
    %295 = arith.addf %293, %294 : vector<8x128xf32>
    %296 = vector.broadcast %9 : vector<1x128xf32> to vector<8x128xf32>
    %297 = arith.addf %295, %296 : vector<8x128xf32>
    %298 = math.tanh %297 : vector<8x128xf32>
    %299 = vector.broadcast %10 : vector<1x128xf32> to vector<8x128xf32>
    %300 = arith.mulf %298, %299 : vector<8x128xf32>
    %301 = vector.broadcast %11 : vector<1x128xf32> to vector<8x128xf32>
    %302 = arith.addf %300, %301 : vector<8x128xf32>
    %303 = vector.extract_strided_slice %302 {offsets = [0, 0], sizes = [8, 32], strides = [1, 1]} : vector<8x128xf32> to vector<8x32xf32>
    %304 = vector.extract_strided_slice %302 {offsets = [0, 32], sizes = [8, 32], strides = [1, 1]} : vector<8x128xf32> to vector<8x32xf32>
    %305 = vector.extract_strided_slice %302 {offsets = [0, 64], sizes = [8, 32], strides = [1, 1]} : vector<8x128xf32> to vector<8x32xf32>
    %306 = vector.extract_strided_slice %302 {offsets = [0, 96], sizes = [8, 32], strides = [1, 1]} : vector<8x128xf32> to vector<8x32xf32>
    %307 = arith.mulf %304, %265 : vector<8x32xf32>
    %308 = arith.mulf %303, %305 : vector<8x32xf32>
    %309 = arith.addf %307, %308 : vector<8x32xf32>
    %310 = math.tanh %309 : vector<8x32xf32>
    %311 = arith.mulf %306, %310 : vector<8x32xf32>
    %312 = arith.truncf %311 : vector<8x32xf32> to vector<8x32xbf16>
    %c0_67 = arith.constant 0 : index
    %c24 = arith.constant 24 : index
    %c0_68 = arith.constant 0 : index
    %313 = vector.load %arg18[%c0_67, %c24, %c0_68] : memref<5x64x32xf32, #tpu.memory_space<vmem>>, vector<1x8x32xf32>
    %314 = vector.shape_cast %313 : vector<1x8x32xf32> to vector<8x32xf32>
    %315 = vector.shape_cast %311 : vector<8x32xf32> to vector<1x8x32xf32>
    tpu.vector_store %arg18[%c0_67, %c24, %c0_68], %315 {strides = array<i32>} : memref<5x64x32xf32, #tpu.memory_space<vmem>>, vector<1x8x32xf32>,
    %c2_69 = arith.constant 2 : index
    %c16_70 = arith.constant 16 : index
    %c0_71 = arith.constant 0 : index
    %316 = vector.load %arg18[%c2_69, %c16_70, %c0_71] : memref<5x64x32xf32, #tpu.memory_space<vmem>>, vector<1x8x32xf32>
    %317 = vector.shape_cast %316 : vector<1x8x32xf32> to vector<8x32xf32>
    %318 = vector.shape_cast %311 : vector<8x32xf32> to vector<1x8x32xf32>
    tpu.vector_store %arg18[%c2_69, %c16_70, %c0_71], %318 {strides = array<i32>} : memref<5x64x32xf32, #tpu.memory_space<vmem>>, vector<1x8x32xf32>,
    %c4_72 = arith.constant 4 : index
    %c8_73 = arith.constant 8 : index
    %c0_74 = arith.constant 0 : index
    %319 = vector.load %arg18[%c4_72, %c8_73, %c0_74] : memref<5x64x32xf32, #tpu.memory_space<vmem>>, vector<1x8x32xf32>
    %320 = vector.shape_cast %319 : vector<1x8x32xf32> to vector<8x32xf32>
    %321 = vector.shape_cast %311 : vector<8x32xf32> to vector<1x8x32xf32>
    tpu.vector_store %arg18[%c4_72, %c8_73, %c0_74], %321 {strides = array<i32>} : memref<5x64x32xf32, #tpu.memory_space<vmem>>, vector<1x8x32xf32>,
    %322 = vector.extract_strided_slice %5 {offsets = [56, 0], sizes = [8, 128], strides = [1, 1]} : vector<160x128xf32> to vector<8x128xf32>
    %cst_75 = arith.constant dense<0.000000e+00> : vector<8x128xf32>
    %323 = tpu.matmul %292, %6, %cst_75 {dimension_numbers = #tpu.dot_dimension_numbers<[1], [0], [0], [1], [0, 0, 1, 1], [], []>} : vector<8x32xbf16>, vector<32x128xbf16>, vector<8x128xf32> -> vector<8x128xf32>
    %324 = arith.addf %322, %323 : vector<8x128xf32>
    %325 = math.tanh %324 : vector<8x128xf32>
    %326 = vector.broadcast %10 : vector<1x128xf32> to vector<8x128xf32>
    %327 = arith.mulf %325, %326 : vector<8x128xf32>
    %328 = vector.broadcast %11 : vector<1x128xf32> to vector<8x128xf32>
    %329 = arith.addf %327, %328 : vector<8x128xf32>
    %330 = vector.extract_strided_slice %329 {offsets = [0, 0], sizes = [8, 32], strides = [1, 1]} : vector<8x128xf32> to vector<8x32xf32>
    %331 = vector.extract_strided_slice %329 {offsets = [0, 32], sizes = [8, 32], strides = [1, 1]} : vector<8x128xf32> to vector<8x32xf32>
    %332 = vector.extract_strided_slice %329 {offsets = [0, 64], sizes = [8, 32], strides = [1, 1]} : vector<8x128xf32> to vector<8x32xf32>
    %333 = vector.extract_strided_slice %329 {offsets = [0, 96], sizes = [8, 32], strides = [1, 1]} : vector<8x128xf32> to vector<8x32xf32>
    %334 = arith.mulf %331, %289 : vector<8x32xf32>
    %335 = arith.mulf %330, %332 : vector<8x32xf32>
    %336 = arith.addf %334, %335 : vector<8x32xf32>
    %337 = math.tanh %336 : vector<8x32xf32>
    %338 = arith.mulf %333, %337 : vector<8x32xf32>
    %339 = arith.truncf %338 : vector<8x32xf32> to vector<8x32xbf16>
    %cst_76 = arith.constant dense<0.000000e+00> : vector<8x128xf32>
    %340 = tpu.matmul %339, %7, %cst_76 {dimension_numbers = #tpu.dot_dimension_numbers<[1], [0], [0], [1], [0, 0, 1, 1], [], []>} : vector<8x32xbf16>, vector<32x128xbf16>, vector<8x128xf32> -> vector<8x128xf32>
    %cst_77 = arith.constant dense<0.000000e+00> : vector<8x128xf32>
    %341 = tpu.matmul %312, %8, %cst_77 {dimension_numbers = #tpu.dot_dimension_numbers<[1], [0], [0], [1], [0, 0, 1, 1], [], []>} : vector<8x32xbf16>, vector<32x128xbf16>, vector<8x128xf32> -> vector<8x128xf32>
    %342 = arith.addf %340, %341 : vector<8x128xf32>
    %343 = vector.broadcast %9 : vector<1x128xf32> to vector<8x128xf32>
    %344 = arith.addf %342, %343 : vector<8x128xf32>
    %345 = math.tanh %344 : vector<8x128xf32>
    %346 = vector.broadcast %10 : vector<1x128xf32> to vector<8x128xf32>
    %347 = arith.mulf %345, %346 : vector<8x128xf32>
    %348 = vector.broadcast %11 : vector<1x128xf32> to vector<8x128xf32>
    %349 = arith.addf %347, %348 : vector<8x128xf32>
    %350 = vector.extract_strided_slice %349 {offsets = [0, 0], sizes = [8, 32], strides = [1, 1]} : vector<8x128xf32> to vector<8x32xf32>
    %351 = vector.extract_strided_slice %349 {offsets = [0, 32], sizes = [8, 32], strides = [1, 1]} : vector<8x128xf32> to vector<8x32xf32>
    %352 = vector.extract_strided_slice %349 {offsets = [0, 64], sizes = [8, 32], strides = [1, 1]} : vector<8x128xf32> to vector<8x32xf32>
    %353 = vector.extract_strided_slice %349 {offsets = [0, 96], sizes = [8, 32], strides = [1, 1]} : vector<8x128xf32> to vector<8x32xf32>
    %354 = arith.mulf %351, %309 : vector<8x32xf32>
    %355 = arith.mulf %350, %352 : vector<8x32xf32>
    %356 = arith.addf %354, %355 : vector<8x32xf32>
    %357 = math.tanh %356 : vector<8x32xf32>
    %358 = arith.mulf %353, %357 : vector<8x32xf32>
    %359 = arith.truncf %358 : vector<8x32xf32> to vector<8x32xbf16>
    %c1_78 = arith.constant 1 : index
    %c24_79 = arith.constant 24 : index
    %c0_80 = arith.constant 0 : index
    %360 = vector.load %arg18[%c1_78, %c24_79, %c0_80] : memref<5x64x32xf32, #tpu.memory_space<vmem>>, vector<1x8x32xf32>
    %361 = vector.shape_cast %360 : vector<1x8x32xf32> to vector<8x32xf32>
    %362 = vector.shape_cast %358 : vector<8x32xf32> to vector<1x8x32xf32>
    tpu.vector_store %arg18[%c1_78, %c24_79, %c0_80], %362 {strides = array<i32>} : memref<5x64x32xf32, #tpu.memory_space<vmem>>, vector<1x8x32xf32>,
    %c3_81 = arith.constant 3 : index
    %c16_82 = arith.constant 16 : index
    %c0_83 = arith.constant 0 : index
    %363 = vector.load %arg18[%c3_81, %c16_82, %c0_83] : memref<5x64x32xf32, #tpu.memory_space<vmem>>, vector<1x8x32xf32>
    %364 = vector.shape_cast %363 : vector<1x8x32xf32> to vector<8x32xf32>
    %365 = vector.shape_cast %358 : vector<8x32xf32> to vector<1x8x32xf32>
    tpu.vector_store %arg18[%c3_81, %c16_82, %c0_83], %365 {strides = array<i32>} : memref<5x64x32xf32, #tpu.memory_space<vmem>>, vector<1x8x32xf32>,
    %366 = vector.extract_strided_slice %5 {offsets = [64, 0], sizes = [8, 128], strides = [1, 1]} : vector<160x128xf32> to vector<8x128xf32>
    %cst_84 = arith.constant dense<0.000000e+00> : vector<8x128xf32>
    %367 = tpu.matmul %339, %6, %cst_84 {dimension_numbers = #tpu.dot_dimension_numbers<[1], [0], [0], [1], [0, 0, 1, 1], [], []>} : vector<8x32xbf16>, vector<32x128xbf16>, vector<8x128xf32> -> vector<8x128xf32>
    %368 = arith.addf %366, %367 : vector<8x128xf32>
    %369 = math.tanh %368 : vector<8x128xf32>
    %370 = vector.broadcast %10 : vector<1x128xf32> to vector<8x128xf32>
    %371 = arith.mulf %369, %370 : vector<8x128xf32>
    %372 = vector.broadcast %11 : vector<1x128xf32> to vector<8x128xf32>
    %373 = arith.addf %371, %372 : vector<8x128xf32>
    %374 = vector.extract_strided_slice %373 {offsets = [0, 0], sizes = [8, 32], strides = [1, 1]} : vector<8x128xf32> to vector<8x32xf32>
    %375 = vector.extract_strided_slice %373 {offsets = [0, 32], sizes = [8, 32], strides = [1, 1]} : vector<8x128xf32> to vector<8x32xf32>
    %376 = vector.extract_strided_slice %373 {offsets = [0, 64], sizes = [8, 32], strides = [1, 1]} : vector<8x128xf32> to vector<8x32xf32>
    %377 = vector.extract_strided_slice %373 {offsets = [0, 96], sizes = [8, 32], strides = [1, 1]} : vector<8x128xf32> to vector<8x32xf32>
    %378 = arith.mulf %375, %336 : vector<8x32xf32>
    %379 = arith.mulf %374, %376 : vector<8x32xf32>
    %380 = arith.addf %378, %379 : vector<8x32xf32>
    %381 = math.tanh %380 : vector<8x32xf32>
    %382 = arith.mulf %377, %381 : vector<8x32xf32>
    %383 = arith.truncf %382 : vector<8x32xf32> to vector<8x32xbf16>
    %cst_85 = arith.constant dense<0.000000e+00> : vector<8x128xf32>
    %384 = tpu.matmul %383, %7, %cst_85 {dimension_numbers = #tpu.dot_dimension_numbers<[1], [0], [0], [1], [0, 0, 1, 1], [], []>} : vector<8x32xbf16>, vector<32x128xbf16>, vector<8x128xf32> -> vector<8x128xf32>
    %cst_86 = arith.constant dense<0.000000e+00> : vector<8x128xf32>
    %385 = tpu.matmul %359, %8, %cst_86 {dimension_numbers = #tpu.dot_dimension_numbers<[1], [0], [0], [1], [0, 0, 1, 1], [], []>} : vector<8x32xbf16>, vector<32x128xbf16>, vector<8x128xf32> -> vector<8x128xf32>
    %386 = arith.addf %384, %385 : vector<8x128xf32>
    %387 = vector.broadcast %9 : vector<1x128xf32> to vector<8x128xf32>
    %388 = arith.addf %386, %387 : vector<8x128xf32>
    %389 = math.tanh %388 : vector<8x128xf32>
    %390 = vector.broadcast %10 : vector<1x128xf32> to vector<8x128xf32>
    %391 = arith.mulf %389, %390 : vector<8x128xf32>
    %392 = vector.broadcast %11 : vector<1x128xf32> to vector<8x128xf32>
    %393 = arith.addf %391, %392 : vector<8x128xf32>
    %394 = vector.extract_strided_slice %393 {offsets = [0, 0], sizes = [8, 32], strides = [1, 1]} : vector<8x128xf32> to vector<8x32xf32>
    %395 = vector.extract_strided_slice %393 {offsets = [0, 32], sizes = [8, 32], strides = [1, 1]} : vector<8x128xf32> to vector<8x32xf32>
    %396 = vector.extract_strided_slice %393 {offsets = [0, 64], sizes = [8, 32], strides = [1, 1]} : vector<8x128xf32> to vector<8x32xf32>
    %397 = vector.extract_strided_slice %393 {offsets = [0, 96], sizes = [8, 32], strides = [1, 1]} : vector<8x128xf32> to vector<8x32xf32>
    %398 = arith.mulf %395, %356 : vector<8x32xf32>
    %399 = arith.mulf %394, %396 : vector<8x32xf32>
    %400 = arith.addf %398, %399 : vector<8x32xf32>
    %401 = math.tanh %400 : vector<8x32xf32>
    %402 = arith.mulf %397, %401 : vector<8x32xf32>
    %403 = arith.truncf %402 : vector<8x32xf32> to vector<8x32xbf16>
    %c0_87 = arith.constant 0 : index
    %c32 = arith.constant 32 : index
    %c0_88 = arith.constant 0 : index
    %404 = vector.load %arg18[%c0_87, %c32, %c0_88] : memref<5x64x32xf32, #tpu.memory_space<vmem>>, vector<1x8x32xf32>
    %405 = vector.shape_cast %404 : vector<1x8x32xf32> to vector<8x32xf32>
    %406 = vector.shape_cast %402 : vector<8x32xf32> to vector<1x8x32xf32>
    tpu.vector_store %arg18[%c0_87, %c32, %c0_88], %406 {strides = array<i32>} : memref<5x64x32xf32, #tpu.memory_space<vmem>>, vector<1x8x32xf32>,
    %c2_89 = arith.constant 2 : index
    %c24_90 = arith.constant 24 : index
    %c0_91 = arith.constant 0 : index
    %407 = vector.load %arg18[%c2_89, %c24_90, %c0_91] : memref<5x64x32xf32, #tpu.memory_space<vmem>>, vector<1x8x32xf32>
    %408 = vector.shape_cast %407 : vector<1x8x32xf32> to vector<8x32xf32>
    %409 = vector.shape_cast %402 : vector<8x32xf32> to vector<1x8x32xf32>
    tpu.vector_store %arg18[%c2_89, %c24_90, %c0_91], %409 {strides = array<i32>} : memref<5x64x32xf32, #tpu.memory_space<vmem>>, vector<1x8x32xf32>,
    %c4_92 = arith.constant 4 : index
    %c16_93 = arith.constant 16 : index
    %c0_94 = arith.constant 0 : index
    %410 = vector.load %arg18[%c4_92, %c16_93, %c0_94] : memref<5x64x32xf32, #tpu.memory_space<vmem>>, vector<1x8x32xf32>
    %411 = vector.shape_cast %410 : vector<1x8x32xf32> to vector<8x32xf32>
    %412 = vector.shape_cast %402 : vector<8x32xf32> to vector<1x8x32xf32>
    tpu.vector_store %arg18[%c4_92, %c16_93, %c0_94], %412 {strides = array<i32>} : memref<5x64x32xf32, #tpu.memory_space<vmem>>, vector<1x8x32xf32>,
    %413 = vector.extract_strided_slice %5 {offsets = [72, 0], sizes = [8, 128], strides = [1, 1]} : vector<160x128xf32> to vector<8x128xf32>
    %cst_95 = arith.constant dense<0.000000e+00> : vector<8x128xf32>
    %414 = tpu.matmul %383, %6, %cst_95 {dimension_numbers = #tpu.dot_dimension_numbers<[1], [0], [0], [1], [0, 0, 1, 1], [], []>} : vector<8x32xbf16>, vector<32x128xbf16>, vector<8x128xf32> -> vector<8x128xf32>
    %415 = arith.addf %413, %414 : vector<8x128xf32>
    %416 = math.tanh %415 : vector<8x128xf32>
    %417 = vector.broadcast %10 : vector<1x128xf32> to vector<8x128xf32>
    %418 = arith.mulf %416, %417 : vector<8x128xf32>
    %419 = vector.broadcast %11 : vector<1x128xf32> to vector<8x128xf32>
    %420 = arith.addf %418, %419 : vector<8x128xf32>
    %421 = vector.extract_strided_slice %420 {offsets = [0, 0], sizes = [8, 32], strides = [1, 1]} : vector<8x128xf32> to vector<8x32xf32>
    %422 = vector.extract_strided_slice %420 {offsets = [0, 32], sizes = [8, 32], strides = [1, 1]} : vector<8x128xf32> to vector<8x32xf32>
    %423 = vector.extract_strided_slice %420 {offsets = [0, 64], sizes = [8, 32], strides = [1, 1]} : vector<8x128xf32> to vector<8x32xf32>
    %424 = vector.extract_strided_slice %420 {offsets = [0, 96], sizes = [8, 32], strides = [1, 1]} : vector<8x128xf32> to vector<8x32xf32>
    %425 = arith.mulf %422, %380 : vector<8x32xf32>
    %426 = arith.mulf %421, %423 : vector<8x32xf32>
    %427 = arith.addf %425, %426 : vector<8x32xf32>
    %428 = math.tanh %427 : vector<8x32xf32>
    %429 = arith.mulf %424, %428 : vector<8x32xf32>
    %430 = arith.truncf %429 : vector<8x32xf32> to vector<8x32xbf16>
    %cst_96 = arith.constant dense<0.000000e+00> : vector<8x128xf32>
    %431 = tpu.matmul %430, %7, %cst_96 {dimension_numbers = #tpu.dot_dimension_numbers<[1], [0], [0], [1], [0, 0, 1, 1], [], []>} : vector<8x32xbf16>, vector<32x128xbf16>, vector<8x128xf32> -> vector<8x128xf32>
    %cst_97 = arith.constant dense<0.000000e+00> : vector<8x128xf32>
    %432 = tpu.matmul %403, %8, %cst_97 {dimension_numbers = #tpu.dot_dimension_numbers<[1], [0], [0], [1], [0, 0, 1, 1], [], []>} : vector<8x32xbf16>, vector<32x128xbf16>, vector<8x128xf32> -> vector<8x128xf32>
    %433 = arith.addf %431, %432 : vector<8x128xf32>
    %434 = vector.broadcast %9 : vector<1x128xf32> to vector<8x128xf32>
    %435 = arith.addf %433, %434 : vector<8x128xf32>
    %436 = math.tanh %435 : vector<8x128xf32>
    %437 = vector.broadcast %10 : vector<1x128xf32> to vector<8x128xf32>
    %438 = arith.mulf %436, %437 : vector<8x128xf32>
    %439 = vector.broadcast %11 : vector<1x128xf32> to vector<8x128xf32>
    %440 = arith.addf %438, %439 : vector<8x128xf32>
    %441 = vector.extract_strided_slice %440 {offsets = [0, 0], sizes = [8, 32], strides = [1, 1]} : vector<8x128xf32> to vector<8x32xf32>
    %442 = vector.extract_strided_slice %440 {offsets = [0, 32], sizes = [8, 32], strides = [1, 1]} : vector<8x128xf32> to vector<8x32xf32>
    %443 = vector.extract_strided_slice %440 {offsets = [0, 64], sizes = [8, 32], strides = [1, 1]} : vector<8x128xf32> to vector<8x32xf32>
    %444 = vector.extract_strided_slice %440 {offsets = [0, 96], sizes = [8, 32], strides = [1, 1]} : vector<8x128xf32> to vector<8x32xf32>
    %445 = arith.mulf %442, %400 : vector<8x32xf32>
    %446 = arith.mulf %441, %443 : vector<8x32xf32>
    %447 = arith.addf %445, %446 : vector<8x32xf32>
    %448 = math.tanh %447 : vector<8x32xf32>
    %449 = arith.mulf %444, %448 : vector<8x32xf32>
    %450 = arith.truncf %449 : vector<8x32xf32> to vector<8x32xbf16>
    %c1_98 = arith.constant 1 : index
    %c32_99 = arith.constant 32 : index
    %c0_100 = arith.constant 0 : index
    %451 = vector.load %arg18[%c1_98, %c32_99, %c0_100] : memref<5x64x32xf32, #tpu.memory_space<vmem>>, vector<1x8x32xf32>
    %452 = vector.shape_cast %451 : vector<1x8x32xf32> to vector<8x32xf32>
    %453 = vector.shape_cast %449 : vector<8x32xf32> to vector<1x8x32xf32>
    tpu.vector_store %arg18[%c1_98, %c32_99, %c0_100], %453 {strides = array<i32>} : memref<5x64x32xf32, #tpu.memory_space<vmem>>, vector<1x8x32xf32>,
    %c3_101 = arith.constant 3 : index
    %c24_102 = arith.constant 24 : index
    %c0_103 = arith.constant 0 : index
    %454 = vector.load %arg18[%c3_101, %c24_102, %c0_103] : memref<5x64x32xf32, #tpu.memory_space<vmem>>, vector<1x8x32xf32>
    %455 = vector.shape_cast %454 : vector<1x8x32xf32> to vector<8x32xf32>
    %456 = vector.shape_cast %449 : vector<8x32xf32> to vector<1x8x32xf32>
    tpu.vector_store %arg18[%c3_101, %c24_102, %c0_103], %456 {strides = array<i32>} : memref<5x64x32xf32, #tpu.memory_space<vmem>>, vector<1x8x32xf32>,
    %457 = vector.extract_strided_slice %5 {offsets = [80, 0], sizes = [8, 128], strides = [1, 1]} : vector<160x128xf32> to vector<8x128xf32>
    %cst_104 = arith.constant dense<0.000000e+00> : vector<8x128xf32>
    %458 = tpu.matmul %430, %6, %cst_104 {dimension_numbers = #tpu.dot_dimension_numbers<[1], [0], [0], [1], [0, 0, 1, 1], [], []>} : vector<8x32xbf16>, vector<32x128xbf16>, vector<8x128xf32> -> vector<8x128xf32>
    %459 = arith.addf %457, %458 : vector<8x128xf32>
    %460 = math.tanh %459 : vector<8x128xf32>
    %461 = vector.broadcast %10 : vector<1x128xf32> to vector<8x128xf32>
    %462 = arith.mulf %460, %461 : vector<8x128xf32>
    %463 = vector.broadcast %11 : vector<1x128xf32> to vector<8x128xf32>
    %464 = arith.addf %462, %463 : vector<8x128xf32>
    %465 = vector.extract_strided_slice %464 {offsets = [0, 0], sizes = [8, 32], strides = [1, 1]} : vector<8x128xf32> to vector<8x32xf32>
    %466 = vector.extract_strided_slice %464 {offsets = [0, 32], sizes = [8, 32], strides = [1, 1]} : vector<8x128xf32> to vector<8x32xf32>
    %467 = vector.extract_strided_slice %464 {offsets = [0, 64], sizes = [8, 32], strides = [1, 1]} : vector<8x128xf32> to vector<8x32xf32>
    %468 = vector.extract_strided_slice %464 {offsets = [0, 96], sizes = [8, 32], strides = [1, 1]} : vector<8x128xf32> to vector<8x32xf32>
    %469 = arith.mulf %466, %427 : vector<8x32xf32>
    %470 = arith.mulf %465, %467 : vector<8x32xf32>
    %471 = arith.addf %469, %470 : vector<8x32xf32>
    %472 = math.tanh %471 : vector<8x32xf32>
    %473 = arith.mulf %468, %472 : vector<8x32xf32>
    %474 = arith.truncf %473 : vector<8x32xf32> to vector<8x32xbf16>
    %cst_105 = arith.constant dense<0.000000e+00> : vector<8x128xf32>
    %475 = tpu.matmul %474, %7, %cst_105 {dimension_numbers = #tpu.dot_dimension_numbers<[1], [0], [0], [1], [0, 0, 1, 1], [], []>} : vector<8x32xbf16>, vector<32x128xbf16>, vector<8x128xf32> -> vector<8x128xf32>
    %cst_106 = arith.constant dense<0.000000e+00> : vector<8x128xf32>
    %476 = tpu.matmul %450, %8, %cst_106 {dimension_numbers = #tpu.dot_dimension_numbers<[1], [0], [0], [1], [0, 0, 1, 1], [], []>} : vector<8x32xbf16>, vector<32x128xbf16>, vector<8x128xf32> -> vector<8x128xf32>
    %477 = arith.addf %475, %476 : vector<8x128xf32>
    %478 = vector.broadcast %9 : vector<1x128xf32> to vector<8x128xf32>
    %479 = arith.addf %477, %478 : vector<8x128xf32>
    %480 = math.tanh %479 : vector<8x128xf32>
    %481 = vector.broadcast %10 : vector<1x128xf32> to vector<8x128xf32>
    %482 = arith.mulf %480, %481 : vector<8x128xf32>
    %483 = vector.broadcast %11 : vector<1x128xf32> to vector<8x128xf32>
    %484 = arith.addf %482, %483 : vector<8x128xf32>
    %485 = vector.extract_strided_slice %484 {offsets = [0, 0], sizes = [8, 32], strides = [1, 1]} : vector<8x128xf32> to vector<8x32xf32>
    %486 = vector.extract_strided_slice %484 {offsets = [0, 32], sizes = [8, 32], strides = [1, 1]} : vector<8x128xf32> to vector<8x32xf32>
    %487 = vector.extract_strided_slice %484 {offsets = [0, 64], sizes = [8, 32], strides = [1, 1]} : vector<8x128xf32> to vector<8x32xf32>
    %488 = vector.extract_strided_slice %484 {offsets = [0, 96], sizes = [8, 32], strides = [1, 1]} : vector<8x128xf32> to vector<8x32xf32>
    %489 = arith.mulf %486, %447 : vector<8x32xf32>
    %490 = arith.mulf %485, %487 : vector<8x32xf32>
    %491 = arith.addf %489, %490 : vector<8x32xf32>
    %492 = math.tanh %491 : vector<8x32xf32>
    %493 = arith.mulf %488, %492 : vector<8x32xf32>
    %494 = arith.truncf %493 : vector<8x32xf32> to vector<8x32xbf16>
    %c0_107 = arith.constant 0 : index
    %c40 = arith.constant 40 : index
    %c0_108 = arith.constant 0 : index
    %495 = vector.load %arg18[%c0_107, %c40, %c0_108] : memref<5x64x32xf32, #tpu.memory_space<vmem>>, vector<1x8x32xf32>
    %496 = vector.shape_cast %495 : vector<1x8x32xf32> to vector<8x32xf32>
    %497 = vector.shape_cast %493 : vector<8x32xf32> to vector<1x8x32xf32>
    tpu.vector_store %arg18[%c0_107, %c40, %c0_108], %497 {strides = array<i32>} : memref<5x64x32xf32, #tpu.memory_space<vmem>>, vector<1x8x32xf32>,
    %c2_109 = arith.constant 2 : index
    %c32_110 = arith.constant 32 : index
    %c0_111 = arith.constant 0 : index
    %498 = vector.load %arg18[%c2_109, %c32_110, %c0_111] : memref<5x64x32xf32, #tpu.memory_space<vmem>>, vector<1x8x32xf32>
    %499 = vector.shape_cast %498 : vector<1x8x32xf32> to vector<8x32xf32>
    %500 = vector.shape_cast %493 : vector<8x32xf32> to vector<1x8x32xf32>
    tpu.vector_store %arg18[%c2_109, %c32_110, %c0_111], %500 {strides = array<i32>} : memref<5x64x32xf32, #tpu.memory_space<vmem>>, vector<1x8x32xf32>,
    %c4_112 = arith.constant 4 : index
    %c24_113 = arith.constant 24 : index
    %c0_114 = arith.constant 0 : index
    %501 = vector.load %arg18[%c4_112, %c24_113, %c0_114] : memref<5x64x32xf32, #tpu.memory_space<vmem>>, vector<1x8x32xf32>
    %502 = vector.shape_cast %501 : vector<1x8x32xf32> to vector<8x32xf32>
    %503 = vector.shape_cast %493 : vector<8x32xf32> to vector<1x8x32xf32>
    tpu.vector_store %arg18[%c4_112, %c24_113, %c0_114], %503 {strides = array<i32>} : memref<5x64x32xf32, #tpu.memory_space<vmem>>, vector<1x8x32xf32>,
    %504 = vector.extract_strided_slice %5 {offsets = [88, 0], sizes = [8, 128], strides = [1, 1]} : vector<160x128xf32> to vector<8x128xf32>
    %cst_115 = arith.constant dense<0.000000e+00> : vector<8x128xf32>
    %505 = tpu.matmul %474, %6, %cst_115 {dimension_numbers = #tpu.dot_dimension_numbers<[1], [0], [0], [1], [0, 0, 1, 1], [], []>} : vector<8x32xbf16>, vector<32x128xbf16>, vector<8x128xf32> -> vector<8x128xf32>
    %506 = arith.addf %504, %505 : vector<8x128xf32>
    %507 = math.tanh %506 : vector<8x128xf32>
    %508 = vector.broadcast %10 : vector<1x128xf32> to vector<8x128xf32>
    %509 = arith.mulf %507, %508 : vector<8x128xf32>
    %510 = vector.broadcast %11 : vector<1x128xf32> to vector<8x128xf32>
    %511 = arith.addf %509, %510 : vector<8x128xf32>
    %512 = vector.extract_strided_slice %511 {offsets = [0, 0], sizes = [8, 32], strides = [1, 1]} : vector<8x128xf32> to vector<8x32xf32>
    %513 = vector.extract_strided_slice %511 {offsets = [0, 32], sizes = [8, 32], strides = [1, 1]} : vector<8x128xf32> to vector<8x32xf32>
    %514 = vector.extract_strided_slice %511 {offsets = [0, 64], sizes = [8, 32], strides = [1, 1]} : vector<8x128xf32> to vector<8x32xf32>
    %515 = vector.extract_strided_slice %511 {offsets = [0, 96], sizes = [8, 32], strides = [1, 1]} : vector<8x128xf32> to vector<8x32xf32>
    %516 = arith.mulf %513, %471 : vector<8x32xf32>
    %517 = arith.mulf %512, %514 : vector<8x32xf32>
    %518 = arith.addf %516, %517 : vector<8x32xf32>
    %519 = math.tanh %518 : vector<8x32xf32>
    %520 = arith.mulf %515, %519 : vector<8x32xf32>
    %521 = arith.truncf %520 : vector<8x32xf32> to vector<8x32xbf16>
    %cst_116 = arith.constant dense<0.000000e+00> : vector<8x128xf32>
    %522 = tpu.matmul %521, %7, %cst_116 {dimension_numbers = #tpu.dot_dimension_numbers<[1], [0], [0], [1], [0, 0, 1, 1], [], []>} : vector<8x32xbf16>, vector<32x128xbf16>, vector<8x128xf32> -> vector<8x128xf32>
    %cst_117 = arith.constant dense<0.000000e+00> : vector<8x128xf32>
    %523 = tpu.matmul %494, %8, %cst_117 {dimension_numbers = #tpu.dot_dimension_numbers<[1], [0], [0], [1], [0, 0, 1, 1], [], []>} : vector<8x32xbf16>, vector<32x128xbf16>, vector<8x128xf32> -> vector<8x128xf32>
    %524 = arith.addf %522, %523 : vector<8x128xf32>
    %525 = vector.broadcast %9 : vector<1x128xf32> to vector<8x128xf32>
    %526 = arith.addf %524, %525 : vector<8x128xf32>
    %527 = math.tanh %526 : vector<8x128xf32>
    %528 = vector.broadcast %10 : vector<1x128xf32> to vector<8x128xf32>
    %529 = arith.mulf %527, %528 : vector<8x128xf32>
    %530 = vector.broadcast %11 : vector<1x128xf32> to vector<8x128xf32>
    %531 = arith.addf %529, %530 : vector<8x128xf32>
    %532 = vector.extract_strided_slice %531 {offsets = [0, 0], sizes = [8, 32], strides = [1, 1]} : vector<8x128xf32> to vector<8x32xf32>
    %533 = vector.extract_strided_slice %531 {offsets = [0, 32], sizes = [8, 32], strides = [1, 1]} : vector<8x128xf32> to vector<8x32xf32>
    %534 = vector.extract_strided_slice %531 {offsets = [0, 64], sizes = [8, 32], strides = [1, 1]} : vector<8x128xf32> to vector<8x32xf32>
    %535 = vector.extract_strided_slice %531 {offsets = [0, 96], sizes = [8, 32], strides = [1, 1]} : vector<8x128xf32> to vector<8x32xf32>
    %536 = arith.mulf %533, %491 : vector<8x32xf32>
    %537 = arith.mulf %532, %534 : vector<8x32xf32>
    %538 = arith.addf %536, %537 : vector<8x32xf32>
    %539 = math.tanh %538 : vector<8x32xf32>
    %540 = arith.mulf %535, %539 : vector<8x32xf32>
    %541 = arith.truncf %540 : vector<8x32xf32> to vector<8x32xbf16>
    %c1_118 = arith.constant 1 : index
    %c40_119 = arith.constant 40 : index
    %c0_120 = arith.constant 0 : index
    %542 = vector.load %arg18[%c1_118, %c40_119, %c0_120] : memref<5x64x32xf32, #tpu.memory_space<vmem>>, vector<1x8x32xf32>
    %543 = vector.shape_cast %542 : vector<1x8x32xf32> to vector<8x32xf32>
    %544 = vector.shape_cast %540 : vector<8x32xf32> to vector<1x8x32xf32>
    tpu.vector_store %arg18[%c1_118, %c40_119, %c0_120], %544 {strides = array<i32>} : memref<5x64x32xf32, #tpu.memory_space<vmem>>, vector<1x8x32xf32>,
    %c3_121 = arith.constant 3 : index
    %c32_122 = arith.constant 32 : index
    %c0_123 = arith.constant 0 : index
    %545 = vector.load %arg18[%c3_121, %c32_122, %c0_123] : memref<5x64x32xf32, #tpu.memory_space<vmem>>, vector<1x8x32xf32>
    %546 = vector.shape_cast %545 : vector<1x8x32xf32> to vector<8x32xf32>
    %547 = vector.shape_cast %540 : vector<8x32xf32> to vector<1x8x32xf32>
    tpu.vector_store %arg18[%c3_121, %c32_122, %c0_123], %547 {strides = array<i32>} : memref<5x64x32xf32, #tpu.memory_space<vmem>>, vector<1x8x32xf32>,
    %548 = vector.extract_strided_slice %5 {offsets = [96, 0], sizes = [8, 128], strides = [1, 1]} : vector<160x128xf32> to vector<8x128xf32>
    %cst_124 = arith.constant dense<0.000000e+00> : vector<8x128xf32>
    %549 = tpu.matmul %521, %6, %cst_124 {dimension_numbers = #tpu.dot_dimension_numbers<[1], [0], [0], [1], [0, 0, 1, 1], [], []>} : vector<8x32xbf16>, vector<32x128xbf16>, vector<8x128xf32> -> vector<8x128xf32>
    %550 = arith.addf %548, %549 : vector<8x128xf32>
    %551 = math.tanh %550 : vector<8x128xf32>
    %552 = vector.broadcast %10 : vector<1x128xf32> to vector<8x128xf32>
    %553 = arith.mulf %551, %552 : vector<8x128xf32>
    %554 = vector.broadcast %11 : vector<1x128xf32> to vector<8x128xf32>
    %555 = arith.addf %553, %554 : vector<8x128xf32>
    %556 = vector.extract_strided_slice %555 {offsets = [0, 0], sizes = [8, 32], strides = [1, 1]} : vector<8x128xf32> to vector<8x32xf32>
    %557 = vector.extract_strided_slice %555 {offsets = [0, 32], sizes = [8, 32], strides = [1, 1]} : vector<8x128xf32> to vector<8x32xf32>
    %558 = vector.extract_strided_slice %555 {offsets = [0, 64], sizes = [8, 32], strides = [1, 1]} : vector<8x128xf32> to vector<8x32xf32>
    %559 = vector.extract_strided_slice %555 {offsets = [0, 96], sizes = [8, 32], strides = [1, 1]} : vector<8x128xf32> to vector<8x32xf32>
    %560 = arith.mulf %557, %518 : vector<8x32xf32>
    %561 = arith.mulf %556, %558 : vector<8x32xf32>
    %562 = arith.addf %560, %561 : vector<8x32xf32>
    %563 = math.tanh %562 : vector<8x32xf32>
    %564 = arith.mulf %559, %563 : vector<8x32xf32>
    %565 = arith.truncf %564 : vector<8x32xf32> to vector<8x32xbf16>
    %cst_125 = arith.constant dense<0.000000e+00> : vector<8x128xf32>
    %566 = tpu.matmul %565, %7, %cst_125 {dimension_numbers = #tpu.dot_dimension_numbers<[1], [0], [0], [1], [0, 0, 1, 1], [], []>} : vector<8x32xbf16>, vector<32x128xbf16>, vector<8x128xf32> -> vector<8x128xf32>
    %cst_126 = arith.constant dense<0.000000e+00> : vector<8x128xf32>
    %567 = tpu.matmul %541, %8, %cst_126 {dimension_numbers = #tpu.dot_dimension_numbers<[1], [0], [0], [1], [0, 0, 1, 1], [], []>} : vector<8x32xbf16>, vector<32x128xbf16>, vector<8x128xf32> -> vector<8x128xf32>
    %568 = arith.addf %566, %567 : vector<8x128xf32>
    %569 = vector.broadcast %9 : vector<1x128xf32> to vector<8x128xf32>
    %570 = arith.addf %568, %569 : vector<8x128xf32>
    %571 = math.tanh %570 : vector<8x128xf32>
    %572 = vector.broadcast %10 : vector<1x128xf32> to vector<8x128xf32>
    %573 = arith.mulf %571, %572 : vector<8x128xf32>
    %574 = vector.broadcast %11 : vector<1x128xf32> to vector<8x128xf32>
    %575 = arith.addf %573, %574 : vector<8x128xf32>
    %576 = vector.extract_strided_slice %575 {offsets = [0, 0], sizes = [8, 32], strides = [1, 1]} : vector<8x128xf32> to vector<8x32xf32>
    %577 = vector.extract_strided_slice %575 {offsets = [0, 32], sizes = [8, 32], strides = [1, 1]} : vector<8x128xf32> to vector<8x32xf32>
    %578 = vector.extract_strided_slice %575 {offsets = [0, 64], sizes = [8, 32], strides = [1, 1]} : vector<8x128xf32> to vector<8x32xf32>
    %579 = vector.extract_strided_slice %575 {offsets = [0, 96], sizes = [8, 32], strides = [1, 1]} : vector<8x128xf32> to vector<8x32xf32>
    %580 = arith.mulf %577, %538 : vector<8x32xf32>
    %581 = arith.mulf %576, %578 : vector<8x32xf32>
    %582 = arith.addf %580, %581 : vector<8x32xf32>
    %583 = math.tanh %582 : vector<8x32xf32>
    %584 = arith.mulf %579, %583 : vector<8x32xf32>
    %585 = arith.truncf %584 : vector<8x32xf32> to vector<8x32xbf16>
    %c0_127 = arith.constant 0 : index
    %c48 = arith.constant 48 : index
    %c0_128 = arith.constant 0 : index
    %586 = vector.load %arg18[%c0_127, %c48, %c0_128] : memref<5x64x32xf32, #tpu.memory_space<vmem>>, vector<1x8x32xf32>
    %587 = vector.shape_cast %586 : vector<1x8x32xf32> to vector<8x32xf32>
    %588 = vector.shape_cast %584 : vector<8x32xf32> to vector<1x8x32xf32>
    tpu.vector_store %arg18[%c0_127, %c48, %c0_128], %588 {strides = array<i32>} : memref<5x64x32xf32, #tpu.memory_space<vmem>>, vector<1x8x32xf32>,
    %c2_129 = arith.constant 2 : index
    %c40_130 = arith.constant 40 : index
    %c0_131 = arith.constant 0 : index
    %589 = vector.load %arg18[%c2_129, %c40_130, %c0_131] : memref<5x64x32xf32, #tpu.memory_space<vmem>>, vector<1x8x32xf32>
    %590 = vector.shape_cast %589 : vector<1x8x32xf32> to vector<8x32xf32>
    %591 = vector.shape_cast %584 : vector<8x32xf32> to vector<1x8x32xf32>
    tpu.vector_store %arg18[%c2_129, %c40_130, %c0_131], %591 {strides = array<i32>} : memref<5x64x32xf32, #tpu.memory_space<vmem>>, vector<1x8x32xf32>,
    %c4_132 = arith.constant 4 : index
    %c32_133 = arith.constant 32 : index
    %c0_134 = arith.constant 0 : index
    %592 = vector.load %arg18[%c4_132, %c32_133, %c0_134] : memref<5x64x32xf32, #tpu.memory_space<vmem>>, vector<1x8x32xf32>
    %593 = vector.shape_cast %592 : vector<1x8x32xf32> to vector<8x32xf32>
    %594 = vector.shape_cast %584 : vector<8x32xf32> to vector<1x8x32xf32>
    tpu.vector_store %arg18[%c4_132, %c32_133, %c0_134], %594 {strides = array<i32>} : memref<5x64x32xf32, #tpu.memory_space<vmem>>, vector<1x8x32xf32>,
    %595 = vector.extract_strided_slice %5 {offsets = [104, 0], sizes = [8, 128], strides = [1, 1]} : vector<160x128xf32> to vector<8x128xf32>
    %cst_135 = arith.constant dense<0.000000e+00> : vector<8x128xf32>
    %596 = tpu.matmul %565, %6, %cst_135 {dimension_numbers = #tpu.dot_dimension_numbers<[1], [0], [0], [1], [0, 0, 1, 1], [], []>} : vector<8x32xbf16>, vector<32x128xbf16>, vector<8x128xf32> -> vector<8x128xf32>
    %597 = arith.addf %595, %596 : vector<8x128xf32>
    %598 = math.tanh %597 : vector<8x128xf32>
    %599 = vector.broadcast %10 : vector<1x128xf32> to vector<8x128xf32>
    %600 = arith.mulf %598, %599 : vector<8x128xf32>
    %601 = vector.broadcast %11 : vector<1x128xf32> to vector<8x128xf32>
    %602 = arith.addf %600, %601 : vector<8x128xf32>
    %603 = vector.extract_strided_slice %602 {offsets = [0, 0], sizes = [8, 32], strides = [1, 1]} : vector<8x128xf32> to vector<8x32xf32>
    %604 = vector.extract_strided_slice %602 {offsets = [0, 32], sizes = [8, 32], strides = [1, 1]} : vector<8x128xf32> to vector<8x32xf32>
    %605 = vector.extract_strided_slice %602 {offsets = [0, 64], sizes = [8, 32], strides = [1, 1]} : vector<8x128xf32> to vector<8x32xf32>
    %606 = vector.extract_strided_slice %602 {offsets = [0, 96], sizes = [8, 32], strides = [1, 1]} : vector<8x128xf32> to vector<8x32xf32>
    %607 = arith.mulf %604, %562 : vector<8x32xf32>
    %608 = arith.mulf %603, %605 : vector<8x32xf32>
    %609 = arith.addf %607, %608 : vector<8x32xf32>
    %610 = math.tanh %609 : vector<8x32xf32>
    %611 = arith.mulf %606, %610 : vector<8x32xf32>
    %612 = arith.truncf %611 : vector<8x32xf32> to vector<8x32xbf16>
    %cst_136 = arith.constant dense<0.000000e+00> : vector<8x128xf32>
    %613 = tpu.matmul %612, %7, %cst_136 {dimension_numbers = #tpu.dot_dimension_numbers<[1], [0], [0], [1], [0, 0, 1, 1], [], []>} : vector<8x32xbf16>, vector<32x128xbf16>, vector<8x128xf32> -> vector<8x128xf32>
    %cst_137 = arith.constant dense<0.000000e+00> : vector<8x128xf32>
    %614 = tpu.matmul %585, %8, %cst_137 {dimension_numbers = #tpu.dot_dimension_numbers<[1], [0], [0], [1], [0, 0, 1, 1], [], []>} : vector<8x32xbf16>, vector<32x128xbf16>, vector<8x128xf32> -> vector<8x128xf32>
    %615 = arith.addf %613, %614 : vector<8x128xf32>
    %616 = vector.broadcast %9 : vector<1x128xf32> to vector<8x128xf32>
    %617 = arith.addf %615, %616 : vector<8x128xf32>
    %618 = math.tanh %617 : vector<8x128xf32>
    %619 = vector.broadcast %10 : vector<1x128xf32> to vector<8x128xf32>
    %620 = arith.mulf %618, %619 : vector<8x128xf32>
    %621 = vector.broadcast %11 : vector<1x128xf32> to vector<8x128xf32>
    %622 = arith.addf %620, %621 : vector<8x128xf32>
    %623 = vector.extract_strided_slice %622 {offsets = [0, 0], sizes = [8, 32], strides = [1, 1]} : vector<8x128xf32> to vector<8x32xf32>
    %624 = vector.extract_strided_slice %622 {offsets = [0, 32], sizes = [8, 32], strides = [1, 1]} : vector<8x128xf32> to vector<8x32xf32>
    %625 = vector.extract_strided_slice %622 {offsets = [0, 64], sizes = [8, 32], strides = [1, 1]} : vector<8x128xf32> to vector<8x32xf32>
    %626 = vector.extract_strided_slice %622 {offsets = [0, 96], sizes = [8, 32], strides = [1, 1]} : vector<8x128xf32> to vector<8x32xf32>
    %627 = arith.mulf %624, %582 : vector<8x32xf32>
    %628 = arith.mulf %623, %625 : vector<8x32xf32>
    %629 = arith.addf %627, %628 : vector<8x32xf32>
    %630 = math.tanh %629 : vector<8x32xf32>
    %631 = arith.mulf %626, %630 : vector<8x32xf32>
    %632 = arith.truncf %631 : vector<8x32xf32> to vector<8x32xbf16>
    %c1_138 = arith.constant 1 : index
    %c48_139 = arith.constant 48 : index
    %c0_140 = arith.constant 0 : index
    %633 = vector.load %arg18[%c1_138, %c48_139, %c0_140] : memref<5x64x32xf32, #tpu.memory_space<vmem>>, vector<1x8x32xf32>
    %634 = vector.shape_cast %633 : vector<1x8x32xf32> to vector<8x32xf32>
    %635 = vector.shape_cast %631 : vector<8x32xf32> to vector<1x8x32xf32>
    tpu.vector_store %arg18[%c1_138, %c48_139, %c0_140], %635 {strides = array<i32>} : memref<5x64x32xf32, #tpu.memory_space<vmem>>, vector<1x8x32xf32>,
    %c3_141 = arith.constant 3 : index
    %c40_142 = arith.constant 40 : index
    %c0_143 = arith.constant 0 : index
    %636 = vector.load %arg18[%c3_141, %c40_142, %c0_143] : memref<5x64x32xf32, #tpu.memory_space<vmem>>, vector<1x8x32xf32>
    %637 = vector.shape_cast %636 : vector<1x8x32xf32> to vector<8x32xf32>
    %638 = vector.shape_cast %631 : vector<8x32xf32> to vector<1x8x32xf32>
    tpu.vector_store %arg18[%c3_141, %c40_142, %c0_143], %638 {strides = array<i32>} : memref<5x64x32xf32, #tpu.memory_space<vmem>>, vector<1x8x32xf32>,
    %639 = vector.extract_strided_slice %5 {offsets = [112, 0], sizes = [8, 128], strides = [1, 1]} : vector<160x128xf32> to vector<8x128xf32>
    %cst_144 = arith.constant dense<0.000000e+00> : vector<8x128xf32>
    %640 = tpu.matmul %612, %6, %cst_144 {dimension_numbers = #tpu.dot_dimension_numbers<[1], [0], [0], [1], [0, 0, 1, 1], [], []>} : vector<8x32xbf16>, vector<32x128xbf16>, vector<8x128xf32> -> vector<8x128xf32>
    %641 = arith.addf %639, %640 : vector<8x128xf32>
    %642 = math.tanh %641 : vector<8x128xf32>
    %643 = vector.broadcast %10 : vector<1x128xf32> to vector<8x128xf32>
    %644 = arith.mulf %642, %643 : vector<8x128xf32>
    %645 = vector.broadcast %11 : vector<1x128xf32> to vector<8x128xf32>
    %646 = arith.addf %644, %645 : vector<8x128xf32>
    %647 = vector.extract_strided_slice %646 {offsets = [0, 0], sizes = [8, 32], strides = [1, 1]} : vector<8x128xf32> to vector<8x32xf32>
    %648 = vector.extract_strided_slice %646 {offsets = [0, 32], sizes = [8, 32], strides = [1, 1]} : vector<8x128xf32> to vector<8x32xf32>
    %649 = vector.extract_strided_slice %646 {offsets = [0, 64], sizes = [8, 32], strides = [1, 1]} : vector<8x128xf32> to vector<8x32xf32>
    %650 = vector.extract_strided_slice %646 {offsets = [0, 96], sizes = [8, 32], strides = [1, 1]} : vector<8x128xf32> to vector<8x32xf32>
    %651 = arith.mulf %648, %609 : vector<8x32xf32>
    %652 = arith.mulf %647, %649 : vector<8x32xf32>
    %653 = arith.addf %651, %652 : vector<8x32xf32>
    %654 = math.tanh %653 : vector<8x32xf32>
    %655 = arith.mulf %650, %654 : vector<8x32xf32>
    %656 = arith.truncf %655 : vector<8x32xf32> to vector<8x32xbf16>
    %cst_145 = arith.constant dense<0.000000e+00> : vector<8x128xf32>
    %657 = tpu.matmul %656, %7, %cst_145 {dimension_numbers = #tpu.dot_dimension_numbers<[1], [0], [0], [1], [0, 0, 1, 1], [], []>} : vector<8x32xbf16>, vector<32x128xbf16>, vector<8x128xf32> -> vector<8x128xf32>
    %cst_146 = arith.constant dense<0.000000e+00> : vector<8x128xf32>
    %658 = tpu.matmul %632, %8, %cst_146 {dimension_numbers = #tpu.dot_dimension_numbers<[1], [0], [0], [1], [0, 0, 1, 1], [], []>} : vector<8x32xbf16>, vector<32x128xbf16>, vector<8x128xf32> -> vector<8x128xf32>
    %659 = arith.addf %657, %658 : vector<8x128xf32>
    %660 = vector.broadcast %9 : vector<1x128xf32> to vector<8x128xf32>
    %661 = arith.addf %659, %660 : vector<8x128xf32>
    %662 = math.tanh %661 : vector<8x128xf32>
    %663 = vector.broadcast %10 : vector<1x128xf32> to vector<8x128xf32>
    %664 = arith.mulf %662, %663 : vector<8x128xf32>
    %665 = vector.broadcast %11 : vector<1x128xf32> to vector<8x128xf32>
    %666 = arith.addf %664, %665 : vector<8x128xf32>
    %667 = vector.extract_strided_slice %666 {offsets = [0, 0], sizes = [8, 32], strides = [1, 1]} : vector<8x128xf32> to vector<8x32xf32>
    %668 = vector.extract_strided_slice %666 {offsets = [0, 32], sizes = [8, 32], strides = [1, 1]} : vector<8x128xf32> to vector<8x32xf32>
    %669 = vector.extract_strided_slice %666 {offsets = [0, 64], sizes = [8, 32], strides = [1, 1]} : vector<8x128xf32> to vector<8x32xf32>
    %670 = vector.extract_strided_slice %666 {offsets = [0, 96], sizes = [8, 32], strides = [1, 1]} : vector<8x128xf32> to vector<8x32xf32>
    %671 = arith.mulf %668, %629 : vector<8x32xf32>
    %672 = arith.mulf %667, %669 : vector<8x32xf32>
    %673 = arith.addf %671, %672 : vector<8x32xf32>
    %674 = math.tanh %673 : vector<8x32xf32>
    %675 = arith.mulf %670, %674 : vector<8x32xf32>
    %676 = arith.truncf %675 : vector<8x32xf32> to vector<8x32xbf16>
    %c0_147 = arith.constant 0 : index
    %c56 = arith.constant 56 : index
    %c0_148 = arith.constant 0 : index
    %677 = vector.load %arg18[%c0_147, %c56, %c0_148] : memref<5x64x32xf32, #tpu.memory_space<vmem>>, vector<1x8x32xf32>
    %678 = vector.shape_cast %677 : vector<1x8x32xf32> to vector<8x32xf32>
    %679 = vector.shape_cast %675 : vector<8x32xf32> to vector<1x8x32xf32>
    tpu.vector_store %arg18[%c0_147, %c56, %c0_148], %679 {strides = array<i32>} : memref<5x64x32xf32, #tpu.memory_space<vmem>>, vector<1x8x32xf32>,
    %c2_149 = arith.constant 2 : index
    %c48_150 = arith.constant 48 : index
    %c0_151 = arith.constant 0 : index
    %680 = vector.load %arg18[%c2_149, %c48_150, %c0_151] : memref<5x64x32xf32, #tpu.memory_space<vmem>>, vector<1x8x32xf32>
    %681 = vector.shape_cast %680 : vector<1x8x32xf32> to vector<8x32xf32>
    %682 = vector.shape_cast %675 : vector<8x32xf32> to vector<1x8x32xf32>
    tpu.vector_store %arg18[%c2_149, %c48_150, %c0_151], %682 {strides = array<i32>} : memref<5x64x32xf32, #tpu.memory_space<vmem>>, vector<1x8x32xf32>,
    %c4_152 = arith.constant 4 : index
    %c40_153 = arith.constant 40 : index
    %c0_154 = arith.constant 0 : index
    %683 = vector.load %arg18[%c4_152, %c40_153, %c0_154] : memref<5x64x32xf32, #tpu.memory_space<vmem>>, vector<1x8x32xf32>
    %684 = vector.shape_cast %683 : vector<1x8x32xf32> to vector<8x32xf32>
    %685 = vector.shape_cast %675 : vector<8x32xf32> to vector<1x8x32xf32>
    tpu.vector_store %arg18[%c4_152, %c40_153, %c0_154], %685 {strides = array<i32>} : memref<5x64x32xf32, #tpu.memory_space<vmem>>, vector<1x8x32xf32>,
    %686 = vector.extract_strided_slice %5 {offsets = [120, 0], sizes = [8, 128], strides = [1, 1]} : vector<160x128xf32> to vector<8x128xf32>
    %cst_155 = arith.constant dense<0.000000e+00> : vector<8x128xf32>
    %687 = tpu.matmul %656, %6, %cst_155 {dimension_numbers = #tpu.dot_dimension_numbers<[1], [0], [0], [1], [0, 0, 1, 1], [], []>} : vector<8x32xbf16>, vector<32x128xbf16>, vector<8x128xf32> -> vector<8x128xf32>
    %688 = arith.addf %686, %687 : vector<8x128xf32>
    %689 = math.tanh %688 : vector<8x128xf32>
    %690 = vector.broadcast %10 : vector<1x128xf32> to vector<8x128xf32>
    %691 = arith.mulf %689, %690 : vector<8x128xf32>
    %692 = vector.broadcast %11 : vector<1x128xf32> to vector<8x128xf32>
    %693 = arith.addf %691, %692 : vector<8x128xf32>
    %694 = vector.extract_strided_slice %693 {offsets = [0, 0], sizes = [8, 32], strides = [1, 1]} : vector<8x128xf32> to vector<8x32xf32>
    %695 = vector.extract_strided_slice %693 {offsets = [0, 32], sizes = [8, 32], strides = [1, 1]} : vector<8x128xf32> to vector<8x32xf32>
    %696 = vector.extract_strided_slice %693 {offsets = [0, 64], sizes = [8, 32], strides = [1, 1]} : vector<8x128xf32> to vector<8x32xf32>
    %697 = vector.extract_strided_slice %693 {offsets = [0, 96], sizes = [8, 32], strides = [1, 1]} : vector<8x128xf32> to vector<8x32xf32>
    %698 = arith.mulf %695, %653 : vector<8x32xf32>
    %699 = arith.mulf %694, %696 : vector<8x32xf32>
    %700 = arith.addf %698, %699 : vector<8x32xf32>
    %701 = math.tanh %700 : vector<8x32xf32>
    %702 = arith.mulf %697, %701 : vector<8x32xf32>
    %703 = arith.truncf %702 : vector<8x32xf32> to vector<8x32xbf16>
    %cst_156 = arith.constant dense<0.000000e+00> : vector<8x128xf32>
    %704 = tpu.matmul %703, %7, %cst_156 {dimension_numbers = #tpu.dot_dimension_numbers<[1], [0], [0], [1], [0, 0, 1, 1], [], []>} : vector<8x32xbf16>, vector<32x128xbf16>, vector<8x128xf32> -> vector<8x128xf32>
    %cst_157 = arith.constant dense<0.000000e+00> : vector<8x128xf32>
    %705 = tpu.matmul %676, %8, %cst_157 {dimension_numbers = #tpu.dot_dimension_numbers<[1], [0], [0], [1], [0, 0, 1, 1], [], []>} : vector<8x32xbf16>, vector<32x128xbf16>, vector<8x128xf32> -> vector<8x128xf32>
    %706 = arith.addf %704, %705 : vector<8x128xf32>
    %707 = vector.broadcast %9 : vector<1x128xf32> to vector<8x128xf32>
    %708 = arith.addf %706, %707 : vector<8x128xf32>
    %709 = math.tanh %708 : vector<8x128xf32>
    %710 = vector.broadcast %10 : vector<1x128xf32> to vector<8x128xf32>
    %711 = arith.mulf %709, %710 : vector<8x128xf32>
    %712 = vector.broadcast %11 : vector<1x128xf32> to vector<8x128xf32>
    %713 = arith.addf %711, %712 : vector<8x128xf32>
    %714 = vector.extract_strided_slice %713 {offsets = [0, 0], sizes = [8, 32], strides = [1, 1]} : vector<8x128xf32> to vector<8x32xf32>
    %715 = vector.extract_strided_slice %713 {offsets = [0, 32], sizes = [8, 32], strides = [1, 1]} : vector<8x128xf32> to vector<8x32xf32>
    %716 = vector.extract_strided_slice %713 {offsets = [0, 64], sizes = [8, 32], strides = [1, 1]} : vector<8x128xf32> to vector<8x32xf32>
    %717 = vector.extract_strided_slice %713 {offsets = [0, 96], sizes = [8, 32], strides = [1, 1]} : vector<8x128xf32> to vector<8x32xf32>
    %718 = arith.mulf %715, %673 : vector<8x32xf32>
    %719 = arith.mulf %714, %716 : vector<8x32xf32>
    %720 = arith.addf %718, %719 : vector<8x32xf32>
    %721 = math.tanh %720 : vector<8x32xf32>
    %722 = arith.mulf %717, %721 : vector<8x32xf32>
    %723 = arith.truncf %722 : vector<8x32xf32> to vector<8x32xbf16>
    %c1_158 = arith.constant 1 : index
    %c56_159 = arith.constant 56 : index
    %c0_160 = arith.constant 0 : index
    %724 = vector.load %arg18[%c1_158, %c56_159, %c0_160] : memref<5x64x32xf32, #tpu.memory_space<vmem>>, vector<1x8x32xf32>
    %725 = vector.shape_cast %724 : vector<1x8x32xf32> to vector<8x32xf32>
    %726 = vector.shape_cast %722 : vector<8x32xf32> to vector<1x8x32xf32>
    tpu.vector_store %arg18[%c1_158, %c56_159, %c0_160], %726 {strides = array<i32>} : memref<5x64x32xf32, #tpu.memory_space<vmem>>, vector<1x8x32xf32>,
    %c3_161 = arith.constant 3 : index
    %c48_162 = arith.constant 48 : index
    %c0_163 = arith.constant 0 : index
    %727 = vector.load %arg18[%c3_161, %c48_162, %c0_163] : memref<5x64x32xf32, #tpu.memory_space<vmem>>, vector<1x8x32xf32>
    %728 = vector.shape_cast %727 : vector<1x8x32xf32> to vector<8x32xf32>
    %729 = vector.shape_cast %722 : vector<8x32xf32> to vector<1x8x32xf32>
    tpu.vector_store %arg18[%c3_161, %c48_162, %c0_163], %729 {strides = array<i32>} : memref<5x64x32xf32, #tpu.memory_space<vmem>>, vector<1x8x32xf32>,
    %730 = vector.extract_strided_slice %5 {offsets = [128, 0], sizes = [8, 128], strides = [1, 1]} : vector<160x128xf32> to vector<8x128xf32>
    %cst_164 = arith.constant dense<0.000000e+00> : vector<8x128xf32>
    %731 = tpu.matmul %703, %6, %cst_164 {dimension_numbers = #tpu.dot_dimension_numbers<[1], [0], [0], [1], [0, 0, 1, 1], [], []>} : vector<8x32xbf16>, vector<32x128xbf16>, vector<8x128xf32> -> vector<8x128xf32>
    %732 = arith.addf %730, %731 : vector<8x128xf32>
    %733 = math.tanh %732 : vector<8x128xf32>
    %734 = vector.broadcast %10 : vector<1x128xf32> to vector<8x128xf32>
    %735 = arith.mulf %733, %734 : vector<8x128xf32>
    %736 = vector.broadcast %11 : vector<1x128xf32> to vector<8x128xf32>
    %737 = arith.addf %735, %736 : vector<8x128xf32>
    %738 = vector.extract_strided_slice %737 {offsets = [0, 0], sizes = [8, 32], strides = [1, 1]} : vector<8x128xf32> to vector<8x32xf32>
    %739 = vector.extract_strided_slice %737 {offsets = [0, 32], sizes = [8, 32], strides = [1, 1]} : vector<8x128xf32> to vector<8x32xf32>
    %740 = vector.extract_strided_slice %737 {offsets = [0, 64], sizes = [8, 32], strides = [1, 1]} : vector<8x128xf32> to vector<8x32xf32>
    %741 = vector.extract_strided_slice %737 {offsets = [0, 96], sizes = [8, 32], strides = [1, 1]} : vector<8x128xf32> to vector<8x32xf32>
    %742 = arith.mulf %739, %700 : vector<8x32xf32>
    %743 = arith.mulf %738, %740 : vector<8x32xf32>
    %744 = arith.addf %742, %743 : vector<8x32xf32>
    %745 = math.tanh %744 : vector<8x32xf32>
    %746 = arith.mulf %741, %745 : vector<8x32xf32>
    %747 = arith.truncf %746 : vector<8x32xf32> to vector<8x32xbf16>
    %cst_165 = arith.constant dense<0.000000e+00> : vector<8x128xf32>
    %748 = tpu.matmul %747, %7, %cst_165 {dimension_numbers = #tpu.dot_dimension_numbers<[1], [0], [0], [1], [0, 0, 1, 1], [], []>} : vector<8x32xbf16>, vector<32x128xbf16>, vector<8x128xf32> -> vector<8x128xf32>
    %cst_166 = arith.constant dense<0.000000e+00> : vector<8x128xf32>
    %749 = tpu.matmul %723, %8, %cst_166 {dimension_numbers = #tpu.dot_dimension_numbers<[1], [0], [0], [1], [0, 0, 1, 1], [], []>} : vector<8x32xbf16>, vector<32x128xbf16>, vector<8x128xf32> -> vector<8x128xf32>
    %750 = arith.addf %748, %749 : vector<8x128xf32>
    %751 = vector.broadcast %9 : vector<1x128xf32> to vector<8x128xf32>
    %752 = arith.addf %750, %751 : vector<8x128xf32>
    %753 = math.tanh %752 : vector<8x128xf32>
    %754 = vector.broadcast %10 : vector<1x128xf32> to vector<8x128xf32>
    %755 = arith.mulf %753, %754 : vector<8x128xf32>
    %756 = vector.broadcast %11 : vector<1x128xf32> to vector<8x128xf32>
    %757 = arith.addf %755, %756 : vector<8x128xf32>
    %758 = vector.extract_strided_slice %757 {offsets = [0, 0], sizes = [8, 32], strides = [1, 1]} : vector<8x128xf32> to vector<8x32xf32>
    %759 = vector.extract_strided_slice %757 {offsets = [0, 32], sizes = [8, 32], strides = [1, 1]} : vector<8x128xf32> to vector<8x32xf32>
    %760 = vector.extract_strided_slice %757 {offsets = [0, 64], sizes = [8, 32], strides = [1, 1]} : vector<8x128xf32> to vector<8x32xf32>
    %761 = vector.extract_strided_slice %757 {offsets = [0, 96], sizes = [8, 32], strides = [1, 1]} : vector<8x128xf32> to vector<8x32xf32>
    %762 = arith.mulf %759, %720 : vector<8x32xf32>
    %763 = arith.mulf %758, %760 : vector<8x32xf32>
    %764 = arith.addf %762, %763 : vector<8x32xf32>
    %765 = math.tanh %764 : vector<8x32xf32>
    %766 = arith.mulf %761, %765 : vector<8x32xf32>
    %767 = arith.truncf %766 : vector<8x32xf32> to vector<8x32xbf16>
    %c2_167 = arith.constant 2 : index
    %c56_168 = arith.constant 56 : index
    %c0_169 = arith.constant 0 : index
    %768 = vector.load %arg18[%c2_167, %c56_168, %c0_169] : memref<5x64x32xf32, #tpu.memory_space<vmem>>, vector<1x8x32xf32>
    %769 = vector.shape_cast %768 : vector<1x8x32xf32> to vector<8x32xf32>
    %770 = vector.shape_cast %766 : vector<8x32xf32> to vector<1x8x32xf32>
    tpu.vector_store %arg18[%c2_167, %c56_168, %c0_169], %770 {strides = array<i32>} : memref<5x64x32xf32, #tpu.memory_space<vmem>>, vector<1x8x32xf32>,
    %c4_170 = arith.constant 4 : index
    %c48_171 = arith.constant 48 : index
    %c0_172 = arith.constant 0 : index
    %771 = vector.load %arg18[%c4_170, %c48_171, %c0_172] : memref<5x64x32xf32, #tpu.memory_space<vmem>>, vector<1x8x32xf32>
    %772 = vector.shape_cast %771 : vector<1x8x32xf32> to vector<8x32xf32>
    %773 = vector.shape_cast %766 : vector<8x32xf32> to vector<1x8x32xf32>
    tpu.vector_store %arg18[%c4_170, %c48_171, %c0_172], %773 {strides = array<i32>} : memref<5x64x32xf32, #tpu.memory_space<vmem>>, vector<1x8x32xf32>,
    %774 = vector.extract_strided_slice %5 {offsets = [136, 0], sizes = [8, 128], strides = [1, 1]} : vector<160x128xf32> to vector<8x128xf32>
    %cst_173 = arith.constant dense<0.000000e+00> : vector<8x128xf32>
    %775 = tpu.matmul %747, %6, %cst_173 {dimension_numbers = #tpu.dot_dimension_numbers<[1], [0], [0], [1], [0, 0, 1, 1], [], []>} : vector<8x32xbf16>, vector<32x128xbf16>, vector<8x128xf32> -> vector<8x128xf32>
    %776 = arith.addf %774, %775 : vector<8x128xf32>
    %777 = math.tanh %776 : vector<8x128xf32>
    %778 = vector.broadcast %10 : vector<1x128xf32> to vector<8x128xf32>
    %779 = arith.mulf %777, %778 : vector<8x128xf32>
    %780 = vector.broadcast %11 : vector<1x128xf32> to vector<8x128xf32>
    %781 = arith.addf %779, %780 : vector<8x128xf32>
    %782 = vector.extract_strided_slice %781 {offsets = [0, 0], sizes = [8, 32], strides = [1, 1]} : vector<8x128xf32> to vector<8x32xf32>
    %783 = vector.extract_strided_slice %781 {offsets = [0, 32], sizes = [8, 32], strides = [1, 1]} : vector<8x128xf32> to vector<8x32xf32>
    %784 = vector.extract_strided_slice %781 {offsets = [0, 64], sizes = [8, 32], strides = [1, 1]} : vector<8x128xf32> to vector<8x32xf32>
    %785 = vector.extract_strided_slice %781 {offsets = [0, 96], sizes = [8, 32], strides = [1, 1]} : vector<8x128xf32> to vector<8x32xf32>
    %786 = arith.mulf %783, %744 : vector<8x32xf32>
    %787 = arith.mulf %782, %784 : vector<8x32xf32>
    %788 = arith.addf %786, %787 : vector<8x32xf32>
    %789 = math.tanh %788 : vector<8x32xf32>
    %790 = arith.mulf %785, %789 : vector<8x32xf32>
    %791 = arith.truncf %790 : vector<8x32xf32> to vector<8x32xbf16>
    %cst_174 = arith.constant dense<0.000000e+00> : vector<8x128xf32>
    %792 = tpu.matmul %791, %7, %cst_174 {dimension_numbers = #tpu.dot_dimension_numbers<[1], [0], [0], [1], [0, 0, 1, 1], [], []>} : vector<8x32xbf16>, vector<32x128xbf16>, vector<8x128xf32> -> vector<8x128xf32>
    %cst_175 = arith.constant dense<0.000000e+00> : vector<8x128xf32>
    %793 = tpu.matmul %767, %8, %cst_175 {dimension_numbers = #tpu.dot_dimension_numbers<[1], [0], [0], [1], [0, 0, 1, 1], [], []>} : vector<8x32xbf16>, vector<32x128xbf16>, vector<8x128xf32> -> vector<8x128xf32>
    %794 = arith.addf %792, %793 : vector<8x128xf32>
    %795 = vector.broadcast %9 : vector<1x128xf32> to vector<8x128xf32>
    %796 = arith.addf %794, %795 : vector<8x128xf32>
    %797 = math.tanh %796 : vector<8x128xf32>
    %798 = vector.broadcast %10 : vector<1x128xf32> to vector<8x128xf32>
    %799 = arith.mulf %797, %798 : vector<8x128xf32>
    %800 = vector.broadcast %11 : vector<1x128xf32> to vector<8x128xf32>
    %801 = arith.addf %799, %800 : vector<8x128xf32>
    %802 = vector.extract_strided_slice %801 {offsets = [0, 0], sizes = [8, 32], strides = [1, 1]} : vector<8x128xf32> to vector<8x32xf32>
    %803 = vector.extract_strided_slice %801 {offsets = [0, 32], sizes = [8, 32], strides = [1, 1]} : vector<8x128xf32> to vector<8x32xf32>
    %804 = vector.extract_strided_slice %801 {offsets = [0, 64], sizes = [8, 32], strides = [1, 1]} : vector<8x128xf32> to vector<8x32xf32>
    %805 = vector.extract_strided_slice %801 {offsets = [0, 96], sizes = [8, 32], strides = [1, 1]} : vector<8x128xf32> to vector<8x32xf32>
    %806 = arith.mulf %803, %764 : vector<8x32xf32>
    %807 = arith.mulf %802, %804 : vector<8x32xf32>
    %808 = arith.addf %806, %807 : vector<8x32xf32>
    %809 = math.tanh %808 : vector<8x32xf32>
    %810 = arith.mulf %805, %809 : vector<8x32xf32>
    %811 = arith.truncf %810 : vector<8x32xf32> to vector<8x32xbf16>
    %c3_176 = arith.constant 3 : index
    %c56_177 = arith.constant 56 : index
    %c0_178 = arith.constant 0 : index
    %812 = vector.load %arg18[%c3_176, %c56_177, %c0_178] : memref<5x64x32xf32, #tpu.memory_space<vmem>>, vector<1x8x32xf32>
    %813 = vector.shape_cast %812 : vector<1x8x32xf32> to vector<8x32xf32>
    %814 = vector.shape_cast %810 : vector<8x32xf32> to vector<1x8x32xf32>
    tpu.vector_store %arg18[%c3_176, %c56_177, %c0_178], %814 {strides = array<i32>} : memref<5x64x32xf32, #tpu.memory_space<vmem>>, vector<1x8x32xf32>,
    %815 = vector.extract_strided_slice %5 {offsets = [144, 0], sizes = [8, 128], strides = [1, 1]} : vector<160x128xf32> to vector<8x128xf32>
    %cst_179 = arith.constant dense<0.000000e+00> : vector<8x128xf32>
    %816 = tpu.matmul %791, %6, %cst_179 {dimension_numbers = #tpu.dot_dimension_numbers<[1], [0], [0], [1], [0, 0, 1, 1], [], []>} : vector<8x32xbf16>, vector<32x128xbf16>, vector<8x128xf32> -> vector<8x128xf32>
    %817 = arith.addf %815, %816 : vector<8x128xf32>
    %818 = math.tanh %817 : vector<8x128xf32>
    %819 = vector.broadcast %10 : vector<1x128xf32> to vector<8x128xf32>
    %820 = arith.mulf %818, %819 : vector<8x128xf32>
    %821 = vector.broadcast %11 : vector<1x128xf32> to vector<8x128xf32>
    %822 = arith.addf %820, %821 : vector<8x128xf32>
    %823 = vector.extract_strided_slice %822 {offsets = [0, 0], sizes = [8, 32], strides = [1, 1]} : vector<8x128xf32> to vector<8x32xf32>
    %824 = vector.extract_strided_slice %822 {offsets = [0, 32], sizes = [8, 32], strides = [1, 1]} : vector<8x128xf32> to vector<8x32xf32>
    %825 = vector.extract_strided_slice %822 {offsets = [0, 64], sizes = [8, 32], strides = [1, 1]} : vector<8x128xf32> to vector<8x32xf32>
    %826 = vector.extract_strided_slice %822 {offsets = [0, 96], sizes = [8, 32], strides = [1, 1]} : vector<8x128xf32> to vector<8x32xf32>
    %827 = arith.mulf %824, %788 : vector<8x32xf32>
    %828 = arith.mulf %823, %825 : vector<8x32xf32>
    %829 = arith.addf %827, %828 : vector<8x32xf32>
    %830 = math.tanh %829 : vector<8x32xf32>
    %831 = arith.mulf %826, %830 : vector<8x32xf32>
    %832 = arith.truncf %831 : vector<8x32xf32> to vector<8x32xbf16>
    %cst_180 = arith.constant dense<0.000000e+00> : vector<8x128xf32>
    %833 = tpu.matmul %832, %7, %cst_180 {dimension_numbers = #tpu.dot_dimension_numbers<[1], [0], [0], [1], [0, 0, 1, 1], [], []>} : vector<8x32xbf16>, vector<32x128xbf16>, vector<8x128xf32> -> vector<8x128xf32>
    %cst_181 = arith.constant dense<0.000000e+00> : vector<8x128xf32>
    %834 = tpu.matmul %811, %8, %cst_181 {dimension_numbers = #tpu.dot_dimension_numbers<[1], [0], [0], [1], [0, 0, 1, 1], [], []>} : vector<8x32xbf16>, vector<32x128xbf16>, vector<8x128xf32> -> vector<8x128xf32>
    %835 = arith.addf %833, %834 : vector<8x128xf32>
    %836 = vector.broadcast %9 : vector<1x128xf32> to vector<8x128xf32>
    %837 = arith.addf %835, %836 : vector<8x128xf32>
    %838 = math.tanh %837 : vector<8x128xf32>
    %839 = vector.broadcast %10 : vector<1x128xf32> to vector<8x128xf32>
    %840 = arith.mulf %838, %839 : vector<8x128xf32>
    %841 = vector.broadcast %11 : vector<1x128xf32> to vector<8x128xf32>
    %842 = arith.addf %840, %841 : vector<8x128xf32>
    %843 = vector.extract_strided_slice %842 {offsets = [0, 0], sizes = [8, 32], strides = [1, 1]} : vector<8x128xf32> to vector<8x32xf32>
    %844 = vector.extract_strided_slice %842 {offsets = [0, 32], sizes = [8, 32], strides = [1, 1]} : vector<8x128xf32> to vector<8x32xf32>
    %845 = vector.extract_strided_slice %842 {offsets = [0, 64], sizes = [8, 32], strides = [1, 1]} : vector<8x128xf32> to vector<8x32xf32>
    %846 = vector.extract_strided_slice %842 {offsets = [0, 96], sizes = [8, 32], strides = [1, 1]} : vector<8x128xf32> to vector<8x32xf32>
    %847 = arith.mulf %844, %808 : vector<8x32xf32>
    %848 = arith.mulf %843, %845 : vector<8x32xf32>
    %849 = arith.addf %847, %848 : vector<8x32xf32>
    %850 = math.tanh %849 : vector<8x32xf32>
    %851 = arith.mulf %846, %850 : vector<8x32xf32>
    %c4_182 = arith.constant 4 : index
    %c56_183 = arith.constant 56 : index
    %c0_184 = arith.constant 0 : index
    %852 = vector.load %arg18[%c4_182, %c56_183, %c0_184] : memref<5x64x32xf32, #tpu.memory_space<vmem>>, vector<1x8x32xf32>
    %853 = vector.shape_cast %852 : vector<1x8x32xf32> to vector<8x32xf32>
    %854 = vector.shape_cast %851 : vector<8x32xf32> to vector<1x8x32xf32>
    tpu.vector_store %arg18[%c4_182, %c56_183, %c0_184], %854 {strides = array<i32>} : memref<5x64x32xf32, #tpu.memory_space<vmem>>, vector<1x8x32xf32>,
    %cst_185 = arith.constant 0.000000e+00 : f32
    %855 = vector.broadcast %cst_185 : f32 to vector<64x896xf32>
    %c0_186 = arith.constant 0 : index
    %c0_187 = arith.constant 0 : index
    %c0_188 = arith.constant 0 : index
    %856 = vector.load %arg18[%c0_186, %c0_187, %c0_188] : memref<5x64x32xf32, #tpu.memory_space<vmem>>, vector<1x64x32xf32>
    %857 = vector.shape_cast %856 : vector<1x64x32xf32> to vector<64x32xf32>
    %858 = arith.truncf %857 : vector<64x32xf32> to vector<64x32xbf16>
    %c0_189 = arith.constant 0 : index
    %c0_190 = arith.constant 0 : index
    %c0_191 = arith.constant 0 : index
    %859 = vector.load %arg9[%c0_189, %c0_190, %c0_191] : memref<5x32x896xbf16, #tpu.memory_space<vmem>>, vector<1x32x896xbf16>
    %860 = vector.shape_cast %859 : vector<1x32x896xbf16> to vector<32x896xbf16>
    %cst_192 = arith.constant dense<0.000000e+00> : vector<64x896xf32>
    %861 = tpu.matmul %858, %860, %cst_192 {dimension_numbers = #tpu.dot_dimension_numbers<[1], [0], [0], [1], [0, 0, 1, 1], [], []>} : vector<64x32xbf16>, vector<32x896xbf16>, vector<64x896xf32> -> vector<64x896xf32>
    %862 = arith.addf %855, %861 : vector<64x896xf32>
    %c1_193 = arith.constant 1 : index
    %c0_194 = arith.constant 0 : index
    %c0_195 = arith.constant 0 : index
    %863 = vector.load %arg18[%c1_193, %c0_194, %c0_195] : memref<5x64x32xf32, #tpu.memory_space<vmem>>, vector<1x64x32xf32>
    %864 = vector.shape_cast %863 : vector<1x64x32xf32> to vector<64x32xf32>
    %865 = arith.truncf %864 : vector<64x32xf32> to vector<64x32xbf16>
    %c1_196 = arith.constant 1 : index
    %c0_197 = arith.constant 0 : index
    %c0_198 = arith.constant 0 : index
    %866 = vector.load %arg9[%c1_196, %c0_197, %c0_198] : memref<5x32x896xbf16, #tpu.memory_space<vmem>>, vector<1x32x896xbf16>
    %867 = vector.shape_cast %866 : vector<1x32x896xbf16> to vector<32x896xbf16>
    %cst_199 = arith.constant dense<0.000000e+00> : vector<64x896xf32>
    %868 = tpu.matmul %865, %867, %cst_199 {dimension_numbers = #tpu.dot_dimension_numbers<[1], [0], [0], [1], [0, 0, 1, 1], [], []>} : vector<64x32xbf16>, vector<32x896xbf16>, vector<64x896xf32> -> vector<64x896xf32>
    %869 = arith.addf %862, %868 : vector<64x896xf32>
    %c2_200 = arith.constant 2 : index
    %c0_201 = arith.constant 0 : index
    %c0_202 = arith.constant 0 : index
    %870 = vector.load %arg18[%c2_200, %c0_201, %c0_202] : memref<5x64x32xf32, #tpu.memory_space<vmem>>, vector<1x64x32xf32>
    %871 = vector.shape_cast %870 : vector<1x64x32xf32> to vector<64x32xf32>
    %872 = arith.truncf %871 : vector<64x32xf32> to vector<64x32xbf16>
    %c2_203 = arith.constant 2 : index
    %c0_204 = arith.constant 0 : index
    %c0_205 = arith.constant 0 : index
    %873 = vector.load %arg9[%c2_203, %c0_204, %c0_205] : memref<5x32x896xbf16, #tpu.memory_space<vmem>>, vector<1x32x896xbf16>
    %874 = vector.shape_cast %873 : vector<1x32x896xbf16> to vector<32x896xbf16>
    %cst_206 = arith.constant dense<0.000000e+00> : vector<64x896xf32>
    %875 = tpu.matmul %872, %874, %cst_206 {dimension_numbers = #tpu.dot_dimension_numbers<[1], [0], [0], [1], [0, 0, 1, 1], [], []>} : vector<64x32xbf16>, vector<32x896xbf16>, vector<64x896xf32> -> vector<64x896xf32>
    %876 = arith.addf %869, %875 : vector<64x896xf32>
    %c3_207 = arith.constant 3 : index
    %c0_208 = arith.constant 0 : index
    %c0_209 = arith.constant 0 : index
    %877 = vector.load %arg18[%c3_207, %c0_208, %c0_209] : memref<5x64x32xf32, #tpu.memory_space<vmem>>, vector<1x64x32xf32>
    %878 = vector.shape_cast %877 : vector<1x64x32xf32> to vector<64x32xf32>
    %879 = arith.truncf %878 : vector<64x32xf32> to vector<64x32xbf16>
    %c3_210 = arith.constant 3 : index
    %c0_211 = arith.constant 0 : index
    %c0_212 = arith.constant 0 : index
    %880 = vector.load %arg9[%c3_210, %c0_211, %c0_212] : memref<5x32x896xbf16, #tpu.memory_space<vmem>>, vector<1x32x896xbf16>
    %881 = vector.shape_cast %880 : vector<1x32x896xbf16> to vector<32x896xbf16>
    %cst_213 = arith.constant dense<0.000000e+00> : vector<64x896xf32>
    %882 = tpu.matmul %879, %881, %cst_213 {dimension_numbers = #tpu.dot_dimension_numbers<[1], [0], [0], [1], [0, 0, 1, 1], [], []>} : vector<64x32xbf16>, vector<32x896xbf16>, vector<64x896xf32> -> vector<64x896xf32>
    %883 = arith.addf %876, %882 : vector<64x896xf32>
    %c4_214 = arith.constant 4 : index
    %c0_215 = arith.constant 0 : index
    %c0_216 = arith.constant 0 : index
    %884 = vector.load %arg18[%c4_214, %c0_215, %c0_216] : memref<5x64x32xf32, #tpu.memory_space<vmem>>, vector<1x64x32xf32>
    %885 = vector.shape_cast %884 : vector<1x64x32xf32> to vector<64x32xf32>
    %886 = arith.truncf %885 : vector<64x32xf32> to vector<64x32xbf16>
    %c4_217 = arith.constant 4 : index
    %c0_218 = arith.constant 0 : index
    %c0_219 = arith.constant 0 : index
    %887 = vector.load %arg9[%c4_217, %c0_218, %c0_219] : memref<5x32x896xbf16, #tpu.memory_space<vmem>>, vector<1x32x896xbf16>
    %888 = vector.shape_cast %887 : vector<1x32x896xbf16> to vector<32x896xbf16>
    %cst_220 = arith.constant dense<0.000000e+00> : vector<64x896xf32>
    %889 = tpu.matmul %886, %888, %cst_220 {dimension_numbers = #tpu.dot_dimension_numbers<[1], [0], [0], [1], [0, 0, 1, 1], [], []>} : vector<64x32xbf16>, vector<32x896xbf16>, vector<64x896xf32> -> vector<64x896xf32>
    %890 = arith.addf %883, %889 : vector<64x896xf32>
    %c0_221 = arith.constant 0 : index
    %c0_222 = arith.constant 0 : index
    %891 = vector.load %arg10[%c0_221, %c0_222] : memref<1x896xf32, #tpu.memory_space<vmem>>, vector<1x896xf32>
    %892 = vector.broadcast %891 : vector<1x896xf32> to vector<64x896xf32>
    %893 = arith.addf %890, %892 : vector<64x896xf32>
    %894 = vector.extract_strided_slice %893 {offsets = [0, 0], sizes = [64, 768], strides = [1, 1]} : vector<64x896xf32> to vector<64x768xf32>
    %895 = vector.extract_strided_slice %893 {offsets = [0, 64], sizes = [64, 768], strides = [1, 1]} : vector<64x896xf32> to vector<64x768xf32>
    %896 = arith.maximumf %894, %895 : vector<64x768xf32>
    %897 = vector.extract_strided_slice %893 {offsets = [0, 128], sizes = [64, 768], strides = [1, 1]} : vector<64x896xf32> to vector<64x768xf32>
    %898 = arith.maximumf %896, %897 : vector<64x768xf32>
    %899 = vector.extract_strided_slice %898 {offsets = [0, 0], sizes = [48, 768], strides = [1, 1]} : vector<64x768xf32> to vector<48x768xf32>
    %900 = vector.extract_strided_slice %898 {offsets = [8, 0], sizes = [48, 768], strides = [1, 1]} : vector<64x768xf32> to vector<48x768xf32>
    %901 = arith.maximumf %899, %900 : vector<48x768xf32>
    %902 = vector.extract_strided_slice %898 {offsets = [16, 0], sizes = [48, 768], strides = [1, 1]} : vector<64x768xf32> to vector<48x768xf32>
    %903 = arith.maximumf %901, %902 : vector<48x768xf32>
    %cst_223 = arith.constant 0.000000e+00 : f32
    %904 = vector.broadcast %cst_223 : f32 to vector<8x128xf32>
    %905 = vector.extract_strided_slice %903 {offsets = [0, 0], sizes = [8, 768], strides = [1, 1]} : vector<48x768xf32> to vector<8x768xf32>
    %906 = vector.extract_strided_slice %903 {offsets = [8, 0], sizes = [8, 768], strides = [1, 1]} : vector<48x768xf32> to vector<8x768xf32>
    %907 = arith.addf %905, %906 : vector<8x768xf32>
    %908 = vector.extract_strided_slice %903 {offsets = [16, 0], sizes = [8, 768], strides = [1, 1]} : vector<48x768xf32> to vector<8x768xf32>
    %909 = arith.addf %907, %908 : vector<8x768xf32>
    %910 = vector.extract_strided_slice %903 {offsets = [24, 0], sizes = [8, 768], strides = [1, 1]} : vector<48x768xf32> to vector<8x768xf32>
    %911 = arith.addf %909, %910 : vector<8x768xf32>
    %912 = arith.truncf %911 : vector<8x768xf32> to vector<8x768xbf16>
    %c0_224 = arith.constant 0 : index
    %c0_225 = arith.constant 0 : index
    %c0_226 = arith.constant 0 : index
    %913 = vector.load %arg11[%c0_224, %c0_225, %c0_226] : memref<3x768x128xbf16, #tpu.memory_space<vmem>>, vector<1x768x128xbf16>
    %914 = vector.shape_cast %913 : vector<1x768x128xbf16> to vector<768x128xbf16>
    %cst_227 = arith.constant dense<0.000000e+00> : vector<8x128xf32>
    %915 = tpu.matmul %912, %914, %cst_227 {dimension_numbers = #tpu.dot_dimension_numbers<[1], [0], [0], [1], [0, 0, 1, 1], [], []>} : vector<8x768xbf16>, vector<768x128xbf16>, vector<8x128xf32> -> vector<8x128xf32>
    %916 = arith.addf %904, %915 : vector<8x128xf32>
    %917 = vector.extract_strided_slice %903 {offsets = [8, 0], sizes = [8, 768], strides = [1, 1]} : vector<48x768xf32> to vector<8x768xf32>
    %918 = vector.extract_strided_slice %903 {offsets = [16, 0], sizes = [8, 768], strides = [1, 1]} : vector<48x768xf32> to vector<8x768xf32>
    %919 = arith.addf %917, %918 : vector<8x768xf32>
    %920 = vector.extract_strided_slice %903 {offsets = [24, 0], sizes = [8, 768], strides = [1, 1]} : vector<48x768xf32> to vector<8x768xf32>
    %921 = arith.addf %919, %920 : vector<8x768xf32>
    %922 = vector.extract_strided_slice %903 {offsets = [32, 0], sizes = [8, 768], strides = [1, 1]} : vector<48x768xf32> to vector<8x768xf32>
    %923 = arith.addf %921, %922 : vector<8x768xf32>
    %924 = arith.truncf %923 : vector<8x768xf32> to vector<8x768xbf16>
    %c1_228 = arith.constant 1 : index
    %c0_229 = arith.constant 0 : index
    %c0_230 = arith.constant 0 : index
    %925 = vector.load %arg11[%c1_228, %c0_229, %c0_230] : memref<3x768x128xbf16, #tpu.memory_space<vmem>>, vector<1x768x128xbf16>
    %926 = vector.shape_cast %925 : vector<1x768x128xbf16> to vector<768x128xbf16>
    %cst_231 = arith.constant dense<0.000000e+00> : vector<8x128xf32>
    %927 = tpu.matmul %924, %926, %cst_231 {dimension_numbers = #tpu.dot_dimension_numbers<[1], [0], [0], [1], [0, 0, 1, 1], [], []>} : vector<8x768xbf16>, vector<768x128xbf16>, vector<8x128xf32> -> vector<8x128xf32>
    %928 = arith.addf %916, %927 : vector<8x128xf32>
    %929 = vector.extract_strided_slice %903 {offsets = [16, 0], sizes = [8, 768], strides = [1, 1]} : vector<48x768xf32> to vector<8x768xf32>
    %930 = vector.extract_strided_slice %903 {offsets = [24, 0], sizes = [8, 768], strides = [1, 1]} : vector<48x768xf32> to vector<8x768xf32>
    %931 = arith.addf %929, %930 : vector<8x768xf32>
    %932 = vector.extract_strided_slice %903 {offsets = [32, 0], sizes = [8, 768], strides = [1, 1]} : vector<48x768xf32> to vector<8x768xf32>
    %933 = arith.addf %931, %932 : vector<8x768xf32>
    %934 = vector.extract_strided_slice %903 {offsets = [40, 0], sizes = [8, 768], strides = [1, 1]} : vector<48x768xf32> to vector<8x768xf32>
    %935 = arith.addf %933, %934 : vector<8x768xf32>
    %936 = arith.truncf %935 : vector<8x768xf32> to vector<8x768xbf16>
    %c2_232 = arith.constant 2 : index
    %c0_233 = arith.constant 0 : index
    %c0_234 = arith.constant 0 : index
    %937 = vector.load %arg11[%c2_232, %c0_233, %c0_234] : memref<3x768x128xbf16, #tpu.memory_space<vmem>>, vector<1x768x128xbf16>
    %938 = vector.shape_cast %937 : vector<1x768x128xbf16> to vector<768x128xbf16>
    %cst_235 = arith.constant dense<0.000000e+00> : vector<8x128xf32>
    %939 = tpu.matmul %936, %938, %cst_235 {dimension_numbers = #tpu.dot_dimension_numbers<[1], [0], [0], [1], [0, 0, 1, 1], [], []>} : vector<8x768xbf16>, vector<768x128xbf16>, vector<8x128xf32> -> vector<8x128xf32>
    %940 = arith.addf %928, %939 : vector<8x128xf32>
    %cst_236 = arith.constant 2.500000e-02 : f32
    %941 = vector.broadcast %cst_236 : f32 to vector<8x128xf32>
    %942 = arith.mulf %940, %941 : vector<8x128xf32>
    %c0_237 = arith.constant 0 : index
    %c0_238 = arith.constant 0 : index
    %943 = vector.load %arg12[%c0_237, %c0_238] : memref<1x128xf32, #tpu.memory_space<vmem>>, vector<1x128xf32>
    %944 = vector.broadcast %943 : vector<1x128xf32> to vector<8x128xf32>
    %945 = arith.addf %942, %944 : vector<8x128xf32>
    %946 = tpu.iota {dimensions = array<i32: 0>} : vector<8x1xi32>
    %c2_i32 = arith.constant 2 : i32
    %947 = vector.broadcast %c2_i32 : i32 to vector<8x1xi32>
    %948 = arith.cmpi slt, %946, %947 : vector<8x1xi32>
    %949 = arith.extui %948 : vector<8x1xi1> to vector<8x1xi32>
    %950 = arith.sitofp %949 : vector<8x1xi32> to vector<8x1xf32>
    %951 = vector.broadcast %950 : vector<8x1xf32> to vector<8x128xf32>
    %952 = arith.mulf %945, %951 : vector<8x128xf32>
    %cst_239 = arith.constant dense<0.000000e+00> : vector<128xf32>
    %953 = vector.multi_reduction <add>, %952, %cst_239 [0] : vector<8x128xf32> to vector<128xf32>
    %954 = vector.shape_cast %953 : vector<128xf32> to vector<1x128xf32>
    %cst_240 = arith.constant 5.000000e-01 : f32
    %955 = vector.broadcast %cst_240 : f32 to vector<1x128xf32>
    %956 = arith.mulf %954, %955 : vector<1x128xf32>
    %957 = vector.broadcast %956 : vector<1x128xf32> to vector<8x128xf32>
    %958 = arith.subf %945, %957 : vector<8x128xf32>
    %959 = arith.mulf %958, %958 : vector<8x128xf32>
    %960 = vector.broadcast %950 : vector<8x1xf32> to vector<8x128xf32>
    %961 = arith.mulf %959, %960 : vector<8x128xf32>
    %cst_241 = arith.constant dense<0.000000e+00> : vector<128xf32>
    %962 = vector.multi_reduction <add>, %961, %cst_241 [0] : vector<8x128xf32> to vector<128xf32>
    %963 = vector.shape_cast %962 : vector<128xf32> to vector<1x128xf32>
    %cst_242 = arith.constant 5.000000e-01 : f32
    %964 = vector.broadcast %cst_242 : f32 to vector<1x128xf32>
    %965 = arith.mulf %963, %964 : vector<1x128xf32>
    %cst_243 = arith.constant 9.99999974E-6 : f32
    %966 = vector.broadcast %cst_243 : f32 to vector<1x128xf32>
    %967 = arith.addf %965, %966 : vector<1x128xf32>
    %968 = math.rsqrt %967 : vector<1x128xf32>
    %969 = vector.broadcast %968 : vector<1x128xf32> to vector<8x128xf32>
    %970 = arith.mulf %958, %969 : vector<8x128xf32>
    %c0_244 = arith.constant 0 : index
    %c0_245 = arith.constant 0 : index
    %971 = vector.load %arg13[%c0_244, %c0_245] : memref<1x128xf32, #tpu.memory_space<vmem>>, vector<1x128xf32>
    %972 = vector.broadcast %971 : vector<1x128xf32> to vector<8x128xf32>
    %973 = arith.mulf %970, %972 : vector<8x128xf32>
    %c0_246 = arith.constant 0 : index
    %c0_247 = arith.constant 0 : index
    %974 = vector.load %arg14[%c0_246, %c0_247] : memref<1x128xf32, #tpu.memory_space<vmem>>, vector<1x128xf32>
    %975 = vector.broadcast %974 : vector<1x128xf32> to vector<8x128xf32>
    %976 = arith.addf %973, %975 : vector<8x128xf32>
    %977 = arith.truncf %976 : vector<8x128xf32> to vector<8x128xbf16>
    %c0_248 = arith.constant 0 : index
    %c0_249 = arith.constant 0 : index
    %978 = vector.load %arg15[%c0_248, %c0_249] : memref<128x10xbf16, #tpu.memory_space<vmem>>, vector<128x10xbf16>
    %cst_250 = arith.constant dense<0.000000e+00> : vector<8x10xf32>
    %979 = tpu.matmul %977, %978, %cst_250 {dimension_numbers = #tpu.dot_dimension_numbers<[1], [0], [0], [1], [0, 0, 1, 1], [], []>} : vector<8x128xbf16>, vector<128x10xbf16>, vector<8x10xf32> -> vector<8x10xf32>
    %c0_251 = arith.constant 0 : index
    %c0_252 = arith.constant 0 : index
    %980 = vector.load %arg16[%c0_251, %c0_252] : memref<1x10xf32, #tpu.memory_space<vmem>>, vector<1x10xf32>
    %981 = vector.broadcast %980 : vector<1x10xf32> to vector<8x10xf32>
    %982 = arith.addf %979, %981 : vector<8x10xf32>
    %cst_253 = arith.constant dense<0xFF800000> : vector<8xf32>
    %983 = vector.multi_reduction <maximumf>, %982, %cst_253 [1] : vector<8x10xf32> to vector<8xf32>
    %984 = vector.shape_cast %983 : vector<8xf32> to vector<8x1xf32>
    %985 = vector.broadcast %984 : vector<8x1xf32> to vector<8x10xf32>
    %986 = arith.subf %982, %985 : vector<8x10xf32>
    %987 = math.exp %986 : vector<8x10xf32>
    %cst_254 = arith.constant dense<0.000000e+00> : vector<8xf32>
    %988 = vector.multi_reduction <add>, %987, %cst_254 [1] : vector<8x10xf32> to vector<8xf32>
    %989 = vector.shape_cast %988 : vector<8xf32> to vector<8x1xf32>
    %990 = vector.broadcast %989 : vector<8x1xf32> to vector<8x10xf32>
    %991 = arith.divf %987, %990 : vector<8x10xf32>
    %c0_255 = arith.constant 0 : index
    %c0_256 = arith.constant 0 : index
    %992 = vector.load %arg17[%c0_255, %c0_256] : memref<8x10xf32, #tpu.memory_space<vmem>>, vector<8x10xf32>
    tpu.vector_store %arg17[%c0_255, %c0_256], %991 {strides = array<i32>} : memref<8x10xf32, #tpu.memory_space<vmem>>, vector<8x10xf32>,
    return
  }
}

</mosaic_0001>

<bundles_post_ra>
// kernel: squeeze.0
= control target key start
LH: loop header
LB: loop body
LE: loop exit
PB: predicated region body
PF: predicated region fallthrough
CT: control target
= control target key end

     0   :  { %s129_s10 = smov 12  ;;  %s148_s11 = smov 3  ;;  %vm73_vm0 = vcmask 1043458   ;;  %vm135_vm1 = vcmask 1047556   ;;  %vm78_vm2 = vcmask 1045508   ;;  %vm83_vm3 = vcmask 1047558   ;;  %s395_s0 = inlined_call_operand.vmem [shape: bf16[2,1,16,20], index: 0, kind: input, shape index: {}]   ;;  %s396_s1 = inlined_call_operand.vmem [shape: bf16[2,20,16], index: 1, kind: output, shape index: {}]  }
   0x1   :  { %v318_v0 = vld [vmem:[%s395_s0 + $0x8] sm:$0xff]   ;;  %v300_v1 = vld [vmem:[%s395_s0] sm:$0xff]   ;;  %s126_s0 = smov 3  ;;  %s151_s12 = smov 12  ;;  %vm63_vm4 = vcmask 130048   ;;  %vm139_vm5 = vcmask 64512  }
   0x2   :  { %v297_v2 = vunpack.c.l.bf16 %v318_v0  ;;  %v298_v3 = vunpack.c.h.bf16 %v318_v0  ;;  %v302_v4 = vunpack.c.h.bf16 %v300_v1  ;;  %v301_v5 = vunpack.c.l.bf16 %v300_v1  ;;  %s97_s13 = smov 3  ;;  %s100_s14 = smov 12 }
   0x3   :  { %s105_s15 = smov 48  ;;  %s110_s16 = smov 192  ;;  %vm161_vm6 = vcmask 31744   ;;  %vm116_vm7 = vcmask 97280   ;;  %vm190_vm8 = vcmask 130144   ;;  %vm213_vm9 = vcmask 130112  }
   0x4   :  { %18 = vst [vmem:[#allocation1 + $0x18] sm:$0xff] %v298_v3  ;;  %s351_s17 = smov 3  ;;  %s353_s18 = smov 3  ;;  %vm236_vm10 = vcmask 130080  }
   0x5   :  { %33 = vst [vmem:[#allocation1 + $0x10] sm:$0xff] %v297_v2  ;;  %s355_s19 = smov 12  ;;  %s76_s20 = smov 48 }
   0x6   :  { %48 = vst [vmem:[#allocation1 + $0x8] sm:$0xff] %v302_v4  ;;  %s357_s21 = smov 192  ;;  %s171_s22 = smov 3 }
   0x7   :  { %61 = vst [vmem:[#allocation1] sm:$0xff] %v301_v5  ;;  %s174_s23 = smov 12  ;;  %s328_s24 = smov 116  }
   0x8   :  { %s179_s25 = smov 48  ;;  %s184_s26 = smov 192 }
   0x9   :  { %s329_s27 = smov 112   ;;  %s200_s28 = smov 3 }
   0xa   :  { %s226_s29 = smov 12  ;;  %s203_s30 = smov 12 }
   0xb   :  { %s330_s2 = smov 12   ;;  %s331_s3 = smov 120  }
   0xc   :  { %s332_s4 = smov 124   ;;  %s333_s5 = smov 8  }
   0xd   :  { %v134_v6 = vld [vmem:[#allocation1 - $0x7] ss:$4 sm:$0xf0]   ;;  %v156_v7 = vld [vmem:[#allocation1 - $0x8] ss:$4 sm:$0xf0]  }
   0xe   :  { %v127_v8 = vld [vmem:[#allocation1 + $0x1] ss:$24 sm:%s126_s0]   ;;  %v130_v9 = vld [vmem:[#allocation1 - $0x2b] ss:$24 sm:%s129_s10]   ;;  %v149_v10 = vld [vmem:[#allocation1] ss:$24 sm:%s148_s11]  }
   0xf   :  { %v132_v11 = vsel %vm73_vm0, %v130_v9, %v127_v8  ;;  %v152_v12 = vld [vmem:[#allocation1 - $0x2c] ss:$24 sm:%s151_s12]   ;;  %v98_v13 = vld [vmem:[#allocation1 + $0x16] ss:$-20 sm:%s97_s13]   ;;  %v69_v21 = vld [vmem:[#allocation1 + $0x17] ss:$-20 sm:%s353_s18]  }
  0x10   :  { %v101_v14 = vld [vmem:[#allocation1 + $0x42] ss:$-20 sm:%s100_s14]   ;;  %v136_v15 = vsel %vm135_vm1, %v134_v6, %v132_v11  ;;  %v154_v16 = vsel %vm73_vm0, %v152_v12, %v149_v10  ;;  %v72_v22 = vld [vmem:[#allocation1 + $0x43] ss:$-20 sm:%s355_s19]   ;;  %v224_v39 = vld [vmem:[#allocation1 + $0x1] ss:$24 sm:%s351_s17]  }
  0x11   :  { %v103_v17 = vsel %vm73_vm0, %v101_v14, %v98_v13  ;;  %v106_v18 = vld [vmem:[#allocation1 + $0x6e] ss:$-20 sm:%s105_s15]   ;;  %137 = vrot.lane.b32.xlu0 %v136_v15, %s328_s24  ;;  %v158_v19 = vsel %vm135_vm1, %v156_v7, %v154_v16  ;;  %v77_v23 = vld [vmem:[#allocation1 + $0x6f] ss:$-20 sm:%s76_s20]   ;;  %v74_v25 = vsel %vm73_vm0, %v72_v22, %v69_v21  ;;  %v227_v40 = vld [vmem:[#allocation1 - $0x2b] ss:$24 sm:%s226_s29]  }
  0x12   :  { %v111_v20 = vld [vmem:[#allocation1 - $0xa] ss:$4 sm:%s110_s16]   ;;  %159 = vrot.lane.b32.xlu1 %v158_v19, %s329_s27  ;;  %v108_v24 = vsel %vm78_vm2, %v106_v18, %v103_v17  ;;  %v172_v26 = vld [vmem:[#allocation1 + $0x17] ss:$-20 sm:%s171_s22]   ;;  %v79_v28 = vsel %vm78_vm2, %v77_v23, %v74_v25  ;;  %v229_v43 = vsel %vm73_vm0, %v227_v40, %v224_v39  ;;  %s334_s6 = smov 4  }
  0x13   :  { %v175_v27 = vld [vmem:[#allocation1 + $0x43] ss:$-20 sm:%s174_s23]   ;;  %v113_v34 = vsel %vm83_vm3, %v111_v20, %v108_v24  ;;  %v201_v36 = vld [vmem:[#allocation1 + $0x2] ss:$24 sm:%s200_s28]   ;;  %v204_v37 = vld [vmem:[#allocation1 - $0x2a] ss:$24 sm:%s203_s30]  }
  0x14   :  { %v82_v29 = vld [vmem:[#allocation1 - $0x9] ss:$4 sm:%s357_s21]   ;;  %v177_v30 = vsel %vm73_vm0, %v175_v27, %v172_v26  ;;  %v206_v41 = vsel %vm73_vm0, %v204_v37, %v201_v36  ;;  %v208_v42 = vld [vmem:[#allocation1 - $0x6] ss:$4 sm:$0xf0]  }
  0x15   :  { %v180_v31 = vld [vmem:[#allocation1 + $0x6f] ss:$-20 sm:%s179_s25]   ;;  %v84_v38 = vsel %vm83_vm3, %v82_v29, %v79_v28  ;;  %v231_v44 = vld [vmem:[#allocation1 - $0x7] ss:$4 sm:$0xf0]   ;;  %v210_v45 = vsel %vm135_vm1, %v208_v42, %v206_v41 }
  0x16   :  { %v185_v32 = vld [vmem:[#allocation1 - $0x9] ss:$4 sm:%s184_s26]   ;;  %v182_v33 = vsel %vm78_vm2, %v180_v31, %v177_v30  ;;  %v233_v46 = vsel %vm135_vm1, %v231_v44, %v229_v43  ;;  %v62_v49 = vld [vmem:[#allocation1] ss:$4 sm:$0xff]  }
  0x17   :  { %v187_v35 = vsel %vm83_vm3, %v185_v32, %v182_v33  ;;  %64 = vst.msk [vmem:[#allocation0] ss:$5 sm:$0xf] %vm63_vm4, %v62_v49  }
  0x18   :  { %188 = vrot.lane.b32.xlu2 %v187_v35, %s330_s2  ;;  %66 = vst.msk [vmem:[#allocation0 + $0x4] ss:$5 sm:$0xf0] %vm63_vm4, %v62_v49  }
  0x19   :  { %114 = vrot.lane.b32.xlu0 %v113_v34, %s331_s3 }
  0x1a   :  { %85 = vrot.lane.b32.xlu1 %v84_v38, %s332_s4 }
  0x20   :  { %211 = vrot.lane.b32.xlu2 %v210_v45, %s333_s5 }
  0x21   :  { %234 = vrot.lane.b32.xlu0 %v233_v46, %s334_s6 }
  0x72   :  { %v189_v47 = vpop.permute.xlu2 %188  }
  0x7a   :  { %v212_v48 = vpop.permute.xlu2 %211  }
  0x83   :  { %v138_v50 = vpop.permute.xlu0 %137  }
  0x84   :  { %141 = vst.msk [vmem:[#allocation0 + $0x2] ss:$34 sm:$0x3] %vm139_vm5, %v138_v50   ;;  %v160_v51 = vpop.permute.xlu1 %159  }
  0x85   :  { %143 = vst.msk [vmem:[#allocation0 - $0x3d] ss:$34 sm:$0xc] %vm139_vm5, %v138_v50  }
  0x86   :  { %145 = vst.msk [vmem:[#allocation0 - $0x8] ss:$5 sm:$0x30] %vm139_vm5, %v138_v50  }
  0x87   :  { %147 = vst.msk [vmem:[#allocation0 - $0x4] ss:$5 sm:$0xc0] %vm139_vm5, %v138_v50  }
  0x88   :  { %163 = vst.msk [vmem:[#allocation0 + $0x1] ss:$34 sm:$0x3] %vm161_vm6, %v160_v51  }
  0x89   :  { %165 = vst.msk [vmem:[#allocation0 - $0x3e] ss:$34 sm:$0xc] %vm161_vm6, %v160_v51  }
  0x8a   :  { %167 = vst.msk [vmem:[#allocation0 - $0x9] ss:$5 sm:$0x30] %vm161_vm6, %v160_v51  }
  0x8b   :  { %169 = vst.msk [vmem:[#allocation0 - $0x5] ss:$5 sm:$0xc0] %vm161_vm6, %v160_v51   ;;  %v115_v52 = vpop.permute.xlu0 %114  }
  0x8c   :  { %118 = vst.msk [vmem:[#allocation0 + $0x20] ss:$-29 sm:$0x3] %vm116_vm7, %v115_v52   ;;  %v86_v53 = vpop.permute.xlu1 %85  }
  0x8d   :  { %120 = vst.msk [vmem:[#allocation0 + $0x5f] ss:$-29 sm:$0xc] %vm116_vm7, %v115_v52  }
  0x8e   :  { %122 = vst.msk [vmem:[#allocation0 + $0x9e] ss:$-29 sm:$0x30] %vm116_vm7, %v115_v52  }
  0x8f   :  { %124 = vst.msk [vmem:[#allocation0 - $0x24] ss:$9 sm:$0xc0] %vm116_vm7, %v115_v52  }
  0x90   :  { %192 = vst.msk [vmem:[#allocation0 + $0x20] ss:$-29 sm:$0x3] %vm190_vm8, %v189_v47  }
  0x91   :  { %194 = vst.msk [vmem:[#allocation0 + $0x5f] ss:$-29 sm:$0xc] %vm190_vm8, %v189_v47  }
  0x92   :  { %196 = vst.msk [vmem:[#allocation0 + $0x9e] ss:$-29 sm:$0x30] %vm190_vm8, %v189_v47  }
  0x93   :  { %198 = vst.msk [vmem:[#allocation0 - $0x24] ss:$9 sm:$0xc0] %vm190_vm8, %v189_v47   ;;  %v235_v54 = vpop.permute.xlu0 %234  }
  0x94   :  { %215 = vst.msk [vmem:[#allocation0 + $0x2] ss:$34 sm:$0x3] %vm213_vm9, %v212_v48  }
  0x95   :  { %217 = vst.msk [vmem:[#allocation0 - $0x3d] ss:$34 sm:$0xc] %vm213_vm9, %v212_v48  }
  0x96   :  { %219 = vst.msk [vmem:[#allocation0 - $0x8] ss:$5 sm:$0x30] %vm213_vm9, %v212_v48  }
  0x97   :  { %221 = vst.msk [vmem:[#allocation0 - $0x4] ss:$5 sm:$0xc0] %vm213_vm9, %v212_v48  }
  0x98   :  { %238 = vst.msk [vmem:[#allocation0 + $0x1] ss:$34 sm:$0x3] %vm236_vm10, %v235_v54  }
  0x99   :  { %240 = vst.msk [vmem:[#allocation0 - $0x3e] ss:$34 sm:$0xc] %vm236_vm10, %v235_v54  }
  0x9a   :  { %242 = vst.msk [vmem:[#allocation0 - $0x9] ss:$5 sm:$0x30] %vm236_vm10, %v235_v54  }
  0x9b   :  { %244 = vst.msk [vmem:[#allocation0 - $0x5] ss:$5 sm:$0xc0] %vm236_vm10, %v235_v54  }
  0x9c   :  { %89 = vst.msk [vmem:[#allocation0 + $0x21] ss:$-29 sm:$0x3] %vm63_vm4, %v86_v53  }
  0x9d   :  { %91 = vst.msk [vmem:[#allocation0 + $0x60] ss:$-29 sm:$0xc] %vm63_vm4, %v86_v53  }
  0x9e   :  { %93 = vst.msk [vmem:[#allocation0 + $0x9f] ss:$-29 sm:$0x30] %vm63_vm4, %v86_v53  }
  0x9f   :  { %95 = vst.msk [vmem:[#allocation0 - $0x23] ss:$9 sm:$0xc0] %vm63_vm4, %v86_v53  }
  0xa3   :  { %v247_v55 = vld [vmem:[#allocation0] sm:$0xff] }
  0xa4   :  { %v274_v56 = vld [vmem:[#allocation0 + $0x20] sm:$0xff] }
  0xa5   :  { %v253_v57 = vld [vmem:[#allocation0 + $0x8] sm:$0xff] }
  0xa6   :  { %v281_v58 = vld [vmem:[#allocation0 + $0x28] sm:$0xff]  ;;  %v306_v59 = vpack.c.bf16 %v253_v57, %v247_v55  ;;  %v260_v60 = vld [vmem:[#allocation0 + $0x10] sm:$0xff]  ;;  %v267_v61 = vld [vmem:[#allocation0 + $0x18] sm:$0xff] }
  0xa7   :  { %v316_v62 = vpack.c.bf16 %v281_v58, %v274_v56  ;;  %v311_v63 = vpack.c.bf16 %v267_v61, %v260_v60 }
  0xa8   :  { %307 = vst [vmem:[%s396_s1] sm:$0xff] %v306_v59  }
  0xa9   :  { %319 = vst [vmem:[%s396_s1 + $0x8] sm:$0xff] %v311_v63  }
  0xaa   :  { %320 = vst [vmem:[%s396_s1 + $0x10] sm:$0xff] %v316_v62  }

// kernel: lstm_cnn_forward.1
= control target key start
LH: loop header
LB: loop body
LE: loop exit
PB: predicated region body
PF: predicated region fallthrough
CT: control target
= control target key end

     0   :  { %s10421_s0 = inlined_call_operand.vmem [shape: bf16[160,16], index: 0, kind: input, shape index: {}]   ;;  %s10422_s1 = inlined_call_operand.vmem [shape: bf16[16,128], index: 1, kind: input, shape index: {}]   ;;  %s10423_s2 = inlined_call_operand.vmem [shape: bf16[32,128], index: 2, kind: input, shape index: {}]   ;;  %s10424_s3 = inlined_call_operand.vmem [shape: f32[1,128], index: 3, kind: input, shape index: {}]   ;;  %s10425_s4 = inlined_call_operand.vmem [shape: bf16[32,128], index: 4, kind: input, shape index: {}]   ;;  %s10426_s5 = inlined_call_operand.vmem [shape: bf16[32,128], index: 5, kind: input, shape index: {}]   ;;  %s10427_s6 = inlined_call_operand.vmem [shape: f32[1,128], index: 6, kind: input, shape index: {}]   ;;  %s10428_s7 = inlined_call_operand.vmem [shape: f32[1,128], index: 7, kind: input, shape index: {}]   ;;  %s10429_s8 = inlined_call_operand.vmem [shape: f32[1,128], index: 8, kind: input, shape index: {}]   ;;  %s10430_s9 = inlined_call_operand.hbm [shape: bf16[5,32,896], index: 9, kind: input, shape index: {}]   ;;  %s10431_s10 = inlined_call_operand.vmem [shape: f32[1,896], index: 10, kind: input, shape index: {}]   ;;  %s10432_s11 = inlined_call_operand.hbm [shape: bf16[3,768,128], index: 11, kind: input, shape index: {}]   ;;  %s10433_s12 = inlined_call_operand.vmem [shape: f32[1,128], index: 12, kind: input, shape index: {}]   ;;  %s10434_s13 = inlined_call_operand.vmem [shape: f32[1,128], index: 13, kind: input, shape index: {}]   ;;  %s10435_s14 = inlined_call_operand.vmem [shape: f32[1,128], index: 14, kind: input, shape index: {}]   ;;  %s10436_s15 = inlined_call_operand.vmem [shape: bf16[128,10], index: 15, kind: input, shape index: {}]   ;;  %s10437_s16 = inlined_call_operand.vmem [shape: f32[1,10], index: 16, kind: input, shape index: {}]   ;;  %s10438_s17 = inlined_call_operand.vmem [shape: f32[8,10], index: 17, kind: output, shape index: {}]  }
   0x1   :  { %10499 = sst [smem:[#allocation70_spill]] %s10421_s0 }
   0x2   :  { %10500 = sst [smem:[#allocation71_spill]] %s10422_s1 }
   0x3   :  { %22 = vsyncpa [#allocation4], 0  ;;  %s46_s26 = sshll.u32 %s10430_s9, 4  ;;  %s47_s26 = int_to_ptr.hbm [resolvable:$true] %s46_s26 }
   0x4   :  { %23 = vsyncpa [#allocation6], 0  ;;  %s7761_s27 = smov [#allocation3]   ;;  %s61_s30 = sshll.u32 %s10432_s11, 4  ;;  %s62_s30 = int_to_ptr.hbm [resolvable:$true] %s61_s30 }
   0x5   :  { %s48_s28 = sshll.u32 %s7761_s27, 4  ;;  %s7762_s18 = smov 448   ;;  %s49_s28 = int_to_ptr.vmem [resolvable:$true] %s48_s28 }
   0x6   :  { %s7763_s19 = smov 28   ;;  %s7764_s1 = smov [#allocation5]  }
   0x7   :  { %54 = dma.hbm_to_vmem [thread:$0]  %s47_s26, 8960, %s49_s28, [#allocation4], %s7762_s18, %s7762_s18, %s7763_s19  }
   0x8   :  { %s63_s20 = sshll.u32 %s7764_s1, 4  ;;  %s7765_s21 = smov 64   ;;  %s64_s20 = int_to_ptr.vmem [resolvable:$true] %s63_s20 }
   0x9   :  { %s7766_s22 = smov 4  }
   0xa   :  { %69 = dma.hbm_to_vmem [thread:$0]  %s62_s30, 18432, %s64_s20, [#allocation6], %s7765_s21, %s7765_s21, %s7766_s22  }
   0xb   :  { %7757 = dma.done.wait [#allocation4], 8960  }
   0xc   :  { %7758 = vsyncadd [#allocation4], 4294958336 }
   0xd   :  { %7759 = dma.done.wait [#allocation6], 18432  }
   0xe   :  { %7760 = vsyncadd [#allocation6], 4294948864  ;;  %s10501_s24 = sld [smem:[#allocation71_spill]]  ;;  %v7874_v1 = vld [vmem:[%s10423_s2 + $0x8] sm:$0xff]  ;;  %vm171_vm0 = vcmask 130048   ;;  %v7882_v3 = vld [vmem:[%s10423_s2] sm:$0xff] }
   0xf   :  { %s10502_s28 = sld [smem:[#allocation70_spill]]  ;;  %297 = vmatpush.bf16.msra.mxu1 %v7874_v1  ;;  %v7767_v4 = vmov 0   ;;  %v7894_v5 = vld [vmem:[%s10424_s3] ss:$0 sm:$0xff]  ;;  %s7768_s9 = smov 32   ;;  %v7917_v19 = vld [vmem:[%s10425_s4 + $0x8] sm:$0xff] }
  0x10   :  { %v7900_v10 = vld [vmem:[%s10428_s7] ss:$0 sm:$0xff]  ;;  %484 = vmatpush.bf16.msra.mxu3 %v7917_v19  ;;  %v7965_v34 = vld [vmem:[%s10426_s5 + $0x8] sm:$0xff]  ;;  %vm287_vm1 = vcmask 261120   ;;  %vm4229_vm2 = vcmask 523264   ;;  %vm6088_vm7 = vcmask 80896  }
  0x11   :  { %v7905_v12 = vld [vmem:[%s10429_s8] ss:$0 sm:$0xff]  ;;  %350 = vmatpush.bf16.msra.mxu2 %v7965_v34 }
  0x12   :  { %v7941_v27 = vld [vmem:[%s10425_s4] sm:$0xff] }
  0x13   :  { %298 = vmatpush.bf16.msra.mxu1 %v7882_v3  ;;  %v7971_v35 = vld [vmem:[%s10426_s5] sm:$0xff] }
  0x14   :  { %v7292_v0 = vld [vmem:[%s10501_s24] sm:$0xff]  ;;  %485 = vmatpush.bf16.msra.mxu3 %v7941_v27 }
  0x15   :  { %v7282_v2 = vld [vmem:[%s10502_s28] sm:$0xff]  ;;  %209 = vmatpush.bf16.msra.mxu0 %v7292_v0  ;;  %v7283_v18 = vld [vmem:[%s10502_s28 + $0x8] sm:$0xff]  ;;  %v7284_v20 = vld [vmem:[%s10502_s28 + $0x10] sm:$0xff]  ;;  %351 = vmatpush.bf16.msra.mxu2 %v7971_v35 }
  0x16   :  { %299 = vmatmul.bf16.vlgmr.msra.gmra.mxu1 %v7767_v4  ;;  %v7285_v24 = vld [vmem:[%s10502_s28 + $0x18] sm:$0xff]  ;;  %v7286_v26 = vld [vmem:[%s10502_s28 + $0x20] sm:$0xff]  ;;  %v7287_v28 = vld [vmem:[%s10502_s28 + $0x28] sm:$0xff] }
  0x17   :  { %424 = vmatpush.bf16.msrb.mxu1 %v7874_v1  ;;  %v7288_v32 = vld [vmem:[%s10502_s28 + $0x30] sm:$0xff]  ;;  %v7289_v33 = vld [vmem:[%s10502_s28 + $0x38] sm:$0xff]  ;;  %v7290_v36 = vld [vmem:[%s10502_s28 + $0x40] sm:$0xff] }
  0x18   :  { %6164 = vmatmul.msk.bf16.vlgmr.msra.gmra.mxu0 %vm171_vm0, %v7282_v2  ;;  %585 = vmatpush.bf16.msrb.mxu3 %v7917_v19  ;;  %v7291_v39 = vld [vmem:[%s10502_s28 + $0x48] sm:$0xff]  ;;  %v8029_v60 = vld [vmem:[%s10427_s6] ss:$0 sm:$0xff] }
  0x19   :  { %381 = vmatpush.bf16.msrb.mxu0 %v7917_v19  ;;  %465 = vmatpush.bf16.msrb.mxu2 %v7965_v34 }
  0x1a   :  { %352 = vmatmul.bf16.vlgmr.msra.gmra.mxu2 %v7767_v4 }
  0x1b   :  { %425 = vmatpush.bf16.msrb.mxu1 %v7882_v3 }
  0x1c   :  { %586 = vmatpush.bf16.msrb.mxu3 %v7941_v27 }
  0x1d   :  { %382 = vmatpush.bf16.msrb.mxu0 %v7941_v27  ;;  %466 = vmatpush.bf16.msrb.mxu2 %v7971_v35 }
  0x1f   :  { %525 = vmatpush.bf16.msra.mxu1 %v7874_v1 }
  0x21   :  { %1339 = vmatpush.bf16.msra.mxu0 %v7874_v1  ;;  %566 = vmatpush.bf16.msra.mxu2 %v7965_v34 }
  0x23   :  { %526 = vmatpush.bf16.msra.mxu1 %v7882_v3 }
  0x25   :  { %1340 = vmatpush.bf16.msra.mxu0 %v7882_v3  ;;  %567 = vmatpush.bf16.msra.mxu2 %v7971_v35 }
  0x28   :  { %6165 = vmatmul.msk.bf16.gmra.mxu0 %vm171_vm0, %v7283_v18 }
  0x38   :  { %6166 = vmatmul.msk.bf16.gmra.mxu0 %vm171_vm0, %v7284_v20 }
  0x48   :  { %6167 = vmatmul.msk.bf16.gmra.mxu0 %vm171_vm0, %v7285_v24 }
  0x58   :  { %6168 = vmatmul.msk.bf16.gmra.mxu0 %vm171_vm0, %v7286_v26 }
  0x68   :  { %6169 = vmatmul.msk.bf16.gmra.mxu0 %vm171_vm0, %v7287_v28 }
  0x78   :  { %6170 = vmatmul.msk.bf16.gmra.mxu0 %vm171_vm0, %v7288_v32 }
  0x88   :  { %6171 = vmatmul.msk.bf16.gmra.mxu0 %vm171_vm0, %v7289_v33 }
  0x93   :  { %v300_v8 = vpop.f32.mrf.mxu1 }
  0x95   :  { %v211_v6 = vpop.f32.mrf.mxu0 }
  0x96   :  { %v212_v7 = vadd.f32 %v7894_v5, %v211_v6 }
  0x98   :  { %v304_v9 = vadd.f32 %v300_v8, %v212_v7  ;;  %6172 = vmatmul.msk.bf16.gmra.mxu0 %vm171_vm0, %v7290_v36 }
  0x9a   :  { %7538 = vtanh.f32 %v304_v9 }
  0x9b   :  { %v302_v11 = vpop.f32.mrf.mxu1 }
  0x9d   :  { %v213_v37 = vpop.f32.mrf.mxu0  ;;  %v353_v54 = vpop.f32.mrf.mxu2 }
  0x9e   :  { %v214_v0 = vadd.f32 %v7894_v5, %v213_v37 }
  0xa0   :  { %v7539_v13 = vpop.eup %7538 }
  0xa1   :  { %v309_v14 = vmul.f32 %v7539_v13, %v7900_v10 }
  0xa3   :  { %v313_v15 = vadd.f32 %v7905_v12, %v309_v14 }
  0xa5   :  { %316 = vrot.lane.b32.xlu0 %v313_v15, %s7765_s21  ;;  %v314_v21 = vmul.f32 0.0, %v313_v15  ;;  %v7982_v38 = vpop.f32.mrf.mxu0  ;;  %v355_v56 = vpop.f32.mrf.mxu2 }
  0xa6   :  { %v217_v56 = vadd.f32 %v7894_v5, %v7982_v38 }
  0xa8   :  { %6173 = vmatmul.msk.bf16.gmra.mxu0 %vm171_vm0, %v7291_v39 }
  0xad   :  { %v7988_v40 = vpop.f32.mrf.mxu0 }
  0xb5   :  { %v7990_v41 = vpop.f32.mrf.mxu0 }
  0xbd   :  { %v7992_v42 = vpop.f32.mrf.mxu0 }
  0xc5   :  { %v7994_v43 = vpop.f32.mrf.mxu0 }
  0xcd   :  { %v7996_v44 = vpop.f32.mrf.mxu0 }
  0xd5   :  { %v7998_v45 = vpop.f32.mrf.mxu0 }
  0xdd   :  { %v8000_v46 = vpop.f32.mrf.mxu0 }
  0xe5   :  { %v8004_v48 = vpop.f32.mrf.mxu0 }
  0xed   :  { %v8010_v49 = vpop.f32.mrf.mxu0 }
  0xf5   :  { %v8012_v50 = vpop.f32.mrf.mxu0 }
  0xfd   :  { %v8014_v51 = vpop.f32.mrf.mxu0 }
 0x105   :  { %v8016_v52 = vpop.f32.mrf.mxu0 }
 0x10d   :  { %v8018_v53 = vpop.f32.mrf.mxu0 }
 0x115   :  { %v8020_v55 = vpop.f32.mrf.mxu0 }
 0x117   :  { %v317_v16 = vpop.permute.xlu0 %316 }
 0x118   :  { %v319_v17 = vmul.f32 %v317_v16, %v313_v15 }
 0x11a   :  { %321 = vrot.lane.b32.xlu0 %v319_v17, %s7768_s9 }
 0x11d   :  { %v8022_v57 = vpop.f32.mrf.mxu0 }
 0x125   :  { %v8024_v58 = vpop.f32.mrf.mxu0 }
 0x12d   :  { %v258_v59 = vpop.f32.mrf.mxu0 }
 0x18c   :  { %v322_v22 = vpop.permute.xlu0 %321 }
 0x18d   :  { %v7926_v23 = vadd.f32 %v322_v22, %v314_v21 }
 0x18f   :  { %7540 = vtanh.f32 %v7926_v23 }
 0x195   :  { %v7541_v25 = vpop.eup %7540 }
 0x196   :  { %327 = vrot.lane.b32.xlu1 %v7541_v25, %s7765_s21 }
 0x208   :  { %v328_v29 = vpop.permute.xlu1 %327 }
 0x209   :  { %v330_v30 = vmul.f32 %v328_v29, %v313_v15 }
 0x20b   :  { %v331_v31 = vpack.c.bf16 %v330_v30, %v330_v30 }
 0x20d   :  { %358 = vrot.lane.b32.xlu1 %v331_v31, %s7768_s9 }
 0x27f   :  { %v359_v47 = vpop.permute.xlu1 %358 }
 0x280   :  { %6198 = vmatmul.msk.bf16.vlgmr.msrb.gmra.mxu0 %vm287_vm1, %v359_v47  ;;  %6199 = vmatmul.msk.bf16.vlgmr.msrb.gmra.mxu1 %vm287_vm1, %v359_v47 }
 0x281   :  { %627 = vmatpush.bf16.msrb.mxu1 %v7874_v1  ;;  %1482 = vmatpush.bf16.msrb.mxu0 %v7965_v34 }
 0x285   :  { %628 = vmatpush.bf16.msrb.mxu1 %v7882_v3  ;;  %1483 = vmatpush.bf16.msrb.mxu0 %v7971_v35 }
 0x2fd   :  { %v384_v61 = vpop.f32.mrf.mxu0  ;;  %v427_v62 = vpop.f32.mrf.mxu1 }
 0x2fe   :  { %v385_v63 = vadd.f32 %v384_v61, %v353_v54  ;;  %v431_v4 = vadd.f32 %v427_v62, %v214_v0 }
 0x300   :  { %v391_v2 = vadd.f32 %v8029_v60, %v385_v63 }
 0x302   :  { %7542 = vtanh.f32 %v391_v2 }
 0x303   :  { %7544 = vtanh.f32 %v431_v4 }
 0x305   :  { %v386_v6 = vpop.f32.mrf.mxu0  ;;  %v429_v7 = vpop.f32.mrf.mxu1 }
 0x308   :  { %v7543_v8 = vpop.eup %7542 }
 0x309   :  { %v393_v9 = vmul.f32 %v7543_v8, %v7900_v10  ;;  %v7545_v13 = vpop.eup %7544 }
 0x30a   :  { %v433_v14 = vmul.f32 %v7545_v13, %v7900_v10 }
 0x30b   :  { %v394_v11 = vadd.f32 %v7905_v12, %v393_v9 }
 0x30c   :  { %v434_v15 = vadd.f32 %v7905_v12, %v433_v14 }
 0x30d   :  { %397 = vrot.lane.b32.xlu2 %v394_v11, %s7765_s21  ;;  %v395_v21 = vmul.f32 0.0, %v394_v11 }
 0x30e   :  { %v435_v25 = vmul.f32 %v434_v15, %v7926_v23 }
 0x315   :  { %437 = vrot.lane.b32.xlu2 %v434_v15, %s7765_s21 }
 0x367   :  { %v398_v16 = vpop.permute.xlu2 %397 }
 0x368   :  { %v400_v17 = vmul.f32 %v398_v16, %v394_v11 }
 0x36a   :  { %402 = vrot.lane.b32.xlu0 %v400_v17, %s7768_s9 }
 0x36f   :  { %v438_v18 = vpop.permute.xlu2 %437 }
 0x370   :  { %v440_v20 = vmul.f32 %v438_v18, %v434_v15 }
 0x372   :  { %442 = vrot.lane.b32.xlu1 %v440_v20, %s7768_s9 }
 0x3dc   :  { %v403_v22 = vpop.permute.xlu0 %402 }
 0x3dd   :  { %v405_v24 = vadd.f32 %v403_v22, %v395_v21 }
 0x3df   :  { %7546 = vtanh.f32 %v405_v24 }
 0x3e4   :  { %v443_v26 = vpop.permute.xlu1 %442 }
 0x3e5   :  { %v7547_v28 = vpop.eup %7546  ;;  %v445_v29 = vadd.f32 %v443_v26, %v435_v25 }
 0x3e6   :  { %408 = vrot.lane.b32.xlu2 %v7547_v28, %s7765_s21 }
 0x3e7   :  { %7548 = vtanh.f32 %v445_v29 }
 0x3ed   :  { %v7549_v30 = vpop.eup %7548 }
 0x3ee   :  { %448 = vrot.lane.b32.xlu0 %v7549_v30, %s7765_s21 }
 0x440   :  { %v409_v31 = vpop.permute.xlu2 %408 }
 0x441   :  { %v8044_v32 = vmul.f32 %v409_v31, %v394_v11 }
 0x443   :  { %v412_v33 = vpack.c.bf16 %v8044_v32, %v8044_v32 }
 0x445   :  { %454 = vrot.lane.b32.xlu1 %v412_v33, %s7768_s9 }
 0x460   :  { %v449_v36 = vpop.permute.xlu0 %448 }
 0x461   :  { %v451_v37 = vmul.f32 %v449_v36, %v434_v15 }
 0x463   :  { %v452_v23 = vpack.c.bf16 %v451_v37, %v451_v37 }
 0x465   :  { %473 = vrot.lane.b32.xlu2 %v452_v23, %s7768_s9 }
 0x4b7   :  { %v455_v39 = vpop.permute.xlu1 %454 }
 0x4b8   :  { %6200 = vmatmul.msk.bf16.vlgmr.msrb.gmra.mxu2 %vm287_vm1, %v455_v39 }
 0x4b9   :  { %668 = vmatpush.bf16.msrb.mxu2 %v7965_v34 }
 0x4bd   :  { %669 = vmatpush.bf16.msrb.mxu2 %v7971_v35 }
 0x4bf   :  { %v474_v47 = vpop.permute.xlu2 %473 }
 0x4c0   :  { %6201 = vmatmul.msk.bf16.vlgmr.msra.gmra.mxu3 %vm287_vm1, %v474_v47  ;;  %6202 = vmatmul.msk.bf16.vlgmr.msra.gmra.mxu1 %vm287_vm1, %v474_v47  ;;  %v219_v47 = vadd.f32 %v7894_v5, %v7988_v40 }
 0x4c1   :  { %687 = vmatpush.bf16.msra.mxu3 %v7917_v19  ;;  %729 = vmatpush.bf16.msra.mxu1 %v7874_v1 }
 0x4c5   :  { %688 = vmatpush.bf16.msra.mxu3 %v7941_v27  ;;  %730 = vmatpush.bf16.msra.mxu1 %v7882_v3 }
 0x53b   :  { %v468_v54 = vpop.f32.mrf.mxu2 }
 0x53d   :  { %v528_v59 = vpop.f32.mrf.mxu1 }
 0x53e   :  { %v532_v61 = vadd.f32 %v528_v59, %v217_v56 }
 0x540   :  { %7550 = vtanh.f32 %v532_v61 }
 0x543   :  { %v470_v62 = vpop.f32.mrf.mxu2  ;;  %v487_v63 = vpop.f32.mrf.mxu3 }
 0x544   :  { %v488_v0 = vadd.f32 %v487_v63, %v468_v54 }
 0x545   :  { %v530_v2 = vpop.f32.mrf.mxu1 }
 0x546   :  { %v7551_v4 = vpop.eup %7550  ;;  %v491_v6 = vadd.f32 %v8029_v60, %v488_v0 }
 0x547   :  { %v534_v7 = vmul.f32 %v7551_v4, %v7900_v10 }
 0x548   :  { %7552 = vtanh.f32 %v491_v6 }
 0x549   :  { %v535_v8 = vadd.f32 %v7905_v12, %v534_v7 }
 0x54b   :  { %538 = vrot.lane.b32.xlu1 %v535_v8, %s7765_s21  ;;  %v489_v9 = vpop.f32.mrf.mxu3  ;;  %v536_v25 = vmul.f32 %v535_v8, %v445_v29 }
 0x54e   :  { %v7553_v11 = vpop.eup %7552 }
 0x54f   :  { %v493_v38 = vmul.f32 %v7553_v11, %v7900_v10 }
 0x551   :  { %v494_v13 = vadd.f32 %v7905_v12, %v493_v38 }
 0x553   :  { %497 = vrot.lane.b32.xlu0 %v494_v13, %s7765_s21  ;;  %v495_v18 = vmul.f32 %v494_v13, %v405_v24 }
 0x5bd   :  { %v539_v14 = vpop.permute.xlu1 %538 }
 0x5be   :  { %v541_v15 = vmul.f32 %v539_v14, %v535_v8 }
 0x5c0   :  { %543 = vrot.lane.b32.xlu0 %v541_v15, %s7768_s9 }
 0x5c5   :  { %v498_v16 = vpop.permute.xlu0 %497 }
 0x5c6   :  { %v500_v17 = vmul.f32 %v498_v16, %v494_v13 }
 0x5c8   :  { %502 = vrot.lane.b32.xlu2 %v500_v17, %s7768_s9 }
 0x622   :  { %v503_v20 = vpop.permute.xlu2 %502 }
 0x623   :  { %v505_v21 = vadd.f32 %v503_v20, %v495_v18 }
 0x625   :  { %7554 = vtanh.f32 %v505_v21 }
 0x62b   :  { %v7555_v22 = vpop.eup %7554 }
 0x62c   :  { %508 = vrot.lane.b32.xlu1 %v7555_v22, %s7765_s21 }
 0x632   :  { %v544_v26 = vpop.permute.xlu0 %543 }
 0x633   :  { %v546_v28 = vadd.f32 %v544_v26, %v536_v25 }
 0x635   :  { %7556 = vtanh.f32 %v546_v28 }
 0x63b   :  { %v7557_v30 = vpop.eup %7556 }
 0x63c   :  { %549 = vrot.lane.b32.xlu2 %v7557_v30, %s7765_s21 }
 0x696   :  { %v550_v31 = vpop.permute.xlu2 %549 }
 0x697   :  { %v552_v33 = vmul.f32 %v550_v31, %v535_v8 }
 0x699   :  { %v553_v36 = vpack.c.bf16 %v552_v33, %v552_v33 }
 0x69b   :  { %574 = vrot.lane.b32.xlu1 %v553_v36, %s7768_s9 }
 0x69e   :  { %v509_v37 = vpop.permute.xlu1 %508 }
 0x69f   :  { %v8073_v24 = vmul.f32 %v509_v37, %v494_v13 }
 0x6a1   :  { %v512_v23 = vpack.c.bf16 %v8073_v24, %v8073_v24 }
 0x6a3   :  { %555 = vrot.lane.b32.xlu0 %v512_v23, %s7768_s9 }
 0x70d   :  { %v575_v29 = vpop.permute.xlu1 %574 }
 0x70e   :  { %6204 = vmatmul.msk.bf16.vlgmr.msrb.gmra.mxu3 %vm287_vm1, %v575_v29  ;;  %6205 = vmatmul.msk.bf16.vlgmr.msrb.gmra.mxu1 %vm287_vm1, %v575_v29 }
 0x70f   :  { %789 = vmatpush.bf16.msrb.mxu3 %v7917_v19  ;;  %832 = vmatpush.bf16.msrb.mxu1 %v7874_v1 }
 0x713   :  { %790 = vmatpush.bf16.msrb.mxu3 %v7941_v27  ;;  %833 = vmatpush.bf16.msrb.mxu1 %v7882_v3 }
 0x715   :  { %v556_v39 = vpop.permute.xlu0 %555 }
 0x716   :  { %6203 = vmatmul.msk.bf16.vlgmr.msra.gmra.mxu2 %vm287_vm1, %v556_v39 }
 0x717   :  { %770 = vmatpush.bf16.msra.mxu2 %v7965_v34 }
 0x71b   :  { %771 = vmatpush.bf16.msra.mxu2 %v7971_v35 }
 0x78b   :  { %v630_v54 = vpop.f32.mrf.mxu1 }
 0x78c   :  { %v634_v56 = vadd.f32 %v630_v54, %v219_v47  ;;  %v222_v47 = vadd.f32 %v7894_v5, %v7990_v41 }
 0x78e   :  { %7558 = vtanh.f32 %v634_v56 }
 0x791   :  { %v588_v59 = vpop.f32.mrf.mxu3 }
 0x793   :  { %v632_v61 = vpop.f32.mrf.mxu1 }
 0x794   :  { %v7559_v62 = vpop.eup %7558 }
 0x795   :  { %v636_v63 = vmul.f32 %v7559_v62, %v7900_v10 }
 0x797   :  { %v637_v0 = vadd.f32 %v7905_v12, %v636_v63 }
 0x799   :  { %v569_v2 = vpop.f32.mrf.mxu2  ;;  %640 = vrot.lane.b32.xlu0 %v637_v0, %s7765_s21  ;;  %v590_v4 = vpop.f32.mrf.mxu3  ;;  %v638_v16 = vmul.f32 %v637_v0, %v546_v28 }
 0x79a   :  { %v589_v6 = vadd.f32 %v588_v59, %v569_v2 }
 0x79c   :  { %v592_v7 = vadd.f32 %v8029_v60, %v589_v6 }
 0x79e   :  { %7560 = vtanh.f32 %v592_v7 }
 0x7a1   :  { %v571_v8 = vpop.f32.mrf.mxu2 }
 0x7a4   :  { %v7561_v40 = vpop.eup %7560 }
 0x7a5   :  { %v594_v9 = vmul.f32 %v7561_v40, %v7900_v10 }
 0x7a7   :  { %v595_v11 = vadd.f32 %v7905_v12, %v594_v9 }
 0x7a9   :  { %598 = vrot.lane.b32.xlu2 %v595_v11, %s7765_s21  ;;  %v596_v22 = vmul.f32 %v595_v11, %v505_v21 }
 0x803   :  { %v599_v38 = vpop.permute.xlu2 %598 }
 0x804   :  { %v601_v13 = vmul.f32 %v599_v38, %v595_v11 }
 0x806   :  { %603 = vrot.lane.b32.xlu1 %v601_v13, %s7768_s9 }
 0x80b   :  { %v641_v14 = vpop.permute.xlu0 %640 }
 0x80c   :  { %v643_v15 = vmul.f32 %v641_v14, %v637_v0 }
 0x80e   :  { %645 = vrot.lane.b32.xlu2 %v643_v15, %s7768_s9 }
 0x868   :  { %v646_v17 = vpop.permute.xlu2 %645 }
 0x869   :  { %v648_v18 = vadd.f32 %v646_v17, %v638_v16 }
 0x86b   :  { %7562 = vtanh.f32 %v648_v18 }
 0x871   :  { %v7563_v20 = vpop.eup %7562 }
 0x872   :  { %651 = vrot.lane.b32.xlu1 %v7563_v20, %s7765_s21 }
 0x878   :  { %v604_v25 = vpop.permute.xlu1 %603 }
 0x879   :  { %v606_v26 = vadd.f32 %v604_v25, %v596_v22 }
 0x87b   :  { %7564 = vtanh.f32 %v606_v26 }
 0x881   :  { %v7565_v30 = vpop.eup %7564 }
 0x882   :  { %609 = vrot.lane.b32.xlu0 %v7565_v30, %s7765_s21 }
 0x8e4   :  { %v652_v31 = vpop.permute.xlu1 %651 }
 0x8e5   :  { %v654_v33 = vmul.f32 %v652_v31, %v637_v0 }
 0x8e7   :  { %v655_v36 = vpack.c.bf16 %v654_v33, %v654_v33 }
 0x8e9   :  { %676 = vrot.lane.b32.xlu0 %v655_v36, %s7768_s9 }
 0x8f4   :  { %v610_v37 = vpop.permute.xlu0 %609 }
 0x8f5   :  { %v8101_v28 = vmul.f32 %v610_v37, %v595_v11 }
 0x8f7   :  { %v613_v23 = vpack.c.bf16 %v8101_v28, %v8101_v28 }
 0x8f9   :  { %657 = vrot.lane.b32.xlu2 %v613_v23, %s7768_s9 }
 0x953   :  { %v658_v21 = vpop.permute.xlu2 %657 }
 0x954   :  { %6206 = vmatmul.msk.bf16.vlgmr.msrb.gmra.mxu2 %vm287_vm1, %v658_v21 }
 0x955   :  { %873 = vmatpush.bf16.msrb.mxu2 %v7965_v34 }
 0x959   :  { %874 = vmatpush.bf16.msrb.mxu2 %v7971_v35 }
 0x95b   :  { %v677_v29 = vpop.permute.xlu0 %676 }
 0x95c   :  { %6207 = vmatmul.msk.bf16.vlgmr.msra.gmra.mxu3 %vm287_vm1, %v677_v29  ;;  %6208 = vmatmul.msk.bf16.vlgmr.msra.gmra.mxu1 %vm287_vm1, %v677_v29  ;;  %v224_v29 = vadd.f32 %v7894_v5, %v7992_v42 }
 0x95d   :  { %892 = vmatpush.bf16.msra.mxu3 %v7917_v19  ;;  %933 = vmatpush.bf16.msra.mxu1 %v7874_v1 }
 0x961   :  { %893 = vmatpush.bf16.msra.mxu3 %v7941_v27  ;;  %934 = vmatpush.bf16.msra.mxu1 %v7882_v3 }
 0x9d7   :  { %v671_v39 = vpop.f32.mrf.mxu2 }
 0x9d9   :  { %v732_v54 = vpop.f32.mrf.mxu1 }
 0x9da   :  { %v736_v56 = vadd.f32 %v732_v54, %v222_v47 }
 0x9dc   :  { %7566 = vtanh.f32 %v736_v56 }
 0x9df   :  { %v673_v59 = vpop.f32.mrf.mxu2  ;;  %v690_v61 = vpop.f32.mrf.mxu3 }
 0x9e0   :  { %v691_v62 = vadd.f32 %v690_v61, %v671_v39 }
 0x9e1   :  { %v734_v63 = vpop.f32.mrf.mxu1 }
 0x9e2   :  { %v7567_v0 = vpop.eup %7566  ;;  %v694_v2 = vadd.f32 %v8029_v60, %v691_v62 }
 0x9e3   :  { %v738_v4 = vmul.f32 %v7567_v0, %v7900_v10 }
 0x9e4   :  { %7568 = vtanh.f32 %v694_v2 }
 0x9e5   :  { %v739_v6 = vadd.f32 %v7905_v12, %v738_v4 }
 0x9e7   :  { %742 = vrot.lane.b32.xlu2 %v739_v6, %s7765_s21  ;;  %v692_v7 = vpop.f32.mrf.mxu3  ;;  %v740_v14 = vmul.f32 %v739_v6, %v648_v18 }
 0x9ea   :  { %v7569_v8 = vpop.eup %7568 }
 0x9eb   :  { %v696_v41 = vmul.f32 %v7569_v8, %v7900_v10 }
 0x9ed   :  { %v697_v40 = vadd.f32 %v7905_v12, %v696_v41 }
 0x9ef   :  { %700 = vrot.lane.b32.xlu1 %v697_v40, %s7765_s21  ;;  %v698_v20 = vmul.f32 %v697_v40, %v606_v26 }
 0xa41   :  { %v743_v9 = vpop.permute.xlu2 %742 }
 0xa42   :  { %v745_v11 = vmul.f32 %v743_v9, %v739_v6 }
 0xa44   :  { %747 = vrot.lane.b32.xlu1 %v745_v11, %s7768_s9 }
 0xa61   :  { %v701_v38 = vpop.permute.xlu1 %700 }
 0xa62   :  { %v703_v13 = vmul.f32 %v701_v38, %v697_v40 }
 0xa64   :  { %705 = vrot.lane.b32.xlu0 %v703_v13, %s7768_s9 }
 0xab6   :  { %v748_v15 = vpop.permute.xlu1 %747 }
 0xab7   :  { %v750_v16 = vadd.f32 %v748_v15, %v740_v14 }
 0xab9   :  { %7570 = vtanh.f32 %v750_v16 }
 0xabf   :  { %v7571_v17 = vpop.eup %7570 }
 0xac0   :  { %753 = vrot.lane.b32.xlu0 %v7571_v17, %s7765_s21 }
 0xad6   :  { %v706_v22 = vpop.permute.xlu0 %705 }
 0xad7   :  { %v708_v25 = vadd.f32 %v706_v22, %v698_v20 }
 0xad9   :  { %7572 = vtanh.f32 %v708_v25 }
 0xadf   :  { %v7573_v30 = vpop.eup %7572 }
 0xae0   :  { %711 = vrot.lane.b32.xlu2 %v7573_v30, %s7765_s21 }
 0xb32   :  { %v754_v31 = vpop.permute.xlu0 %753 }
 0xb33   :  { %v756_v33 = vmul.f32 %v754_v31, %v739_v6 }
 0xb35   :  { %v757_v36 = vpack.c.bf16 %v756_v33, %v756_v33 }
 0xb37   :  { %778 = vrot.lane.b32.xlu2 %v757_v36, %s7768_s9 }
 0xb3a   :  { %v712_v37 = vpop.permute.xlu2 %711 }
 0xb3b   :  { %v8129_v18 = vmul.f32 %v712_v37, %v697_v40 }
 0xb3d   :  { %v715_v23 = vpack.c.bf16 %v8129_v18, %v8129_v18 }
 0xb3f   :  { %759 = vrot.lane.b32.xlu1 %v715_v23, %s7768_s9 }
 0xb91   :  { %v779_v26 = vpop.permute.xlu2 %778 }
 0xb92   :  { %6210 = vmatmul.msk.bf16.vlgmr.msrb.gmra.mxu3 %vm287_vm1, %v779_v26  ;;  %6211 = vmatmul.msk.bf16.vlgmr.msrb.gmra.mxu1 %vm287_vm1, %v779_v26 }
 0xb93   :  { %993 = vmatpush.bf16.msrb.mxu3 %v7917_v19  ;;  %1035 = vmatpush.bf16.msrb.mxu1 %v7874_v1 }
 0xb97   :  { %994 = vmatpush.bf16.msrb.mxu3 %v7941_v27  ;;  %1036 = vmatpush.bf16.msrb.mxu1 %v7882_v3 }
 0xbb1   :  { %v760_v21 = vpop.permute.xlu1 %759 }
 0xbb2   :  { %6209 = vmatmul.msk.bf16.vlgmr.msra.gmra.mxu2 %vm287_vm1, %v760_v21  ;;  %v227_v21 = vadd.f32 %v7894_v5, %v7994_v43 }
 0xbb3   :  { %974 = vmatpush.bf16.msra.mxu2 %v7965_v34 }
 0xbb7   :  { %975 = vmatpush.bf16.msra.mxu2 %v7971_v35 }
 0xc0f   :  { %v835_v39 = vpop.f32.mrf.mxu1 }
 0xc10   :  { %v839_v47 = vadd.f32 %v835_v39, %v224_v29 }
 0xc12   :  { %7574 = vtanh.f32 %v839_v47 }
 0xc15   :  { %v792_v54 = vpop.f32.mrf.mxu3 }
 0xc17   :  { %v837_v56 = vpop.f32.mrf.mxu1 }
 0xc18   :  { %v7575_v59 = vpop.eup %7574 }
 0xc19   :  { %v841_v61 = vmul.f32 %v7575_v59, %v7900_v10 }
 0xc1b   :  { %v842_v62 = vadd.f32 %v7905_v12, %v841_v61 }
 0xc1d   :  { %845 = vrot.lane.b32.xlu1 %v842_v62, %s7765_s21  ;;  %v794_v63 = vpop.f32.mrf.mxu3  ;;  %v843_v38 = vmul.f32 %v842_v62, %v750_v16 }
 0xc35   :  { %v773_v0 = vpop.f32.mrf.mxu2 }
 0xc36   :  { %v793_v2 = vadd.f32 %v792_v54, %v773_v0 }
 0xc38   :  { %v796_v4 = vadd.f32 %v8029_v60, %v793_v2 }
 0xc3a   :  { %7576 = vtanh.f32 %v796_v4 }
 0xc3d   :  { %v775_v6 = vpop.f32.mrf.mxu2 }
 0xc40   :  { %v7577_v42 = vpop.eup %7576 }
 0xc41   :  { %v798_v7 = vmul.f32 %v7577_v42, %v7900_v10 }
 0xc43   :  { %v799_v8 = vadd.f32 %v7905_v12, %v798_v7 }
 0xc45   :  { %802 = vrot.lane.b32.xlu0 %v799_v8, %s7765_s21  ;;  %v800_v17 = vmul.f32 %v799_v8, %v708_v25 }
 0xc8f   :  { %v846_v41 = vpop.permute.xlu1 %845 }
 0xc90   :  { %v848_v40 = vmul.f32 %v846_v41, %v842_v62 }
 0xc92   :  { %850 = vrot.lane.b32.xlu0 %v848_v40, %s7768_s9 }
 0xcb7   :  { %v803_v9 = vpop.permute.xlu0 %802 }
 0xcb8   :  { %v805_v11 = vmul.f32 %v803_v9, %v799_v8 }
 0xcba   :  { %807 = vrot.lane.b32.xlu2 %v805_v11, %s7768_s9 }
 0xd04   :  { %v851_v13 = vpop.permute.xlu0 %850 }
 0xd05   :  { %v853_v14 = vadd.f32 %v851_v13, %v843_v38 }
 0xd07   :  { %7578 = vtanh.f32 %v853_v14 }
 0xd0d   :  { %v7579_v15 = vpop.eup %7578 }
 0xd0e   :  { %856 = vrot.lane.b32.xlu2 %v7579_v15, %s7765_s21 }
 0xd14   :  { %v808_v20 = vpop.permute.xlu2 %807 }
 0xd15   :  { %v810_v22 = vadd.f32 %v808_v20, %v800_v17 }
 0xd17   :  { %7580 = vtanh.f32 %v810_v22 }
 0xd1d   :  { %v7581_v30 = vpop.eup %7580 }
 0xd1e   :  { %813 = vrot.lane.b32.xlu1 %v7581_v30, %s7765_s21 }
 0xd68   :  { %v857_v31 = vpop.permute.xlu2 %856 }
 0xd69   :  { %v859_v33 = vmul.f32 %v857_v31, %v842_v62 }
 0xd6b   :  { %v860_v36 = vpack.c.bf16 %v859_v33, %v859_v33 }
 0xd6d   :  { %881 = vrot.lane.b32.xlu1 %v860_v36, %s7768_s9 }
 0xd90   :  { %v814_v37 = vpop.permute.xlu1 %813 }
 0xd91   :  { %v8157_v16 = vmul.f32 %v814_v37, %v799_v8 }
 0xd93   :  { %v817_v23 = vpack.c.bf16 %v8157_v16, %v8157_v16 }
 0xd95   :  { %862 = vrot.lane.b32.xlu0 %v817_v23, %s7768_s9 }
 0xddf   :  { %v882_v25 = vpop.permute.xlu1 %881 }
 0xde0   :  { %6213 = vmatmul.msk.bf16.vlgmr.msra.gmra.mxu3 %vm287_vm1, %v882_v25  ;;  %6214 = vmatmul.msk.bf16.vlgmr.msra.gmra.mxu1 %vm287_vm1, %v882_v25 }
 0xde1   :  { %1095 = vmatpush.bf16.msra.mxu3 %v7917_v19  ;;  %1136 = vmatpush.bf16.msra.mxu1 %v7874_v1 }
 0xde5   :  { %1096 = vmatpush.bf16.msra.mxu3 %v7941_v27  ;;  %1137 = vmatpush.bf16.msra.mxu1 %v7882_v3 }
 0xe07   :  { %v863_v26 = vpop.permute.xlu0 %862 }
 0xe08   :  { %6212 = vmatmul.msk.bf16.vlgmr.msrb.gmra.mxu2 %vm287_vm1, %v863_v26  ;;  %v229_v26 = vadd.f32 %v7894_v5, %v7996_v44 }
 0xe09   :  { %1076 = vmatpush.bf16.msrb.mxu2 %v7965_v34 }
 0xe0d   :  { %1077 = vmatpush.bf16.msrb.mxu2 %v7971_v35 }
 0xe5d   :  { %v936_v29 = vpop.f32.mrf.mxu1 }
 0xe5e   :  { %v940_v39 = vadd.f32 %v936_v29, %v227_v21 }
 0xe60   :  { %7582 = vtanh.f32 %v940_v39 }
 0xe63   :  { %v895_v47 = vpop.f32.mrf.mxu3 }
 0xe65   :  { %v938_v54 = vpop.f32.mrf.mxu1 }
 0xe66   :  { %v7583_v56 = vpop.eup %7582 }
 0xe67   :  { %v942_v59 = vmul.f32 %v7583_v56, %v7900_v10 }
 0xe69   :  { %v943_v61 = vadd.f32 %v7905_v12, %v942_v59 }
 0xe6b   :  { %946 = vrot.lane.b32.xlu0 %v943_v61, %s7765_s21  ;;  %v897_v62 = vpop.f32.mrf.mxu3  ;;  %v944_v9 = vmul.f32 %v943_v61, %v853_v14 }
 0xe8b   :  { %v876_v63 = vpop.f32.mrf.mxu2 }
 0xe8c   :  { %v896_v0 = vadd.f32 %v895_v47, %v876_v63 }
 0xe8e   :  { %v899_v2 = vadd.f32 %v8029_v60, %v896_v0 }
 0xe90   :  { %7584 = vtanh.f32 %v899_v2 }
 0xe93   :  { %v878_v4 = vpop.f32.mrf.mxu2 }
 0xe96   :  { %v7585_v43 = vpop.eup %7584 }
 0xe97   :  { %v901_v6 = vmul.f32 %v7585_v43, %v7900_v10 }
 0xe99   :  { %v902_v42 = vadd.f32 %v7905_v12, %v901_v6 }
 0xe9b   :  { %905 = vrot.lane.b32.xlu2 %v902_v42, %s7765_s21  ;;  %v903_v15 = vmul.f32 %v902_v42, %v810_v22 }
 0xedd   :  { %v947_v7 = vpop.permute.xlu0 %946 }
 0xede   :  { %v949_v8 = vmul.f32 %v947_v7, %v943_v61 }
 0xee0   :  { %951 = vrot.lane.b32.xlu2 %v949_v8, %s7768_s9 }
 0xef5   :  { %v906_v41 = vpop.permute.xlu2 %905 }
 0xef6   :  { %v908_v40 = vmul.f32 %v906_v41, %v902_v42 }
 0xef8   :  { %910 = vrot.lane.b32.xlu1 %v908_v40, %s7768_s9 }
 0xf3a   :  { %v952_v11 = vpop.permute.xlu2 %951 }
 0xf3b   :  { %v954_v38 = vadd.f32 %v952_v11, %v944_v9 }
 0xf3d   :  { %7586 = vtanh.f32 %v954_v38 }
 0xf43   :  { %v7587_v13 = vpop.eup %7586 }
 0xf44   :  { %957 = vrot.lane.b32.xlu1 %v7587_v13, %s7765_s21 }
 0xf6a   :  { %v911_v17 = vpop.permute.xlu1 %910 }
 0xf6b   :  { %v913_v20 = vadd.f32 %v911_v17, %v903_v15 }
 0xf6d   :  { %7588 = vtanh.f32 %v913_v20 }
 0xf73   :  { %v7589_v30 = vpop.eup %7588 }
 0xf74   :  { %916 = vrot.lane.b32.xlu0 %v7589_v30, %s7765_s21 }
 0xfb6   :  { %v958_v31 = vpop.permute.xlu1 %957 }
 0xfb7   :  { %v960_v33 = vmul.f32 %v958_v31, %v943_v61 }
 0xfb9   :  { %v961_v36 = vpack.c.bf16 %v960_v33, %v960_v33 }
 0xfbb   :  { %982 = vrot.lane.b32.xlu0 %v961_v36, %s7768_s9 }
 0xfe6   :  { %v917_v37 = vpop.permute.xlu0 %916 }
 0xfe7   :  { %v8185_v14 = vmul.f32 %v917_v37, %v902_v42 }
 0xfe9   :  { %v920_v23 = vpack.c.bf16 %v8185_v14, %v8185_v14 }
 0xfeb   :  { %963 = vrot.lane.b32.xlu2 %v920_v23, %s7768_s9  ;;  %v232_v23 = vadd.f32 %v7894_v5, %v7998_v45 }
0x102d   :  { %v983_v22 = vpop.permute.xlu0 %982 }
0x102e   :  { %6216 = vmatmul.msk.bf16.vlgmr.msrb.gmra.mxu3 %vm287_vm1, %v983_v22  ;;  %6217 = vmatmul.msk.bf16.vlgmr.msrb.gmra.mxu1 %vm287_vm1, %v983_v22 }
0x102f   :  { %1196 = vmatpush.bf16.msrb.mxu3 %v7917_v19  ;;  %1238 = vmatpush.bf16.msrb.mxu1 %v7874_v1 }
0x1033   :  { %1197 = vmatpush.bf16.msrb.mxu3 %v7941_v27  ;;  %1239 = vmatpush.bf16.msrb.mxu1 %v7882_v3 }
0x1045   :  { %v964_v25 = vpop.permute.xlu2 %963 }
0x1046   :  { %6215 = vmatmul.msk.bf16.vlgmr.msra.gmra.mxu2 %vm287_vm1, %v964_v25 }
0x1047   :  { %1177 = vmatpush.bf16.msra.mxu2 %v7965_v34 }
0x104b   :  { %1178 = vmatpush.bf16.msra.mxu2 %v7971_v35 }
0x10ab   :  { %v1038_v21 = vpop.f32.mrf.mxu1 }
0x10ac   :  { %v1042_v29 = vadd.f32 %v1038_v21, %v229_v26 }
0x10ae   :  { %7590 = vtanh.f32 %v1042_v29 }
0x10b1   :  { %v996_v39 = vpop.f32.mrf.mxu3 }
0x10b3   :  { %v1040_v47 = vpop.f32.mrf.mxu1 }
0x10b4   :  { %v7591_v1 = vpop.eup %7590 }
0x10b5   :  { %v1044_v54 = vmul.f32 %v7591_v1, %v7900_v10 }
0x10b7   :  { %v1045_v3 = vadd.f32 %v7905_v12, %v1044_v54 }
0x10b9   :  { %1048 = vrot.lane.b32.xlu2 %v1045_v3, %s7765_s21  ;;  %v998_v56 = vpop.f32.mrf.mxu3  ;;  %v1046_v7 = vmul.f32 %v1045_v3, %v954_v38 }
0x10c9   :  { %v977_v59 = vpop.f32.mrf.mxu2 }
0x10ca   :  { %v997_v61 = vadd.f32 %v996_v39, %v977_v59 }
0x10cc   :  { %v1000_v62 = vadd.f32 %v8029_v60, %v997_v61 }
0x10ce   :  { %7592 = vtanh.f32 %v1000_v62 }
0x10d1   :  { %v979_v63 = vpop.f32.mrf.mxu2 }
0x10d4   :  { %v7593_v44 = vpop.eup %7592 }
0x10d5   :  { %v1002_v0 = vmul.f32 %v7593_v44, %v7900_v10 }
0x10d7   :  { %v1003_v2 = vadd.f32 %v7905_v12, %v1002_v0 }
0x10d9   :  { %1006 = vrot.lane.b32.xlu1 %v1003_v2, %s7765_s21  ;;  %v1004_v9 = vmul.f32 %v1003_v2, %v913_v20 }
0x1113   :  { %v1049_v4 = vpop.permute.xlu2 %1048 }
0x1114   :  { %v1051_v43 = vmul.f32 %v1049_v4, %v1045_v3 }
0x1116   :  { %1053 = vrot.lane.b32.xlu1 %v1051_v43, %s7768_s9 }
0x114b   :  { %v1007_v6 = vpop.permute.xlu1 %1006 }
0x114c   :  { %v1009_v42 = vmul.f32 %v1007_v6, %v1003_v2 }
0x114e   :  { %1011 = vrot.lane.b32.xlu0 %v1009_v42, %s7768_s9 }
0x1188   :  { %v1054_v8 = vpop.permute.xlu1 %1053 }
0x1189   :  { %v1056_v41 = vadd.f32 %v1054_v8, %v1046_v7 }
0x118b   :  { %7594 = vtanh.f32 %v1056_v41 }
0x1191   :  { %v7595_v40 = vpop.eup %7594 }
0x1192   :  { %1059 = vrot.lane.b32.xlu0 %v7595_v40, %s7765_s21 }
0x11c0   :  { %v1012_v11 = vpop.permute.xlu0 %1011 }
0x11c1   :  { %v1014_v13 = vadd.f32 %v1012_v11, %v1004_v9  ;;  %v8251_v11 = vld [vmem:[%s10423_s2 + $0x8] sm:$0xff] }
0x11c3   :  { %7596 = vtanh.f32 %v1014_v13 }
0x11c9   :  { %v7597_v15 = vpop.eup %7596 }
0x11ca   :  { %1017 = vrot.lane.b32.xlu2 %v7597_v15, %s7765_s21  ;;  %v8263_v15 = vld [vmem:[%s10423_s2] sm:$0xff] }
0x1204   :  { %v1060_v17 = vpop.permute.xlu0 %1059 }
0x1205   :  { %v1062_v30 = vmul.f32 %v1060_v17, %v1045_v3 }
0x1207   :  { %v1063_v31 = vpack.c.bf16 %v1062_v30, %v1062_v30  ;;  %v8272_v30 = vld [vmem:[%s10425_s4] sm:$0xff] }
0x1209   :  { %1084 = vrot.lane.b32.xlu2 %v1063_v31, %s7768_s9  ;;  %v8278_v31 = vld [vmem:[%s10424_s3] ss:$0 sm:$0xff] }
0x1224   :  { %v1018_v33 = vpop.permute.xlu2 %1017 }
0x1225   :  { %v8213_v38 = vmul.f32 %v1018_v33, %v1003_v2 }
0x1227   :  { %v1021_v36 = vpack.c.bf16 %v8213_v38, %v8213_v38 }
0x1229   :  { %1065 = vrot.lane.b32.xlu1 %v1021_v36, %s7768_s9 }
0x1263   :  { %v1085_v20 = vpop.permute.xlu2 %1084 }
0x1264   :  { %6219 = vmatmul.msk.bf16.vlgmr.msra.gmra.mxu3 %vm287_vm1, %v1085_v20  ;;  %6220 = vmatmul.msk.bf16.vlgmr.msra.gmra.mxu1 %vm287_vm1, %v1085_v20 }
0x1265   :  { %1298 = vmatpush.bf16.msra.mxu3 %v7917_v19  ;;  %1380 = vmatpush.bf16.msra.mxu1 %v7965_v34 }
0x1269   :  { %1299 = vmatpush.bf16.msra.mxu3 %v7941_v27  ;;  %1381 = vmatpush.bf16.msra.mxu1 %v7971_v35 }
0x129b   :  { %v1066_v37 = vpop.permute.xlu1 %1065 }
0x129c   :  { %6218 = vmatmul.msk.bf16.vlgmr.msrb.gmra.mxu2 %vm287_vm1, %v1066_v37 }
0x129d   :  { %1279 = vmatpush.bf16.msrb.mxu2 %v7965_v34 }
0x12a1   :  { %1280 = vmatpush.bf16.msrb.mxu2 %v7971_v35 }
0x12e1   :  { %v1139_v22 = vpop.f32.mrf.mxu1 }
0x12e2   :  { %v1143_v25 = vadd.f32 %v1139_v22, %v232_v23  ;;  %v8285_v22 = vld [vmem:[%s10428_s7] ss:$0 sm:$0xff] }
0x12e4   :  { %7598 = vtanh.f32 %v1143_v25 }
0x12e7   :  { %v1098_v19 = vpop.f32.mrf.mxu3 }
0x12e9   :  { %v1141_v26 = vpop.f32.mrf.mxu1 }
0x12ea   :  { %v7599_v21 = vpop.eup %7598 }
0x12eb   :  { %v1145_v29 = vmul.f32 %v7599_v21, %v7900_v10 }
0x12ed   :  { %v1146_v39 = vadd.f32 %v7905_v12, %v1145_v29 }
0x12ef   :  { %1149 = vrot.lane.b32.xlu1 %v1146_v39, %s7765_s21  ;;  %v1100_v47 = vpop.f32.mrf.mxu3  ;;  %v1147_v63 = vmul.f32 %v1146_v39, %v1056_v41 }
0x131f   :  { %v1079_v1 = vpop.f32.mrf.mxu2 }
0x1320   :  { %v1099_v34 = vadd.f32 %v1098_v19, %v1079_v1  ;;  %v8291_v19 = vld [vmem:[%s10429_s8] ss:$0 sm:$0xff] }
0x1322   :  { %v1102_v35 = vadd.f32 %v8029_v60, %v1099_v34 }
0x1324   :  { %7600 = vtanh.f32 %v1102_v35 }
0x1327   :  { %v1081_v54 = vpop.f32.mrf.mxu2 }
0x132a   :  { %v7601_v5 = vpop.eup %7600 }
0x132b   :  { %v1104_v45 = vmul.f32 %v7601_v5, %v7900_v10 }
0x132d   :  { %v1105_v3 = vadd.f32 %v7905_v12, %v1104_v45 }
0x132f   :  { %1108 = vrot.lane.b32.xlu0 %v1105_v3, %s7765_s21  ;;  %v1106_v10 = vmul.f32 %v1105_v3, %v1014_v13  ;;  %v8257_v13 = vld [vmem:[%s10425_s4 + $0x8] sm:$0xff] }
0x1361   :  { %v1150_v56 = vpop.permute.xlu1 %1149 }
0x1362   :  { %v1152_v59 = vmul.f32 %v1150_v56, %v1146_v39 }
0x1364   :  { %1154 = vrot.lane.b32.xlu0 %v1152_v59, %s7768_s9 }
0x13a1   :  { %v1109_v61 = vpop.permute.xlu0 %1108 }
0x13a2   :  { %v1111_v62 = vmul.f32 %v1109_v61, %v1105_v3 }
0x13a4   :  { %1113 = vrot.lane.b32.xlu2 %v1111_v62, %s7768_s9 }
0x13d6   :  { %v1155_v44 = vpop.permute.xlu0 %1154 }
0x13d7   :  { %v1157_v0 = vadd.f32 %v1155_v44, %v1147_v63 }
0x13d9   :  { %7602 = vtanh.f32 %v1157_v0 }
0x13df   :  { %v7603_v2 = vpop.eup %7602 }
0x13e0   :  { %1160 = vrot.lane.b32.xlu2 %v7603_v2, %s7765_s21 }
0x13fe   :  { %v1114_v4 = vpop.permute.xlu2 %1113 }
0x13ff   :  { %v1116_v12 = vadd.f32 %v1114_v4, %v1106_v10 }
0x1401   :  { %7604 = vtanh.f32 %v1116_v12 }
0x1407   :  { %v7605_v43 = vpop.eup %7604 }
0x1408   :  { %1119 = vrot.lane.b32.xlu1 %v7605_v43, %s7765_s21 }
0x143a   :  { %v1161_v6 = vpop.permute.xlu2 %1160 }
0x143b   :  { %v1163_v42 = vmul.f32 %v1161_v6, %v1146_v39 }
0x143d   :  { %v1164_v7 = vpack.c.bf16 %v1163_v42, %v1163_v42 }
0x143f   :  { %1185 = vrot.lane.b32.xlu1 %v1164_v7, %s7768_s9  ;;  %v8314_v7 = vld [vmem:[%s10426_s5 + $0x8] sm:$0xff] }
0x147a   :  { %v1120_v8 = vpop.permute.xlu1 %1119 }
0x147b   :  { %v8241_v41 = vmul.f32 %v1120_v8, %v1105_v3  ;;  %v8321_v8 = vld [vmem:[%s10426_s5] sm:$0xff] }
0x147d   :  { %v1123_v40 = vpack.c.bf16 %v8241_v41, %v8241_v41 }
0x147f   :  { %1166 = vrot.lane.b32.xlu0 %v1123_v40, %s7768_s9 }
0x14b1   :  { %v1186_v9 = vpop.permute.xlu1 %1185 }
0x14b2   :  { %6222 = vmatmul.msk.bf16.vlgmr.msrb.gmra.mxu3 %vm287_vm1, %v1186_v9  ;;  %6223 = vmatmul.msk.bf16.vlgmr.msrb.gmra.mxu1 %vm287_vm1, %v1186_v9  ;;  %v237_v9 = vadd.f32 %v8278_v31, %v8004_v48 }
0x14b3   :  { %1441 = vmatpush.bf16.msrb.mxu3 %v8251_v11  ;;  %1501 = vmatpush.bf16.msrb.mxu1 %v8257_v13 }
0x14b7   :  { %1442 = vmatpush.bf16.msrb.mxu3 %v8263_v15  ;;  %1502 = vmatpush.bf16.msrb.mxu1 %v7941_v27  ;;  %v234_v27 = vadd.f32 %v8278_v31, %v8000_v46 }
0x14f1   :  { %v1167_v17 = vpop.permute.xlu0 %1166 }
0x14f2   :  { %6221 = vmatmul.msk.bf16.vlgmr.msra.gmra.mxu2 %vm287_vm1, %v1167_v17 }
0x14f3   :  { %1399 = vmatpush.bf16.msra.mxu2 %v8257_v13 }
0x14f7   :  { %1400 = vmatpush.bf16.msra.mxu2 %v8272_v30 }
0x152f   :  { %v1241_v33 = vpop.f32.mrf.mxu1 }
0x1530   :  { %v1245_v36 = vadd.f32 %v1241_v33, %v234_v27 }
0x1532   :  { %7606 = vtanh.f32 %v1245_v36 }
0x1535   :  { %v1199_v20 = vpop.f32.mrf.mxu3 }
0x1537   :  { %v1243_v37 = vpop.f32.mrf.mxu1 }
0x1538   :  { %v7607_v23 = vpop.eup %7606 }
0x1539   :  { %v1247_v25 = vmul.f32 %v8285_v22, %v7607_v23 }
0x153b   :  { %v1248_v46 = vadd.f32 %v8291_v19, %v1247_v25 }
0x153d   :  { %1251 = vrot.lane.b32.xlu0 %v1248_v46, %s7765_s21  ;;  %v1201_v26 = vpop.f32.mrf.mxu3  ;;  %v1249_v56 = vmul.f32 %v1248_v46, %v1157_v0 }
0x1575   :  { %v1180_v21 = vpop.f32.mrf.mxu2 }
0x1576   :  { %v1200_v29 = vadd.f32 %v1199_v20, %v1180_v21  ;;  %v8336_v21 = vld [vmem:[%s10427_s6] ss:$0 sm:$0xff] }
0x1578   :  { %v1203_v39 = vadd.f32 %v8029_v60, %v1200_v29 }
0x157a   :  { %7608 = vtanh.f32 %v1203_v39 }
0x157d   :  { %v1182_v47 = vpop.f32.mrf.mxu2 }
0x1580   :  { %v7609_v1 = vpop.eup %7608 }
0x1581   :  { %v1205_v34 = vmul.f32 %v8285_v22, %v7609_v1 }
0x1583   :  { %v1206_v35 = vadd.f32 %v8291_v19, %v1205_v34 }
0x1585   :  { %1209 = vrot.lane.b32.xlu2 %v1206_v35, %s7765_s21  ;;  %v1207_v62 = vmul.f32 %v1206_v35, %v1116_v12 }
0x15af   :  { %v1252_v54 = vpop.permute.xlu0 %1251 }
0x15b0   :  { %v1254_v5 = vmul.f32 %v1252_v54, %v1248_v46 }
0x15b2   :  { %1256 = vrot.lane.b32.xlu2 %v1254_v5, %s7768_s9 }
0x15df   :  { %v1210_v45 = vpop.permute.xlu2 %1209 }
0x15e0   :  { %v1212_v3 = vmul.f32 %v1210_v45, %v1206_v35 }
0x15e2   :  { %1214 = vrot.lane.b32.xlu1 %v1212_v3, %s7768_s9 }
0x160c   :  { %v1257_v59 = vpop.permute.xlu2 %1256 }
0x160d   :  { %v1259_v60 = vadd.f32 %v1257_v59, %v1249_v56 }
0x160f   :  { %7610 = vtanh.f32 %v1259_v60 }
0x1615   :  { %v7611_v61 = vpop.eup %7610 }
0x1616   :  { %1262 = vrot.lane.b32.xlu1 %v7611_v61, %s7765_s21 }
0x1654   :  { %v1215_v63 = vpop.permute.xlu1 %1214 }
0x1655   :  { %v1217_v44 = vadd.f32 %v1215_v63, %v1207_v62 }
0x1657   :  { %7612 = vtanh.f32 %v1217_v44 }
0x165d   :  { %v7613_v2 = vpop.eup %7612 }
0x165e   :  { %1220 = vrot.lane.b32.xlu0 %v7613_v2, %s7765_s21 }
0x1688   :  { %v1263_v10 = vpop.permute.xlu1 %1262 }
0x1689   :  { %v1265_v4 = vmul.f32 %v1263_v10, %v1248_v46 }
0x168b   :  { %v1266_v43 = vpack.c.bf16 %v1265_v4, %v1265_v4 }
0x168d   :  { %1287 = vrot.lane.b32.xlu0 %v1266_v43, %s7768_s9 }
0x16d0   :  { %v1221_v6 = vpop.permute.xlu0 %1220 }
0x16d1   :  { %v8304_v0 = vmul.f32 %v1221_v6, %v1206_v35 }
0x16d3   :  { %v1224_v42 = vpack.c.bf16 %v8304_v0, %v8304_v0 }
0x16d5   :  { %1268 = vrot.lane.b32.xlu2 %v1224_v42, %s7768_s9 }
0x16ff   :  { %v1288_v12 = vpop.permute.xlu0 %1287 }
0x1700   :  { %6225 = vmatmul.msk.bf16.vlgmr.msra.gmra.mxu3 %vm287_vm1, %v1288_v12  ;;  %6226 = vmatmul.msk.bf16.vlgmr.msra.gmra.mxu0 %vm287_vm1, %v1288_v12 }
0x1701   :  { %1583 = vmatpush.bf16.msra.mxu3 %v8314_v7  ;;  %1602 = vmatpush.bf16.msra.mxu0 %v8257_v13 }
0x1705   :  { %1584 = vmatpush.bf16.msra.mxu3 %v8321_v8  ;;  %1603 = vmatpush.bf16.msra.mxu0 %v8272_v30 }
0x172f   :  { %v1269_v40 = vpop.permute.xlu2 %1268 }
0x1730   :  { %6224 = vmatmul.msk.bf16.vlgmr.msrb.gmra.mxu2 %vm287_vm1, %v1269_v40  ;;  %v239_v40 = vadd.f32 %v8278_v31, %v8010_v49 }
0x1731   :  { %1542 = vmatpush.bf16.msrb.mxu2 %v8251_v11 }
0x1735   :  { %1543 = vmatpush.bf16.msrb.mxu2 %v8263_v15 }
0x177d   :  { %v1342_v17 = vpop.f32.mrf.mxu0 }
0x177e   :  { %v1346_v27 = vadd.f32 %v1342_v17, %v237_v9 }
0x1780   :  { %7614 = vtanh.f32 %v1346_v27 }
0x1783   :  { %v1301_v33 = vpop.f32.mrf.mxu3 }
0x1785   :  { %v1344_v36 = vpop.f32.mrf.mxu0 }
0x1786   :  { %v7615_v20 = vpop.eup %7614 }
0x1787   :  { %v1348_v37 = vmul.f32 %v8285_v22, %v7615_v20 }
0x1789   :  { %v1349_v23 = vadd.f32 %v8291_v19, %v1348_v37 }
0x178b   :  { %1352 = vrot.lane.b32.xlu1 %v1349_v23, %s7765_s21  ;;  %v1303_v25 = vpop.f32.mrf.mxu3  ;;  %v1350_v45 = vmul.f32 %v1349_v23, %v1259_v60 }
0x17b3   :  { %v1282_v46 = vpop.f32.mrf.mxu2 }
0x17b4   :  { %v1302_v26 = vadd.f32 %v1301_v33, %v1282_v46 }
0x17b6   :  { %v1305_v48 = vadd.f32 %v8336_v21, %v1302_v26 }
0x17b8   :  { %7616 = vtanh.f32 %v1305_v48 }
0x17bb   :  { %v1284_v29 = vpop.f32.mrf.mxu2 }
0x17be   :  { %v7617_v39 = vpop.eup %7616 }
0x17bf   :  { %v1307_v47 = vmul.f32 %v8285_v22, %v7617_v39 }
0x17c1   :  { %v1308_v1 = vadd.f32 %v8291_v19, %v1307_v47 }
0x17c3   :  { %1311 = vrot.lane.b32.xlu2 %v1308_v1, %s7765_s21  ;;  %v1309_v61 = vmul.f32 %v1308_v1, %v1217_v44 }
0x17fd   :  { %v1353_v34 = vpop.permute.xlu1 %1352 }
0x17fe   :  { %v1355_v35 = vmul.f32 %v1353_v34, %v1349_v23 }
0x1800   :  { %1357 = vrot.lane.b32.xlu0 %v1355_v35, %s7768_s9 }
0x181d   :  { %v1312_v54 = vpop.permute.xlu2 %1311 }
0x181e   :  { %v1314_v5 = vmul.f32 %v1312_v54, %v1308_v1 }
0x1820   :  { %1316 = vrot.lane.b32.xlu1 %v1314_v5, %s7768_s9 }
0x1872   :  { %v1358_v3 = vpop.permute.xlu0 %1357 }
0x1873   :  { %v1360_v56 = vadd.f32 %v1358_v3, %v1350_v45 }
0x1875   :  { %7618 = vtanh.f32 %v1360_v56 }
0x187b   :  { %v7619_v59 = vpop.eup %7618 }
0x187c   :  { %1363 = vrot.lane.b32.xlu2 %v7619_v59, %s7765_s21 }
0x1892   :  { %v1317_v62 = vpop.permute.xlu1 %1316 }
0x1893   :  { %v1319_v63 = vadd.f32 %v1317_v62, %v1309_v61 }
0x1895   :  { %7620 = vtanh.f32 %v1319_v63 }
0x189b   :  { %v7621_v2 = vpop.eup %7620 }
0x189c   :  { %1322 = vrot.lane.b32.xlu0 %v7621_v2, %s7765_s21 }
0x18d6   :  { %v1364_v10 = vpop.permute.xlu2 %1363 }
0x18d7   :  { %v1366_v4 = vmul.f32 %v1364_v10, %v1349_v23 }
0x18d9   :  { %v1367_v43 = vpack.c.bf16 %v1366_v4, %v1366_v4 }
0x18db   :  { %1388 = vrot.lane.b32.xlu1 %v1367_v43, %s7768_s9 }
0x190e   :  { %v1323_v6 = vpop.permute.xlu0 %1322 }
0x190f   :  { %v8347_v60 = vmul.f32 %v1323_v6, %v1308_v1 }
0x1911   :  { %v1326_v42 = vpack.c.bf16 %v8347_v60, %v8347_v60 }
0x1913   :  { %1369 = vrot.lane.b32.xlu2 %v1326_v42, %s7768_s9 }
0x194d   :  { %v1389_v44 = vpop.permute.xlu1 %1388 }
0x194e   :  { %6228 = vmatmul.msk.bf16.vlgmr.msra.gmra.mxu2 %vm287_vm1, %v1389_v44  ;;  %6229 = vmatmul.msk.bf16.vlgmr.msrb.gmra.mxu3 %vm287_vm1, %v1389_v44 }
0x194f   :  { %1704 = vmatpush.bf16.msrb.mxu3 %v8257_v13  ;;  %1685 = vmatpush.bf16.msra.mxu2 %v8314_v7 }
0x1953   :  { %1705 = vmatpush.bf16.msrb.mxu3 %v8272_v30  ;;  %1686 = vmatpush.bf16.msra.mxu2 %v8321_v8 }
0x196d   :  { %v1370_v12 = vpop.permute.xlu2 %1369 }
0x196e   :  { %6227 = vmatmul.msk.bf16.vlgmr.msra.gmra.mxu1 %vm287_vm1, %v1370_v12 }
0x196f   :  { %1644 = vmatpush.bf16.msra.mxu1 %v8251_v11 }
0x1973   :  { %1645 = vmatpush.bf16.msra.mxu1 %v8263_v15 }
0x19d1   :  { %v1402_v9 = vpop.f32.mrf.mxu2  ;;  %v1444_v17 = vpop.f32.mrf.mxu3 }
0x19d2   :  { %v1448_v27 = vadd.f32 %v1444_v17, %v239_v40  ;;  %v242_v40 = vadd.f32 %v8278_v31, %v8012_v50 }
0x19d4   :  { %7622 = vtanh.f32 %v1448_v27 }
0x19d9   :  { %v1404_v33 = vpop.f32.mrf.mxu2  ;;  %v1446_v36 = vpop.f32.mrf.mxu3 }
0x19da   :  { %v7623_v20 = vpop.eup %7622 }
0x19db   :  { %v1450_v37 = vmul.f32 %v8285_v22, %v7623_v20 }
0x19dd   :  { %v1451_v23 = vadd.f32 %v8291_v19, %v1450_v37 }
0x19df   :  { %1454 = vrot.lane.b32.xlu1 %v1451_v23, %s7765_s21  ;;  %v1452_v54 = vmul.f32 %v1451_v23, %v1360_v56 }
0x19eb   :  { %v1383_v25 = vpop.f32.mrf.mxu1 }
0x19ec   :  { %v1403_v46 = vadd.f32 %v1402_v9, %v1383_v25 }
0x19ee   :  { %v1406_v26 = vadd.f32 %v8336_v21, %v1403_v46 }
0x19f0   :  { %7624 = vtanh.f32 %v1406_v26 }
0x19f3   :  { %v1385_v48 = vpop.f32.mrf.mxu1 }
0x19f6   :  { %v7625_v49 = vpop.eup %7624 }
0x19f7   :  { %v1408_v29 = vmul.f32 %v8285_v22, %v7625_v49 }
0x19f9   :  { %v1409_v39 = vadd.f32 %v8291_v19, %v1408_v29 }
0x19fb   :  { %1412 = vrot.lane.b32.xlu0 %v1409_v39, %s7765_s21  ;;  %v1410_v3 = vmul.f32 %v1409_v39, %v1319_v63 }
0x1a51   :  { %v1455_v47 = vpop.permute.xlu1 %1454 }
0x1a52   :  { %v1457_v1 = vmul.f32 %v1455_v47, %v1451_v23 }
0x1a54   :  { %1459 = vrot.lane.b32.xlu0 %v1457_v1, %s7768_s9 }
0x1a6d   :  { %v1413_v34 = vpop.permute.xlu0 %1412 }
0x1a6e   :  { %v1415_v35 = vmul.f32 %v1413_v34, %v1409_v39 }
0x1a70   :  { %1417 = vrot.lane.b32.xlu2 %v1415_v35, %s7768_s9 }
0x1ac6   :  { %v1460_v5 = vpop.permute.xlu0 %1459 }
0x1ac7   :  { %v1462_v45 = vadd.f32 %v1460_v5, %v1452_v54 }
0x1ac9   :  { %7626 = vtanh.f32 %v1462_v45 }
0x1aca   :  { %v1418_v59 = vpop.permute.xlu2 %1417 }
0x1acb   :  { %v1420_v61 = vadd.f32 %v1418_v59, %v1410_v3 }
0x1acd   :  { %7628 = vtanh.f32 %v1420_v61 }
0x1acf   :  { %v7627_v62 = vpop.eup %7626 }
0x1ad0   :  { %1465 = vrot.lane.b32.xlu2 %v7627_v62, %s7765_s21 }
0x1ad3   :  { %v7629_v2 = vpop.eup %7628 }
0x1ad4   :  { %1423 = vrot.lane.b32.xlu1 %v7629_v2, %s7765_s21 }
0x1b2a   :  { %v1466_v10 = vpop.permute.xlu2 %1465 }
0x1b2b   :  { %v1468_v4 = vmul.f32 %v1466_v10, %v1451_v23 }
0x1b2d   :  { %v1469_v43 = vpack.c.bf16 %v1468_v4, %v1468_v4 }
0x1b2f   :  { %1490 = vrot.lane.b32.xlu1 %v1469_v43, %s7768_s9 }
0x1b46   :  { %v1424_v6 = vpop.permute.xlu1 %1423 }
0x1b47   :  { %v8375_v56 = vmul.f32 %v1424_v6, %v1409_v39 }
0x1b49   :  { %v1427_v63 = vpack.c.bf16 %v8375_v56, %v8375_v56 }
0x1b4b   :  { %1471 = vrot.lane.b32.xlu0 %v1427_v63, %s7768_s9 }
0x1ba1   :  { %v1491_v42 = vpop.permute.xlu1 %1490 }
0x1ba2   :  { %6231 = vmatmul.msk.bf16.vlgmr.msrb.gmra.mxu1 %vm287_vm1, %v1491_v42  ;;  %6232 = vmatmul.msk.bf16.vlgmr.msrb.gmra.mxu2 %vm287_vm1, %v1491_v42 }
0x1ba3   :  { %1805 = vmatpush.bf16.msrb.mxu2 %v8257_v13  ;;  %1786 = vmatpush.bf16.msrb.mxu1 %v8314_v7 }
0x1ba7   :  { %1806 = vmatpush.bf16.msrb.mxu2 %v8272_v30  ;;  %1787 = vmatpush.bf16.msrb.mxu1 %v8321_v8 }
0x1bbd   :  { %v1472_v44 = vpop.permute.xlu0 %1471 }
0x1bbe   :  { %6230 = vmatmul.msk.bf16.vlgmr.msrb.gmra.mxu0 %vm287_vm1, %v1472_v44  ;;  %v244_v44 = vadd.f32 %v8278_v31, %v8014_v51 }
0x1bbf   :  { %1745 = vmatpush.bf16.msrb.mxu0 %v8251_v11 }
0x1bc3   :  { %1746 = vmatpush.bf16.msrb.mxu0 %v8263_v15 }
0x1c1f   :  { %v1504_v12 = vpop.f32.mrf.mxu1 }
0x1c25   :  { %v1545_v9 = vpop.f32.mrf.mxu2 }
0x1c26   :  { %v1549_v17 = vadd.f32 %v1545_v9, %v242_v40 }
0x1c27   :  { %v1506_v27 = vpop.f32.mrf.mxu1 }
0x1c28   :  { %7630 = vtanh.f32 %v1549_v17 }
0x1c2d   :  { %v1547_v33 = vpop.f32.mrf.mxu2 }
0x1c2e   :  { %v7631_v36 = vpop.eup %7630 }
0x1c2f   :  { %v1551_v20 = vmul.f32 %v8285_v22, %v7631_v36 }
0x1c31   :  { %v1552_v37 = vadd.f32 %v8291_v19, %v1551_v20 }
0x1c33   :  { %1555 = vrot.lane.b32.xlu0 %v1552_v37, %s7765_s21  ;;  %v1553_v34 = vmul.f32 %v1552_v37, %v1462_v45 }
0x1c3b   :  { %v1485_v23 = vpop.f32.mrf.mxu0 }
0x1c3c   :  { %v1505_v25 = vadd.f32 %v1504_v12, %v1485_v23 }
0x1c3e   :  { %v1508_v46 = vadd.f32 %v8336_v21, %v1505_v25 }
0x1c40   :  { %7632 = vtanh.f32 %v1508_v46 }
0x1c43   :  { %v1487_v26 = vpop.f32.mrf.mxu0 }
0x1c46   :  { %v7633_v48 = vpop.eup %7632 }
0x1c47   :  { %v1510_v50 = vmul.f32 %v8285_v22, %v7633_v48 }
0x1c49   :  { %v1511_v49 = vadd.f32 %v8291_v19, %v1510_v50 }
0x1c4b   :  { %1514 = vrot.lane.b32.xlu2 %v1511_v49, %s7765_s21  ;;  %v1512_v3 = vmul.f32 %v1511_v49, %v1420_v61 }
0x1ca5   :  { %v1556_v29 = vpop.permute.xlu0 %1555  ;;  %v1515_v39 = vpop.permute.xlu2 %1514 }
0x1ca6   :  { %v1558_v47 = vmul.f32 %v1556_v29, %v1552_v37  ;;  %v1517_v1 = vmul.f32 %v1515_v39, %v1511_v49 }
0x1ca8   :  { %1560 = vrot.lane.b32.xlu2 %v1558_v47, %s7768_s9  ;;  %1519 = vrot.lane.b32.xlu1 %v1517_v1, %s7768_s9 }
0x1d02   :  { %v1561_v35 = vpop.permute.xlu2 %1560 }
0x1d03   :  { %v1563_v54 = vadd.f32 %v1561_v35, %v1553_v34 }
0x1d05   :  { %7634 = vtanh.f32 %v1563_v54 }
0x1d0b   :  { %v7635_v5 = vpop.eup %7634 }
0x1d0c   :  { %1566 = vrot.lane.b32.xlu1 %v7635_v5, %s7765_s21 }
0x1d1a   :  { %v1520_v59 = vpop.permute.xlu1 %1519 }
0x1d1b   :  { %v1522_v62 = vadd.f32 %v1520_v59, %v1512_v3 }
0x1d1d   :  { %7636 = vtanh.f32 %v1522_v62 }
0x1d23   :  { %v7637_v2 = vpop.eup %7636 }
0x1d24   :  { %1525 = vrot.lane.b32.xlu0 %v7637_v2, %s7765_s21 }
0x1d7e   :  { %v1567_v10 = vpop.permute.xlu1 %1566 }
0x1d7f   :  { %v1569_v4 = vmul.f32 %v1567_v10, %v1552_v37 }
0x1d81   :  { %v1570_v43 = vpack.c.bf16 %v1569_v4, %v1569_v4 }
0x1d83   :  { %1591 = vrot.lane.b32.xlu0 %v1570_v43, %s7768_s9 }
0x1d96   :  { %v1526_v6 = vpop.permute.xlu0 %1525 }
0x1d97   :  { %v8403_v45 = vmul.f32 %v1526_v6, %v1511_v49 }
0x1d99   :  { %v1529_v63 = vpack.c.bf16 %v8403_v45, %v8403_v45 }
0x1d9b   :  { %1572 = vrot.lane.b32.xlu2 %v1529_v63, %s7768_s9 }
0x1df5   :  { %v1573_v61 = vpop.permute.xlu2 %1572  ;;  %v1592_v42 = vpop.permute.xlu0 %1591 }
0x1df6   :  { %6233 = vmatmul.msk.bf16.vlgmr.msra.gmra.mxu3 %vm287_vm1, %v1573_v61  ;;  %6234 = vmatmul.msk.bf16.vlgmr.msra.gmra.mxu0 %vm287_vm1, %v1592_v42 }
0x1df7   :  { %6235 = vmatmul.msk.bf16.vlgmr.msra.gmra.mxu1 %vm287_vm1, %v1592_v42  ;;  %1847 = vmatpush.bf16.msra.mxu3 %v8251_v11  ;;  %v247_v42 = vadd.f32 %v8278_v31, %v8016_v52 }
0x1df8   :  { %1907 = vmatpush.bf16.msra.mxu1 %v8257_v13  ;;  %1888 = vmatpush.bf16.msra.mxu0 %v8314_v7 }
0x1dfb   :  { %1848 = vmatpush.bf16.msra.mxu3 %v8263_v15 }
0x1dfc   :  { %1908 = vmatpush.bf16.msra.mxu1 %v8272_v30  ;;  %1889 = vmatpush.bf16.msra.mxu0 %v8321_v8 }
0x1e73   :  { %v1605_v12 = vpop.f32.mrf.mxu0 }
0x1e74   :  { %v1647_v40 = vpop.f32.mrf.mxu1 }
0x1e75   :  { %v1651_v9 = vadd.f32 %v1647_v40, %v244_v44 }
0x1e77   :  { %7638 = vtanh.f32 %v1651_v9 }
0x1e79   :  { %v1586_v17 = vpop.f32.mrf.mxu3 }
0x1e7a   :  { %v1606_v27 = vadd.f32 %v1605_v12, %v1586_v17 }
0x1e7b   :  { %v1607_v33 = vpop.f32.mrf.mxu0 }
0x1e7c   :  { %v1609_v36 = vadd.f32 %v8336_v21, %v1606_v27  ;;  %v1649_v20 = vpop.f32.mrf.mxu1 }
0x1e7d   :  { %v7639_v37 = vpop.eup %7638 }
0x1e7e   :  { %v1653_v23 = vmul.f32 %v8285_v22, %v7639_v37  ;;  %7640 = vtanh.f32 %v1609_v36 }
0x1e80   :  { %v1654_v25 = vadd.f32 %v8291_v19, %v1653_v23 }
0x1e81   :  { %v1588_v46 = vpop.f32.mrf.mxu3 }
0x1e82   :  { %1657 = vrot.lane.b32.xlu2 %v1654_v25, %s7765_s21  ;;  %v1655_v47 = vmul.f32 %v1654_v25, %v1563_v54 }
0x1e84   :  { %v7641_v51 = vpop.eup %7640 }
0x1e85   :  { %v1611_v26 = vmul.f32 %v8285_v22, %v7641_v51 }
0x1e87   :  { %v1612_v48 = vadd.f32 %v8291_v19, %v1611_v26 }
0x1e89   :  { %1615 = vrot.lane.b32.xlu1 %v1612_v48, %s7765_s21  ;;  %v1613_v5 = vmul.f32 %v1612_v48, %v1522_v62 }
0x1edc   :  { %v1658_v50 = vpop.permute.xlu2 %1657 }
0x1edd   :  { %v1660_v49 = vmul.f32 %v1658_v50, %v1654_v25 }
0x1edf   :  { %1662 = vrot.lane.b32.xlu1 %v1660_v49, %s7768_s9 }
0x1efb   :  { %v1616_v29 = vpop.permute.xlu1 %1615 }
0x1efc   :  { %v1618_v39 = vmul.f32 %v1616_v29, %v1612_v48 }
0x1efe   :  { %1620 = vrot.lane.b32.xlu0 %v1618_v39, %s7768_s9 }
0x1f51   :  { %v1663_v1 = vpop.permute.xlu1 %1662 }
0x1f52   :  { %v1665_v34 = vadd.f32 %v1663_v1, %v1655_v47 }
0x1f54   :  { %7642 = vtanh.f32 %v1665_v34 }
0x1f5a   :  { %v7643_v35 = vpop.eup %7642 }
0x1f5b   :  { %1668 = vrot.lane.b32.xlu0 %v7643_v35, %s7765_s21 }
0x1f70   :  { %v1621_v3 = vpop.permute.xlu0 %1620 }
0x1f71   :  { %v1623_v59 = vadd.f32 %v1621_v3, %v1613_v5 }
0x1f73   :  { %7644 = vtanh.f32 %v1623_v59 }
0x1f79   :  { %v7645_v2 = vpop.eup %7644 }
0x1f7a   :  { %1626 = vrot.lane.b32.xlu2 %v7645_v2, %s7765_s21 }
0x1fcd   :  { %v1669_v10 = vpop.permute.xlu0 %1668 }
0x1fce   :  { %v1671_v4 = vmul.f32 %v1669_v10, %v1654_v25 }
0x1fd0   :  { %v1672_v43 = vpack.c.bf16 %v1671_v4, %v1671_v4 }
0x1fd2   :  { %1693 = vrot.lane.b32.xlu2 %v1672_v43, %s7768_s9 }
0x1fd4   :  { %v1627_v6 = vpop.permute.xlu2 %1626 }
0x1fd5   :  { %v8431_v54 = vmul.f32 %v1627_v6, %v1612_v48 }
0x1fd7   :  { %v1630_v63 = vpack.c.bf16 %v8431_v54, %v8431_v54 }
0x1fd9   :  { %1674 = vrot.lane.b32.xlu1 %v1630_v63, %s7768_s9 }
0x202c   :  { %v1694_v62 = vpop.permute.xlu2 %1693 }
0x202d   :  { %6237 = vmatmul.msk.bf16.vlgmr.msrb.gmra.mxu3 %vm287_vm1, %v1694_v62  ;;  %6238 = vmatmul.msk.bf16.vlgmr.msrb.gmra.mxu0 %vm287_vm1, %v1694_v62 }
0x202e   :  { %2008 = vmatpush.bf16.msrb.mxu0 %v8257_v13  ;;  %1989 = vmatpush.bf16.msrb.mxu3 %v8314_v7 }
0x2032   :  { %2009 = vmatpush.bf16.msrb.mxu0 %v8272_v30  ;;  %1990 = vmatpush.bf16.msrb.mxu3 %v8321_v8 }
0x204b   :  { %v1675_v61 = vpop.permute.xlu1 %1674 }
0x204c   :  { %6236 = vmatmul.msk.bf16.vlgmr.msra.gmra.mxu2 %vm287_vm1, %v1675_v61  ;;  %v249_v61 = vadd.f32 %v8278_v31, %v8018_v53 }
0x204d   :  { %1948 = vmatpush.bf16.msra.mxu2 %v8251_v11 }
0x2051   :  { %1949 = vmatpush.bf16.msra.mxu2 %v8263_v15 }
0x20aa   :  { %v1748_v44 = vpop.f32.mrf.mxu0 }
0x20ab   :  { %v1752_v12 = vadd.f32 %v1748_v44, %v247_v42 }
0x20ad   :  { %7646 = vtanh.f32 %v1752_v12 }
0x20b0   :  { %v1707_v40 = vpop.f32.mrf.mxu3 }
0x20b2   :  { %v1750_v9 = vpop.f32.mrf.mxu0 }
0x20b3   :  { %v7647_v17 = vpop.eup %7646 }
0x20b4   :  { %v1754_v27 = vmul.f32 %v8285_v22, %v7647_v17 }
0x20b6   :  { %v1755_v33 = vadd.f32 %v8291_v19, %v1754_v27 }
0x20b8   :  { %1758 = vrot.lane.b32.xlu0 %v1755_v33, %s7765_s21  ;;  %v1709_v36 = vpop.f32.mrf.mxu3  ;;  %v1756_v29 = vmul.f32 %v1755_v33, %v1665_v34 }
0x20cf   :  { %v1688_v20 = vpop.f32.mrf.mxu2 }
0x20d0   :  { %v1708_v37 = vadd.f32 %v1707_v40, %v1688_v20 }
0x20d2   :  { %v1711_v23 = vadd.f32 %v8336_v21, %v1708_v37 }
0x20d4   :  { %7648 = vtanh.f32 %v1711_v23 }
0x20d7   :  { %v1690_v25 = vpop.f32.mrf.mxu2 }
0x20da   :  { %v7649_v52 = vpop.eup %7648 }
0x20db   :  { %v1713_v46 = vmul.f32 %v8285_v22, %v7649_v52 }
0x20dd   :  { %v1714_v51 = vadd.f32 %v8291_v19, %v1713_v46 }
0x20df   :  { %1717 = vrot.lane.b32.xlu1 %v1714_v51, %s7765_s21  ;;  %v1715_v35 = vmul.f32 %v1714_v51, %v1623_v59 }
0x212a   :  { %v1759_v26 = vpop.permute.xlu0 %1758 }
0x212b   :  { %v1761_v48 = vmul.f32 %v1759_v26, %v1755_v33 }
0x212d   :  { %1763 = vrot.lane.b32.xlu2 %v1761_v48, %s7768_s9 }
0x2151   :  { %v1718_v50 = vpop.permute.xlu1 %1717 }
0x2152   :  { %v1720_v49 = vmul.f32 %v1718_v50, %v1714_v51 }
0x2154   :  { %1722 = vrot.lane.b32.xlu0 %v1720_v49, %s7768_s9 }
0x2187   :  { %v1764_v39 = vpop.permute.xlu2 %1763 }
0x2188   :  { %v1766_v47 = vadd.f32 %v1764_v39, %v1756_v29 }
0x218a   :  { %7650 = vtanh.f32 %v1766_v47 }
0x2190   :  { %v7651_v1 = vpop.eup %7650 }
0x2191   :  { %1769 = vrot.lane.b32.xlu1 %v7651_v1, %s7765_s21 }
0x21c6   :  { %v1723_v5 = vpop.permute.xlu0 %1722 }
0x21c7   :  { %v1725_v3 = vadd.f32 %v1723_v5, %v1715_v35 }
0x21c9   :  { %7652 = vtanh.f32 %v1725_v3 }
0x21cf   :  { %v7653_v2 = vpop.eup %7652 }
0x21d0   :  { %1728 = vrot.lane.b32.xlu2 %v7653_v2, %s7765_s21 }
0x2203   :  { %v1770_v10 = vpop.permute.xlu1 %1769 }
0x2204   :  { %v1772_v4 = vmul.f32 %v1770_v10, %v1755_v33 }
0x2206   :  { %v1773_v43 = vpack.c.bf16 %v1772_v4, %v1772_v4 }
0x2208   :  { %1794 = vrot.lane.b32.xlu0 %v1773_v43, %s7768_s9 }
0x222a   :  { %v1729_v6 = vpop.permute.xlu2 %1728 }
0x222b   :  { %v8459_v34 = vmul.f32 %v1729_v6, %v1714_v51 }
0x222d   :  { %v1732_v63 = vpack.c.bf16 %v8459_v34, %v8459_v34 }
0x222f   :  { %1775 = vrot.lane.b32.xlu1 %v1732_v63, %s7768_s9 }
0x227a   :  { %v1795_v59 = vpop.permute.xlu0 %1794 }
0x227b   :  { %6240 = vmatmul.msk.bf16.vlgmr.msrb.gmra.mxu2 %vm287_vm1, %v1795_v59  ;;  %6241 = vmatmul.msk.bf16.vlgmr.msra.gmra.mxu3 %vm287_vm1, %v1795_v59 }
0x227c   :  { %2109 = vmatpush.bf16.msra.mxu3 %v8257_v13  ;;  %2090 = vmatpush.bf16.msrb.mxu2 %v8314_v7 }
0x2280   :  { %2110 = vmatpush.bf16.msra.mxu3 %v8272_v30  ;;  %2091 = vmatpush.bf16.msrb.mxu2 %v8321_v8 }
0x22a1   :  { %v1776_v62 = vpop.permute.xlu1 %1775 }
0x22a2   :  { %6239 = vmatmul.msk.bf16.vlgmr.msrb.gmra.mxu1 %vm287_vm1, %v1776_v62 }
0x22a3   :  { %2049 = vmatpush.bf16.msrb.mxu1 %v8251_v11 }
0x22a7   :  { %2050 = vmatpush.bf16.msrb.mxu1 %v8263_v15 }
0x22fe   :  { %v1808_v42 = vpop.f32.mrf.mxu2  ;;  %v1850_v44 = vpop.f32.mrf.mxu3 }
0x22ff   :  { %v1854_v12 = vadd.f32 %v1850_v44, %v249_v61  ;;  %v252_v61 = vadd.f32 %v8278_v31, %v8020_v55 }
0x2301   :  { %7654 = vtanh.f32 %v1854_v12 }
0x2306   :  { %v1810_v40 = vpop.f32.mrf.mxu2  ;;  %v1852_v9 = vpop.f32.mrf.mxu3 }
0x2307   :  { %v7655_v17 = vpop.eup %7654 }
0x2308   :  { %v1856_v27 = vmul.f32 %v8285_v22, %v7655_v17 }
0x230a   :  { %v1857_v33 = vadd.f32 %v8291_v19, %v1856_v27 }
0x230c   :  { %1860 = vrot.lane.b32.xlu0 %v1857_v33, %s7765_s21  ;;  %v1858_v50 = vmul.f32 %v1857_v33, %v1766_v47 }
0x231f   :  { %v1789_v36 = vpop.f32.mrf.mxu1 }
0x2320   :  { %v1809_v20 = vadd.f32 %v1808_v42, %v1789_v36 }
0x2322   :  { %v1812_v37 = vadd.f32 %v8336_v21, %v1809_v20 }
0x2324   :  { %7656 = vtanh.f32 %v1812_v37 }
0x2327   :  { %v1791_v23 = vpop.f32.mrf.mxu1 }
0x232a   :  { %v7657_v53 = vpop.eup %7656 }
0x232b   :  { %v1814_v25 = vmul.f32 %v8285_v22, %v7657_v53 }
0x232d   :  { %v1815_v52 = vadd.f32 %v8291_v19, %v1814_v25 }
0x232f   :  { %1818 = vrot.lane.b32.xlu2 %v1815_v52, %s7765_s21  ;;  %v1816_v1 = vmul.f32 %v1815_v52, %v1725_v3 }
0x237e   :  { %v1861_v46 = vpop.permute.xlu0 %1860 }
0x237f   :  { %v1863_v51 = vmul.f32 %v1861_v46, %v1857_v33 }
0x2381   :  { %1865 = vrot.lane.b32.xlu2 %v1863_v51, %s7768_s9 }
0x2389   :  { %v1819_v26 = vpop.permute.xlu2 %1818 }
0x238a   :  { %v1821_v48 = vmul.f32 %v1819_v26, %v1815_v52 }
0x238c   :  { %1823 = vrot.lane.b32.xlu1 %v1821_v48, %s7768_s9 }
0x23db   :  { %v1866_v49 = vpop.permute.xlu2 %1865 }
0x23dc   :  { %v1868_v29 = vadd.f32 %v1866_v49, %v1858_v50 }
0x23de   :  { %7658 = vtanh.f32 %v1868_v29 }
0x23e4   :  { %v7659_v39 = vpop.eup %7658 }
0x23e5   :  { %1871 = vrot.lane.b32.xlu1 %v7659_v39, %s7765_s21 }
0x23fe   :  { %v1824_v35 = vpop.permute.xlu1 %1823 }
0x23ff   :  { %v1826_v5 = vadd.f32 %v1824_v35, %v1816_v1 }
0x2401   :  { %7660 = vtanh.f32 %v1826_v5 }
0x2407   :  { %v7661_v2 = vpop.eup %7660 }
0x2408   :  { %1829 = vrot.lane.b32.xlu0 %v7661_v2, %s7765_s21 }
0x2457   :  { %v1872_v10 = vpop.permute.xlu1 %1871 }
0x2458   :  { %v1874_v4 = vmul.f32 %v1872_v10, %v1857_v33  ;;  %v254_v10 = vadd.f32 %v8278_v31, %v8022_v57 }
0x245a   :  { %v1875_v43 = vpack.c.bf16 %v1874_v4, %v1874_v4 }
0x245c   :  { %1896 = vrot.lane.b32.xlu0 %v1875_v43, %s7768_s9 }
0x247a   :  { %v1830_v6 = vpop.permute.xlu0 %1829 }
0x247b   :  { %v8487_v47 = vmul.f32 %v1830_v6, %v1815_v52 }
0x247d   :  { %v1833_v63 = vpack.c.bf16 %v8487_v47, %v8487_v47 }
0x247f   :  { %1877 = vrot.lane.b32.xlu2 %v1833_v63, %s7768_s9 }
0x24ce   :  { %v1897_v3 = vpop.permute.xlu0 %1896 }
0x24cf   :  { %6243 = vmatmul.msk.bf16.vlgmr.msra.gmra.mxu1 %vm287_vm1, %v1897_v3  ;;  %6244 = vmatmul.msk.bf16.vlgmr.msra.gmra.mxu2 %vm287_vm1, %v1897_v3 }
0x24d0   :  { %2190 = vmatpush.bf16.msra.mxu1 %v8314_v7  ;;  %2209 = vmatpush.bf16.msra.mxu2 %v8257_v13 }
0x24d4   :  { %2191 = vmatpush.bf16.msra.mxu1 %v8321_v8  ;;  %2210 = vmatpush.bf16.msra.mxu2 %v8272_v30 }
0x24d9   :  { %v1878_v59 = vpop.permute.xlu2 %1877 }
0x24da   :  { %6242 = vmatmul.msk.bf16.vlgmr.msra.gmra.mxu0 %vm287_vm1, %v1878_v59 }
0x24db   :  { %2149 = vmatpush.bf16.msra.mxu0 %v8251_v11 }
0x24df   :  { %2150 = vmatpush.bf16.msra.mxu0 %v8263_v15 }
0x254c   :  { %v1910_v62 = vpop.f32.mrf.mxu1 }
0x2552   :  { %v1951_v42 = vpop.f32.mrf.mxu2 }
0x2553   :  { %v1955_v44 = vadd.f32 %v1951_v42, %v252_v61 }
0x2554   :  { %v1912_v7 = vpop.f32.mrf.mxu1 }
0x2555   :  { %7662 = vtanh.f32 %v1955_v44 }
0x2557   :  { %v1891_v13 = vpop.f32.mrf.mxu0 }
0x2558   :  { %v1911_v12 = vadd.f32 %v1910_v62, %v1891_v13 }
0x255a   :  { %v1914_v8 = vadd.f32 %v8336_v21, %v1911_v12  ;;  %v1953_v30 = vpop.f32.mrf.mxu2 }
0x255b   :  { %v7663_v40 = vpop.eup %7662 }
0x255c   :  { %v1957_v9 = vmul.f32 %v8285_v22, %v7663_v40  ;;  %7664 = vtanh.f32 %v1914_v8 }
0x255e   :  { %v1958_v11 = vadd.f32 %v8291_v19, %v1957_v9 }
0x255f   :  { %v1893_v15 = vpop.f32.mrf.mxu0 }
0x2560   :  { %1961 = vrot.lane.b32.xlu2 %v1958_v11, %s7765_s21  ;;  %v1959_v23 = vmul.f32 %v1958_v11, %v1868_v29 }
0x2562   :  { %v7665_v17 = vpop.eup %7664 }
0x2563   :  { %v1916_v55 = vmul.f32 %v8285_v22, %v7665_v17 }
0x2565   :  { %v1917_v27 = vadd.f32 %v8291_v19, %v1916_v55 }
0x2567   :  { %1920 = vrot.lane.b32.xlu1 %v1917_v27, %s7765_s21  ;;  %v1918_v46 = vmul.f32 %v1917_v27, %v1826_v5 }
0x25ba   :  { %v1962_v33 = vpop.permute.xlu2 %1961 }
0x25bb   :  { %v1964_v36 = vmul.f32 %v1962_v33, %v1958_v11 }
0x25bd   :  { %1966 = vrot.lane.b32.xlu1 %v1964_v36, %s7768_s9 }
0x25d9   :  { %v1921_v20 = vpop.permute.xlu1 %1920 }
0x25da   :  { %v1923_v37 = vmul.f32 %v1921_v20, %v1917_v27 }
0x25dc   :  { %1925 = vrot.lane.b32.xlu0 %v1923_v37, %s7768_s9 }
0x262f   :  { %v1967_v53 = vpop.permute.xlu1 %1966 }
0x2630   :  { %v1969_v25 = vadd.f32 %v1967_v53, %v1959_v23 }
0x2632   :  { %7666 = vtanh.f32 %v1969_v25 }
0x2638   :  { %v7667_v52 = vpop.eup %7666 }
0x2639   :  { %1972 = vrot.lane.b32.xlu0 %v7667_v52, %s7765_s21 }
0x264e   :  { %v1926_v51 = vpop.permute.xlu0 %1925 }
0x264f   :  { %v1928_v26 = vadd.f32 %v1926_v51, %v1918_v46 }
0x2651   :  { %7668 = vtanh.f32 %v1928_v26 }
0x2657   :  { %v7669_v48 = vpop.eup %7668 }
0x2658   :  { %1931 = vrot.lane.b32.xlu2 %v7669_v48, %s7765_s21 }
0x26ab   :  { %v1973_v50 = vpop.permute.xlu0 %1972 }
0x26ac   :  { %v1975_v49 = vmul.f32 %v1973_v50, %v1958_v11  ;;  %v257_v50 = vadd.f32 %v8278_v31, %v8024_v58 }
0x26ae   :  { %v1976_v39 = vpack.c.bf16 %v1975_v49, %v1975_v49 }
0x26b0   :  { %1997 = vrot.lane.b32.xlu2 %v1976_v39, %s7768_s9 }
0x26b2   :  { %v1932_v1 = vpop.permute.xlu2 %1931 }
0x26b3   :  { %v8515_v29 = vmul.f32 %v1932_v1, %v1917_v27 }
0x26b5   :  { %v1935_v35 = vpack.c.bf16 %v8515_v29, %v8515_v29 }
0x26b7   :  { %1978 = vrot.lane.b32.xlu1 %v1935_v35, %s7768_s9 }
0x270a   :  { %v1998_v5 = vpop.permute.xlu2 %1997 }
0x270b   :  { %6246 = vmatmul.msk.bf16.vlgmr.msrb.gmra.mxu0 %vm287_vm1, %v1998_v5  ;;  %6247 = vmatmul.msk.bf16.vlgmr.msrb.gmra.mxu1 %vm287_vm1, %v1998_v5 }
0x2729   :  { %v1979_v2 = vpop.permute.xlu1 %1978 }
0x272a   :  { %6245 = vmatmul.msk.bf16.vlgmr.msrb.gmra.mxu3 %vm287_vm1, %v1979_v2 }
0x2788   :  { %v2011_v4 = vpop.f32.mrf.mxu0  ;;  %v2052_v43 = vpop.f32.mrf.mxu1 }
0x2789   :  { %v2056_v6 = vadd.f32 %v2052_v43, %v254_v10 }
0x278b   :  { %7670 = vtanh.f32 %v2056_v6 }
0x2790   :  { %v2013_v63 = vpop.f32.mrf.mxu0  ;;  %v2054_v3 = vpop.f32.mrf.mxu1 }
0x2791   :  { %v7671_v59 = vpop.eup %7670 }
0x2792   :  { %v2058_v62 = vmul.f32 %v8285_v22, %v7671_v59 }
0x2794   :  { %v2059_v61 = vadd.f32 %v8291_v19, %v2058_v62 }
0x2796   :  { %2062 = vrot.lane.b32.xlu1 %v2059_v61, %s7765_s21  ;;  %v2060_v15 = vmul.f32 %v2059_v61, %v1969_v25 }
0x27ad   :  { %v1992_v42 = vpop.f32.mrf.mxu3 }
0x27ae   :  { %v2012_v44 = vadd.f32 %v2011_v4, %v1992_v42 }
0x27b0   :  { %v2015_v7 = vadd.f32 %v8336_v21, %v2012_v44 }
0x27b2   :  { %7672 = vtanh.f32 %v2015_v7 }
0x27b5   :  { %v1994_v13 = vpop.f32.mrf.mxu3 }
0x27b6   :  { %v7323_v13 = vld [vmem:[#allocation3 + $0xc0] sm:$0xf0] }
0x27b8   :  { %v7673_v57 = vpop.eup %7672 }
0x27b9   :  { %v2017_v12 = vmul.f32 %v8285_v22, %v7673_v57 }
0x27bb   :  { %v2018_v8 = vadd.f32 %v8291_v19, %v2017_v12  ;;  %v6285_v12 = vld [vmem:[#allocation3 + $0xc4] sm:$0xf0] }
0x27bd   :  { %2021 = vrot.lane.b32.xlu0 %v2018_v8, %s7765_s21  ;;  %v2019_v33 = vmul.f32 %v2018_v8, %v1928_v26 }
0x2808   :  { %v2063_v30 = vpop.permute.xlu1 %2062 }
0x2809   :  { %v2065_v40 = vmul.f32 %v2063_v30, %v2059_v61  ;;  %v6255_v30 = vld [vmem:[#allocation3 + $0x70] sm:$0xf] }
0x280b   :  { %2067 = vrot.lane.b32.xlu0 %v2065_v40, %s7768_s9  ;;  %v7316_v40 = vld [vmem:[#allocation3 + $0x88] sm:$0xf0] }
0x282f   :  { %v2022_v9 = vpop.permute.xlu0 %2021 }
0x2830   :  { %v2024_v11 = vmul.f32 %v2022_v9, %v2018_v8  ;;  %v7313_v9 = vld [vmem:[#allocation3 + $0x74] sm:$0xf] }
0x2832   :  { %2026 = vrot.lane.b32.xlu2 %v2024_v11, %s7768_s9  ;;  %v6256_v11 = vor.u32 %v7316_v40, %v6255_v30  ;;  %v7306_v40 = vld [vmem:[#allocation3 + $0x3c] sm:$0xf] }
0x287d   :  { %v2068_v17 = vpop.permute.xlu0 %2067 }
0x287e   :  { %v8534_v55 = vadd.f32 %v2068_v17, %v2060_v15  ;;  %v6257_v15 = vld [vmem:[#allocation3 + $0x8c] sm:$0xf0] }
0x287f   :  { %v6260_v17 = vor.u32 %v7313_v9, %v6257_v15  ;;  %v6369_v9 = vld [vmem:[#allocation3 + $0x54] sm:$0xf0] }
0x2880   :  { %7674 = vtanh.f32 %v8534_v55  ;;  %v6372_v15 = vor.u32 %v7306_v40, %v6369_v9  ;;  %v7305_v9 = vld [vmem:[#allocation3 + $0x30] sm:$0xf0] }
0x2886   :  { %v7675_v27 = vpop.eup %7674 }
0x2887   :  { %2073 = vrot.lane.b32.xlu2 %v7675_v27, %s7765_s21 }
0x288c   :  { %v2027_v36 = vpop.permute.xlu2 %2026 }
0x288d   :  { %v2029_v20 = vadd.f32 %v2027_v36, %v2019_v33 }
0x288f   :  { %7676 = vtanh.f32 %v2029_v20 }
0x2895   :  { %v7677_v37 = vpop.eup %7676 }
0x2896   :  { %2032 = vrot.lane.b32.xlu1 %v7677_v37, %s7765_s21 }
0x28e1   :  { %v2074_v23 = vpop.permute.xlu2 %2073 }
0x28e2   :  { %v2076_v53 = vmul.f32 %v2074_v23, %v2059_v61 }
0x28e4   :  { %v2077_v52 = vpack.c.bf16 %v2076_v53, %v2076_v53 }
0x28e6   :  { %2098 = vrot.lane.b32.xlu1 %v2077_v52, %s7768_s9 }
0x2908   :  { %v2033_v25 = vpop.permute.xlu1 %2032 }
0x2909   :  { %v8540_v46 = vmul.f32 %v2033_v25, %v2018_v8 }
0x290b   :  { %v2036_v51 = vpack.c.bf16 %v8540_v46, %v8540_v46 }
0x290d   :  { %2079 = vrot.lane.b32.xlu0 %v2036_v51, %s7768_s9 }
0x2958   :  { %v2099_v26 = vpop.permute.xlu1 %2098 }
0x2959   :  { %6249 = vmatmul.msk.bf16.vlgmr.msra.gmra.mxu3 %vm287_vm1, %v2099_v26  ;;  %6250 = vmatmul.msk.bf16.vlgmr.msra.gmra.mxu0 %vm287_vm1, %v2099_v26 }
0x297f   :  { %v2080_v48 = vpop.permute.xlu0 %2079 }
0x2980   :  { %6248 = vmatmul.msk.bf16.vlgmr.msrb.gmra.mxu2 %vm287_vm1, %v2080_v48 }
0x29d6   :  { %v2152_v49 = vpop.f32.mrf.mxu0 }
0x29d7   :  { %v2156_v39 = vadd.f32 %v2152_v49, %v257_v50 }
0x29d9   :  { %7678 = vtanh.f32 %v2156_v39 }
0x29dc   :  { %v2112_v1 = vpop.f32.mrf.mxu3 }
0x29de   :  { %v2154_v35 = vpop.f32.mrf.mxu0 }
0x29df   :  { %v7679_v5 = vpop.eup %7678  ;;  %v7317_v35 = vld [vmem:[#allocation3 + $0x90] sm:$0xf0] }
0x29e0   :  { %v2158_v2 = vmul.f32 %v8285_v22, %v7679_v5 }
0x29e2   :  { %v8552_v10 = vadd.f32 %v8291_v19, %v2158_v2 }
0x29e4   :  { %2162 = vrot.lane.b32.xlu1 %v8552_v10, %s7765_s21  ;;  %v2114_v4 = vpop.f32.mrf.mxu3  ;;  %v2160_v27 = vmul.f32 %v8552_v10, %v8534_v55 }
0x2a03   :  { %v2093_v43 = vpop.f32.mrf.mxu2 }
0x2a04   :  { %v2113_v6 = vadd.f32 %v2112_v1, %v2093_v43  ;;  %v6263_v1 = vld [vmem:[#allocation3 + $0x78] sm:$0xf] }
0x2a05   :  { %v6264_v5 = vor.u32 %v7317_v35, %v6263_v1  ;;  %v6299_v43 = vld [vmem:[#allocation3 + $0xb8] sm:$0xf] }
0x2a06   :  { %v2116_v63 = vadd.f32 %v8336_v21, %v2113_v6  ;;  %v7325_v6 = vld [vmem:[#allocation3 + $0xd0] sm:$0xf0] }
0x2a08   :  { %7680 = vtanh.f32 %v2116_v63  ;;  %v7322_v63 = vld [vmem:[#allocation3 + $0xbc] sm:$0xf] }
0x2a0b   :  { %v2095_v58 = vpop.f32.mrf.mxu2 }
0x2a0c   :  { %v6300_v58 = vor.u32 %v7325_v6, %v6299_v43 }
0x2a0e   :  { %v7681_v31 = vpop.eup %7680 }
0x2a0f   :  { %v2118_v3 = vmul.f32 %v8285_v22, %v7681_v31  ;;  %v6301_v31 = vld [vmem:[#allocation3 + $0xd4] sm:$0xf0] }
0x2a11   :  { %v2119_v59 = vadd.f32 %v8291_v19, %v2118_v3  ;;  %v6271_v3 = vld [vmem:[#allocation3 + $0x80] sm:$0xf] }
0x2a13   :  { %2122 = vrot.lane.b32.xlu2 %v2119_v59, %s7765_s21  ;;  %v2120_v22 = vmul.f32 %v2119_v59, %v2029_v20 }
0x2a56   :  { %v2163_v42 = vpop.permute.xlu1 %2162 }
0x2a57   :  { %v2165_v44 = vmul.f32 %v2163_v42, %v8552_v10 }
0x2a6d   :  { %v2123_v62 = vpop.permute.xlu2 %2122 }
0x2a6e   :  { %v2125_v61 = vmul.f32 %v2123_v62, %v2119_v59  ;;  %v7315_v62 = vld [vmem:[#allocation3 + $0x84] sm:$0xf] }
0x2a70   :  { %2127 = vrot.lane.b32.xlu0 %v2125_v61, %s7768_s9 }
0x2a78   :  { %2167 = vrot.lane.b32.xlu0 %v2165_v44, %s7768_s9 }
0x2a80   :  { %717 = vrot.lane.b32.xlu0 %v8129_v18, %s7768_s9 }
0x2a88   :  { %1125 = vrot.lane.b32.xlu0 %v8241_v41, %s7768_s9 }
0x2a90   :  { %1734 = vrot.lane.b32.xlu0 %v8459_v34, %s7768_s9 }
0x2a98   :  { %414 = vrot.lane.b32.xlu0 %v8044_v32, %s7768_s9 }
0x2aa0   :  { %1023 = vrot.lane.b32.xlu0 %v8213_v38, %s7768_s9 }
0x2aa8   :  { %1632 = vrot.lane.b32.xlu0 %v8431_v54, %s7768_s9 }
0x2ae2   :  { %v2128_v19 = vpop.permute.xlu0 %2127 }
0x2ae3   :  { %v8575_v21 = vadd.f32 %v2128_v19, %v2120_v22  ;;  %v6273_v19 = vld [vmem:[#allocation3 + $0x9c] sm:$0xf0] }
0x2ae5   :  { %10503 = vst [vmem:[#allocation9_spill] sm:$0xff] %v8575_v21  ;;  %7682 = vtanh.f32 %v8575_v21  ;;  %v6551_v21 = vld [vmem:[#allocation3 + $0x198] sm:$0xf] }
0x2aea   :  { %v2168_v18 = vpop.permute.xlu0 %2167 }
0x2aeb   :  { %v7683_v41 = vpop.eup %7682  ;;  %v2170_v20 = vadd.f32 %v2168_v18, %v2160_v27  ;;  %v7314_v27 = vld [vmem:[#allocation3 + $0x7c] sm:$0xf] }
0x2aec   :  { %2133 = vrot.lane.b32.xlu2 %v7683_v41, %s7765_s21  ;;  %v6276_v41 = vor.u32 %v7315_v62, %v6273_v19  ;;  %v7308_v19 = vld [vmem:[#allocation3 + $0x4c] sm:$0xf] }
0x2aed   :  { %7684 = vtanh.f32 %v2170_v20 }
0x2af2   :  { %v718_v34 = vpop.permute.xlu0 %717 }
0x2af3   :  { %720 = vst.msk [vmem:[#allocation2 + $0x48] sm:$0xff] %vm287_vm1, %v718_v34  ;;  %v7685_v53 = vpop.eup %7684 }
0x2af4   :  { %722 = vst.msk [vmem:[#allocation2 + $0xc0] sm:$0xff] %vm287_vm1, %v718_v34  ;;  %514 = vrot.lane.b32.xlu2 %v8073_v24, %s7768_s9  ;;  %v6307_v34 = vld [vmem:[#allocation3 + $0xc0] sm:$0xf] }
0x2afa   :  { %v1126_v32 = vpop.permute.xlu0 %1125  ;;  %v2271_v51 = vld [vmem:[#allocation2 + $0x48] sm:$0xff] }
0x2afb   :  { %1128 = vst.msk [vmem:[#allocation2 + $0x58] sm:$0xff] %vm287_vm1, %v1126_v32 }
0x2afc   :  { %1129 = vst.msk [vmem:[#allocation2 + $0xd0] sm:$0xff] %vm287_vm1, %v1126_v32  ;;  %922 = vrot.lane.b32.xlu2 %v8185_v14, %s7768_s9  ;;  %v6283_v14 = vld [vmem:[#allocation3 + $0xa8] sm:$0xf]  ;;  %v7326_v32 = vld [vmem:[#allocation3 + $0xd8] sm:$0xf0] }
0x2afd   :  { %v6284_v57 = vor.u32 %v7323_v13, %v6283_v14  ;;  %v6279_v14 = vld [vmem:[#allocation3 + $0x88] sm:$0xf]  ;;  %v7319_v13 = vld [vmem:[#allocation3 + $0xa0] sm:$0xf0] }
0x2aff   :  { %2389 = vmatpush.bf16.msrb.mxu3 %v6284_v57 }
0x2b02   :  { %v1735_v38 = vpop.permute.xlu0 %1734  ;;  %v2273_v50 = vld [vmem:[#allocation2 + $0x58] sm:$0xff] }
0x2b03   :  { %1737 = vst.msk [vmem:[#allocation2 + $0x70] sm:$0xff] %vm287_vm1, %v1735_v38  ;;  %2390 = vmatpush.bf16.msrb.mxu3 %v6256_v11  ;;  %v6375_v11 = vld [vmem:[#allocation3 + $0x40] sm:$0xf] }
0x2b04   :  { %1738 = vst.msk [vmem:[#allocation2 + $0xe8] sm:$0xff] %vm287_vm1, %v1735_v38  ;;  %1531 = vrot.lane.b32.xlu2 %v8403_v45, %s7768_s9  ;;  %v7320_v45 = vld [vmem:[#allocation3 + $0xac] sm:$0xf]  ;;  %v6308_v38 = vor.u32 %v7326_v32, %v6307_v34 }
0x2b05   :  { %v6288_v8 = vor.u32 %v7320_v45, %v6285_v12  ;;  %v7321_v12 = vld [vmem:[#allocation3 + $0xb4] sm:$0xf]  ;;  %v7312_v32 = vld [vmem:[#allocation3 + $0x68] sm:$0xf0] }
0x2b07   :  { %2418 = vmatpush.bf16.msrb.mxu0 %v6288_v8  ;;  %2505 = vmatpush.bf16.msra.mxu3 %v6300_v58  ;;  %v6293_v8 = vld [vmem:[#allocation3 + $0xcc] sm:$0xf0] }
0x2b08   :  { %v6296_v30 = vor.u32 %v7321_v12, %v6293_v8  ;;  %v6363_v12 = vld [vmem:[#allocation3 + $0x18] sm:$0xf] }
0x2b0a   :  { %v415_v54 = vpop.permute.xlu0 %414  ;;  %2476 = vmatpush.bf16.msrb.mxu2 %v6296_v30 }
0x2b0b   :  { %417 = vst.msk [vmem:[#allocation2] sm:$0xff] %vm287_vm1, %v415_v54  ;;  %2419 = vmatpush.bf16.msrb.mxu0 %v6260_v17  ;;  %v7310_v17 = vld [vmem:[#allocation3 + $0x58] sm:$0xf0] }
0x2b12   :  { %v1024_v24 = vpop.permute.xlu0 %1023 }
0x2b13   :  { %1026 = vst.msk [vmem:[#allocation2 + $0x18] sm:$0xff] %vm287_vm1, %v1024_v24 }
0x2b14   :  { %1027 = vst.msk [vmem:[#allocation2 + $0x90] sm:$0xff] %vm287_vm1, %v1024_v24 }
0x2b15   :  { %1028 = vst.msk [vmem:[#allocation2 + $0x108] sm:$0xff] %vm287_vm1, %v1024_v24 }
0x2b1a   :  { %v1633_v7 = vpop.permute.xlu0 %1632 }
0x2b1b   :  { %1635 = vst.msk [vmem:[#allocation2 + $0x30] sm:$0xff] %vm287_vm1, %v1633_v7 }
0x2b1c   :  { %1636 = vst.msk [vmem:[#allocation2 + $0xa8] sm:$0xff] %vm287_vm1, %v1633_v7 }
0x2b1d   :  { %1637 = vst.msk [vmem:[#allocation2 + $0x120] sm:$0xff] %vm287_vm1, %v1633_v7  ;;  %v2276_v7 = vld [vmem:[#allocation2 + $0x70] sm:$0xff] }
0x2b46   :  { %v2134_v33 = vpop.permute.xlu2 %2133 }
0x2b47   :  { %v2136_v36 = vmul.f32 %v2134_v33, %v2119_v59  ;;  %v7318_v59 = vld [vmem:[#allocation3 + $0x98] sm:$0xf0]  ;;  %v6265_v33 = vld [vmem:[#allocation3 + $0x94] sm:$0xf0] }
0x2b48   :  { %v6272_v22 = vor.u32 %v7318_v59, %v6271_v3  ;;  %v6268_v20 = vor.u32 %v7314_v27, %v6265_v33  ;;  %v2245_v3 = vld [vmem:[#allocation2 + $0x18] sm:$0xff] }
0x2b49   :  { %v2137_v37 = vpack.c.bf16 %v2136_v36, %v2136_v36 }
0x2b4a   :  { %2506 = vmatpush.bf16.msra.mxu3 %v6272_v22  ;;  %2477 = vmatpush.bf16.msrb.mxu2 %v6268_v20  ;;  %v7309_v22 = vld [vmem:[#allocation3 + $0x50] sm:$0xf0] }
0x2b4b   :  { %2179 = vrot.lane.b32.xlu1 %v2137_v37, %s7768_s9  ;;  %v7299_v37 = vld [vmem:[#allocation3 + $0x4] sm:$0xf] }
0x2b4e   :  { %v515_v23 = vpop.permute.xlu2 %514 }
0x2b4f   :  { %518 = vst.msk [vmem:[#allocation2 + $0x40] sm:$0xff] %vm287_vm1, %v515_v23  ;;  %v6341_v23 = vld [vmem:[#allocation3 + $0x1c] sm:$0xf0] }
0x2b53   :  { %2173 = vrot.lane.b32.xlu1 %v7685_v53, %s7765_s21  ;;  %v6347_v53 = vld [vmem:[#allocation3 + $0x8] sm:$0xf] }
0x2b56   :  { %v923_v52 = vpop.permute.xlu2 %922  ;;  %v2270_v25 = vld [vmem:[#allocation2 + $0x40] sm:$0xff] }
0x2b57   :  { %925 = vst.msk [vmem:[#allocation2 + $0x50] sm:$0xff] %vm287_vm1, %v923_v52  ;;  %v8604_v26 = vpack.c.bf16 %v2271_v51, %v2270_v25  ;;  %v7303_v25 = vld [vmem:[#allocation3 + $0x20] sm:$0xf0] }
0x2b58   :  { %926 = vst.msk [vmem:[#allocation2 + $0xc8] sm:$0xff] %vm287_vm1, %v923_v52  ;;  %v6344_v52 = vor.u32 %v7299_v37, %v6341_v23  ;;  %v6348_v51 = vor.u32 %v7303_v25, %v6347_v53  ;;  %v2248_v23 = vld [vmem:[#allocation2 + $0x30] sm:$0xff]  ;;  %v6451_v53 = vld [vmem:[#allocation3 + $0x118] sm:$0xf] }
0x2b59   :  { %6309 = vmatmul.msk.bf16.vlgmr.msrb.gmra.mxu3 %vm287_vm1, %v8604_v26  ;;  %6313 = vmatmul.msk.bf16.vlgmr.msrb.gmra.mxu0 %vm287_vm1, %v8604_v26 }
0x2b5a   :  { %2705 = vmatpush.bf16.msrb.mxu3 %v6372_v15  ;;  %v6364_v15 = vor.u32 %v7305_v9, %v6363_v12 }
0x2b5b   :  { %1328 = vrot.lane.b32.xlu1 %v8347_v60, %s7768_s9  ;;  %v6291_v60 = vld [vmem:[#allocation3 + $0xb0] sm:$0xf] }
0x2b5e   :  { %v1532_v55 = vpop.permute.xlu2 %1531  ;;  %v2272_v48 = vld [vmem:[#allocation2 + $0x50] sm:$0xff]  ;;  %2706 = vmatpush.bf16.msrb.mxu3 %v6344_v52 }
0x2b5f   :  { %1534 = vst.msk [vmem:[#allocation2 + $0x68] sm:$0xff] %vm287_vm1, %v1532_v55  ;;  %v8617_v49 = vpack.c.bf16 %v2273_v50, %v2272_v48  ;;  %v7307_v48 = vld [vmem:[#allocation3 + $0x44] sm:$0xf]  ;;  %v6377_v50 = vld [vmem:[#allocation3 + $0x5c] sm:$0xf0] }
0x2b60   :  { %1535 = vst.msk [vmem:[#allocation2 + $0xe0] sm:$0xff] %vm287_vm1, %v1532_v55  ;;  %v7337_v52 = vld [vmem:[#allocation3 + $0x130] sm:$0xf0] }
0x2b63   :  { %1937 = vrot.lane.b32.xlu1 %v8515_v29, %s7768_s9  ;;  %v7324_v29 = vld [vmem:[#allocation3 + $0xc8] sm:$0xf0] }
0x2b64   :  { %v6292_v39 = vor.u32 %v7324_v29, %v6291_v60  ;;  %v6380_v60 = vor.u32 %v7307_v48, %v6377_v50  ;;  %v7300_v29 = vld [vmem:[#allocation3 + $0xc] sm:$0xf]  ;;  %v7330_v48 = vld [vmem:[#allocation3 + $0xf8] sm:$0xf0] }
0x2b66   :  { %2447 = vmatpush.bf16.msrb.mxu1 %v6292_v39  ;;  %v2275_v44 = vld [vmem:[#allocation2 + $0x68] sm:$0xff] }
0x2b67   :  { %v6349_v39 = vld [vmem:[#allocation3 + $0x24] sm:$0xf0] }
0x2b68   :  { %v6352_v1 = vor.u32 %v7300_v29, %v6349_v39 }
0x2b69   :  { %6310 = vmatmul.msk.bf16.gmra.mxu3 %vm287_vm1, %v8617_v49  ;;  %6314 = vmatmul.msk.bf16.gmra.mxu0 %vm287_vm1, %v8617_v49 }
0x2b6a   :  { %2448 = vmatpush.bf16.msrb.mxu1 %v6264_v5 }
0x2b6b   :  { %615 = vrot.lane.b32.xlu1 %v8101_v28, %s7768_s9 }
0x2b73   :  { %1226 = vrot.lane.b32.xlu1 %v8304_v0, %s7768_s9 }
0x2b7b   :  { %1835 = vrot.lane.b32.xlu1 %v8487_v47, %s7768_s9 }
0x2b83   :  { %2139 = vrot.lane.b32.xlu1 %v2136_v36, %s7768_s9  ;;  %v6376_v36 = vor.u32 %v7310_v17, %v6375_v11 }
0x2bbd   :  { %v2180_v2 = vpop.permute.xlu1 %2179 }
0x2bbe   :  { %6251 = vmatmul.msk.bf16.vlgmr.msra.gmra.mxu1 %vm287_vm1, %v2180_v2 }
0x2bbf   :  { %2563 = vmatpush.bf16.msra.mxu1 %v6308_v38  ;;  %v6339_v38 = vld [vmem:[#allocation3] sm:$0xf] }
0x2bc5   :  { %v2174_v28 = vpop.permute.xlu1 %2173 }
0x2bc6   :  { %v2176_v4 = vmul.f32 %v2174_v28, %v8552_v10  ;;  %v6304_v10 = vor.u32 %v7322_v63, %v6301_v31 }
0x2bc8   :  { %v2177_v0 = vpack.c.bf16 %v2176_v4, %v2176_v4  ;;  %2534 = vmatpush.bf16.msra.mxu0 %v6304_v10 }
0x2bca   :  { %2198 = vrot.lane.b32.xlu2 %v2177_v0, %s7768_s9  ;;  %v2242_v0 = vld [vmem:[#allocation2] sm:$0xff] }
0x2bcc   :  { %2535 = vmatpush.bf16.msra.mxu0 %v6276_v41  ;;  %v6385_v41 = vld [vmem:[#allocation3 + $0x64] sm:$0xf0] }
0x2bcd   :  { %v1329_v47 = vpop.permute.xlu1 %1328  ;;  %v6388_v34 = vor.u32 %v7308_v19, %v6385_v41 }
0x2bce   :  { %1331 = vst.msk [vmem:[#allocation2 + $0x60] sm:$0xff] %vm287_vm1, %v1329_v47  ;;  %6317 = vmatmul.msk.bf16.vlgmr.msrb.gmra.mxu1 %vm287_vm1, %v8604_v26 }
0x2bcf   :  { %1332 = vst.msk [vmem:[#allocation2 + $0xd8] sm:$0xff] %vm287_vm1, %v1329_v47 }
0x2bd0   :  { %2734 = vmatpush.bf16.msrb.mxu0 %v6376_v36 }
0x2bd2   :  { %819 = vrot.lane.b32.xlu2 %v8157_v16, %s7768_s9 }
0x2bd4   :  { %2735 = vmatpush.bf16.msrb.mxu0 %v6348_v51  ;;  %v6452_v51 = vor.u32 %v7337_v52, %v6451_v53 }
0x2bd5   :  { %v1938_v61 = vpop.permute.xlu1 %1937  ;;  %v2274_v42 = vld [vmem:[#allocation2 + $0x60] sm:$0xff] }
0x2bd6   :  { %1940 = vst.msk [vmem:[#allocation2 + $0x78] sm:$0xff] %vm287_vm1, %v1938_v61  ;;  %v8640_v18 = vpack.c.bf16 %v2275_v44, %v2274_v42  ;;  %v8697_v5 = vpop.f32.mrf.mxu0  ;;  %v6367_v44 = vld [vmem:[#allocation3 + $0x38] sm:$0xf] }
0x2bd7   :  { %1941 = vst.msk [vmem:[#allocation2 + $0xf0] sm:$0xff] %vm287_vm1, %v1938_v61 }
0x2bd8   :  { %6311 = vmatmul.msk.bf16.gmra.mxu3 %vm287_vm1, %v8640_v18  ;;  %6315 = vmatmul.msk.bf16.gmra.mxu0 %vm287_vm1, %v8640_v18 }
0x2bda   :  { %1429 = vrot.lane.b32.xlu2 %v8375_v56, %s7768_s9 }
0x2bdc   :  { %v8700_v4 = vpop.f32.mrf.mxu3 }
0x2bdd   :  { %v616_v16 = vpop.permute.xlu1 %615  ;;  %v2277_v54 = vld [vmem:[#allocation2 + $0x78] sm:$0xff] }
0x2bde   :  { %618 = vst.msk [vmem:[#allocation2 + $0x8] sm:$0xff] %vm287_vm1, %v616_v16  ;;  %6318 = vmatmul.msk.bf16.gmra.mxu1 %vm287_vm1, %v8617_v49  ;;  %v8656_v56 = vpack.c.bf16 %v2277_v54, %v2276_v7  ;;  %v8713_v43 = vpop.f32.mrf.mxu0  ;;  %v7302_v54 = vld [vmem:[#allocation3 + $0x18] sm:$0xf0] }
0x2bdf   :  { %620 = vst.msk [vmem:[#allocation2 + $0x80] sm:$0xff] %vm287_vm1, %v616_v16  ;;  %v6391_v16 = vld [vmem:[#allocation3 + $0x50] sm:$0xf]  ;;  %v6340_v7 = vor.u32 %v7302_v54, %v6339_v38  ;;  %v6459_v38 = vld [vmem:[#allocation3 + $0x120] sm:$0xf] }
0x2be0   :  { %10504 = vst [vmem:[#allocation10_spill] sm:$0xff] %v8713_v43  ;;  %v7338_v54 = vld [vmem:[#allocation3 + $0x138] sm:$0xf0] }
0x2be2   :  { %2038 = vrot.lane.b32.xlu2 %v8540_v46, %s7768_s9  ;;  %v6280_v46 = vor.u32 %v7319_v13, %v6279_v14 }
0x2be4   :  { %2564 = vmatpush.bf16.msra.mxu1 %v6280_v46 }
0x2be5   :  { %v1227_v24 = vpop.permute.xlu1 %1226  ;;  %v2243_v2 = vld [vmem:[#allocation2 + $0x8] sm:$0xff] }
0x2be6   :  { %1229 = vst.msk [vmem:[#allocation2 + $0x20] sm:$0xff] %vm287_vm1, %v1227_v24  ;;  %v8706_v47 = vpack.c.bf16 %v2243_v2, %v2242_v0  ;;  %v8723_v58 = vpop.f32.mrf.mxu0 }
0x2be7   :  { %1230 = vst.msk [vmem:[#allocation2 + $0x98] sm:$0xff] %vm287_vm1, %v1227_v24 }
0x2be8   :  { %1231 = vst.msk [vmem:[#allocation2 + $0x110] sm:$0xff] %vm287_vm1, %v1227_v24  ;;  %6312 = vmatmul.msk.bf16.gmra.mxu3 %vm287_vm1, %v8656_v56  ;;  %6316 = vmatmul.msk.bf16.gmra.mxu0 %vm287_vm1, %v8656_v56  ;;  %v6392_v24 = vor.u32 %v7312_v32, %v6391_v16  ;;  %v6383_v16 = vld [vmem:[#allocation3 + $0x48] sm:$0xf] }
0x2be9   :  { %2763 = vmatpush.bf16.msrb.mxu1 %v6380_v60  ;;  %10505 = vst [vmem:[#allocation11_spill] sm:$0xff] %v8723_v58  ;;  %v6545_v58 = vld [vmem:[#allocation3 + $0x1ac] sm:$0xf0] }
0x2bed   :  { %v1836_v45 = vpop.permute.xlu1 %1835  ;;  %2764 = vmatpush.bf16.msrb.mxu1 %v6352_v1  ;;  %v2246_v30 = vld [vmem:[#allocation2 + $0x20] sm:$0xff] }
0x2bee   :  { %1838 = vst.msk [vmem:[#allocation2 + $0x38] sm:$0xff] %vm287_vm1, %v1836_v45  ;;  %6319 = vmatmul.msk.bf16.gmra.mxu1 %vm287_vm1, %v8640_v18  ;;  %v8737_v42 = vpop.f32.mrf.mxu0 }
0x2bef   :  { %1839 = vst.msk [vmem:[#allocation2 + $0xb0] sm:$0xff] %vm287_vm1, %v1836_v45 }
0x2bf0   :  { %1840 = vst.msk [vmem:[#allocation2 + $0x128] sm:$0xff] %vm287_vm1, %v1836_v45  ;;  %v7301_v45 = vld [vmem:[#allocation3 + $0x14] sm:$0xf] }
0x2bf1   :  { %10506 = vst [vmem:[#allocation12_spill] sm:$0xff] %v8737_v42 }
0x2bf5   :  { %v2140_v57 = vpop.permute.xlu1 %2139  ;;  %v2249_v20 = vld [vmem:[#allocation2 + $0x38] sm:$0xff] }
0x2bf6   :  { %2142 = vst.msk [vmem:[#allocation2 + $0xf8] sm:$0xff] %vm287_vm1, %v2140_v57  ;;  %v6357_v57 = vld [vmem:[#allocation3 + $0x2c] sm:$0xf0]  ;;  %v8771_v25 = vpack.c.bf16 %v2249_v20, %v2248_v23  ;;  %v7331_v20 = vld [vmem:[#allocation3 + $0x100] sm:$0xf0] }
0x2bf7   :  { %v6360_v40 = vor.u32 %v7301_v45, %v6357_v57  ;;  %v6355_v45 = vld [vmem:[#allocation3 + $0x10] sm:$0xf]  ;;  %v7304_v57 = vld [vmem:[#allocation3 + $0x28] sm:$0xf0] }
0x2bf8   :  { %6325 = vmatmul.msk.bf16.vlgmr.msra.gmra.mxu3 %vm287_vm1, %v8604_v26  ;;  %6329 = vmatmul.msk.bf16.vlgmr.msra.gmra.mxu0 %vm287_vm1, %v8604_v26  ;;  %v7328_v23 = vld [vmem:[#allocation3 + $0xec] sm:$0xf] }
0x2bf9   :  { %2821 = vmatpush.bf16.msra.mxu3 %v6388_v34  ;;  %2850 = vmatpush.bf16.msra.mxu0 %v6392_v24  ;;  %v7311_v34 = vld [vmem:[#allocation3 + $0x60] sm:$0xf0] }
0x2bfa   :  { %v6384_v32 = vor.u32 %v7311_v34, %v6383_v16  ;;  %v7335_v24 = vld [vmem:[#allocation3 + $0x124] sm:$0xf] }
0x2bfd   :  { %2822 = vmatpush.bf16.msra.mxu3 %v6360_v40  ;;  %2851 = vmatpush.bf16.msra.mxu0 %v6364_v15  ;;  %v6431_v15 = vld [vmem:[#allocation3 + $0xe8] sm:$0xf] }
0x2bfe   :  { %6320 = vmatmul.msk.bf16.gmra.mxu1 %vm287_vm1, %v8656_v56  ;;  %v6432_v52 = vor.u32 %v7331_v20, %v6431_v15  ;;  %v7332_v15 = vld [vmem:[#allocation3 + $0x108] sm:$0xf0]  ;;  %v7706_v20 = vld [vmem:[%s10427_s6] ss:$0 sm:$0xff] }
0x2c08   :  { %6326 = vmatmul.msk.bf16.gmra.mxu3 %vm287_vm1, %v8617_v49  ;;  %6330 = vmatmul.msk.bf16.gmra.mxu0 %vm287_vm1, %v8617_v49 }
0x2c0e   :  { %6333 = vmatmul.msk.bf16.vlgmr.msra.gmra.mxu1 %vm287_vm1, %v8604_v26 }
0x2c0f   :  { %2992 = vmatpush.bf16.msra.mxu1 %v6452_v51  ;;  %v6433_v51 = vld [vmem:[#allocation3 + $0x104] sm:$0xf0] }
0x2c18   :  { %6327 = vmatmul.msk.bf16.gmra.mxu3 %vm287_vm1, %v8640_v18  ;;  %6331 = vmatmul.msk.bf16.gmra.mxu0 %vm287_vm1, %v8640_v18 }
0x2c1e   :  { %6334 = vmatmul.msk.bf16.gmra.mxu1 %vm287_vm1, %v8617_v49 }
0x2c24   :  { %v2199_v55 = vpop.permute.xlu2 %2198 }
0x2c25   :  { %6252 = vmatmul.msk.bf16.vlgmr.msra.gmra.mxu2 %vm287_vm1, %v2199_v55  ;;  %v6423_v55 = vld [vmem:[#allocation3 + $0xe0] sm:$0xf] }
0x2c28   :  { %6328 = vmatmul.msk.bf16.gmra.mxu3 %vm287_vm1, %v8656_v56  ;;  %6332 = vmatmul.msk.bf16.gmra.mxu0 %vm287_vm1, %v8656_v56 }
0x2c2c   :  { %v820_v35 = vpop.permute.xlu2 %819 }
0x2c2d   :  { %822 = vst.msk [vmem:[#allocation2 + $0x10] sm:$0xff] %vm287_vm1, %v820_v35 }
0x2c2e   :  { %823 = vst.msk [vmem:[#allocation2 + $0x88] sm:$0xff] %vm287_vm1, %v820_v35  ;;  %6335 = vmatmul.msk.bf16.gmra.mxu1 %vm287_vm1, %v8640_v18 }
0x2c2f   :  { %825 = vst.msk [vmem:[#allocation2 + $0x100] sm:$0xff] %vm287_vm1, %v820_v35 }
0x2c34   :  { %v1430_v28 = vpop.permute.xlu2 %1429  ;;  %v2244_v10 = vld [vmem:[#allocation2 + $0x10] sm:$0xff] }
0x2c35   :  { %1432 = vst.msk [vmem:[#allocation2 + $0x28] sm:$0xff] %vm287_vm1, %v1430_v28  ;;  %6321 = vmatmul.msk.bf16.vlgmr.msrb.gmra.mxu2 %vm287_vm1, %v8604_v26  ;;  %v8721_v26 = vpop.f32.mrf.mxu3  ;;  %v8727_v59 = vpack.c.bf16 %v2245_v3, %v2244_v10  ;;  %v2874_v3 = vld [vmem:[#allocation2 + $0x88] sm:$0xff] }
0x2c36   :  { %1433 = vst.msk [vmem:[#allocation2 + $0xa0] sm:$0xff] %vm287_vm1, %v1430_v28 }
0x2c37   :  { %1434 = vst.msk [vmem:[#allocation2 + $0x118] sm:$0xff] %vm287_vm1, %v1430_v28 }
0x2c38   :  { %6397 = vmatmul.msk.bf16.vlgmr.msrb.gmra.mxu3 %vm287_vm1, %v8706_v47  ;;  %6401 = vmatmul.msk.bf16.vlgmr.msrb.gmra.mxu0 %vm287_vm1, %v8706_v47 }
0x2c3b   :  { %v8715_v6 = vpop.f32.mrf.mxu1 }
0x2c3c   :  { %v2039_v63 = vpop.permute.xlu2 %2038  ;;  %v2247_v46 = vld [vmem:[#allocation2 + $0x28] sm:$0xff] }
0x2c3d   :  { %2041 = vst.msk [vmem:[#allocation2 + $0xb8] sm:$0xff] %vm287_vm1, %v2039_v63  ;;  %v8733_v62 = vpop.f32.mrf.mxu3  ;;  %v8749_v11 = vpack.c.bf16 %v2247_v46, %v2246_v30  ;;  %v6461_v46 = vld [vmem:[#allocation3 + $0x13c] sm:$0xf0]  ;;  %v6356_v30 = vor.u32 %v7304_v57, %v6355_v45 }
0x2c3e   :  { %2042 = vst.msk [vmem:[#allocation2 + $0x130] sm:$0xff] %vm287_vm1, %v2039_v63  ;;  %6336 = vmatmul.msk.bf16.gmra.mxu1 %vm287_vm1, %v8656_v56  ;;  %v6464_v12 = vor.u32 %v7335_v24, %v6461_v46  ;;  %v6467_v24 = vld [vmem:[#allocation3 + $0x128] sm:$0xf] }
0x2c40   :  { %3079 = vmatpush.bf16.msrb.mxu0 %v6464_v12  ;;  %v2877_v12 = vld [vmem:[#allocation2 + $0xa0] sm:$0xff] }
0x2c43   :  { %v2195_v31 = vpop.f32.mrf.mxu1 }
0x2c45   :  { %6322 = vmatmul.msk.bf16.gmra.mxu2 %vm287_vm1, %v8617_v49  ;;  %v6368_v49 = vor.u32 %v7309_v22, %v6367_v44  ;;  %v8741_v14 = vpop.f32.mrf.mxu3 }
0x2c47   :  { %2676 = vmatpush.bf16.msra.mxu2 %v6368_v49  ;;  %v2873_v49 = vld [vmem:[#allocation2 + $0x80] sm:$0xff] }
0x2c48   :  { %6398 = vmatmul.msk.bf16.gmra.mxu3 %vm287_vm1, %v8727_v59  ;;  %6402 = vmatmul.msk.bf16.gmra.mxu0 %vm287_vm1, %v8727_v59  ;;  %v8821_v19 = vpack.c.bf16 %v2874_v3, %v2873_v49  ;;  %v2875_v49 = vld [vmem:[#allocation2 + $0x90] sm:$0xff] }
0x2c4b   :  { %v8735_v61 = vpop.f32.mrf.mxu1  ;;  %2677 = vmatpush.bf16.msra.mxu2 %v6340_v7  ;;  %v6460_v7 = vor.u32 %v7338_v54, %v6459_v38 }
0x2c4d   :  { %3050 = vmatpush.bf16.msrb.mxu3 %v6460_v7  ;;  %v7339_v7 = vld [vmem:[#allocation3 + $0x140] sm:$0xf0] }
0x2c4e   :  { %6405 = vmatmul.msk.bf16.vlgmr.msrb.gmra.mxu1 %vm287_vm1, %v8706_v47  ;;  %v6468_v46 = vor.u32 %v7339_v7, %v6467_v24 }
0x2c4f   :  { %2792 = vmatpush.bf16.msrb.mxu2 %v6384_v32 }
0x2c51   :  { %3051 = vmatpush.bf16.msrb.mxu3 %v6432_v52 }
0x2c53   :  { %v8743_v13 = vpop.f32.mrf.mxu1  ;;  %2793 = vmatpush.bf16.msrb.mxu2 %v6356_v30  ;;  %v6439_v30 = vld [vmem:[#allocation3 + $0xf0] sm:$0xf] }
0x2c55   :  { %v8745_v8 = vpop.f32.mrf.mxu0  ;;  %6323 = vmatmul.msk.bf16.gmra.mxu2 %vm287_vm1, %v8640_v18 }
0x2c56   :  { %10507 = vst [vmem:[#allocation13_spill] sm:$0xff] %v8745_v8 }
0x2c58   :  { %6399 = vmatmul.msk.bf16.gmra.mxu3 %vm287_vm1, %v8749_v11  ;;  %6403 = vmatmul.msk.bf16.gmra.mxu0 %vm287_vm1, %v8749_v11 }
0x2c5b   :  { %v8755_v17 = vpop.f32.mrf.mxu3  ;;  %v8757_v27 = vpop.f32.mrf.mxu1 }
0x2c5d   :  { %v8759_v33 = vpop.f32.mrf.mxu0 }
0x2c5e   :  { %10508 = vst [vmem:[#allocation14_spill] sm:$0xff] %v8759_v33  ;;  %6406 = vmatmul.msk.bf16.gmra.mxu1 %vm287_vm1, %v8727_v59 }
0x2c63   :  { %v8763_v18 = vpop.f32.mrf.mxu3  ;;  %v8765_v36 = vpop.f32.mrf.mxu1 }
0x2c65   :  { %v8767_v37 = vpop.f32.mrf.mxu0  ;;  %6324 = vmatmul.msk.bf16.gmra.mxu2 %vm287_vm1, %v8656_v56  ;;  %v6424_v56 = vor.u32 %v7330_v48, %v6423_v55  ;;  %v6436_v55 = vor.u32 %v7328_v23, %v6433_v51  ;;  %v2876_v48 = vld [vmem:[#allocation2 + $0x98] sm:$0xff] }
0x2c66   :  { %10509 = vst [vmem:[#allocation15_spill] sm:$0xff] %v8767_v37  ;;  %v8843_v16 = vpack.c.bf16 %v2876_v48, %v2875_v49  ;;  %v6440_v48 = vor.u32 %v7332_v15, %v6439_v30  ;;  %v7708_v15 = vld [vmem:[%s10429_s8] ss:$0 sm:$0xff] }
0x2c67   :  { %2993 = vmatpush.bf16.msra.mxu1 %v6424_v56  ;;  %3080 = vmatpush.bf16.msrb.mxu0 %v6436_v55  ;;  %v2878_v55 = vld [vmem:[#allocation2 + $0xa8] sm:$0xff] }
0x2c68   :  { %6400 = vmatmul.msk.bf16.gmra.mxu3 %vm287_vm1, %v8771_v25  ;;  %6404 = vmatmul.msk.bf16.gmra.mxu0 %vm287_vm1, %v8771_v25  ;;  %v8869_v49 = vpack.c.bf16 %v2878_v55, %v2877_v12  ;;  %v2880_v55 = vld [vmem:[#allocation2 + $0xb8] sm:$0xff] }
0x2c6b   :  { %v8777_v50 = vpop.f32.mrf.mxu3  ;;  %v8779_v60 = vpop.f32.mrf.mxu1  ;;  %3108 = vmatpush.bf16.msrb.mxu1 %v6468_v46 }
0x2c6d   :  { %v8781_v29 = vpop.f32.mrf.mxu0 }
0x2c6e   :  { %10510 = vst [vmem:[#allocation16_spill] sm:$0xff] %v8781_v29  ;;  %6407 = vmatmul.msk.bf16.gmra.mxu1 %vm287_vm1, %v8749_v11  ;;  %v6425_v29 = vld [vmem:[#allocation3 + $0xfc] sm:$0xf0] }
0x2c6f   :  { %3109 = vmatpush.bf16.msrb.mxu1 %v6440_v48 }
0x2c73   :  { %v8785_v39 = vpop.f32.mrf.mxu3  ;;  %v8787_v1 = vpop.f32.mrf.mxu1 }
0x2c75   :  { %v8789_v35 = vpop.f32.mrf.mxu0  ;;  %6393 = vmatmul.msk.bf16.vlgmr.msra.gmra.mxu2 %vm287_vm1, %v8706_v47 }
0x2c76   :  { %10511 = vst [vmem:[#allocation17_spill] sm:$0xff] %v8789_v35  ;;  %v7327_v35 = vld [vmem:[#allocation3 + $0xe4] sm:$0xf] }
0x2c78   :  { %6413 = vmatmul.msk.bf16.vlgmr.msra.gmra.mxu3 %vm287_vm1, %v8706_v47  ;;  %6417 = vmatmul.msk.bf16.vlgmr.msra.gmra.mxu0 %vm287_vm1, %v8706_v47 }
0x2c7b   :  { %v8797_v2 = vpop.f32.mrf.mxu1  ;;  %v8799_v28 = vpop.f32.mrf.mxu3 }
0x2c7d   :  { %v8801_v0 = vpop.f32.mrf.mxu0 }
0x2c7e   :  { %10512 = vst [vmem:[#allocation18_spill] sm:$0xff] %v8801_v0  ;;  %6408 = vmatmul.msk.bf16.gmra.mxu1 %vm287_vm1, %v8771_v25  ;;  %v7351_v0 = vld [vmem:[#allocation3 + $0x1a0] sm:$0xf0] }
0x2c83   :  { %v8805_v63 = vpop.f32.mrf.mxu1  ;;  %v8807_v31 = vpop.f32.mrf.mxu3 }
0x2c84   :  { %10513 = vst [vmem:[#allocation19_spill] sm:$0xff] %v8805_v63 }
0x2c85   :  { %v8809_v10 = vpop.f32.mrf.mxu0  ;;  %6394 = vmatmul.msk.bf16.gmra.mxu2 %vm287_vm1, %v8727_v59 }
0x2c86   :  { %10514 = vst [vmem:[#allocation20_spill] sm:$0xff] %v8809_v10 }
0x2c88   :  { %6414 = vmatmul.msk.bf16.gmra.mxu3 %vm287_vm1, %v8727_v59  ;;  %6418 = vmatmul.msk.bf16.gmra.mxu0 %vm287_vm1, %v8727_v59 }
0x2c8b   :  { %v8817_v44 = vpop.f32.mrf.mxu3  ;;  %v8819_v22 = vpop.f32.mrf.mxu1 }
0x2c8c   :  { %10515 = vst [vmem:[#allocation21_spill] sm:$0xff] %v8819_v22 }
0x2c8d   :  { %v8823_v41 = vpop.f32.mrf.mxu0 }
0x2c8e   :  { %10516 = vst [vmem:[#allocation22_spill] sm:$0xff] %v8823_v41  ;;  %6477 = vmatmul.msk.bf16.vlgmr.msra.gmra.mxu1 %vm287_vm1, %v8821_v19  ;;  %v6535_v41 = vld [vmem:[#allocation3 + $0x188] sm:$0xf] }
0x2c93   :  { %v8827_v40 = vpop.f32.mrf.mxu3  ;;  %v8829_v9 = vpop.f32.mrf.mxu1 }
0x2c94   :  { %10517 = vst [vmem:[#allocation23_spill] sm:$0xff] %v8829_v9 }
0x2c95   :  { %v8831_v53 = vpop.f32.mrf.mxu0  ;;  %6395 = vmatmul.msk.bf16.gmra.mxu2 %vm287_vm1, %v8749_v11 }
0x2c96   :  { %10518 = vst [vmem:[#allocation24_spill] sm:$0xff] %v8831_v53  ;;  %v7340_v53 = vld [vmem:[#allocation3 + $0x148] sm:$0xf0] }
0x2c98   :  { %6415 = vmatmul.msk.bf16.gmra.mxu3 %vm287_vm1, %v8749_v11  ;;  %6419 = vmatmul.msk.bf16.gmra.mxu0 %vm287_vm1, %v8749_v11 }
0x2c9b   :  { %v8839_v56 = vpop.f32.mrf.mxu3  ;;  %v8841_v3 = vpop.f32.mrf.mxu1 }
0x2c9c   :  { %10519 = vst [vmem:[#allocation25_spill] sm:$0xff] %v8841_v3  ;;  %v6469_v3 = vld [vmem:[#allocation3 + $0x144] sm:$0xf0] }
0x2c9d   :  { %v8845_v34 = vpop.f32.mrf.mxu0 }
0x2c9e   :  { %10520 = vst [vmem:[#allocation26_spill] sm:$0xff] %v8845_v34  ;;  %6478 = vmatmul.msk.bf16.gmra.mxu1 %vm287_vm1, %v8843_v16  ;;  %v6475_v34 = vld [vmem:[#allocation3 + $0x130] sm:$0xf] }
0x2c9f   :  { %v6476_v10 = vor.u32 %v7340_v53, %v6475_v34  ;;  %v7344_v34 = vld [vmem:[#allocation3 + $0x168] sm:$0xf0] }
0x2ca1   :  { %3166 = vmatpush.bf16.msra.mxu3 %v6476_v10 }
0x2ca3   :  { %v8849_v32 = vpop.f32.mrf.mxu3  ;;  %v8851_v38 = vpop.f32.mrf.mxu1 }
0x2ca4   :  { %10521 = vst [vmem:[#allocation27_spill] sm:$0xff] %v8851_v38 }
0x2ca5   :  { %v8853_v54 = vpop.f32.mrf.mxu0  ;;  %6396 = vmatmul.msk.bf16.gmra.mxu2 %vm287_vm1, %v8771_v25 }
0x2ca6   :  { %10522 = vst [vmem:[#allocation28_spill] sm:$0xff] %v8853_v54 }
0x2ca8   :  { %v2212_v45 = vpop.f32.mrf.mxu2  ;;  %6416 = vmatmul.msk.bf16.gmra.mxu3 %vm287_vm1, %v8771_v25  ;;  %6420 = vmatmul.msk.bf16.gmra.mxu0 %vm287_vm1, %v8771_v25 }
0x2ca9   :  { %v2213_v57 = vadd.f32 %v2212_v45, %v8715_v6 }
0x2cab   :  { %v2216_v23 = vadd.f32 %v7706_v20, %v2213_v57  ;;  %v8865_v52 = vpop.f32.mrf.mxu3  ;;  %v8867_v51 = vpop.f32.mrf.mxu1  ;;  %v7707_v57 = vld [vmem:[%s10428_s7] ss:$0 sm:$0xff] }
0x2cac   :  { %10523 = vst [vmem:[#allocation29_spill] sm:$0xff] %v8865_v52 }
0x2cad   :  { %10524 = vst [vmem:[#allocation30_spill] sm:$0xff] %v8867_v51  ;;  %7686 = vtanh.f32 %v2216_v23  ;;  %v8871_v24 = vpop.f32.mrf.mxu0 }
0x2cae   :  { %10525 = vst [vmem:[#allocation31_spill] sm:$0xff] %v8871_v24  ;;  %6479 = vmatmul.msk.bf16.gmra.mxu1 %vm287_vm1, %v8869_v49 }
0x2cb0   :  { %v2214_v6 = vpop.f32.mrf.mxu2 }
0x2cb1   :  { %v2879_v6 = vld [vmem:[#allocation2 + $0xb0] sm:$0xff] }
0x2cb3   :  { %v7687_v7 = vpop.eup %7686  ;;  %v8875_v46 = vpop.f32.mrf.mxu3 }
0x2cb4   :  { %10526 = vst [vmem:[#allocation32_spill] sm:$0xff] %v8875_v46  ;;  %v8877_v45 = vpop.f32.mrf.mxu1  ;;  %v2218_v30 = vmul.f32 %v7707_v57, %v7687_v7  ;;  %v8901_v7 = vpack.c.bf16 %v2880_v55, %v2879_v6 }
0x2cb5   :  { %10527 = vst [vmem:[#allocation33_spill] sm:$0xff] %v8877_v45  ;;  %v8882_v12 = vpop.f32.mrf.mxu0  ;;  %6409 = vmatmul.msk.bf16.vlgmr.msrb.gmra.mxu2 %vm287_vm1, %v8706_v47  ;;  %v6453_v45 = vld [vmem:[#allocation3 + $0x134] sm:$0xf0] }
0x2cb6   :  { %v8889_v20 = vadd.f32 %v7708_v15, %v2218_v30 }
0x2cb8   :  { %v2479_v23 = vpop.f32.mrf.mxu2  ;;  %2222 = vrot.lane.b32.xlu0 %v8889_v20, %s7765_s21  ;;  %6485 = vmatmul.msk.bf16.vlgmr.msrb.gmra.mxu3 %vm287_vm1, %v8821_v19 }
0x2cb9   :  { %6489 = vmatmul.msk.bf16.vlgmr.msrb.gmra.mxu0 %vm287_vm1, %v8821_v19 }
0x2cbb   :  { %v8899_v47 = vpop.f32.mrf.mxu3 }
0x2cbc   :  { %v8897_v48 = vpop.f32.mrf.mxu1 }
0x2cbd   :  { %10528 = vst [vmem:[#allocation34_spill] sm:$0xff] %v8897_v48  ;;  %v8903_v57 = vpop.f32.mrf.mxu0  ;;  %v6536_v48 = vor.u32 %v7351_v0, %v6535_v41 }
0x2cbe   :  { %6480 = vmatmul.msk.bf16.gmra.mxu1 %vm287_vm1, %v8901_v7 }
0x2cbf   :  { %3364 = vmatpush.bf16.msra.mxu0 %v6536_v48 }
0x2cc0   :  { %v2481_v30 = vpop.f32.mrf.mxu2 }
0x2cc3   :  { %v8909_v46 = vpop.f32.mrf.mxu3 }
0x2cc4   :  { %v8907_v15 = vpop.f32.mrf.mxu1  ;;  %10530 = vst [vmem:[#allocation36_spill] sm:$0xff] %v8909_v46 }
0x2cc5   :  { %10529 = vst [vmem:[#allocation35_spill] sm:$0xff] %v8907_v15  ;;  %v8911_v24 = vpop.f32.mrf.mxu0  ;;  %6410 = vmatmul.msk.bf16.gmra.mxu2 %vm287_vm1, %v8727_v59  ;;  %v7334_v15 = vld [vmem:[#allocation3 + $0x11c] sm:$0xf] }
0x2cc6   :  { %v6456_v59 = vor.u32 %v7334_v15, %v6453_v45  ;;  %v6447_v45 = vld [vmem:[#allocation3 + $0xf8] sm:$0xf]  ;;  %v7333_v15 = vld [vmem:[#allocation3 + $0x110] sm:$0xf0] }
0x2cc7   :  { %v6448_v53 = vor.u32 %v7333_v15, %v6447_v45  ;;  %v7348_v15 = vld [vmem:[#allocation3 + $0x18c] sm:$0xf] }
0x2cc8   :  { %v2484_v38 = vpop.f32.mrf.mxu2  ;;  %6486 = vmatmul.msk.bf16.gmra.mxu3 %vm287_vm1, %v8843_v16  ;;  %3021 = vmatpush.bf16.msra.mxu2 %v6456_v59  ;;  %v6507_v59 = vld [vmem:[#allocation3 + $0x150] sm:$0xf] }
0x2cc9   :  { %6490 = vmatmul.msk.bf16.gmra.mxu0 %vm287_vm1, %v8843_v16  ;;  %v6508_v0 = vor.u32 %v7344_v34, %v6507_v59  ;;  %3167 = vmatpush.bf16.msra.mxu3 %v6448_v53  ;;  %v6537_v59 = vld [vmem:[#allocation3 + $0x1a4] sm:$0xf0]  ;;  %v7341_v34 = vld [vmem:[#allocation3 + $0x154] sm:$0xf] }
0x2ccb   :  { %v8919_v55 = vpop.f32.mrf.mxu3  ;;  %3365 = vmatpush.bf16.msra.mxu0 %v6508_v0  ;;  %v6509_v0 = vld [vmem:[#allocation3 + $0x16c] sm:$0xf0] }
0x2ccc   :  { %10531 = vst [vmem:[#allocation37_spill] sm:$0xff] %v8919_v55  ;;  %v2766_v6 = vpop.f32.mrf.mxu1  ;;  %v7349_v55 = vld [vmem:[#allocation3 + $0x194] sm:$0xf] }
0x2ccd   :  { %v8921_v9 = vadd.f32 %v2766_v6, %v2479_v23  ;;  %v8923_v63 = vpop.f32.mrf.mxu0  ;;  %v6428_v23 = vor.u32 %v7327_v35, %v6425_v29  ;;  %v6548_v46 = vor.u32 %v7349_v55, %v6545_v58  ;;  %v3250_v55 = vld [vmem:[#allocation2 + $0xe8] sm:$0xff] }
0x2cce   :  { %6493 = vmatmul.msk.bf16.vlgmr.msrb.gmra.mxu1 %vm287_vm1, %v8821_v19 }
0x2ccf   :  { %3022 = vmatpush.bf16.msra.mxu2 %v6428_v23  ;;  %3451 = vmatpush.bf16.msrb.mxu3 %v6548_v46 }
0x2cd0   :  { %v2486_v54 = vpop.f32.mrf.mxu2 }
0x2cd3   :  { %v8927_v6 = vpop.f32.mrf.mxu3 }
0x2cd4   :  { %10532 = vst [vmem:[#allocation38_spill] sm:$0xff] %v8927_v6  ;;  %v2768_v37 = vpop.f32.mrf.mxu1 }
0x2cd5   :  { %v8929_v33 = vadd.f32 %v2768_v37, %v2481_v30  ;;  %v8931_v51 = vpop.f32.mrf.mxu0  ;;  %6411 = vmatmul.msk.bf16.gmra.mxu2 %vm287_vm1, %v8749_v11 }
0x2cd8   :  { %v2489_v29 = vpop.f32.mrf.mxu2  ;;  %6487 = vmatmul.msk.bf16.gmra.mxu3 %vm287_vm1, %v8869_v49 }
0x2cd9   :  { %6491 = vmatmul.msk.bf16.gmra.mxu0 %vm287_vm1, %v8869_v49 }
0x2cdb   :  { %v8939_v37 = vpop.f32.mrf.mxu3 }
0x2cdc   :  { %10533 = vst [vmem:[#allocation39_spill] sm:$0xff] %v8939_v37  ;;  %v2771_v35 = vpop.f32.mrf.mxu1 }
0x2cdd   :  { %v8941_v10 = vadd.f32 %v2771_v35, %v2484_v38  ;;  %v8943_v41 = vpop.f32.mrf.mxu0  ;;  %v6540_v38 = vor.u32 %v7348_v15, %v6537_v59 }
0x2cde   :  { %6494 = vmatmul.msk.bf16.gmra.mxu1 %vm287_vm1, %v8843_v16 }
0x2cdf   :  { %3393 = vmatpush.bf16.msra.mxu1 %v6540_v38  ;;  %v3246_v38 = vld [vmem:[#allocation2 + $0xc8] sm:$0xff] }
0x2ce0   :  { %v2491_v11 = vpop.f32.mrf.mxu2 }
0x2ce3   :  { %v8947_v48 = vpop.f32.mrf.mxu3 }
0x2ce4   :  { %10534 = vst [vmem:[#allocation40_spill] sm:$0xff] %v8947_v48  ;;  %v2773_v30 = vpop.f32.mrf.mxu1 }
0x2ce5   :  { %v8949_v23 = vadd.f32 %v2773_v30, %v2486_v54  ;;  %v8951_v45 = vpop.f32.mrf.mxu0  ;;  %6412 = vmatmul.msk.bf16.gmra.mxu2 %vm287_vm1, %v8771_v25  ;;  %v6512_v30 = vor.u32 %v7341_v34, %v6509_v0 }
0x2ce7   :  { %3394 = vmatpush.bf16.msra.mxu1 %v6512_v30 }
0x2ce8   :  { %v2494_v53 = vpop.f32.mrf.mxu2  ;;  %6488 = vmatmul.msk.bf16.gmra.mxu3 %vm287_vm1, %v8901_v7 }
0x2ce9   :  { %6492 = vmatmul.msk.bf16.gmra.mxu0 %vm287_vm1, %v8901_v7 }
0x2ceb   :  { %v8959_v54 = vpop.f32.mrf.mxu3 }
0x2cec   :  { %10535 = vst [vmem:[#allocation41_spill] sm:$0xff] %v8959_v54  ;;  %v2776_v35 = vpop.f32.mrf.mxu1  ;;  %v3248_v54 = vld [vmem:[#allocation2 + $0xd8] sm:$0xff] }
0x2ced   :  { %v8961_v48 = vadd.f32 %v2776_v35, %v2489_v29  ;;  %v8963_v25 = vpop.f32.mrf.mxu0  ;;  %v3245_v29 = vld [vmem:[#allocation2 + $0xc0] sm:$0xff] }
0x2cee   :  { %10536 = vst [vmem:[#allocation42_spill] sm:$0xff] %v8963_v25  ;;  %6495 = vmatmul.msk.bf16.gmra.mxu1 %vm287_vm1, %v8869_v49  ;;  %v8975_v34 = vpack.c.bf16 %v3246_v38, %v3245_v29 }
0x2cf0   :  { %v2496_v15 = vpop.f32.mrf.mxu2 }
0x2cf3   :  { %v8967_v59 = vpop.f32.mrf.mxu3 }
0x2cf4   :  { %10537 = vst [vmem:[#allocation43_spill] sm:$0xff] %v8967_v59  ;;  %v2778_v37 = vpop.f32.mrf.mxu1 }
0x2cf5   :  { %v8969_v8 = vadd.f32 %v2778_v37, %v2491_v11  ;;  %v8971_v6 = vpop.f32.mrf.mxu0  ;;  %6481 = vmatmul.msk.bf16.vlgmr.msra.gmra.mxu2 %vm287_vm1, %v8821_v19 }
0x2cf6   :  { %10538 = vst [vmem:[#allocation44_spill] sm:$0xff] %v8971_v6  ;;  %v3249_v6 = vld [vmem:[#allocation2 + $0xe0] sm:$0xff] }
0x2cf8   :  { %v2679_v0 = vpop.f32.mrf.mxu2  ;;  %6501 = vmatmul.msk.bf16.vlgmr.msra.gmra.mxu3 %vm287_vm1, %v8821_v19 }
0x2cf9   :  { %6561 = vmatmul.msk.bf16.vlgmr.msra.gmra.mxu0 %vm287_vm1, %v8975_v34 }
0x2cfb   :  { %v8981_v30 = vpop.f32.mrf.mxu3 }
0x2cfc   :  { %v2781_v35 = vpop.f32.mrf.mxu1  ;;  %10539 = vst [vmem:[#allocation45_spill] sm:$0xff] %v8981_v30  ;;  %v3247_v30 = vld [vmem:[#allocation2 + $0xd0] sm:$0xff] }
0x2cfd   :  { %v8983_v37 = vadd.f32 %v2781_v35, %v2494_v53  ;;  %v8985_v11 = vpop.f32.mrf.mxu0  ;;  %v8997_v53 = vpack.c.bf16 %v3248_v54, %v3247_v30 }
0x2cfe   :  { %10540 = vst [vmem:[#allocation46_spill] sm:$0xff] %v8985_v11  ;;  %6496 = vmatmul.msk.bf16.gmra.mxu1 %vm287_vm1, %v8901_v7  ;;  %v2680_v11 = vadd.f32 %v2679_v0, %v8700_v4  ;;  %v7353_v4 = vld [vmem:[#allocation3 + $0x1b0] sm:$0xf0] }
0x2cff   :  { %v7329_v0 = vld [vmem:[#allocation3 + $0xf4] sm:$0xf] }
0x2d00   :  { %v2681_v25 = vpop.f32.mrf.mxu2 }
0x2d03   :  { %v8989_v29 = vpop.f32.mrf.mxu3 }
0x2d04   :  { %v2783_v38 = vpop.f32.mrf.mxu1  ;;  %10541 = vst [vmem:[#allocation47_spill] sm:$0xff] %v8989_v29 }
0x2d05   :  { %v8991_v59 = vadd.f32 %v2783_v38, %v2496_v15  ;;  %v8993_v42 = vpop.f32.mrf.mxu0  ;;  %6482 = vmatmul.msk.bf16.gmra.mxu2 %vm287_vm1, %v8843_v16 }
0x2d06   :  { %10543 = vst [vmem:[#allocation49_spill] sm:$0xff] %v8993_v42  ;;  %v7336_v42 = vld [vmem:[#allocation3 + $0x12c] sm:$0xf] }
0x2d07   :  { %10542 = vst [vmem:[#allocation48_spill] sm:$0xff] %v8991_v59  ;;  %v6472_v54 = vor.u32 %v7336_v42, %v6469_v3  ;;  %v7342_v42 = vld [vmem:[#allocation3 + $0x15c] sm:$0xf]  ;;  %v6517_v3 = vld [vmem:[#allocation3 + $0x174] sm:$0xf0] }
0x2d08   :  { %v2684_v35 = vpop.f32.mrf.mxu2  ;;  %6502 = vmatmul.msk.bf16.gmra.mxu3 %vm287_vm1, %v8843_v16 }
0x2d09   :  { %6562 = vmatmul.msk.bf16.gmra.mxu0 %vm287_vm1, %v8997_v53  ;;  %3137 = vmatpush.bf16.msrb.mxu2 %v6472_v54  ;;  %v6523_v54 = vld [vmem:[#allocation3 + $0x160] sm:$0xf] }
0x2d0b   :  { %v9004_v15 = vpop.f32.mrf.mxu3 }
0x2d0c   :  { %10544 = vst [vmem:[#allocation50_spill] sm:$0xff] %v9004_v15  ;;  %v2995_v38 = vpop.f32.mrf.mxu1  ;;  %v6441_v15 = vld [vmem:[#allocation3 + $0x10c] sm:$0xf0] }
0x2d0d   :  { %v9006_v59 = vadd.f32 %v2995_v38, %v2680_v11  ;;  %v9008_v29 = vpop.f32.mrf.mxu0  ;;  %v2682_v11 = vadd.f32 %v2681_v25, %v8721_v26  ;;  %v6552_v38 = vor.u32 %v7353_v4, %v6551_v21  ;;  %v6444_v43 = vor.u32 %v7329_v0, %v6441_v15  ;;  %v7346_v21 = vld [vmem:[#allocation3 + $0x178] sm:$0xf0] }
0x2d0e   :  { %10545 = vst [vmem:[#allocation51_spill] sm:$0xff] %v9008_v29  ;;  %6565 = vmatmul.msk.bf16.vlgmr.msra.gmra.mxu1 %vm287_vm1, %v8975_v34  ;;  %v6520_v26 = vor.u32 %v7342_v42, %v6517_v3  ;;  %v6524_v25 = vor.u32 %v7346_v21, %v6523_v54  ;;  %v9021_v15 = vpack.c.bf16 %v3250_v55, %v3249_v6  ;;  %v7350_v21 = vld [vmem:[#allocation3 + $0x19c] sm:$0xf]  ;;  %v6553_v55 = vld [vmem:[#allocation3 + $0x1b4] sm:$0xf0] }
0x2d0f   :  { %3480 = vmatpush.bf16.msrb.mxu0 %v6552_v38  ;;  %3138 = vmatpush.bf16.msrb.mxu2 %v6444_v43  ;;  %v2685_v43 = vadd.f32 %v2684_v35, %v8733_v62  ;;  %v3251_v35 = vld [vmem:[#allocation2 + $0xf0] sm:$0xff] }
0x2d10   :  { %v2686_v30 = vpop.f32.mrf.mxu2  ;;  %3452 = vmatpush.bf16.msrb.mxu3 %v6520_v26  ;;  %v3252_v26 = vld [vmem:[#allocation2 + $0xf8] sm:$0xff] }
0x2d11   :  { %v2687_v38 = vadd.f32 %v2686_v30, %v8741_v14 }
0x2d13   :  { %v9013_v29 = vpop.f32.mrf.mxu3  ;;  %3481 = vmatpush.bf16.msrb.mxu0 %v6524_v25  ;;  %v9045_v25 = vpack.c.bf16 %v3252_v26, %v3251_v35 }
0x2d14   :  { %v2997_v52 = vpop.f32.mrf.mxu1 }
0x2d15   :  { %v9015_v22 = vadd.f32 %v2997_v52, %v2682_v11  ;;  %v9017_v58 = vpop.f32.mrf.mxu0  ;;  %6483 = vmatmul.msk.bf16.gmra.mxu2 %vm287_vm1, %v8869_v49 }
0x2d17   :  { %10546 = vst [vmem:[#allocation52_spill] sm:$0xff] %v9015_v22 }
0x2d18   :  { %v2689_v46 = vpop.f32.mrf.mxu2  ;;  %6503 = vmatmul.msk.bf16.gmra.mxu3 %vm287_vm1, %v8869_v49 }
0x2d19   :  { %6563 = vmatmul.msk.bf16.gmra.mxu0 %vm287_vm1, %v9021_v15  ;;  %v2690_v14 = vadd.f32 %v2689_v46, %v8755_v17 }
0x2d1b   :  { %v9028_v52 = vpop.f32.mrf.mxu3 }
0x2d1c   :  { %v3000_v4 = vpop.f32.mrf.mxu1 }
0x2d1d   :  { %v9030_v0 = vadd.f32 %v3000_v4, %v2685_v43  ;;  %v9032_v11 = vpop.f32.mrf.mxu0  ;;  %v6556_v43 = vor.u32 %v7350_v21, %v6553_v55 }
0x2d1e   :  { %10547 = vst [vmem:[#allocation53_spill] sm:$0xff] %v9032_v11  ;;  %6566 = vmatmul.msk.bf16.gmra.mxu1 %vm287_vm1, %v8997_v53 }
0x2d1f   :  { %3509 = vmatpush.bf16.msrb.mxu1 %v6556_v43 }
0x2d20   :  { %v2691_v6 = vpop.f32.mrf.mxu2 }
0x2d21   :  { %v2692_v46 = vadd.f32 %v2691_v6, %v8763_v18  ;;  %v2738_v18 = vadd.f32 %v8882_v12, %v8735_v61 }
0x2d23   :  { %v9037_v42 = vpop.f32.mrf.mxu3 }
0x2d24   :  { %v3002_v3 = vpop.f32.mrf.mxu1 }
0x2d25   :  { %v9039_v54 = vadd.f32 %v3002_v3, %v2687_v38  ;;  %v9041_v62 = vpop.f32.mrf.mxu0  ;;  %6484 = vmatmul.msk.bf16.gmra.mxu2 %vm287_vm1, %v8901_v7  ;;  %v7343_v38 = vld [vmem:[#allocation3 + $0x164] sm:$0xf]  ;;  %v6525_v3 = vld [vmem:[#allocation3 + $0x17c] sm:$0xf0] }
0x2d26   :  { %v6528_v35 = vor.u32 %v7343_v38, %v6525_v3 }
0x2d27   :  { %10548 = vst [vmem:[#allocation54_spill] sm:$0xff] %v9039_v54 }
0x2d28   :  { %v2694_v4 = vpop.f32.mrf.mxu2  ;;  %6504 = vmatmul.msk.bf16.gmra.mxu3 %vm287_vm1, %v8901_v7  ;;  %3510 = vmatpush.bf16.msrb.mxu1 %v6528_v35 }
0x2d29   :  { %6564 = vmatmul.msk.bf16.gmra.mxu0 %vm287_vm1, %v9045_v25  ;;  %v2695_v6 = vadd.f32 %v2694_v4, %v8777_v50 }
0x2d2a   :  { %v2223_v30 = vpop.permute.xlu0 %2222 }
0x2d2b   :  { %v2225_v11 = vmul.f32 %v2223_v30, %v8889_v20  ;;  %v9053_v54 = vpop.f32.mrf.mxu3 }
0x2d2c   :  { %v3005_v26 = vpop.f32.mrf.mxu1 }
0x2d2d   :  { %v9055_v21 = vadd.f32 %v3005_v26, %v2690_v14  ;;  %2227 = vrot.lane.b32.xlu2 %v2225_v11, %s7768_s9  ;;  %v9058_v55 = vpop.f32.mrf.mxu0 }
0x2d2e   :  { %10549 = vst [vmem:[#allocation55_spill] sm:$0xff] %v9058_v55  ;;  %6567 = vmatmul.msk.bf16.gmra.mxu1 %vm287_vm1, %v9021_v15 }
0x2d30   :  { %v2696_v17 = vpop.f32.mrf.mxu2 }
0x2d31   :  { %v2697_v61 = vadd.f32 %v2696_v17, %v8785_v39 }
0x2d33   :  { %v9063_v43 = vpop.f32.mrf.mxu3 }
0x2d34   :  { %10550 = vst [vmem:[#allocation56_spill] sm:$0xff] %v9063_v43  ;;  %v3007_v30 = vpop.f32.mrf.mxu1 }
0x2d35   :  { %v9065_v22 = vadd.f32 %v3007_v30, %v2692_v46  ;;  %6497 = vmatmul.msk.bf16.vlgmr.msrb.gmra.mxu2 %vm287_vm1, %v8821_v19 }
0x2d36   :  { %v3082_v14 = vpop.f32.mrf.mxu0 }
0x2d37   :  { %v9070_v11 = vadd.f32 %v3082_v14, %v8921_v9  ;;  %v2740_v14 = vadd.f32 %v8903_v57, %v8743_v13  ;;  %v2743_v13 = vadd.f32 %v8911_v24, %v8757_v27  ;;  %v6619_v27 = vld [vmem:[#allocation3 + $0x1f8] sm:$0xf]  ;;  %v7362_v24 = vld [vmem:[#allocation3 + $0x1fc] sm:$0xf] }
0x2d38   :  { %v2795_v38 = vpop.f32.mrf.mxu2  ;;  %6573 = vmatmul.msk.bf16.vlgmr.msrb.gmra.mxu3 %vm287_vm1, %v8975_v34 }
0x2d39   :  { %6577 = vmatmul.msk.bf16.vlgmr.msrb.gmra.mxu0 %vm287_vm1, %v8975_v34  ;;  %v2796_v39 = vadd.f32 %v2795_v38, %v8799_v28  ;;  %v7365_v28 = vld [vmem:[#allocation3 + $0x210] sm:$0xf0] }
0x2d3a   :  { %v6620_v38 = vor.u32 %v7365_v28, %v6619_v27  ;;  %v7358_v27 = vld [vmem:[#allocation3 + $0x1d8] sm:$0xf0]  ;;  %v7355_v28 = vld [vmem:[#allocation3 + $0x1c4] sm:$0xf] }
0x2d3b   :  { %v3053_v26 = vpop.f32.mrf.mxu3 }
0x2d3c   :  { %v3010_v3 = vpop.f32.mrf.mxu1  ;;  %v9081_v19 = vadd.f32 %v3053_v26, %v2738_v18  ;;  %3736 = vmatpush.bf16.msra.mxu3 %v6620_v38 }
0x2d3d   :  { %v9079_v35 = vadd.f32 %v3010_v3, %v2695_v6 }
0x2d3e   :  { %v3084_v9 = vpop.f32.mrf.mxu0  ;;  %6568 = vmatmul.msk.bf16.gmra.mxu1 %vm287_vm1, %v9045_v25 }
0x2d3f   :  { %v9086_v46 = vadd.f32 %v3084_v9, %v8929_v33  ;;  %v7352_v9 = vld [vmem:[#allocation3 + $0x1a8] sm:$0xf0] }
0x2d40   :  { %v2797_v30 = vpop.f32.mrf.mxu2 }
0x2d41   :  { %10551 = vst [vmem:[#allocation57_spill] sm:$0xff] %v9086_v46 }
0x2d43   :  { %v3055_v12 = vpop.f32.mrf.mxu3 }
0x2d44   :  { %v3012_v50 = vpop.f32.mrf.mxu1  ;;  %v9093_v6 = vadd.f32 %v3055_v12, %v2740_v14 }
0x2d45   :  { %v9091_v4 = vadd.f32 %v3012_v50, %v2697_v61  ;;  %6498 = vmatmul.msk.bf16.gmra.mxu2 %vm287_vm1, %v8843_v16 }
0x2d46   :  { %10553 = vst [vmem:[#allocation59_spill] sm:$0xff] %v9093_v6  ;;  %v3087_v18 = vpop.f32.mrf.mxu0  ;;  %v10589_v6 = vld [vmem:[#allocation16_spill] sm:$0xff] }
0x2d47   :  { %10552 = vst [vmem:[#allocation58_spill] sm:$0xff] %v9091_v4  ;;  %v9098_v3 = vadd.f32 %v3087_v18, %v8941_v10  ;;  %v6543_v10 = vld [vmem:[#allocation3 + $0x190] sm:$0xf]  ;;  %v6621_v18 = vld [vmem:[#allocation3 + $0x214] sm:$0xf0] }
0x2d48   :  { %v2800_v33 = vpop.f32.mrf.mxu2  ;;  %6574 = vmatmul.msk.bf16.gmra.mxu3 %vm287_vm1, %v8997_v53  ;;  %v6544_v61 = vor.u32 %v7352_v9, %v6543_v10  ;;  %v6624_v43 = vor.u32 %v7362_v24, %v6621_v18 }
0x2d49   :  { %6578 = vmatmul.msk.bf16.gmra.mxu0 %vm287_vm1, %v8997_v53 }
0x2d4a   :  { %3422 = vmatpush.bf16.msra.mxu2 %v6544_v61  ;;  %3765 = vmatpush.bf16.msra.mxu0 %v6624_v43  ;;  %v6591_v61 = vld [vmem:[#allocation3 + $0x1c0] sm:$0xf]  ;;  %v2748_v43 = vadd.f32 %v8931_v51, %v8779_v60 }
0x2d4b   :  { %v3058_v57 = vpop.f32.mrf.mxu3 }
0x2d4c   :  { %v3111_v17 = vpop.f32.mrf.mxu1  ;;  %v9107_v26 = vadd.f32 %v3058_v57, %v2743_v13  ;;  %v6515_v13 = vld [vmem:[#allocation3 + $0x158] sm:$0xf]  ;;  %v2745_v57 = vadd.f32 %v8923_v63, %v8765_v36  ;;  %v6592_v36 = vor.u32 %v7358_v27, %v6591_v61  ;;  %v6593_v63 = vld [vmem:[#allocation3 + $0x1dc] sm:$0xf0] }
0x2d4d   :  { %v9109_v16 = vadd.f32 %v3111_v17, %v2796_v39  ;;  %v7345_v39 = vld [vmem:[#allocation3 + $0x170] sm:$0xf0]  ;;  %v2798_v17 = vadd.f32 %v2797_v30, %v8807_v31  ;;  %v6596_v30 = vor.u32 %v7355_v28, %v6593_v63  ;;  %v6627_v27 = vld [vmem:[#allocation3 + $0x200] sm:$0xf]  ;;  %v7366_v28 = vld [vmem:[#allocation3 + $0x218] sm:$0xf0] }
0x2d4e   :  { %v3089_v14 = vpop.f32.mrf.mxu0  ;;  %6581 = vmatmul.msk.bf16.vlgmr.msrb.gmra.mxu1 %vm287_vm1, %v8975_v34  ;;  %v6516_v4 = vor.u32 %v7345_v39, %v6515_v13  ;;  %3737 = vmatpush.bf16.msra.mxu3 %v6592_v36  ;;  %v6628_v36 = vor.u32 %v7366_v28, %v6627_v27  ;;  %v10565_v27 = vld [vmem:[#allocation44_spill] sm:$0xff] }
0x2d4f   :  { %v9114_v50 = vadd.f32 %v3089_v14, %v8949_v23  ;;  %3766 = vmatpush.bf16.msra.mxu0 %v6596_v30 }
0x2d50   :  { %v2802_v12 = vpop.f32.mrf.mxu2  ;;  %3423 = vmatpush.bf16.msra.mxu2 %v6516_v4  ;;  %3794 = vmatpush.bf16.msra.mxu1 %v6628_v36  ;;  %v10566_v36 = vld [vmem:[#allocation29_spill] sm:$0xff] }
0x2d51   :  { %10554 = vst [vmem:[#allocation60_spill] sm:$0xff] %v9114_v50  ;;  %v2803_v60 = vadd.f32 %v2802_v12, %v8827_v40  ;;  %v10597_v50 = vld [vmem:[#allocation18_spill] sm:$0xff] }
0x2d53   :  { %v3060_v10 = vpop.f32.mrf.mxu3 }
0x2d54   :  { %v3113_v9 = vpop.f32.mrf.mxu1  ;;  %v9119_v23 = vadd.f32 %v3060_v10, %v2745_v57  ;;  %v2750_v10 = vadd.f32 %v8943_v41, %v8787_v1  ;;  %v2753_v1 = vadd.f32 %v8951_v45, %v8797_v2  ;;  %v7359_v41 = vld [vmem:[#allocation3 + $0x1e0] sm:$0xf0] }
0x2d55   :  { %v9121_v14 = vadd.f32 %v3113_v9, %v2798_v17  ;;  %6499 = vmatmul.msk.bf16.gmra.mxu2 %vm287_vm1, %v8869_v49  ;;  %v2801_v49 = vadd.f32 %v2800_v33, %v8817_v44 }
0x2d56   :  { %10555 = vst [vmem:[#allocation61_spill] sm:$0xff] %v9119_v23  ;;  %v3092_v31 = vpop.f32.mrf.mxu0 }
0x2d57   :  { %10556 = vst [vmem:[#allocation62_spill] sm:$0xff] %v9121_v14  ;;  %v9126_v24 = vadd.f32 %v3092_v31, %v8961_v48 }
0x2d58   :  { %v2805_v38 = vpop.f32.mrf.mxu2  ;;  %6575 = vmatmul.msk.bf16.gmra.mxu3 %vm287_vm1, %v9021_v15 }
0x2d59   :  { %6579 = vmatmul.msk.bf16.gmra.mxu0 %vm287_vm1, %v9021_v15  ;;  %v2806_v40 = vadd.f32 %v2805_v38, %v8839_v56  ;;  %v3617_v38 = vld [vmem:[#allocation2 + $0x100] sm:$0xff] }
0x2d5b   :  { %v3063_v4 = vpop.f32.mrf.mxu3 }
0x2d5c   :  { %v3116_v18 = vpop.f32.mrf.mxu1  ;;  %v9135_v13 = vadd.f32 %v3063_v4, %v2748_v43 }
0x2d5d   :  { %v9137_v48 = vadd.f32 %v3116_v18, %v2801_v49 }
0x2d5e   :  { %v3094_v39 = vpop.f32.mrf.mxu0  ;;  %6582 = vmatmul.msk.bf16.gmra.mxu1 %vm287_vm1, %v8997_v53 }
0x2d5f   :  { %v9142_v57 = vadd.f32 %v3094_v39, %v8969_v8  ;;  %v3618_v39 = vld [vmem:[#allocation2 + $0x108] sm:$0xff] }
0x2d60   :  { %v2807_v17 = vpop.f32.mrf.mxu2 }
0x2d61   :  { %10557 = vst [vmem:[#allocation63_spill] sm:$0xff] %v9142_v57  ;;  %v2808_v2 = vadd.f32 %v2807_v17, %v8849_v32 }
0x2d63   :  { %v3065_v44 = vpop.f32.mrf.mxu3 }
0x2d64   :  { %v3118_v51 = vpop.f32.mrf.mxu1  ;;  %v9147_v33 = vadd.f32 %v3065_v44, %v2750_v10  ;;  %v2709_v44 = vadd.f32 %v8899_v47, %v8697_v5 }
0x2d65   :  { %v9149_v9 = vadd.f32 %v3118_v51, %v2803_v60  ;;  %6500 = vmatmul.msk.bf16.gmra.mxu2 %vm287_vm1, %v8901_v7  ;;  %v6599_v7 = vld [vmem:[#allocation3 + $0x1c8] sm:$0xf]  ;;  %v9180_v60 = vpack.c.bf16 %v3618_v39, %v3617_v38  ;;  %v3620_v38 = vld [vmem:[#allocation2 + $0x118] sm:$0xff]  ;;  %v3619_v39 = vld [vmem:[#allocation2 + $0x110] sm:$0xff] }
0x2d66   :  { %10558 = vst [vmem:[#allocation64_spill] sm:$0xff] %v9147_v33  ;;  %v3097_v61 = vpop.f32.mrf.mxu0 }
0x2d67   :  { %10559 = vst [vmem:[#allocation65_spill] sm:$0xff] %v9149_v9  ;;  %v9154_v8 = vadd.f32 %v3097_v61, %v8983_v37  ;;  %v6600_v37 = vor.u32 %v7359_v41, %v6599_v7  ;;  %v10564_v61 = vld [vmem:[#allocation21_spill] sm:$0xff] }
0x2d68   :  { %v2810_v63 = vpop.f32.mrf.mxu2  ;;  %6576 = vmatmul.msk.bf16.gmra.mxu3 %vm287_vm1, %v9045_v25  ;;  %v2854_v28 = vadd.f32 %v10565_v27, %v10564_v61  ;;  %v9214_v61 = vpack.c.bf16 %v3620_v38, %v3619_v39  ;;  %v10572_v27 = vld [vmem:[#allocation11_spill] sm:$0xff] }
0x2d69   :  { %6580 = vmatmul.msk.bf16.gmra.mxu0 %vm287_vm1, %v9045_v25  ;;  %3795 = vmatpush.bf16.msra.mxu1 %v6600_v37 }
0x2d6b   :  { %v3068_v12 = vpop.f32.mrf.mxu3 }
0x2d6c   :  { %v3121_v31 = vpop.f32.mrf.mxu1  ;;  %v9163_v30 = vadd.f32 %v3068_v12, %v2753_v1  ;;  %v2811_v1 = vadd.f32 %v2810_v63, %v10566_v36  ;;  %v10568_v12 = vld [vmem:[#allocation36_spill] sm:$0xff] }
0x2d6d   :  { %v9165_v43 = vadd.f32 %v3121_v31, %v2806_v40 }
0x2d6e   :  { %v9167_v49 = vpop.f32.mrf.mxu0  ;;  %6583 = vmatmul.msk.bf16.gmra.mxu1 %vm287_vm1, %v9021_v15 }
0x2d6f   :  { %10560 = vst [vmem:[#allocation66_spill] sm:$0xff] %v9167_v49 }
0x2d70   :  { %v9171_v4 = vpop.f32.mrf.mxu2 }
0x2d71   :  { %10561 = vst [vmem:[#allocation67_spill] sm:$0xff] %v9171_v4  ;;  %v3622_v4 = vld [vmem:[#allocation2 + $0x128] sm:$0xff] }
0x2d73   :  { %v9174_v56 = vpop.f32.mrf.mxu3 }
0x2d74   :  { %10562 = vst [vmem:[#allocation68_spill] sm:$0xff] %v9174_v56  ;;  %v3123_v45 = vpop.f32.mrf.mxu1 }
0x2d75   :  { %v9176_v18 = vadd.f32 %v3123_v45, %v2808_v2  ;;  %6569 = vmatmul.msk.bf16.vlgmr.msra.gmra.mxu2 %vm287_vm1, %v8975_v34 }
0x2d76   :  { %v3367_v10 = vpop.f32.mrf.mxu0 }
0x2d77   :  { %10563 = vst [vmem:[#allocation69_spill] sm:$0xff] %v9176_v18  ;;  %v9185_v51 = vadd.f32 %v3367_v10, %v9006_v59  ;;  %v10567_v59 = vld [vmem:[#allocation10_spill] sm:$0xff] }
0x2d78   :  { %v3024_v32 = vpop.f32.mrf.mxu2  ;;  %6645 = vmatmul.msk.bf16.vlgmr.msra.gmra.mxu3 %vm287_vm1, %v9180_v60  ;;  %v2711_v31 = vadd.f32 %v10568_v12, %v10567_v59 }
0x2d79   :  { %v3190_v17 = vadd.f32 %v3024_v32, %v2709_v44  ;;  %6649 = vmatmul.msk.bf16.vlgmr.msra.gmra.mxu0 %vm287_vm1, %v9180_v60  ;;  %v10571_v44 = vld [vmem:[#allocation9_spill] sm:$0xff] }
0x2d7a   :  { %v2220_v32 = vmul.f32 %v8889_v20, %v10571_v44 }
0x2d7b   :  { %v3169_v7 = vpop.f32.mrf.mxu3 }
0x2d7c   :  { %v3126_v40 = vpop.f32.mrf.mxu1  ;;  %v9196_v5 = vadd.f32 %v3169_v7, %v2854_v28  ;;  %v10573_v28 = vld [vmem:[#allocation37_spill] sm:$0xff] }
0x2d7d   :  { %v9194_v41 = vadd.f32 %v3126_v40, %v2811_v1  ;;  %v2714_v36 = vadd.f32 %v10573_v28, %v10572_v27 }
0x2d7e   :  { %v9198_v47 = vpop.f32.mrf.mxu0  ;;  %6584 = vmatmul.msk.bf16.gmra.mxu1 %vm287_vm1, %v9045_v25 }
0x2d80   :  { %v3026_v37 = vpop.f32.mrf.mxu2 }
0x2d81   :  { %v9204_v2 = vadd.f32 %v3026_v37, %v2711_v31  ;;  %v10574_v31 = vld [vmem:[#allocation25_spill] sm:$0xff] }
0x2d82   :  { %v10575_v37 = vld [vmem:[#allocation49_spill] sm:$0xff] }
0x2d83   :  { %v9208_v63 = vpop.f32.mrf.mxu3  ;;  %v2859_v38 = vadd.f32 %v10575_v37, %v10574_v31  ;;  %v7347_v37 = vld [vmem:[#allocation3 + $0x180] sm:$0xf0] }
0x2d84   :  { %v9206_v45 = vpop.f32.mrf.mxu1  ;;  %10570 = vst [vmem:[#allocation44_spill] sm:$0xff] %v9208_v63 }
0x2d85   :  { %10569 = vst [vmem:[#allocation21_spill] sm:$0xff] %v9206_v45  ;;  %6570 = vmatmul.msk.bf16.gmra.mxu2 %vm287_vm1, %v8997_v53 }
0x2d86   :  { %v3372_v10 = vpop.f32.mrf.mxu0 }
0x2d87   :  { %v9219_v1 = vadd.f32 %v3372_v10, %v9030_v0  ;;  %v2228_v40 = vpop.permute.xlu2 %2227  ;;  %v6559_v10 = vld [vmem:[#allocation3 + $0x1a0] sm:$0xf] }
0x2d88   :  { %v2230_v7 = vadd.f32 %v2228_v40, %v2220_v32  ;;  %v3029_v59 = vpop.f32.mrf.mxu2  ;;  %6646 = vmatmul.msk.bf16.gmra.mxu3 %vm287_vm1, %v9214_v61  ;;  %v7354_v32 = vld [vmem:[#allocation3 + $0x1b8] sm:$0xf0]  ;;  %v10576_v40 = vld [vmem:[#allocation12_spill] sm:$0xff] }
0x2d89   :  { %v9223_v12 = vadd.f32 %v3029_v59, %v2714_v36  ;;  %6650 = vmatmul.msk.bf16.gmra.mxu0 %vm287_vm1, %v9214_v61  ;;  %v6560_v36 = vor.u32 %v7354_v32, %v6559_v10  ;;  %v10577_v59 = vld [vmem:[#allocation38_spill] sm:$0xff]  ;;  %v3621_v10 = vld [vmem:[#allocation2 + $0x120] sm:$0xff] }
0x2d8a   :  { %7688 = vtanh.f32 %v2230_v7  ;;  %v2716_v49 = vadd.f32 %v10577_v59, %v10576_v40  ;;  %v9248_v40 = vpack.c.bf16 %v3622_v4, %v3621_v10 }
0x2d8b   :  { %v3174_v39 = vpop.f32.mrf.mxu3  ;;  %3538 = vmatpush.bf16.msrb.mxu2 %v6560_v36  ;;  %v10580_v36 = vld [vmem:[#allocation39_spill] sm:$0xff] }
0x2d8c   :  { %v3396_v44 = vpop.f32.mrf.mxu1  ;;  %v9229_v27 = vadd.f32 %v3174_v39, %v2859_v38 }
0x2d8d   :  { %v9231_v0 = vadd.f32 %v3396_v44, %v3190_v17  ;;  %v6531_v17 = vld [vmem:[#allocation3 + $0x168] sm:$0xf] }
0x2d8e   :  { %v9233_v28 = vpop.f32.mrf.mxu0  ;;  %6653 = vmatmul.msk.bf16.vlgmr.msra.gmra.mxu1 %vm287_vm1, %v9180_v60  ;;  %v6532_v38 = vor.u32 %v7347_v37, %v6531_v17  ;;  %v10581_v37 = vld [vmem:[#allocation30_spill] sm:$0xff] }
0x2d90   :  { %v7689_v45 = vpop.eup %7688  ;;  %v3031_v31 = vpop.f32.mrf.mxu2  ;;  %3539 = vmatpush.bf16.msrb.mxu2 %v6532_v38  ;;  %v2864_v38 = vadd.f32 %v9017_v58, %v10581_v37  ;;  %v10584_v37 = vld [vmem:[#allocation15_spill] sm:$0xff] }
0x2d91   :  { %v9239_v7 = vadd.f32 %v3031_v31, %v2716_v49  ;;  %2233 = vrot.lane.b32.xlu0 %v7689_v45, %s7765_s21  ;;  %v10579_v49 = vld [vmem:[#allocation13_spill] sm:$0xff] }
0x2d92   :  { %v2719_v59 = vadd.f32 %v10580_v36, %v10579_v49 }
0x2d93   :  { %v9242_v39 = vpop.f32.mrf.mxu3 }
0x2d94   :  { %10578 = vst [vmem:[#allocation29_spill] sm:$0xff] %v9242_v39  ;;  %v9244_v44 = vpop.f32.mrf.mxu1 }
0x2d95   :  { %6571 = vmatmul.msk.bf16.gmra.mxu2 %vm287_vm1, %v9021_v15 }
0x2d96   :  { %v3377_v32 = vpop.f32.mrf.mxu0 }
0x2d97   :  { %v9253_v45 = vadd.f32 %v3377_v32, %v9055_v21  ;;  %v10582_v21 = vld [vmem:[#allocation14_spill] sm:$0xff]  ;;  %v10583_v32 = vld [vmem:[#allocation40_spill] sm:$0xff] }
0x2d98   :  { %v3034_v31 = vpop.f32.mrf.mxu2  ;;  %6647 = vmatmul.msk.bf16.gmra.mxu3 %vm287_vm1, %v9248_v40  ;;  %v2721_v36 = vadd.f32 %v10583_v32, %v10582_v21  ;;  %v10587_v21 = vld [vmem:[#allocation34_spill] sm:$0xff] }
0x2d99   :  { %v9257_v17 = vadd.f32 %v3034_v31, %v2719_v59  ;;  %6651 = vmatmul.msk.bf16.gmra.mxu0 %vm287_vm1, %v9248_v40  ;;  %v2869_v32 = vadd.f32 %v9041_v62, %v10587_v21  ;;  %v10593_v21 = vld [vmem:[#allocation17_spill] sm:$0xff] }
0x2d9b   :  { %v3179_v4 = vpop.f32.mrf.mxu3 }
0x2d9c   :  { %v9263_v10 = vpop.f32.mrf.mxu1  ;;  %v9265_v18 = vadd.f32 %v3179_v4, %v2864_v38  ;;  %v10585_v38 = vld [vmem:[#allocation41_spill] sm:$0xff] }
0x2d9d   :  { %v2724_v4 = vadd.f32 %v10585_v38, %v10584_v37  ;;  %v10590_v37 = vld [vmem:[#allocation43_spill] sm:$0xff] }
0x2d9e   :  { %v9267_v49 = vpop.f32.mrf.mxu0  ;;  %6654 = vmatmul.msk.bf16.gmra.mxu1 %vm287_vm1, %v9214_v61  ;;  %v2726_v38 = vadd.f32 %v10590_v37, %v10589_v6 }
0x2da0   :  { %v3036_v59 = vpop.f32.mrf.mxu2 }
0x2da1   :  { %v9273_v31 = vadd.f32 %v3036_v59, %v2721_v36 }
0x2da3   :  { %v9275_v9 = vpop.f32.mrf.mxu3 }
0x2da4   :  { %v9277_v39 = vpop.f32.mrf.mxu1 }
0x2da5   :  { %6572 = vmatmul.msk.bf16.gmra.mxu2 %vm287_vm1, %v9045_v25 }
0x2da6   :  { %v3382_v58 = vpop.f32.mrf.mxu0 }
0x2da7   :  { %v9284_v14 = vadd.f32 %v3382_v58, %v9079_v35 }
0x2da8   :  { %v3039_v63 = vpop.f32.mrf.mxu2 }
0x2da9   :  { %10586 = vst [vmem:[#allocation10_spill] sm:$0xff] %v9284_v14  ;;  %v3232_v56 = vadd.f32 %v3039_v63, %v2724_v4 }
0x2dab   :  { %v3184_v36 = vpop.f32.mrf.mxu3 }
0x2dac   :  { %v9288_v59 = vpop.f32.mrf.mxu1  ;;  %v9290_v33 = vadd.f32 %v3184_v36, %v2869_v32  ;;  %v10594_v32 = vld [vmem:[#allocation45_spill] sm:$0xff] }
0x2dad   :  { %v2825_v36 = vadd.f32 %v10594_v32, %v10593_v21 }
0x2dae   :  { %v9292_v57 = vpop.f32.mrf.mxu0  ;;  %6655 = vmatmul.msk.bf16.gmra.mxu1 %vm287_vm1, %v9248_v40 }
0x2daf   :  { %10588 = vst [vmem:[#allocation36_spill] sm:$0xff] %v9292_v57 }
0x2db0   :  { %v3041_v35 = vpop.f32.mrf.mxu2 }
0x2db1   :  { %v9298_v58 = vadd.f32 %v3041_v35, %v2726_v38 }
0x2db3   :  { %10591 = vst [vmem:[#allocation9_spill] sm:$0xff] %v9298_v58  ;;  %v9300_v63 = vpop.f32.mrf.mxu3 }
0x2db4   :  { %10592 = vst [vmem:[#allocation11_spill] sm:$0xff] %v9300_v63  ;;  %v9302_v4 = vpop.f32.mrf.mxu1 }
0x2db5   :  { %6585 = vmatmul.msk.bf16.vlgmr.msrb.gmra.mxu2 %vm287_vm1, %v8975_v34  ;;  %v10598_v34 = vld [vmem:[#allocation47_spill] sm:$0xff] }
0x2db6   :  { %v3483_v62 = vpop.f32.mrf.mxu0  ;;  %v2827_v46 = vadd.f32 %v10598_v34, %v10597_v50  ;;  %v7363_v34 = vld [vmem:[#allocation3 + $0x204] sm:$0xf] }
0x2db7   :  { %v9309_v57 = vadd.f32 %v3483_v62, %v9109_v16  ;;  %v10601_v62 = vld [vmem:[#allocation50_spill] sm:$0xff] }
0x2db8   :  { %v3140_v14 = vpop.f32.mrf.mxu2 }
0x2db9   :  { %10595 = vst [vmem:[#allocation37_spill] sm:$0xff] %v9309_v57  ;;  %v3194_v23 = vadd.f32 %v3140_v14, %v2825_v36  ;;  %v6629_v57 = vld [vmem:[#allocation3 + $0x21c] sm:$0xf0] }
0x2dbb   :  { %v3454_v37 = vpop.f32.mrf.mxu3 }
0x2dbc   :  { %v3411_v6 = vpop.f32.mrf.mxu1  ;;  %v9314_v35 = vadd.f32 %v3454_v37, %v9070_v11 }
0x2dbd   :  { %v9311_v38 = vadd.f32 %v3411_v6, %v3232_v56  ;;  %v10600_v56 = vld [vmem:[#allocation20_spill] sm:$0xff] }
0x2dbe   :  { %v9316_v58 = vpop.f32.mrf.mxu0  ;;  %v2830_v11 = vadd.f32 %v10601_v62, %v10600_v56 }
0x2dbf   :  { %10596 = vst [vmem:[#allocation25_spill] sm:$0xff] %v9316_v58 }
0x2dc0   :  { %v3142_v63 = vpop.f32.mrf.mxu2 }
0x2dc1   :  { %v9320_v55 = vadd.f32 %v3142_v63, %v2827_v46 }
0x2dc3   :  { %10599 = vst [vmem:[#allocation49_spill] sm:$0xff] %v9320_v55  ;;  %v9324_v16 = vpop.f32.mrf.mxu3  ;;  %v10604_v55 = vld [vmem:[#allocation22_spill] sm:$0xff] }
0x2dc4   :  { %v9322_v21 = vpop.f32.mrf.mxu1  ;;  %v2832_v56 = vadd.f32 %v9013_v29, %v10604_v55 }
0x2dc5   :  { %6586 = vmatmul.msk.bf16.gmra.mxu2 %vm287_vm1, %v8997_v53  ;;  %v6632_v53 = vor.u32 %v7363_v34, %v6629_v57  ;;  %v10605_v57 = vld [vmem:[#allocation24_spill] sm:$0xff] }
0x2dc6   :  { %v3488_v14 = vpop.f32.mrf.mxu0 }
0x2dc7   :  { %v9331_v32 = vadd.f32 %v3488_v14, %v9137_v48  ;;  %3823 = vmatpush.bf16.msra.mxu2 %v6632_v53  ;;  %v7356_v14 = vld [vmem:[#allocation3 + $0x1cc] sm:$0xf] }
0x2dc8   :  { %v3145_v36 = vpop.f32.mrf.mxu2 }
0x2dc9   :  { %10602 = vst [vmem:[#allocation12_spill] sm:$0xff] %v9331_v32  ;;  %v3208_v6 = vadd.f32 %v3145_v36, %v2830_v11  ;;  %v6601_v11 = vld [vmem:[#allocation3 + $0x1e4] sm:$0xf0] }
0x2dca   :  { %v6604_v36 = vor.u32 %v7356_v14, %v6601_v11  ;;  %v10607_v11 = vld [vmem:[#allocation26_spill] sm:$0xff] }
0x2dcb   :  { %v3459_v50 = vpop.f32.mrf.mxu3 }
0x2dcc   :  { %v3512_v37 = vpop.f32.mrf.mxu1  ;;  %v9334_v46 = vadd.f32 %v3459_v50, %v9098_v3  ;;  %3824 = vmatpush.bf16.msra.mxu2 %v6604_v36  ;;  %v2835_v50 = vadd.f32 %v9028_v52, %v10605_v57 }
0x2dcd   :  { %v9336_v63 = vadd.f32 %v3512_v37, %v3194_v23 }
0x2dce   :  { %v9338_v58 = vpop.f32.mrf.mxu0 }
0x2dcf   :  { %10603 = vst [vmem:[#allocation38_spill] sm:$0xff] %v9338_v58 }
0x2dd0   :  { %v3147_v62 = vpop.f32.mrf.mxu2 }
0x2dd1   :  { %v9342_v48 = vadd.f32 %v3147_v62, %v2832_v56 }
0x2dd3   :  { %v9344_v32 = vpop.f32.mrf.mxu3 }
0x2dd4   :  { %v9346_v3 = vpop.f32.mrf.mxu1 }
0x2dd5   :  { %6587 = vmatmul.msk.bf16.gmra.mxu2 %vm287_vm1, %v9021_v15  ;;  %v2837_v15 = vadd.f32 %v9037_v42, %v10607_v11 }
0x2dd6   :  { %v3493_v23 = vpop.f32.mrf.mxu0 }
0x2dd7   :  { %v9353_v29 = vadd.f32 %v3493_v23, %v9165_v43 }
0x2dd8   :  { %v3150_v55 = vpop.f32.mrf.mxu2 }
0x2dd9   :  { %v3222_v37 = vadd.f32 %v3150_v55, %v2835_v50 }
0x2ddb   :  { %v3464_v34 = vpop.f32.mrf.mxu3 }
0x2ddc   :  { %v3517_v53 = vpop.f32.mrf.mxu1  ;;  %v9356_v56 = vadd.f32 %v3464_v34, %v9126_v24  ;;  %v10608_v24 = vld [vmem:[#allocation28_spill] sm:$0xff] }
0x2ddd   :  { %v9358_v62 = vadd.f32 %v3517_v53, %v3208_v6  ;;  %v2840_v6 = vadd.f32 %v9053_v54, %v10608_v24 }
0x2dde   :  { %v9360_v14 = vpop.f32.mrf.mxu0 }
0x2ddf   :  { %10606 = vst [vmem:[#allocation13_spill] sm:$0xff] %v9360_v14 }
0x2de0   :  { %v3152_v36 = vpop.f32.mrf.mxu2 }
0x2de1   :  { %v9364_v58 = vadd.f32 %v3152_v36, %v2837_v15 }
0x2de3   :  { %v9366_v52 = vpop.f32.mrf.mxu3 }
0x2de4   :  { %v9368_v43 = vpop.f32.mrf.mxu1 }
0x2de5   :  { %6588 = vmatmul.msk.bf16.gmra.mxu2 %vm287_vm1, %v9045_v25 }
0x2de6   :  { %v3498_v23 = vpop.f32.mrf.mxu0 }
0x2de7   :  { %v9375_v57 = vadd.f32 %v3498_v23, %v9194_v41 }
0x2de8   :  { %v3155_v50 = vpop.f32.mrf.mxu2 }
0x2de9   :  { %v3236_v55 = vadd.f32 %v3155_v50, %v2840_v6  ;;  %v9399_v6 = vld [vmem:[%s10431_s10] sm:$0xff] }
0x2deb   :  { %v3469_v42 = vpop.f32.mrf.mxu3 }
0x2dec   :  { %v3522_v34 = vpop.f32.mrf.mxu1  ;;  %v9378_v53 = vadd.f32 %v3469_v42, %v9154_v8 }
0x2ded   :  { %v9380_v11 = vadd.f32 %v3522_v34, %v3222_v37  ;;  %v3569_v34 = vadd.f32 %v9244_v44, %v9204_v2  ;;  %v9423_v2 = vperm.slane %v9399_v6, 0 }
0x2dee   :  { %v9382_v15 = vpop.f32.mrf.mxu0 }
0x2def   :  { %10609 = vst [vmem:[#allocation39_spill] sm:$0xff] %v9382_v15 }
0x2df0   :  { %v9384_v36 = vpop.f32.mrf.mxu2 }
0x2df3   :  { %v9386_v25 = vpop.f32.mrf.mxu3 }
0x2df4   :  { %10610 = vst [vmem:[#allocation30_spill] sm:$0xff] %v9386_v25  ;;  %v9388_v14 = vpop.f32.mrf.mxu1 }
0x2df5   :  { %6657 = vmatmul.msk.bf16.vlgmr.msra.gmra.mxu2 %vm287_vm1, %v9180_v60 }
0x2df6   :  { %v3768_v54 = vpop.f32.mrf.mxu0 }
0x2df7   :  { %v9393_v41 = vadd.f32 %v3768_v54, %v9231_v0  ;;  %v9409_v54 = vperm.slane %v9399_v6, 1 }
0x2df8   :  { %v3425_v23 = vpop.f32.mrf.mxu2 }
0x2df9   :  { %10611 = vst [vmem:[#allocation14_spill] sm:$0xff] %v9393_v41  ;;  %v3563_v8 = vadd.f32 %v3425_v23, %v9081_v19  ;;  %v10613_v41 = vld [vmem:[#allocation52_spill] sm:$0xff] }
0x2dfb   :  { %v3739_v24 = vpop.f32.mrf.mxu3 }
0x2dfc   :  { %v3527_v37 = vpop.f32.mrf.mxu1  ;;  %v9404_v42 = vadd.f32 %v3739_v24, %v9185_v51 }
0x2dfd   :  { %v9401_v50 = vadd.f32 %v3527_v37, %v3236_v55  ;;  %v3568_v55 = vadd.f32 %v9198_v47, %v10613_v41  ;;  %v3576_v41 = vadd.f32 %v9263_v10, %v9223_v12  ;;  %v3583_v10 = vadd.f32 %v9277_v39, %v9239_v7 }
0x2dfe   :  { %v3770_v0 = vpop.f32.mrf.mxu0 }
0x2dff   :  { %v3941_v19 = vadd.f32 %v3770_v0, %v3569_v34 }
0x2e00   :  { %v9411_v23 = vpop.f32.mrf.mxu2 }
0x2e01   :  { %v9414_v25 = vadd.f32 %v9409_v54, %v3941_v19 }
0x2e03   :  { %10612 = vst [vmem:[#allocation40_spill] sm:$0xff] %v9414_v25  ;;  %4133 = vrot.lane.b32.xlu0 %v9414_v25, %s7765_s21  ;;  %v3741_v37 = vpop.f32.mrf.mxu3  ;;  %v2234_v24 = vpop.permute.xlu0 %2233 }
0x2e04   :  { %v9420_v51 = vpop.f32.mrf.mxu1  ;;  %v3940_v44 = vadd.f32 %v3741_v37, %v3568_v55  ;;  %v2236_v34 = vmul.f32 %v2234_v24, %v8889_v20 }
0x2e05   :  { %6658 = vmatmul.msk.bf16.gmra.mxu2 %vm287_vm1, %v9214_v61 }
0x2e06   :  { %v9429_v0 = vadd.f32 %v9423_v2, %v3940_v44  ;;  %v3773_v47 = vpop.f32.mrf.mxu0  ;;  %2238 = vrot.lane.b32.xlu1 %v2236_v34, %s7768_s9 }
0x2e07   :  { %v3948_v20 = vadd.f32 %v3773_v47, %v3576_v41 }
0x2e08   :  { %10614 = vst [vmem:[#allocation15_spill] sm:$0xff] %v9429_v0  ;;  %4131 = vrot.lane.b32.xlu2 %v9429_v0, %s7765_s21  ;;  %v3430_v19 = vpop.f32.mrf.mxu2 }
0x2e09   :  { %v9437_v55 = vadd.f32 %v3430_v19, %v9107_v26  ;;  %v9443_v15 = vadd.f32 %v9409_v54, %v3948_v20  ;;  %v10616_v26 = vld [vmem:[#allocation54_spill] sm:$0xff]  ;;  %v3590_v19 = vadd.f32 %v9288_v59, %v9257_v17  ;;  %v3597_v59 = vadd.f32 %v9302_v4, %v9273_v31 }
0x2e0b   :  { %v3744_v37 = vpop.f32.mrf.mxu3  ;;  %10615 = vst [vmem:[#allocation41_spill] sm:$0xff] %v9443_v15 }
0x2e0c   :  { %v3797_v24 = vpop.f32.mrf.mxu1  ;;  %v3947_v25 = vadd.f32 %v3744_v37, %v9219_v1  ;;  %v3582_v1 = vadd.f32 %v9233_v28, %v10616_v26 }
0x2e0d   :  { %v9440_v44 = vadd.f32 %v3797_v24, %v3563_v8 }
0x2e0e   :  { %v9446_v34 = vadd.f32 %v9423_v2, %v3947_v25  ;;  %v3775_v12 = vpop.f32.mrf.mxu0 }
0x2e0f   :  { %v3955_v8 = vadd.f32 %v3775_v12, %v3583_v10 }
0x2e10   :  { %v9450_v0 = vpop.f32.mrf.mxu2  ;;  %4147 = vrot.lane.b32.xlu2 %v9443_v15, %s7765_s21  ;;  %4145 = vrot.lane.b32.xlu1 %v9446_v34, %s7765_s21  ;;  %v6615_v15 = vld [vmem:[#allocation3 + $0x1d8] sm:$0xf] }
0x2e11   :  { %v9461_v25 = vadd.f32 %v9409_v54, %v3955_v8 }
0x2e13   :  { %v3746_v47 = vpop.f32.mrf.mxu3  ;;  %10617 = vst [vmem:[#allocation34_spill] sm:$0xff] %v9461_v25 }
0x2e14   :  { %v3954_v41 = vadd.f32 %v3746_v47, %v3582_v1 }
0x2e15   :  { %6659 = vmatmul.msk.bf16.gmra.mxu2 %vm287_vm1, %v9248_v40 }
0x2e16   :  { %v9464_v7 = vadd.f32 %v9423_v2, %v3954_v41  ;;  %v3778_v39 = vpop.f32.mrf.mxu0 }
0x2e17   :  { %v3962_v37 = vadd.f32 %v3778_v39, %v3590_v19 }
0x2e18   :  { %v3435_v20 = vpop.f32.mrf.mxu2  ;;  %4159 = vrot.lane.b32.xlu0 %v9464_v7, %s7765_s21  ;;  %4161 = vrot.lane.b32.xlu1 %v9461_v25, %s7765_s21 }
0x2e19   :  { %v9473_v28 = vadd.f32 %v3435_v20, %v9135_v13  ;;  %v9477_v10 = vadd.f32 %v9409_v54, %v3962_v37  ;;  %v3596_v13 = vadd.f32 %v9267_v49, %v9065_v22  ;;  %v7364_v20 = vld [vmem:[#allocation3 + $0x20c] sm:$0xf]  ;;  %v6637_v37 = vld [vmem:[#allocation3 + $0x224] sm:$0xf0] }
0x2e1b   :  { %v3749_v24 = vpop.f32.mrf.mxu3  ;;  %10618 = vst [vmem:[#allocation16_spill] sm:$0xff] %v9477_v10 }
0x2e1c   :  { %v3961_v12 = vadd.f32 %v3749_v24, %v9253_v45  ;;  %v6635_v24 = vld [vmem:[#allocation3 + $0x208] sm:$0xf] }
0x2e1e   :  { %v9480_v26 = vadd.f32 %v9423_v2, %v3961_v12  ;;  %v3780_v17 = vpop.f32.mrf.mxu0  ;;  %v6640_v12 = vor.u32 %v7364_v20, %v6637_v37  ;;  %v7357_v20 = vld [vmem:[#allocation3 + $0x1d4] sm:$0xf]  ;;  %v6609_v37 = vld [vmem:[#allocation3 + $0x1ec] sm:$0xf0] }
0x2e1f   :  { %v3969_v45 = vadd.f32 %v3780_v17, %v3597_v59  ;;  %v7367_v17 = vld [vmem:[#allocation3 + $0x220] sm:$0xf0] }
0x2e20   :  { %10619 = vst [vmem:[#allocation43_spill] sm:$0xff] %v9480_v26  ;;  %v9484_v1 = vpop.f32.mrf.mxu2  ;;  %4173 = vrot.lane.b32.xlu2 %v9480_v26, %s7765_s21  ;;  %4175 = vrot.lane.b32.xlu0 %v9477_v10, %s7765_s21  ;;  %v6636_v59 = vor.u32 %v7367_v17, %v6635_v24  ;;  %v6607_v24 = vld [vmem:[#allocation3 + $0x1d0] sm:$0xf]  ;;  %v7360_v17 = vld [vmem:[#allocation3 + $0x1e8] sm:$0xf0] }
0x2e21   :  { %v9493_v41 = vadd.f32 %v9409_v54, %v3969_v45  ;;  %3881 = vmatpush.bf16.msrb.mxu0 %v6640_v12  ;;  %v6643_v45 = vld [vmem:[#allocation3 + $0x210] sm:$0xf]  ;;  %v6612_v12 = vor.u32 %v7357_v20, %v6609_v37  ;;  %v10624_v20 = vld [vmem:[#allocation35_spill] sm:$0xff] }
0x2e22   :  { %3852 = vmatpush.bf16.msrb.mxu3 %v6636_v59  ;;  %v10622_v59 = vld [vmem:[#allocation33_spill] sm:$0xff]  ;;  %v10625_v37 = vld [vmem:[#allocation55_spill] sm:$0xff] }
0x2e23   :  { %v3751_v8 = vpop.f32.mrf.mxu3  ;;  %10620 = vst [vmem:[#allocation17_spill] sm:$0xff] %v9493_v41  ;;  %v2871_v26 = vadd.f32 %v10625_v37, %v10624_v20 }
0x2e24   :  { %v3968_v47 = vadd.f32 %v3751_v8, %v3596_v13  ;;  %v7368_v8 = vld [vmem:[#allocation3 + $0x228] sm:$0xf0] }
0x2e25   :  { %3882 = vmatpush.bf16.msrb.mxu0 %v6612_v12 }
0x2e26   :  { %v9496_v39 = vadd.f32 %v9423_v2, %v3968_v47 }
0x2e28   :  { %10621 = vst [vmem:[#allocation45_spill] sm:$0xff] %v9496_v39  ;;  %v3440_v31 = vpop.f32.mrf.mxu2  ;;  %4189 = vrot.lane.b32.xlu2 %v9493_v41, %s7765_s21  ;;  %4187 = vrot.lane.b32.xlu1 %v9496_v39, %s7765_s21  ;;  %v10623_v39 = vld [vmem:[#allocation53_spill] sm:$0xff] }
0x2e29   :  { %v9503_v4 = vadd.f32 %v3440_v31, %v9163_v30  ;;  %v6644_v30 = vor.u32 %v7368_v8, %v6643_v45  ;;  %v2866_v10 = vadd.f32 %v10623_v39, %v10622_v59  ;;  %v6608_v45 = vor.u32 %v7360_v17, %v6607_v24  ;;  %v10626_v39 = vld [vmem:[#allocation11_spill] sm:$0xff] }
0x2e2a   :  { %v3244_v24 = vadd.f32 %v10626_v39, %v2871_v26  ;;  %v3623_v26 = vld [vmem:[#allocation2 + $0x130] sm:$0xff] }
0x2e2b   :  { %3910 = vmatpush.bf16.msrb.mxu1 %v6644_v30  ;;  %v3230_v8 = vadd.f32 %v9275_v9, %v2866_v10  ;;  %3853 = vmatpush.bf16.msrb.mxu3 %v6608_v45  ;;  %v10627_v45 = vld [vmem:[#allocation57_spill] sm:$0xff] }
0x2e30   :  { %v9505_v22 = vpop.f32.mrf.mxu2 }
0x2e38   :  { %v3541_v49 = vpop.f32.mrf.mxu2 }
0x2e39   :  { %v9508_v19 = vadd.f32 %v3541_v49, %v9196_v5 }
0x2e40   :  { %v9510_v13 = vpop.f32.mrf.mxu2 }
0x2e48   :  { %v3546_v47 = vpop.f32.mrf.mxu2 }
0x2e49   :  { %v9513_v31 = vadd.f32 %v3546_v47, %v9229_v27 }
0x2e50   :  { %v9515_v5 = vpop.f32.mrf.mxu2 }
0x2e58   :  { %v3551_v49 = vpop.f32.mrf.mxu2 }
0x2e59   :  { %v9518_v41 = vadd.f32 %v3551_v49, %v9265_v18  ;;  %v7361_v18 = vld [vmem:[#allocation3 + $0x1f0] sm:$0xf0] }
0x2e5a   :  { %v6616_v25 = vor.u32 %v7361_v18, %v6615_v15  ;;  %v3799_v15 = vpop.f32.mrf.mxu1 }
0x2e5c   :  { %3911 = vmatpush.bf16.msrb.mxu1 %v6616_v25 }
0x2e60   :  { %v3553_v27 = vpop.f32.mrf.mxu2 }
0x2e61   :  { %v9523_v30 = vadd.f32 %v3553_v27, %v3230_v8  ;;  %v9540_v8 = vperm.slane %v9399_v6, 3 }
0x2e62   :  { %v3802_v37 = vpop.f32.mrf.mxu1 }
0x2e68   :  { %v3556_v47 = vpop.f32.mrf.mxu2 }
0x2e69   :  { %v9526_v49 = vadd.f32 %v3556_v47, %v9290_v33  ;;  %v3571_v33 = vadd.f32 %v9324_v16, %v10627_v45 }
0x2e70   :  { %v3558_v12 = vpop.f32.mrf.mxu2 }
0x2e71   :  { %v9531_v17 = vadd.f32 %v3558_v12, %v3244_v24  ;;  %v10628_v24 = vld [vmem:[#allocation60_spill] sm:$0xff] }
0x2e72   :  { %v3585_v12 = vadd.f32 %v9344_v32, %v10628_v24 }
0x2e78   :  { %v3826_v9 = vpop.f32.mrf.mxu2  ;;  %v2239_v59 = vpop.permute.xlu1 %2238 }
0x2e79   :  { %v9534_v10 = vadd.f32 %v3826_v9, %v9314_v35  ;;  %2241 = vst.msk [vmem:[#allocation2 + $0x138] sm:$0xff] %vm287_vm1, %v2239_v59 }
0x2e80   :  { %v3828_v25 = vpop.f32.mrf.mxu2  ;;  %v3624_v47 = vld [vmem:[#allocation2 + $0x138] sm:$0xff] }
0x2e81   :  { %v3943_v27 = vadd.f32 %v3828_v25, %v3571_v33  ;;  %v3628_v18 = vpack.c.bf16 %v3624_v47, %v3623_v26  ;;  %v3804_v33 = vpop.f32.mrf.mxu1  ;;  %v9573_v26 = vperm.slane %v9399_v6, 2 }
0x2e83   :  { %v9543_v20 = vadd.f32 %v9540_v8, %v3943_v27  ;;  %6648 = vmatmul.msk.bf16.gmra.mxu3 %vm287_vm1, %v3628_v18  ;;  %6652 = vmatmul.msk.bf16.gmra.mxu0 %vm287_vm1, %v3628_v18 }
0x2e84   :  { %6656 = vmatmul.msk.bf16.gmra.mxu1 %vm287_vm1, %v3628_v18  ;;  %6660 = vmatmul.msk.bf16.gmra.mxu2 %vm287_vm1, %v3628_v18 }
0x2e85   :  { %4137 = vrot.lane.b32.xlu2 %v9543_v20, %s7765_s21 }
0x2e88   :  { %v3831_v35 = vpop.f32.mrf.mxu2 }
0x2e89   :  { %v3950_v16 = vadd.f32 %v3831_v35, %v9334_v46  ;;  %v10629_v46 = vld [vmem:[#allocation61_spill] sm:$0xff] }
0x2e8a   :  { %v3584_v25 = vadd.f32 %v9450_v0, %v10629_v46  ;;  %v10630_v0 = vld [vmem:[#allocation59_spill] sm:$0xff]  ;;  %v3807_v46 = vpop.f32.mrf.mxu1 }
0x2e8b   :  { %v9553_v39 = vadd.f32 %v9540_v8, %v3950_v16  ;;  %v3570_v24 = vadd.f32 %v9411_v23, %v10630_v0  ;;  %v3949_v23 = vadd.f32 %v3802_v37, %v9437_v55 }
0x2e8c   :  { %v3956_v32 = vadd.f32 %v3804_v33, %v3584_v25 }
0x2e8d   :  { %4151 = vrot.lane.b32.xlu0 %v9553_v39, %s7765_s21 }
0x2e8e   :  { %v9577_v35 = vadd.f32 %v9573_v26, %v3956_v32  ;;  %v9612_v32 = vadd.f32 %v9573_v26, %v3949_v23  ;;  %v10637_v23 = vld [vmem:[#allocation10_spill] sm:$0xff] }
0x2e90   :  { %v3833_v9 = vpop.f32.mrf.mxu2 }
0x2e91   :  { %v3957_v59 = vadd.f32 %v3833_v9, %v3585_v12  ;;  %v3942_v9 = vadd.f32 %v3799_v15, %v3570_v24 }
0x2e93   :  { %v9560_v45 = vadd.f32 %v9540_v8, %v3957_v59  ;;  %6661 = vmatmul.msk.bf16.vlgmr.msrb.gmra.mxu3 %vm287_vm1, %v9180_v60  ;;  %6665 = vmatmul.msk.bf16.vlgmr.msrb.gmra.mxu0 %vm287_vm1, %v9180_v60  ;;  %v9591_v33 = vadd.f32 %v9573_v26, %v3942_v9 }
0x2e94   :  { %6669 = vmatmul.msk.bf16.vlgmr.msrb.gmra.mxu1 %vm287_vm1, %v9180_v60  ;;  %v10631_v60 = vld [vmem:[#allocation63_spill] sm:$0xff] }
0x2e95   :  { %4165 = vrot.lane.b32.xlu1 %v9560_v45, %s7765_s21  ;;  %v3599_v12 = vadd.f32 %v9366_v52, %v10631_v60  ;;  %v3963_v52 = vadd.f32 %v3807_v46, %v9473_v28  ;;  %v10633_v60 = vld [vmem:[#allocation19_spill] sm:$0xff]  ;;  %v10636_v46 = vld [vmem:[#allocation9_spill] sm:$0xff] }
0x2e97   :  { %v9609_v15 = vadd.f32 %v9573_v26, %v3963_v52  ;;  %v3611_v52 = vadd.f32 %v9322_v21, %v10636_v46 }
0x2e98   :  { %v3836_v27 = vpop.f32.mrf.mxu2 }
0x2e99   :  { %v3964_v47 = vadd.f32 %v3836_v27, %v9356_v56  ;;  %v3809_v27 = vpop.f32.mrf.mxu1 }
0x2e9b   :  { %v9580_v16 = vadd.f32 %v9540_v8, %v3964_v47 }
0x2e9d   :  { %4179 = vrot.lane.b32.xlu2 %v9580_v16, %s7765_s21  ;;  %4163 = vrot.lane.b32.xlu1 %v9577_v35, %s7765_s21 }
0x2ea0   :  { %v3838_v56 = vpop.f32.mrf.mxu2 }
0x2ea1   :  { %v3971_v59 = vadd.f32 %v3838_v56, %v3599_v12  ;;  %v10634_v12 = vld [vmem:[#allocation42_spill] sm:$0xff] }
0x2ea2   :  { %v2755_v9 = vadd.f32 %v10634_v12, %v10633_v60 }
0x2ea3   :  { %v9594_v25 = vadd.f32 %v9540_v8, %v3971_v59  ;;  %6662 = vmatmul.msk.bf16.gmra.mxu3 %vm287_vm1, %v9214_v61  ;;  %6666 = vmatmul.msk.bf16.gmra.mxu0 %vm287_vm1, %v9214_v61 }
0x2ea4   :  { %6670 = vmatmul.msk.bf16.gmra.mxu1 %vm287_vm1, %v9214_v61  ;;  %v10632_v61 = vld [vmem:[#allocation64_spill] sm:$0xff] }
0x2ea5   :  { %4135 = vrot.lane.b32.xlu2 %v9591_v33, %s7765_s21  ;;  %4193 = vrot.lane.b32.xlu0 %v9594_v25, %s7765_s21  ;;  %v3598_v47 = vadd.f32 %v9484_v1, %v10632_v61 }
0x2ea7   :  { %v3970_v0 = vadd.f32 %v3809_v27, %v3598_v47 }
0x2ea9   :  { %v9621_v28 = vadd.f32 %v9573_v26, %v3970_v0 }
0x2ead   :  { %4177 = vrot.lane.b32.xlu2 %v9609_v15, %s7765_s21  ;;  %4149 = vrot.lane.b32.xlu0 %v9612_v32, %s7765_s21 }
0x2eb3   :  { %6663 = vmatmul.msk.bf16.gmra.mxu3 %vm287_vm1, %v9248_v40  ;;  %6667 = vmatmul.msk.bf16.gmra.mxu0 %vm287_vm1, %v9248_v40 }
0x2eb4   :  { %6671 = vmatmul.msk.bf16.gmra.mxu1 %vm287_vm1, %v9248_v40  ;;  %v10635_v40 = vld [vmem:[#allocation68_spill] sm:$0xff] }
0x2eb5   :  { %4191 = vrot.lane.b32.xlu0 %v9621_v28, %s7765_s21  ;;  %v3240_v56 = vadd.f32 %v10635_v40, %v2755_v9 }
0x2eb7   :  { %v3612_v27 = vadd.f32 %v9505_v22, %v3240_v56 }
0x2ec3   :  { %6664 = vmatmul.msk.bf16.gmra.mxu3 %vm287_vm1, %v3628_v18  ;;  %6668 = vmatmul.msk.bf16.gmra.mxu0 %vm287_vm1, %v3628_v18 }
0x2ec4   :  { %6672 = vmatmul.msk.bf16.gmra.mxu1 %vm287_vm1, %v3628_v18 }
0x2f00   :  { %v3783_v55 = vpop.f32.mrf.mxu0 }
0x2f01   :  { %v3976_v1 = vadd.f32 %v3783_v55, %v9311_v38  ;;  %v3812_v37 = vpop.f32.mrf.mxu1 }
0x2f02   :  { %v3977_v18 = vadd.f32 %v3812_v37, %v9503_v4  ;;  %v10638_v4 = vld [vmem:[#allocation58_spill] sm:$0xff]  ;;  %v10639_v37 = vld [vmem:[#allocation36_spill] sm:$0xff] }
0x2f03   :  { %v9636_v24 = vadd.f32 %v9409_v54, %v3976_v1  ;;  %v3610_v12 = vadd.f32 %v10639_v37, %v10638_v4 }
0x2f04   :  { %v9656_v60 = vadd.f32 %v9573_v26, %v3977_v18 }
0x2f05   :  { %4203 = vrot.lane.b32.xlu1 %v9636_v24, %s7765_s21 }
0x2f06   :  { %v3754_v59 = vpop.f32.mrf.mxu3 }
0x2f07   :  { %v3975_v38 = vadd.f32 %v3754_v59, %v10637_v23  ;;  %v3841_v21 = vpop.f32.mrf.mxu2  ;;  %v9668_v59 = vperm.slane %v9399_v6, 6 }
0x2f08   :  { %v3785_v61 = vpop.f32.mrf.mxu0  ;;  %v3978_v9 = vadd.f32 %v3841_v21, %v9378_v53 }
0x2f09   :  { %v9649_v47 = vadd.f32 %v9423_v2, %v3975_v38  ;;  %v9651_v0 = vadd.f32 %v3785_v61, %v3611_v52  ;;  %v3814_v55 = vpop.f32.mrf.mxu1  ;;  %v10640_v38 = vld [vmem:[#allocation23_spill] sm:$0xff] }
0x2f0a   :  { %v9653_v1 = vadd.f32 %v3814_v55, %v3612_v27  ;;  %v9675_v23 = vadd.f32 %v9540_v8, %v3978_v9  ;;  %v10641_v27 = vld [vmem:[#allocation46_spill] sm:$0xff]  ;;  %v10643_v55 = vld [vmem:[#allocation44_spill] sm:$0xff] }
0x2f0b   :  { %4201 = vrot.lane.b32.xlu0 %v9649_v47, %s7765_s21  ;;  %v2856_v61 = vadd.f32 %v10641_v27, %v10640_v38  ;;  %v10647_v27 = vld [vmem:[#allocation62_spill] sm:$0xff] }
0x2f0d   :  { %4205 = vrot.lane.b32.xlu1 %v9656_v60, %s7765_s21  ;;  %v3202_v21 = vadd.f32 %v10643_v55, %v2856_v61 }
0x2f0e   :  { %v3756_v22 = vpop.f32.mrf.mxu3 }
0x2f0f   :  { %v9665_v40 = vadd.f32 %v3756_v22, %v3610_v12  ;;  %v9691_v22 = vperm.slane %v9399_v6, 5 }
0x2f10   :  { %v3884_v56 = vpop.f32.mrf.mxu0 }
0x2f11   :  { %v9671_v46 = vadd.f32 %v3884_v56, %v9336_v63  ;;  %v3913_v52 = vpop.f32.mrf.mxu1  ;;  %v10644_v63 = vld [vmem:[#allocation49_spill] sm:$0xff] }
0x2f12   :  { %v3939_v18 = vadd.f32 %v3913_v52, %v9508_v19  ;;  %v3573_v37 = vadd.f32 %v9346_v3, %v10644_v63  ;;  %v3574_v19 = vadd.f32 %v9510_v13, %v3202_v21  ;;  %v10648_v3 = vld [vmem:[#allocation25_spill] sm:$0xff] }
0x2f13   :  { %v3572_v61 = vadd.f32 %v10648_v3, %v10647_v27 }
0x2f14   :  { %v9680_v53 = vadd.f32 %v9668_v59, %v3939_v18 }
0x2f15   :  { %4207 = vrot.lane.b32.xlu1 %v9675_v23, %s7765_s21 }
0x2f16   :  { %10642 = vst [vmem:[#allocation18_spill] sm:$0xff] %v9680_v53  ;;  %v9685_v4 = vpop.f32.mrf.mxu3 }
0x2f18   :  { %v3886_v12 = vpop.f32.mrf.mxu0 }
0x2f19   :  { %v3945_v9 = vadd.f32 %v3886_v12, %v3573_v37  ;;  %v3915_v56 = vpop.f32.mrf.mxu1 }
0x2f1a   :  { %v3946_v52 = vadd.f32 %v3915_v56, %v3574_v19  ;;  %v9707_v19 = vperm.slane %v9399_v6, 4  ;;  %v3587_v6 = vadd.f32 %v9368_v43, %v9342_v48 }
0x2f1b   :  { %v9694_v18 = vadd.f32 %v9691_v22, %v3945_v9 }
0x2f1c   :  { %v9697_v38 = vadd.f32 %v9668_v59, %v3946_v52 }
0x2f1d   :  { %10645 = vst [vmem:[#allocation47_spill] sm:$0xff] %v9694_v18  ;;  %4141 = vrot.lane.b32.xlu1 %v9694_v18, %s7765_s21  ;;  %v10657_v18 = vld [vmem:[#allocation38_spill] sm:$0xff] }
0x2f1e   :  { %10646 = vst [vmem:[#allocation20_spill] sm:$0xff] %v9697_v38  ;;  %4143 = vrot.lane.b32.xlu2 %v9697_v38, %s7765_s21  ;;  %v3857_v13 = vpop.f32.mrf.mxu3 }
0x2f1f   :  { %v3944_v55 = vadd.f32 %v3857_v13, %v3572_v61  ;;  %v10653_v61 = vld [vmem:[#allocation27_spill] sm:$0xff] }
0x2f20   :  { %v3889_v21 = vpop.f32.mrf.mxu0  ;;  %v10654_v13 = vld [vmem:[#allocation51_spill] sm:$0xff] }
0x2f21   :  { %v3952_v63 = vadd.f32 %v3889_v21, %v9358_v62  ;;  %v3918_v37 = vpop.f32.mrf.mxu1  ;;  %v9714_v56 = vadd.f32 %v9707_v19, %v3944_v55  ;;  %v2861_v55 = vadd.f32 %v10654_v13, %v10653_v61  ;;  %v3601_v13 = vadd.f32 %v9388_v14, %v9364_v58  ;;  %v10661_v58 = vld [vmem:[#allocation69_spill] sm:$0xff] }
0x2f22   :  { %v3953_v12 = vadd.f32 %v3918_v37, %v9513_v31  ;;  %v10652_v31 = vld [vmem:[#allocation12_spill] sm:$0xff]  ;;  %v10655_v37 = vld [vmem:[#allocation29_spill] sm:$0xff] }
0x2f23   :  { %v9711_v9 = vadd.f32 %v9691_v22, %v3952_v63  ;;  %10650 = vst [vmem:[#allocation22_spill] sm:$0xff] %v9714_v56 }
0x2f24   :  { %v9717_v52 = vadd.f32 %v9668_v59, %v3953_v12  ;;  %v3216_v12 = vadd.f32 %v10655_v37, %v2861_v55  ;;  %v7423_v37 = vld [vmem:[#allocation5 + $0x1b0] sm:$0xff] }
0x2f25   :  { %10649 = vst [vmem:[#allocation50_spill] sm:$0xff] %v9711_v9  ;;  %4155 = vrot.lane.b32.xlu0 %v9711_v9, %s7765_s21  ;;  %v10656_v9 = vld [vmem:[#allocation65_spill] sm:$0xff] }
0x2f26   :  { %10651 = vst [vmem:[#allocation24_spill] sm:$0xff] %v9717_v52  ;;  %4157 = vrot.lane.b32.xlu1 %v9717_v52, %s7765_s21  ;;  %4139 = vrot.lane.b32.xlu2 %v9714_v56, %s7765_s21  ;;  %v3860_v62 = vpop.f32.mrf.mxu3  ;;  %v3586_v56 = vadd.f32 %v10657_v18, %v10656_v9  ;;  %v3588_v48 = vadd.f32 %v9515_v5, %v3216_v12  ;;  %v9756_v9 = vpop.permute.xlu2 %4131 }
0x2f27   :  { %v3951_v27 = vadd.f32 %v3860_v62, %v10652_v31 }
0x2f28   :  { %v3891_v3 = vpop.f32.mrf.mxu0 }
0x2f29   :  { %v3959_v21 = vadd.f32 %v3891_v3, %v3587_v6  ;;  %v3920_v63 = vpop.f32.mrf.mxu1  ;;  %v9732_v38 = vadd.f32 %v9707_v19, %v3951_v27 }
0x2f2a   :  { %v3960_v62 = vadd.f32 %v3920_v63, %v3588_v48 }
0x2f2b   :  { %v9735_v52 = vadd.f32 %v9691_v22, %v3959_v21 }
0x2f2c   :  { %v9749_v18 = vadd.f32 %v9668_v59, %v3960_v62 }
0x2f2d   :  { %4153 = vrot.lane.b32.xlu0 %v9732_v38, %s7765_s21 }
0x2f2e   :  { %4169 = vrot.lane.b32.xlu2 %v9735_v52, %s7765_s21  ;;  %v3862_v43 = vpop.f32.mrf.mxu3  ;;  %10658 = vst [vmem:[#allocation26_spill] sm:$0xff] %v9749_v18 }
0x2f2f   :  { %v3958_v6 = vadd.f32 %v3862_v43, %v3586_v56 }
0x2f30   :  { %v3894_v31 = vpop.f32.mrf.mxu0 }
0x2f31   :  { %v9745_v27 = vadd.f32 %v9707_v19, %v3958_v6  ;;  %v3966_v3 = vadd.f32 %v3894_v31, %v9380_v11  ;;  %v3923_v61 = vpop.f32.mrf.mxu1  ;;  %v7424_v11 = vld [vmem:[#allocation5 + $0x1b8] sm:$0xff] }
0x2f32   :  { %v3967_v55 = vadd.f32 %v3923_v61, %v9518_v41  ;;  %5023 = vmatpush.bf16.msrb.mxu2 %v7424_v11  ;;  %v9781_v41 = vpop.permute.xlu2 %4147  ;;  %v9785_v61 = vpop.permute.xlu0 %4133 }
0x2f33   :  { %v9752_v5 = vadd.f32 %v9691_v22, %v3966_v3  ;;  %4167 = vrot.lane.b32.xlu1 %v9745_v27, %s7765_s21  ;;  %v7422_v3 = vld [vmem:[#allocation5 + $0x1a8] sm:$0xff] }
0x2f34   :  { %v9770_v62 = vadd.f32 %v9668_v59, %v3967_v55  ;;  %v7421_v55 = vld [vmem:[#allocation5 + $0x1a0] sm:$0xff] }
0x2f35   :  { %4171 = vrot.lane.b32.xlu0 %v9749_v18, %s7765_s21  ;;  %v9821_v18 = vpop.permute.xlu1 %4145 }
0x2f36   :  { %4183 = vrot.lane.b32.xlu2 %v9752_v5, %s7765_s21  ;;  %v3865_v56 = vpop.f32.mrf.mxu3  ;;  %10659 = vst [vmem:[#allocation28_spill] sm:$0xff] %v9770_v62  ;;  %5024 = vmatpush.bf16.msrb.mxu2 %v7423_v37 }
0x2f37   :  { %v3965_v21 = vadd.f32 %v3865_v56, %v9353_v29  ;;  %v10662_v29 = vld [vmem:[#allocation13_spill] sm:$0xff] }
0x2f38   :  { %v3896_v63 = vpop.f32.mrf.mxu0  ;;  %v3600_v14 = vadd.f32 %v10662_v29, %v10661_v58  ;;  %v10664_v58 = vld [vmem:[#allocation56_spill] sm:$0xff] }
0x2f39   :  { %v9767_v12 = vadd.f32 %v9707_v19, %v3965_v21  ;;  %v3973_v48 = vadd.f32 %v3896_v63, %v3601_v13  ;;  %v3925_v43 = vpop.f32.mrf.mxu1 }
0x2f3a   :  { %v3974_v56 = vadd.f32 %v3925_v43, %v9523_v30  ;;  %5025 = vmatpush.bf16.msrb.mxu2 %v7422_v3  ;;  %v9810_v3 = vpop.permute.xlu0 %4159 }
0x2f3b   :  { %v9773_v6 = vadd.f32 %v9691_v22, %v3973_v48  ;;  %4181 = vrot.lane.b32.xlu1 %v9767_v12, %s7765_s21  ;;  %v10663_v48 = vld [vmem:[#allocation31_spill] sm:$0xff] }
0x2f3c   :  { %v2842_v29 = vadd.f32 %v10664_v58, %v10663_v48 }
0x2f3d   :  { %10660 = vst [vmem:[#allocation52_spill] sm:$0xff] %v9773_v6  ;;  %4185 = vrot.lane.b32.xlu0 %v9770_v62, %s7765_s21  ;;  %v9795_v62 = vadd.f32 %v9668_v59, %v3974_v56 }
0x2f3e   :  { %4197 = vrot.lane.b32.xlu2 %v9773_v6, %s7765_s21  ;;  %v3867_v31 = vpop.f32.mrf.mxu3  ;;  %5026 = vmatpush.bf16.msrb.mxu2 %v7421_v55  ;;  %v3243_v30 = vadd.f32 %v9384_v36, %v2842_v29  ;;  %v7419_v36 = vld [vmem:[#allocation5 + $0x190] sm:$0xff]  ;;  %v10667_v55 = vld [vmem:[#allocation32_spill] sm:$0xff] }
0x2f3f   :  { %v3972_v11 = vadd.f32 %v3867_v31, %v3600_v14  ;;  %10665 = vst [vmem:[#allocation54_spill] sm:$0xff] %v9795_v62  ;;  %v7420_v14 = vld [vmem:[#allocation5 + $0x198] sm:$0xff] }
0x2f40   :  { %v3899_v13 = vpop.f32.mrf.mxu0  ;;  %v3615_v31 = vadd.f32 %v9420_v51, %v3243_v30  ;;  %v10669_v51 = vld [vmem:[#allocation21_spill] sm:$0xff] }
0x2f41   :  { %v9789_v21 = vadd.f32 %v9707_v19, %v3972_v11  ;;  %v3980_v63 = vadd.f32 %v3899_v13, %v9401_v50  ;;  %v3928_v37 = vpop.f32.mrf.mxu1  ;;  %v9805_v50 = vpop.permute.xlu2 %4173 }
0x2f42   :  { %v3981_v56 = vadd.f32 %v3928_v37, %v9526_v49  ;;  %5027 = vmatpush.bf16.msrb.mxu2 %v7420_v14  ;;  %v9833_v37 = vadd.f32 %v9423_v2, %v9404_v42  ;;  %v10673_v42 = vld [vmem:[#allocation37_spill] sm:$0xff] }
0x2f43   :  { %v9798_v6 = vadd.f32 %v9691_v22, %v3980_v63  ;;  %4195 = vrot.lane.b32.xlu1 %v9789_v21, %s7765_s21  ;;  %v10668_v63 = vld [vmem:[#allocation67_spill] sm:$0xff] }
0x2f44   :  { %v2813_v48 = vadd.f32 %v10668_v63, %v10667_v55  ;;  %v9824_v49 = vadd.f32 %v9668_v59, %v3981_v56  ;;  %v3937_v55 = vadd.f32 %v9685_v4, %v10673_v42 }
0x2f45   :  { %10666 = vst [vmem:[#allocation33_spill] sm:$0xff] %v9798_v6  ;;  %4199 = vrot.lane.b32.xlu0 %v9795_v62, %s7765_s21 }
0x2f46   :  { %4211 = vrot.lane.b32.xlu2 %v9798_v6, %s7765_s21  ;;  %v3870_v43 = vpop.f32.mrf.mxu3  ;;  %v3242_v30 = vadd.f32 %v10669_v51, %v2813_v48  ;;  %5028 = vmatpush.bf16.msrb.mxu2 %v7419_v36  ;;  %v9851_v36 = vpop.permute.xlu0 %4175  ;;  %v7432_v48 = vld [vmem:[#allocation5 + $0x1f8] sm:$0xff]  ;;  %v9863_v4 = vadd.f32 %v9707_v19, %v3937_v55 }
0x2f47   :  { %v3979_v11 = vadd.f32 %v3870_v43, %v9375_v57 }
0x2f48   :  { %v3901_v13 = vpop.f32.mrf.mxu0 }
0x2f49   :  { %v9817_v58 = vadd.f32 %v9707_v19, %v3979_v11  ;;  %v3987_v29 = vadd.f32 %v3901_v13, %v3615_v31  ;;  %v3930_v6 = vpop.f32.mrf.mxu1  ;;  %v7418_v31 = vld [vmem:[#allocation5 + $0x188] sm:$0xff]  ;;  %v7440_v11 = vld [vmem:[#allocation5 + $0x238] sm:$0xff]  ;;  %v9843_v13 = vpop.permute.xlu2 %4189 }
0x2f4a   :  { %v3988_v62 = vadd.f32 %v3930_v6, %v9531_v17  ;;  %v10672_v17 = vld [vmem:[#allocation39_spill] sm:$0xff]  ;;  %5029 = vmatpush.bf16.msrb.mxu2 %v7418_v31  ;;  %5049 = vmatpush.bf16.msra.mxu3 %v7440_v11  ;;  %v7430_v31 = vld [vmem:[#allocation5 + $0x1e8] sm:$0xff]  ;;  %v9881_v11 = vadd.f32 %v9573_v26, %v9440_v44  ;;  %v9893_v44 = vadd.f32 %v9573_v26, %v9653_v1  ;;  %v3843_v1 = vpop.f32.mrf.mxu2 }
0x2f4b   :  { %v9827_v57 = vadd.f32 %v9691_v22, %v3987_v29  ;;  %4209 = vrot.lane.b32.xlu1 %v9817_v58, %s7765_s21  ;;  %v3614_v6 = vadd.f32 %v10672_v17, %v3242_v30  ;;  %v10675_v29 = vld [vmem:[#allocation14_spill] sm:$0xff]  ;;  %v7431_v30 = vld [vmem:[#allocation5 + $0x1f0] sm:$0xff]  ;;  %v9907_v26 = vadd.f32 %v9423_v2, %v9665_v40 }
0x2f4c   :  { %v9836_v43 = vadd.f32 %v9668_v59, %v3988_v62  ;;  %v7417_v59 = vld [vmem:[#allocation5 + $0x180] sm:$0xff]  ;;  %v9849_v62 = vadd.f32 %v9540_v8, %v9534_v10  ;;  %v9858_v51 = vadd.f32 %v9409_v54, %v10675_v29  ;;  %v9865_v10 = vpop.permute.xlu1 %4161  ;;  %v7439_v17 = vld [vmem:[#allocation5 + $0x230] sm:$0xff]  ;;  %10678 = vst [vmem:[#allocation60_spill] sm:$0xff] %v9881_v11  ;;  %v10681_v29 = vld [vmem:[#allocation66_spill] sm:$0xff] }
0x2f4d   :  { %10670 = vst [vmem:[#allocation53_spill] sm:$0xff] %v9827_v57  ;;  %4213 = vrot.lane.b32.xlu0 %v9824_v49, %s7765_s21 }
0x2f4e   :  { %10671 = vst [vmem:[#allocation35_spill] sm:$0xff] %v9836_v43  ;;  %4117 = vrot.lane.b32.xlu2 %v9833_v37, %s7765_s21  ;;  %v3872_v14 = vpop.f32.mrf.mxu3  ;;  %5030 = vmatpush.bf16.msrb.mxu2 %v7417_v59 }
0x2f4f   :  { %v3986_v56 = vadd.f32 %v3872_v14, %v3614_v6  ;;  %10676 = vst [vmem:[#allocation11_spill] sm:$0xff] %v9858_v51  ;;  %v9873_v14 = vpop.permute.xlu0 %4151  ;;  %5050 = vmatpush.bf16.msra.mxu3 %v7439_v17  ;;  %v9901_v17 = vadd.f32 %v9409_v54, %v9651_v0  ;;  %v7427_v0 = vld [vmem:[#allocation5 + $0x1d0] sm:$0xff] }
0x2f50   :  { %10679 = vst [vmem:[#allocation61_spill] sm:$0xff] %v9893_v44 }
0x2f51   :  { %v9854_v63 = vadd.f32 %v9707_v19, %v3986_v56  ;;  %v9871_v6 = vpop.permute.xlu2 %4137  ;;  %v9877_v19 = vadd.f32 %v9691_v22, %v9671_v46  ;;  %v7438_v56 = vld [vmem:[#allocation5 + $0x228] sm:$0xff]  ;;  %v7429_v46 = vld [vmem:[#allocation5 + $0x1e0] sm:$0xff]  ;;  %10682 = vst [vmem:[#allocation59_spill] sm:$0xff] %v9901_v17 }
0x2f52   :  { %5036 = vmatpush.bf16.msra.mxu2 %v7432_v48  ;;  %v7437_v22 = vld [vmem:[#allocation5 + $0x220] sm:$0xff]  ;;  %v10680_v48 = vld [vmem:[#allocation48_spill] sm:$0xff]  ;;  %10683 = vst [vmem:[#allocation63_spill] sm:$0xff] %v9907_v26 }
0x2f53   :  { %10674 = vst [vmem:[#allocation55_spill] sm:$0xff] %v9854_v63  ;;  %4123 = vrot.lane.b32.xlu1 %v9849_v62, %s7765_s21  ;;  %5051 = vmatpush.bf16.msra.mxu3 %v7438_v56  ;;  %v7436_v56 = vld [vmem:[#allocation5 + $0x218] sm:$0xff] }
0x2f54   :  { %10677 = vst [vmem:[#allocation57_spill] sm:$0xff] %v9877_v19  ;;  %v4188_v42 = vpop.permute.xlu1 %4187 }
0x2f55   :  { %4119 = vrot.lane.b32.xlu0 %v9858_v51, %s7765_s21 }
0x2f56   :  { %4125 = vrot.lane.b32.xlu2 %v9863_v4, %s7765_s21  ;;  %5037 = vmatpush.bf16.msra.mxu2 %v7431_v30  ;;  %v3241_v30 = vadd.f32 %v10681_v29, %v10680_v48  ;;  %v7435_v48 = vld [vmem:[#allocation5 + $0x210] sm:$0xff] }
0x2f57   :  { %v9895_v59 = vpop.permute.xlu0 %4193  ;;  %5052 = vmatpush.bf16.msra.mxu3 %v7437_v22 }
0x2f59   :  { %v9889_v55 = vpop.permute.xlu2 %4179 }
0x2f5a   :  { %5038 = vmatpush.bf16.msra.mxu2 %v7430_v31  ;;  %v7428_v31 = vld [vmem:[#allocation5 + $0x1d8] sm:$0xff] }
0x2f5b   :  { %4127 = vrot.lane.b32.xlu1 %v9877_v19, %s7765_s21  ;;  %5053 = vmatpush.bf16.msra.mxu3 %v7436_v56  ;;  %v4242_v56 = vsel %vm4229_vm2, %v9821_v18, %v9781_v41  ;;  %v7453_v19 = vld [vmem:[#allocation5 + $0x2a0] sm:$0xff] }
0x2f5c   :  { %v9910_v22 = vpop.permute.xlu1 %4165 }
0x2f5d   :  { %4121 = vrot.lane.b32.xlu0 %v9881_v11, %s7765_s21 }
0x2f5e   :  { %4129 = vrot.lane.b32.xlu2 %v9680_v53, %s7765_s21  ;;  %5039 = vmatpush.bf16.msra.mxu2 %v7429_v46  ;;  %v10684_v53 = vld [vmem:[#allocation30_spill] sm:$0xff] }
0x2f5f   :  { %v3613_v46 = vadd.f32 %v10684_v53, %v3241_v30  ;;  %5054 = vmatpush.bf16.msra.mxu3 %v7435_v48  ;;  %v4150_v40 = vpop.permute.xlu0 %4149  ;;  %v7426_v53 = vld [vmem:[#allocation5 + $0x1c8] sm:$0xff]  ;;  %v7433_v48 = vld [vmem:[#allocation5 + $0x200] sm:$0xff] }
0x2f60   :  { %v7434_v30 = vld [vmem:[#allocation5 + $0x208] sm:$0xff] }
0x2f61   :  { %v3985_v54 = vadd.f32 %v3843_v1, %v3613_v46  ;;  %v4136_v29 = vpop.permute.xlu2 %4135  ;;  %v7448_v1 = vld [vmem:[#allocation5 + $0x278] sm:$0xff] }
0x2f62   :  { %5040 = vmatpush.bf16.msra.mxu2 %v7428_v31  ;;  %v4248_v31 = vsel %vm4229_vm2, %v9810_v3, %v9865_v10  ;;  %v7456_v46 = vld [vmem:[#allocation5 + $0x2b8] sm:$0xff]  ;;  %v4236_v3 = vsel %vm4229_vm2, %v9756_v9, %v9785_v61  ;;  %5062 = vmatpush.bf16.msra.mxu0 %v7448_v1  ;;  %v7455_v9 = vld [vmem:[#allocation5 + $0x2b0] sm:$0xff] }
0x2f63   :  { %4219 = vrot.lane.b32.xlu1 %v9893_v44, %s7765_s21  ;;  %v9917_v2 = vadd.f32 %v9540_v8, %v3985_v54  ;;  %v4254_v8 = vsel %vm4229_vm2, %v9805_v50, %v9851_v36  ;;  %5055 = vmatpush.bf16.msra.mxu3 %v7434_v30  ;;  %v4344_v18 = vmax.f32 %v9464_v7, %v4248_v31  ;;  %v10686_v50 = vld [vmem:[#allocation43_spill] sm:$0xff]  ;;  %v10689_v31 = vld [vmem:[#allocation41_spill] sm:$0xff] }
0x2f64   :  { %v4164_v54 = vpop.permute.xlu1 %4163  ;;  %5075 = vmatpush.bf16.msra.mxu1 %v7456_v46  ;;  %v7447_v44 = vld [vmem:[#allocation5 + $0x270] sm:$0xff] }
0x2f65   :  { %4217 = vrot.lane.b32.xlu0 %v9901_v17, %s7765_s21  ;;  %10685 = vst [vmem:[#allocation64_spill] sm:$0xff] %v9917_v2  ;;  %v10688_v17 = vld [vmem:[#allocation34_spill] sm:$0xff] }
0x2f66   :  { %4215 = vrot.lane.b32.xlu2 %v9907_v26, %s7765_s21  ;;  %5041 = vmatpush.bf16.msra.mxu2 %v7427_v0  ;;  %v7425_v0 = vld [vmem:[#allocation5 + $0x1c0] sm:$0xff]  ;;  %v4392_v7 = vmax.f32 %v4344_v18, %v10688_v17 }
0x2f67   :  { %5056 = vmatpush.bf16.msra.mxu3 %v7433_v48  ;;  %5063 = vmatpush.bf16.msra.mxu0 %v7447_v44 }
0x2f68   :  { %5076 = vmatpush.bf16.msra.mxu1 %v7455_v9 }
0x2f69   :  { %v4178_v11 = vpop.permute.xlu2 %4177 }
0x2f6a   :  { %5042 = vmatpush.bf16.msra.mxu2 %v7426_v53  ;;  %v4338_v53 = vmax.f32 %v9446_v34, %v4242_v56  ;;  %v7446_v34 = vld [vmem:[#allocation5 + $0x268] sm:$0xff] }
0x2f6b   :  { %4225 = vrot.lane.b32.xlu1 %v9827_v57, %s7765_s21  ;;  %v4350_v57 = vmax.f32 %v10686_v50, %v4254_v8  ;;  %v7454_v56 = vld [vmem:[#allocation5 + $0x2a8] sm:$0xff]  ;;  %v10691_v8 = vld [vmem:[#allocation16_spill] sm:$0xff]  ;;  %5064 = vmatpush.bf16.msra.mxu0 %v7446_v34  ;;  %v4237_v34 = vsel %vm4229_vm2, %v9785_v61, %v4136_v29  ;;  %v4249_v61 = vsel %vm4229_vm2, %v9865_v10, %v4164_v54 }
0x2f6c   :  { %v9945_v26 = vmax.f32 %v4338_v53, %v10689_v31  ;;  %v4244_v53 = vsel %vm4229_vm2, %v4150_v40, %v9873_v14  ;;  %5077 = vmatpush.bf16.msra.mxu1 %v7454_v56  ;;  %v4243_v56 = vsel %vm4229_vm2, %v9781_v41, %v4150_v40  ;;  %v4255_v10 = vsel %vm4229_vm2, %v9851_v36, %v4178_v11 }
0x2f6d   :  { %4221 = vrot.lane.b32.xlu0 %v9917_v2, %s7765_s21  ;;  %v4260_v2 = vsel %vm4229_vm2, %v4188_v42, %v9843_v13  ;;  %v9948_v1 = vmax.f32 %v4350_v57, %v10691_v8  ;;  %v10693_v42 = vld [vmem:[#allocation40_spill] sm:$0xff] }
0x2f6e   :  { %4227 = vrot.lane.b32.xlu2 %v9836_v43, %s7765_s21  ;;  %5043 = vmatpush.bf16.msra.mxu2 %v7425_v0  ;;  %v10687_v43 = vld [vmem:[#allocation15_spill] sm:$0xff]  ;;  %10690 = vst [vmem:[#allocation19_spill] sm:$0xff] %v9945_v26  ;;  %v4434_v18 = vmax.f32 %v9945_v26, %v4392_v7 }
0x2f6f   :  { %v4332_v30 = vmax.f32 %v10687_v43, %v4236_v3  ;;  %v10692_v43 = vld [vmem:[#allocation45_spill] sm:$0xff]  ;;  %v4192_v3 = vpop.permute.xlu0 %4191 }
0x2f70   :  { %v4356_v46 = vmax.f32 %v10692_v43, %v4260_v2  ;;  %v9962_v57 = vmax.f32 %v4434_v18, %v9948_v1  ;;  %v10696_v2 = vld [vmem:[#allocation17_spill] sm:$0xff]  ;;  %v4250_v43 = vsel %vm4229_vm2, %v4164_v54, %v9910_v22  ;;  %5078 = vmatpush.bf16.msra.mxu1 %v7453_v19 }
0x2f71   :  { %v9954_v0 = vmax.f32 %v4332_v30, %v10693_v42  ;;  %v4238_v30 = vsel %vm4229_vm2, %v4136_v29, %v9871_v6  ;;  %v4346_v29 = vmax.f32 %v9577_v35, %v4250_v43 }
0x2f72   :  { %10695 = vst [vmem:[#allocation68_spill] sm:$0xff] %v9962_v57  ;;  %v9965_v50 = vmax.f32 %v4356_v46, %v10696_v2  ;;  %v4340_v46 = vmax.f32 %v9612_v32, %v4244_v53  ;;  %v4334_v18 = vmax.f32 %v9591_v33, %v4238_v30  ;;  %v4339_v53 = vmax.f32 %v10689_v31, %v4243_v56  ;;  %v7452_v30 = vld [vmem:[#allocation5 + $0x298] sm:$0xff] }
0x2f73   :  { %10694 = vst [vmem:[#allocation42_spill] sm:$0xff] %v9954_v0  ;;  %v4428_v44 = vmax.f32 %v9954_v0, %v9945_v26  ;;  %v4440_v26 = vmax.f32 %v4392_v7, %v9948_v1  ;;  %v4345_v56 = vmax.f32 %v10688_v17, %v4249_v61  ;;  %v4394_v36 = vmax.f32 %v4346_v29, %v9560_v45  ;;  %v7443_v61 = vld [vmem:[#allocation5 + $0x250] sm:$0xff] }
0x2f74   :  { %v10001_v43 = vmax.f32 %v4340_v46, %v9553_v39  ;;  %v10005_v31 = vmax.f32 %v4334_v18, %v9543_v20  ;;  %5079 = vmatpush.bf16.msra.mxu1 %v7452_v30  ;;  %v4351_v17 = vmax.f32 %v10691_v8, %v4255_v10  ;;  %v7451_v29 = vld [vmem:[#allocation5 + $0x290] sm:$0xff] }
0x2f75   :  { %4223 = vrot.lane.b32.xlu0 %v9854_v63, %s7765_s21  ;;  %v9969_v9 = vmax.f32 %v4428_v44, %v4392_v7  ;;  %v7445_v63 = vld [vmem:[#allocation5 + $0x260] sm:$0xff]  ;;  %v4256_v44 = vsel %vm4229_vm2, %v4178_v11, %v9889_v55  ;;  %v9985_v51 = vmax.f32 %v4440_v26, %v9965_v50  ;;  %v4333_v7 = vmax.f32 %v10693_v42, %v4237_v34  ;;  %v7444_v26 = vld [vmem:[#allocation5 + $0x258] sm:$0xff] }
0x2f76   :  { %5065 = vmatpush.bf16.msra.mxu0 %v7445_v63  ;;  %v4262_v63 = vsel %vm4229_vm2, %v4192_v3, %v9895_v59  ;;  %v4352_v54 = vmax.f32 %v9609_v15, %v4256_v44  ;;  %v7376_v34 = vld [vmem:[#allocation5 + $0x38] sm:$0xff]  ;;  %v4261_v11 = vsel %vm4229_vm2, %v9843_v13, %v4192_v3  ;;  %v4430_v3 = vmax.f32 %v10005_v31, %v10001_v43 }
0x2f77   :  { %v4204_v48 = vpop.permute.xlu1 %4203  ;;  %v4614_v40 = vadd.f32 %v9962_v57, %v9969_v9  ;;  %v4358_v46 = vmax.f32 %v9621_v28, %v4262_v63  ;;  %5389 = vmatpush.bf16.msrb.mxu3 %v7376_v34  ;;  %v10018_v18 = vmax.f32 %v4333_v7, %v9591_v33  ;;  %v7375_v33 = vld [vmem:[#allocation5 + $0x30] sm:$0xff]  ;;  %v4393_v8 = vmax.f32 %v4345_v56, %v9577_v35  ;;  %v7464_v35 = vld [vmem:[#allocation5 + $0x2f8] sm:$0xff] }
0x2f78   :  { %v9982_v0 = vpop.permute.xlu2 %4143  ;;  %v4400_v13 = vmax.f32 %v4352_v54, %v9580_v16  ;;  %5080 = vmatpush.bf16.msra.mxu1 %v7451_v29  ;;  %v7450_v54 = vld [vmem:[#allocation5 + $0x288] sm:$0xff] }
0x2f79   :  { %v4620_v44 = vadd.f32 %v4614_v40, %v9985_v51  ;;  %v10036_v40 = vmax.f32 %v4358_v46, %v9594_v25  ;;  %v7374_v46 = vld [vmem:[#allocation5 + $0x28] sm:$0xff] }
0x2f7a   :  { %5066 = vmatpush.bf16.msra.mxu0 %v7444_v26 }
0x2f7b   :  { %10697 = vst [vmem:[#allocation9_spill] sm:$0xff] %v10036_v40  ;;  %5390 = vmatpush.bf16.msrb.mxu3 %v7375_v33 }
0x2f7c   :  { %5081 = vmatpush.bf16.msra.mxu1 %v7450_v54 }
0x2f7d   :  { %v4202_v41 = vpop.permute.xlu0 %4201 }
0x2f7e   :  { %v4266_v19 = vsel %vm4229_vm2, %v4202_v41, %v4204_v48  ;;  %v4446_v41 = vmax.f32 %v9948_v1, %v9965_v50  ;;  %v10022_v1 = vmax.f32 %v4339_v53, %v9612_v32  ;;  %v4357_v32 = vmax.f32 %v10696_v2, %v4261_v11  ;;  %5067 = vmatpush.bf16.msra.mxu0 %v7443_v61  ;;  %v7442_v2 = vld [vmem:[#allocation5 + $0x248] sm:$0xff] }
0x2f7f   :  { %v4362_v57 = vmax.f32 %v9649_v47, %v4266_v19  ;;  %v4206_v42 = vpop.permute.xlu1 %4205  ;;  %v4442_v19 = vmax.f32 %v4394_v36, %v4400_v13  ;;  %5391 = vmatpush.bf16.msrb.mxu3 %v7374_v46  ;;  %v7372_v46 = vld [vmem:[#allocation5 + $0x18] sm:$0xff] }
0x2f80   :  { %v4267_v7 = vsel %vm4229_vm2, %v4204_v48, %v4206_v42  ;;  %v4429_v26 = vmax.f32 %v10018_v18, %v10022_v1  ;;  %v4435_v30 = vmax.f32 %v10022_v1, %v4393_v8  ;;  %v10042_v10 = vpop.permute.xlu2 %4139  ;;  %v10044_v48 = vmax.f32 %v4430_v3, %v4394_v36 }
0x2f81   :  { %v10015_v47 = vmax.f32 %v4362_v57, %v9636_v24  ;;  %v4436_v57 = vmax.f32 %v10001_v43, %v4394_v36  ;;  %v10053_v61 = vmax.f32 %v4357_v32, %v9621_v28  ;;  %v10058_v36 = vmax.f32 %v4442_v19, %v10036_v40  ;;  %v7441_v28 = vld [vmem:[#allocation5 + $0x240] sm:$0xff] }
0x2f82   :  { %5068 = vmatpush.bf16.msra.mxu0 %v7442_v2  ;;  %v7373_v19 = vld [vmem:[#allocation5 + $0x20] sm:$0xff] }
0x2f83   :  { %v10030_v63 = vmax.f32 %v4446_v41, %v10015_v47  ;;  %v10046_v34 = vmax.f32 %v4436_v57, %v4400_v13  ;;  %v4363_v41 = vmax.f32 %v9636_v24, %v4267_v7  ;;  %10698 = vst [vmem:[#allocation10_spill] sm:$0xff] %v10058_v36  ;;  %v10061_v57 = vmax.f32 %v4429_v26, %v4393_v8  ;;  %v7392_v26 = vld [vmem:[#allocation5 + $0xb8] sm:$0xff] }
0x2f84   :  { %v4448_v7 = vmax.f32 %v4400_v13, %v10036_v40  ;;  %5392 = vmatpush.bf16.msrb.mxu3 %v7373_v19  ;;  %v7462_v13 = vld [vmem:[#allocation5 + $0x2e8] sm:$0xff] }
0x2f85   :  { %v4626_v53 = vadd.f32 %v4620_v44, %v10030_v63  ;;  %v4399_v44 = vmax.f32 %v4351_v17, %v9609_v15  ;;  %v7463_v15 = vld [vmem:[#allocation5 + $0x2f0] sm:$0xff]  ;;  %v7449_v17 = vld [vmem:[#allocation5 + $0x280] sm:$0xff]  ;;  %v7382_v19 = vld [vmem:[#allocation5 + $0x68] sm:$0xff] }
0x2f86   :  { %5069 = vmatpush.bf16.msra.mxu0 %v7441_v28  ;;  %5082 = vmatpush.bf16.msra.mxu1 %v7449_v17 }
0x2f87   :  { %v4632_v56 = vpack.c.bf16 %v4626_v53, %v4626_v53  ;;  %v10049_v11 = vpop.permute.xlu1 %4207  ;;  %v4441_v24 = vmax.f32 %v4393_v8, %v4399_v44  ;;  %v10063_v33 = vmax.f32 %v4435_v30, %v4399_v44  ;;  %v4616_v53 = vadd.f32 %v10046_v34, %v10044_v48  ;;  %v7384_v8 = vld [vmem:[#allocation5 + $0x78] sm:$0xff] }
0x2f88   :  { %v4268_v29 = vsel %vm4229_vm2, %v4206_v42, %v10049_v11  ;;  %v10066_v42 = vmax.f32 %v4363_v41, %v9656_v60  ;;  %5393 = vmatpush.bf16.msrb.mxu3 %v7372_v46 }
0x2f89   :  { %v4364_v3 = vmax.f32 %v9656_v60, %v4268_v29  ;;  %5031 = vmatmul.bf16.vlgmr.msrb.gmra.mxu2 %v4632_v56  ;;  %v10075_v30 = vmax.f32 %v4441_v24, %v10053_v61  ;;  %v4622_v2 = vadd.f32 %v4616_v53, %v10058_v36  ;;  %v4615_v56 = vadd.f32 %v10063_v33, %v10061_v57  ;;  %v7391_v29 = vld [vmem:[#allocation5 + $0xb0] sm:$0xff] }
0x2f8a   :  { %5088 = vmatpush.bf16.msrb.mxu2 %v7464_v35  ;;  %v4447_v35 = vmax.f32 %v4399_v44, %v10053_v61  ;;  %5402 = vmatpush.bf16.msrb.mxu0 %v7384_v8  ;;  %v7383_v44 = vld [vmem:[#allocation5 + $0x70] sm:$0xff]  ;;  %v7390_v8 = vld [vmem:[#allocation5 + $0xa8] sm:$0xff] }
0x2f8b   :  { %v10069_v32 = vmax.f32 %v4364_v3, %v9675_v23  ;;  %5415 = vmatpush.bf16.msrb.mxu1 %v7392_v26  ;;  %v10088_v3 = vpop.permute.xlu2 %4169  ;;  %v4621_v24 = vadd.f32 %v4615_v56, %v10075_v30  ;;  %v7371_v53 = vld [vmem:[#allocation5 + $0x10] sm:$0xff]  ;;  %v7460_v26 = vld [vmem:[#allocation5 + $0x2d8] sm:$0xff]  ;;  %v7370_v56 = vld [vmem:[#allocation5 + $0x8] sm:$0xff] }
0x2f8c   :  { %v10083_v54 = vmax.f32 %v4447_v35, %v10066_v42  ;;  %5394 = vmatpush.bf16.msrb.mxu3 %v7371_v53 }
0x2f8d   :  { %10699 = vst [vmem:[#allocation58_spill] sm:$0xff] %v10069_v32  ;;  %v10079_v60 = vmax.f32 %v4448_v7, %v10069_v32  ;;  %v7405_v32 = vld [vmem:[#allocation5 + $0x120] sm:$0xff] }
0x2f8e   :  { %5089 = vmatpush.bf16.msrb.mxu2 %v7463_v15  ;;  %5403 = vmatpush.bf16.msrb.mxu0 %v7383_v44  ;;  %v7461_v15 = vld [vmem:[#allocation5 + $0x2e0] sm:$0xff]  ;;  %v4627_v17 = vadd.f32 %v4621_v24, %v10083_v54  ;;  %v7459_v44 = vld [vmem:[#allocation5 + $0x2d0] sm:$0xff]  ;;  %v7380_v24 = vld [vmem:[#allocation5 + $0x58] sm:$0xff] }
0x2f8f   :  { %10700 = vst [vmem:[#allocation36_spill] sm:$0xff] %v10079_v60  ;;  %v4628_v41 = vadd.f32 %v4622_v2, %v10079_v60  ;;  %5416 = vmatpush.bf16.msrb.mxu1 %v7391_v29  ;;  %v10092_v7 = vpop.permute.xlu1 %4141  ;;  %v7369_v29 = vld [vmem:[#allocation5] sm:$0xff]  ;;  %v7386_v60 = vld [vmem:[#allocation5 + $0x88] sm:$0xff] }
0x2f90   :  { %v4633_v35 = vpack.c.bf16 %v4627_v17, %v4627_v17  ;;  %5395 = vmatpush.bf16.msrb.mxu3 %v7370_v56  ;;  %v7458_v17 = vld [vmem:[#allocation5 + $0x2c8] sm:$0xff]  ;;  %v7407_v56 = vld [vmem:[#allocation5 + $0x130] sm:$0xff] }
0x2f91   :  { %v4634_v28 = vpack.c.bf16 %v4628_v41, %v4628_v41  ;;  %v7389_v41 = vld [vmem:[#allocation5 + $0xa0] sm:$0xff] }
0x2f92   :  { %5090 = vmatpush.bf16.msrb.mxu2 %v7462_v13  ;;  %5404 = vmatpush.bf16.msrb.mxu0 %v7382_v19  ;;  %v7381_v13 = vld [vmem:[#allocation5 + $0x60] sm:$0xff] }
0x2f93   :  { %5057 = vmatmul.bf16.vlgmr.msra.gmra.mxu3 %v4634_v28  ;;  %5417 = vmatpush.bf16.msrb.mxu1 %v7390_v8  ;;  %v10096_v46 = vpop.permute.xlu2 %4183  ;;  %v7388_v28 = vld [vmem:[#allocation5 + $0x98] sm:$0xff]  ;;  %v7379_v8 = vld [vmem:[#allocation5 + $0x50] sm:$0xff] }
0x2f94   :  { %5396 = vmatpush.bf16.msrb.mxu3 %v7369_v29  ;;  %v7406_v29 = vld [vmem:[#allocation5 + $0x128] sm:$0xff] }
0x2f96   :  { %5091 = vmatpush.bf16.msrb.mxu2 %v7461_v15  ;;  %5405 = vmatpush.bf16.msrb.mxu0 %v7381_v13  ;;  %v7408_v15 = vld [vmem:[#allocation5 + $0x138] sm:$0xff] }
0x2f97   :  { %v10094_v2 = vpop.permute.xlu0 %4155  ;;  %5418 = vmatpush.bf16.msrb.mxu1 %v7389_v41  ;;  %v7400_v13 = vld [vmem:[#allocation5 + $0xf8] sm:$0xff]  ;;  %v7378_v41 = vld [vmem:[#allocation5 + $0x48] sm:$0xff] }
0x2f98   :  { %v4158_v53 = vpop.permute.xlu1 %4157  ;;  %5441 = vmatpush.bf16.msra.mxu3 %v7408_v15  ;;  %v7377_v15 = vld [vmem:[#allocation5 + $0x40] sm:$0xff] }
0x2f99   :  { %5044 = vmatmul.bf16.vlgmr.msra.gmra.mxu2 %v4633_v35  ;;  %v7387_v35 = vld [vmem:[#allocation5 + $0x90] sm:$0xff] }
0x2f9a   :  { %5092 = vmatpush.bf16.msrb.mxu2 %v7460_v26  ;;  %5406 = vmatpush.bf16.msrb.mxu0 %v7380_v24  ;;  %v7457_v26 = vld [vmem:[#allocation5 + $0x2c0] sm:$0xff] }
0x2f9b   :  { %5419 = vmatpush.bf16.msrb.mxu1 %v7388_v28  ;;  %v10098_v40 = vpop.permute.xlu2 %4197  ;;  %v7399_v28 = vld [vmem:[#allocation5 + $0xf0] sm:$0xff] }
0x2f9c   :  { %5442 = vmatpush.bf16.msra.mxu3 %v7407_v56  ;;  %v4239_v56 = vsel %vm4229_vm2, %v9871_v6, %v10042_v10 }
0x2f9e   :  { %5093 = vmatpush.bf16.msrb.mxu2 %v7459_v44  ;;  %5407 = vmatpush.bf16.msrb.mxu0 %v7379_v8  ;;  %v7398_v8 = vld [vmem:[#allocation5 + $0xe8] sm:$0xff] }
0x2f9f   :  { %v4154_v19 = vpop.permute.xlu0 %4153  ;;  %5420 = vmatpush.bf16.msrb.mxu1 %v7387_v35 }
0x2fa0   :  { %5443 = vmatpush.bf16.msra.mxu3 %v7406_v29 }
0x2fa2   :  { %5094 = vmatpush.bf16.msrb.mxu2 %v7458_v17  ;;  %5408 = vmatpush.bf16.msrb.mxu0 %v7378_v41  ;;  %v7385_v17 = vld [vmem:[#allocation5 + $0x80] sm:$0xff]  ;;  %v4245_v41 = vsel %vm4229_vm2, %v9873_v14, %v4154_v19  ;;  %v4240_v14 = vsel %vm4229_vm2, %v10042_v10, %v10092_v7 }
0x2fa3   :  { %5421 = vmatpush.bf16.msrb.mxu1 %v7386_v60  ;;  %v10109_v29 = vpop.permute.xlu2 %4211 }
0x2fa4   :  { %5444 = vmatpush.bf16.msra.mxu3 %v7405_v32 }
0x2fa5   :  { %v4168_v44 = vpop.permute.xlu1 %4167 }
0x2fa6   :  { %5095 = vmatpush.bf16.msrb.mxu2 %v7457_v26  ;;  %5409 = vmatpush.bf16.msrb.mxu0 %v7377_v15  ;;  %v4251_v35 = vsel %vm4229_vm2, %v9910_v22, %v4168_v44  ;;  %v4252_v26 = vsel %vm4229_vm2, %v4168_v44, %v10088_v3  ;;  %v4246_v22 = vsel %vm4229_vm2, %v4154_v19, %v10094_v2  ;;  %v7397_v44 = vld [vmem:[#allocation5 + $0xe0] sm:$0xff] }
0x2fa7   :  { %v4172_v24 = vpop.permute.xlu0 %4171  ;;  %5422 = vmatpush.bf16.msrb.mxu1 %v7385_v17  ;;  %v4347_v32 = vmax.f32 %v9560_v45, %v4251_v35  ;;  %v4335_v17 = vmax.f32 %v9543_v20, %v4239_v56  ;;  %v4348_v36 = vmax.f32 %v9745_v27, %v4252_v26  ;;  %v4247_v45 = vsel %vm4229_vm2, %v10094_v2, %v4158_v53  ;;  %v7403_v35 = vld [vmem:[#allocation5 + $0x110] sm:$0xff]  ;;  %v10701_v26 = vld [vmem:[#allocation22_spill] sm:$0xff] }
0x2fa8   :  { %v4341_v19 = vmax.f32 %v9553_v39, %v4245_v41  ;;  %v4342_v20 = vmax.f32 %v9732_v38, %v4246_v22  ;;  %v4253_v10 = vsel %vm4229_vm2, %v10088_v3, %v4172_v24  ;;  %v10702_v39 = vld [vmem:[#allocation47_spill] sm:$0xff] }
0x2fa9   :  { %v4396_v41 = vmax.f32 %v4348_v36, %v9735_v52  ;;  %v4349_v24 = vmax.f32 %v9735_v52, %v4253_v10 }
0x2faa   :  { %5428 = vmatpush.bf16.msra.mxu2 %v7400_v13  ;;  %v7404_v13 = vld [vmem:[#allocation5 + $0x118] sm:$0xff]  ;;  %v10143_v3 = vmax.f32 %v4341_v19, %v9732_v38 }
0x2fab   :  { %5445 = vmatpush.bf16.msra.mxu3 %v7404_v13  ;;  %v4395_v13 = vmax.f32 %v4347_v32, %v9745_v27  ;;  %v7402_v32 = vld [vmem:[#allocation5 + $0x108] sm:$0xff]  ;;  %v10169_v19 = vpop.permute.xlu2 %4117 }
0x2fad   :  { %v4182_v60 = vpop.permute.xlu1 %4181 }
0x2fae   :  { %5429 = vmatpush.bf16.msra.mxu2 %v7399_v28  ;;  %v4257_v28 = vsel %vm4229_vm2, %v9889_v55, %v4182_v60  ;;  %v4258_v6 = vsel %vm4229_vm2, %v4182_v60, %v10096_v46  ;;  %v4241_v55 = vsel %vm4229_vm2, %v10092_v7, %v9982_v0  ;;  %v4336_v60 = vmax.f32 %v10701_v26, %v4240_v14  ;;  %v7396_v0 = vld [vmem:[#allocation5 + $0xd8] sm:$0xff]  ;;  %v7395_v14 = vld [vmem:[#allocation5 + $0xd0] sm:$0xff] }
0x2faf   :  { %v4186_v15 = vpop.permute.xlu0 %4185  ;;  %v4354_v56 = vmax.f32 %v9767_v12, %v4258_v6  ;;  %v10137_v7 = vmax.f32 %v4335_v17, %v10701_v26  ;;  %v4337_v2 = vmax.f32 %v10702_v39, %v4241_v55  ;;  %5446 = vmatpush.bf16.msra.mxu3 %v7403_v35  ;;  %v10704_v55 = vld [vmem:[#allocation24_spill] sm:$0xff]  ;;  %v7401_v26 = vld [vmem:[#allocation5 + $0x100] sm:$0xff] }
0x2fb0   :  { %v4259_v27 = vsel %vm4229_vm2, %v10096_v46, %v4186_v15  ;;  %v10160_v52 = vmax.f32 %v4336_v60, %v10702_v39  ;;  %v10706_v60 = vld [vmem:[#allocation20_spill] sm:$0xff] }
0x2fb2   :  { %5430 = vmatpush.bf16.msra.mxu2 %v7398_v8  ;;  %v4353_v8 = vmax.f32 %v9580_v16, %v4257_v28  ;;  %v10703_v16 = vld [vmem:[#allocation50_spill] sm:$0xff] }
0x2fb3   :  { %v4343_v53 = vmax.f32 %v10703_v16, %v4247_v45  ;;  %v10152_v6 = vmax.f32 %v4342_v20, %v10703_v16  ;;  %5447 = vmatpush.bf16.msra.mxu3 %v7402_v32  ;;  %v10705_v20 = vld [vmem:[#allocation26_spill] sm:$0xff]  ;;  %v10707_v16 = vld [vmem:[#allocation52_spill] sm:$0xff] }
0x2fb4   :  { %v10147_v28 = vmax.f32 %v4353_v8, %v9767_v12  ;;  %v4437_v12 = vmax.f32 %v10143_v3, %v4395_v13  ;;  %v4355_v8 = vmax.f32 %v9752_v5, %v4259_v27  ;;  %v4397_v10 = vmax.f32 %v4349_v24, %v10705_v20 }
0x2fb5   :  { %v4196_v22 = vpop.permute.xlu1 %4195  ;;  %v10166_v45 = vmax.f32 %v4343_v53, %v10704_v55  ;;  %v4432_v39 = vmax.f32 %v10160_v52, %v10152_v6 }
0x2fb6   :  { %5431 = vmatpush.bf16.msra.mxu2 %v7397_v44  ;;  %v4402_v44 = vmax.f32 %v4354_v56, %v9752_v5  ;;  %v4263_v36 = vsel %vm4229_vm2, %v9895_v59, %v4196_v22  ;;  %v4264_v38 = vsel %vm4229_vm2, %v4196_v22, %v10098_v40  ;;  %v4438_v59 = vmax.f32 %v10152_v6, %v4396_v41  ;;  %v7394_v22 = vld [vmem:[#allocation5 + $0xc8] sm:$0xff] }
0x2fb7   :  { %v4359_v46 = vmax.f32 %v9594_v25, %v4263_v36  ;;  %v4360_v15 = vmax.f32 %v9789_v21, %v4264_v38  ;;  %v4200_v17 = vpop.permute.xlu0 %4199  ;;  %v4431_v25 = vmax.f32 %v10137_v7, %v10143_v3  ;;  %v10178_v56 = vmax.f32 %v4437_v12, %v10147_v28  ;;  %v10708_v36 = vld [vmem:[#allocation28_spill] sm:$0xff]  ;;  %5448 = vmatpush.bf16.msra.mxu3 %v7401_v26 }
0x2fb8   :  { %v4265_v35 = vsel %vm4229_vm2, %v10098_v40, %v4200_v17  ;;  %v10185_v5 = vmax.f32 %v4438_v59, %v4402_v44  ;;  %v10198_v32 = vmax.f32 %v4432_v39, %v4396_v41  ;;  %v4403_v38 = vmax.f32 %v4355_v8, %v10708_v36 }
0x2fb9   :  { %v4361_v40 = vmax.f32 %v10707_v16, %v4265_v35  ;;  %v10188_v53 = vmax.f32 %v4431_v25, %v4395_v13  ;;  %v10191_v27 = vmax.f32 %v4359_v46, %v9789_v21  ;;  %v10194_v24 = vmax.f32 %v4360_v15, %v10707_v16  ;;  %v10709_v15 = vld [vmem:[#allocation54_spill] sm:$0xff] }
0x2fba   :  { %5432 = vmatpush.bf16.msra.mxu2 %v7396_v0  ;;  %v10181_v0 = vmax.f32 %v4337_v2, %v10706_v60  ;;  %v4439_v12 = vmax.f32 %v10166_v45, %v4397_v10  ;;  %v4443_v17 = vmax.f32 %v4395_v13, %v10147_v28  ;;  %v4444_v55 = vmax.f32 %v4396_v41, %v4402_v44  ;;  %v7393_v60 = vld [vmem:[#allocation5 + $0xc0] sm:$0xff] }
0x2fbb   :  { %v4617_v46 = vadd.f32 %v10178_v56, %v10188_v53  ;;  %v4618_v8 = vadd.f32 %v10185_v5, %v10198_v32  ;;  %v4449_v16 = vmax.f32 %v10147_v28, %v10191_v27 }
0x2fbc   :  { %v4433_v2 = vmax.f32 %v10181_v0, %v10166_v45  ;;  %v10215_v25 = vmax.f32 %v4443_v17, %v10191_v27  ;;  %v10218_v13 = vmax.f32 %v4444_v55, %v10194_v24  ;;  %v10222_v39 = vmax.f32 %v4439_v12, %v4403_v38  ;;  %v10710_v17 = vld [vmem:[#allocation33_spill] sm:$0xff]  ;;  %v4126_v12 = vpop.permute.xlu2 %4125 }
0x2fbd   :  { %v4210_v21 = vpop.permute.xlu1 %4209 }
0x2fbe   :  { %5433 = vmatpush.bf16.msra.mxu2 %v7395_v14  ;;  %v10206_v14 = vmax.f32 %v4361_v40, %v10709_v15  ;;  %v4269_v59 = vsel %vm4229_vm2, %v10049_v11, %v4210_v21  ;;  %v4270_v35 = vsel %vm4229_vm2, %v4210_v21, %v10109_v29  ;;  %v4445_v11 = vmax.f32 %v4397_v10, %v4403_v38 }
0x2fbf   :  { %v4365_v41 = vmax.f32 %v9675_v23, %v4269_v59  ;;  %v4366_v20 = vmax.f32 %v9817_v58, %v4270_v35  ;;  %v4214_v26 = vpop.permute.xlu0 %4213  ;;  %v4450_v23 = vmax.f32 %v4402_v44, %v10194_v24  ;;  %v10236_v21 = vmax.f32 %v4433_v2, %v4397_v10 }
0x2fc0   :  { %v4271_v40 = vsel %vm4229_vm2, %v10109_v29, %v4214_v26  ;;  %v10239_v15 = vmax.f32 %v4445_v11, %v10206_v14  ;;  %v4624_v59 = vadd.f32 %v4618_v8, %v10218_v13  ;;  %v4451_v10 = vmax.f32 %v4403_v38, %v10206_v14 }
0x2fc1   :  { %v10229_v36 = vmax.f32 %v4365_v41, %v9817_v58  ;;  %v10232_v55 = vmax.f32 %v4366_v20, %v10710_v17  ;;  %v4623_v58 = vadd.f32 %v4617_v46, %v10215_v25  ;;  %v4619_v2 = vadd.f32 %v10222_v39, %v10236_v21 }
0x2fc2   :  { %5434 = vmatpush.bf16.msra.mxu2 %v7394_v22  ;;  %v4367_v22 = vmax.f32 %v10710_v17, %v4271_v40 }
0x2fc3   :  { %v10242_v28 = vmax.f32 %v4449_v16, %v10229_v36  ;;  %v10245_v29 = vmax.f32 %v4450_v23, %v10232_v55  ;;  %v4625_v46 = vadd.f32 %v4619_v2, %v10239_v15  ;;  %v7415_v2 = vld [vmem:[#allocation5 + $0x170] sm:$0xff] }
0x2fc4   :  { %v10250_v44 = vmax.f32 %v4367_v22, %v9824_v49  ;;  %v7472_v49 = vld [vmem:[#allocation5 + $0x338] sm:$0xff] }
0x2fc5   :  { %10711 = vst [vmem:[#allocation23_spill] sm:$0xff] %v10242_v28  ;;  %v4629_v35 = vadd.f32 %v4623_v58, %v10242_v28  ;;  %v4630_v41 = vadd.f32 %v4624_v59, %v10245_v29  ;;  %v4124_v20 = vpop.permute.xlu1 %4123  ;;  %v7480_v59 = vld [vmem:[#allocation5 + $0x378] sm:$0xff] }
0x2fc6   :  { %5435 = vmatpush.bf16.msra.mxu2 %v7393_v60  ;;  %v10258_v26 = vmax.f32 %v4451_v10, %v10250_v44  ;;  %v4233_v8 = vsel %vm4229_vm2, %v4124_v20, %v4126_v12  ;;  %v7416_v60 = vld [vmem:[#allocation5 + $0x178] sm:$0xff] }
0x2fc7   :  { %v4635_v11 = vpack.c.bf16 %v4629_v35, %v4629_v35  ;;  %v4636_v16 = vpack.c.bf16 %v4630_v41, %v4630_v41  ;;  %v4329_v38 = vmax.f32 %v9849_v62, %v4233_v8  ;;  %v4120_v40 = vpop.permute.xlu0 %4119  ;;  %v7471_v35 = vld [vmem:[#allocation5 + $0x330] sm:$0xff] }
0x2fc8   :  { %10712 = vst [vmem:[#allocation46_spill] sm:$0xff] %v10258_v26  ;;  %v4631_v17 = vadd.f32 %v4625_v46, %v10258_v26  ;;  %v4230_v23 = vsel %vm4229_vm2, %v10169_v19, %v4120_v40  ;;  %v10713_v8 = vld [vmem:[#allocation11_spill] sm:$0xff]  ;;  %v4130_v46 = vpop.permute.xlu2 %4129  ;;  %v10714_v26 = vld [vmem:[#allocation42_spill] sm:$0xff] }
0x2fc9   :  { %v4377_v22 = vmax.f32 %v4329_v38, %v9863_v4  ;;  %v4326_v58 = vmax.f32 %v9833_v37, %v4230_v23  ;;  %5070 = vmatmul.bf16.vlgmr.msra.gmra.mxu0 %v4635_v11  ;;  %5083 = vmatmul.bf16.vlgmr.msra.gmra.mxu1 %v4636_v16  ;;  %v7479_v11 = vld [vmem:[#allocation5 + $0x370] sm:$0xff] }
0x2fca   :  { %v4637_v10 = vpack.c.bf16 %v4631_v17, %v4631_v17  ;;  %5454 = vmatpush.bf16.msra.mxu0 %v7416_v60  ;;  %5876 = vmatpush.bf16.msra.mxu1 %v7472_v49  ;;  %v7414_v60 = vld [vmem:[#allocation5 + $0x168] sm:$0xff] }
0x2fcb   :  { %v4425_v41 = vmax.f32 %v4377_v22, %v10137_v7  ;;  %v4374_v28 = vmax.f32 %v4326_v58, %v10713_v8  ;;  %v7470_v49 = vld [vmem:[#allocation5 + $0x328] sm:$0xff]  ;;  %v10715_v7 = vld [vmem:[#allocation19_spill] sm:$0xff] }
0x2fcc   :  { %5096 = vmatmul.bf16.vlgmr.msrb.gmra.mxu2 %v4637_v10 }
0x2fcd   :  { %v4461_v19 = vmax.f32 %v4425_v41, %v10143_v3  ;;  %v4422_v38 = vmax.f32 %v4374_v28, %v10714_v26  ;;  %5889 = vmatpush.bf16.msrb.mxu2 %v7480_v59  ;;  %v4128_v37 = vpop.permute.xlu1 %4127  ;;  %v10717_v41 = vld [vmem:[#allocation60_spill] sm:$0xff] }
0x2fce   :  { %v4234_v16 = vsel %vm4229_vm2, %v4126_v12, %v4128_v37  ;;  %5455 = vmatpush.bf16.msra.mxu0 %v7415_v2  ;;  %5877 = vmatpush.bf16.msra.mxu1 %v7471_v35  ;;  %v4235_v3 = vsel %vm4229_vm2, %v4128_v37, %v4130_v46  ;;  %v10716_v12 = vld [vmem:[#allocation57_spill] sm:$0xff]  ;;  %v7478_v2 = vld [vmem:[#allocation5 + $0x368] sm:$0xff] }
0x2fcf   :  { %v4497_v17 = vadd.f32 %v10188_v53, %v4461_v19  ;;  %v4458_v23 = vmax.f32 %v4422_v38, %v10715_v7  ;;  %v4330_v22 = vmax.f32 %v9863_v4, %v4234_v16  ;;  %v4122_v58 = vpop.permute.xlu0 %4121  ;;  %v7413_v4 = vld [vmem:[#allocation5 + $0x160] sm:$0xff]  ;;  %v10718_v38 = vld [vmem:[#allocation68_spill] sm:$0xff] }
0x2fd0   :  { %v4231_v28 = vsel %vm4229_vm2, %v4120_v40, %v4122_v58  ;;  %v4232_v26 = vsel %vm4229_vm2, %v4122_v58, %v4124_v20  ;;  %v7469_v46 = vld [vmem:[#allocation5 + $0x320] sm:$0xff]  ;;  %v4331_v20 = vmax.f32 %v10716_v12, %v4235_v3  ;;  %v5467_v16 = vadd.f32 %v9985_v51, %v10718_v38 }
0x2fd1   :  { %v4494_v59 = vadd.f32 %v9969_v9, %v4458_v23  ;;  %v4378_v10 = vmax.f32 %v4330_v22, %v10716_v12  ;;  %5890 = vmatpush.bf16.msrb.mxu2 %v7479_v11  ;;  %v4503_v35 = vadd.f32 %v4497_v17, %v10178_v56  ;;  %v4327_v53 = vmax.f32 %v10713_v8, %v4231_v28  ;;  %v7477_v8 = vld [vmem:[#allocation5 + $0x360] sm:$0xff]  ;;  %v7412_v23 = vld [vmem:[#allocation5 + $0x158] sm:$0xff]  ;;  %v10719_v22 = vld [vmem:[#allocation18_spill] sm:$0xff] }
0x2fd2   :  { %v4328_v19 = vmax.f32 %v10717_v41, %v4232_v26  ;;  %5456 = vmatpush.bf16.msra.mxu0 %v7414_v60  ;;  %5878 = vmatpush.bf16.msra.mxu1 %v7470_v49  ;;  %v4216_v49 = vpop.permute.xlu2 %4215  ;;  %v4379_v58 = vmax.f32 %v4331_v20, %v10719_v22  ;;  %v7488_v12 = vld [vmem:[#allocation5 + $0x3b8] sm:$0xff] }
0x2fd3   :  { %v4500_v40 = vadd.f32 %v4494_v59, %v10718_v38  ;;  %v4426_v9 = vmax.f32 %v4378_v10, %v10160_v52  ;;  %v4375_v37 = vmax.f32 %v4327_v53, %v10717_v41  ;;  %v4509_v52 = vadd.f32 %v4503_v35, %v10215_v25  ;;  %v7468_v59 = vld [vmem:[#allocation5 + $0x318] sm:$0xff] }
0x2fd4   :  { %v4376_v11 = vmax.f32 %v4328_v19, %v9849_v62  ;;  %v5468_v62 = vadd.f32 %v10075_v30, %v10063_v33  ;;  %v4452_v35 = vmax.f32 %v9965_v50, %v10015_v47  ;;  %v4453_v53 = vmax.f32 %v10053_v61, %v10066_v42  ;;  %v10721_v19 = vld [vmem:[#allocation59_spill] sm:$0xff]  ;;  %v10722_v47 = vld [vmem:[#allocation61_spill] sm:$0xff] }
0x2fd5   :  { %5891 = vmatpush.bf16.msrb.mxu2 %v7478_v2  ;;  %v4506_v60 = vadd.f32 %v4500_v40, %v9985_v51  ;;  %v4423_v17 = vmax.f32 %v4375_v37, %v10018_v18  ;;  %v4462_v3 = vmax.f32 %v4426_v9, %v10152_v6  ;;  %v4220_v28 = vpop.permute.xlu1 %4219  ;;  %v10720_v6 = vld [vmem:[#allocation63_spill] sm:$0xff]  ;;  %v4515_v38 = vpack.c.bf16 %v4509_v52, %v4509_v52 }
0x2fd6   :  { %v4424_v7 = vmax.f32 %v4376_v11, %v10005_v31  ;;  %5457 = vmatpush.bf16.msra.mxu0 %v7413_v4  ;;  %5879 = vmatpush.bf16.msra.mxu1 %v7469_v46  ;;  %v7476_v46 = vld [vmem:[#allocation5 + $0x358] sm:$0xff]  ;;  %v7411_v40 = vld [vmem:[#allocation5 + $0x150] sm:$0xff]  ;;  %v4427_v20 = vmax.f32 %v4379_v58, %v10181_v0  ;;  %v5473_v11 = vadd.f32 %v5467_v16, %v10030_v63  ;;  %v7466_v16 = vld [vmem:[#allocation5 + $0x308] sm:$0xff] }
0x2fd7   :  { %v4218_v26 = vpop.permute.xlu0 %4217  ;;  %v4512_v51 = vpack.c.bf16 %v4506_v60, %v4506_v60  ;;  %v4459_v18 = vmax.f32 %v4423_v17, %v10022_v1  ;;  %v7467_v42 = vld [vmem:[#allocation5 + $0x310] sm:$0xff]  ;;  %v4498_v37 = vadd.f32 %v10198_v32, %v4462_v3  ;;  %v7486_v3 = vld [vmem:[#allocation5 + $0x3a8] sm:$0xff] }
0x2fd8   :  { %v4460_v31 = vmax.f32 %v4424_v7, %v10001_v43  ;;  %v4272_v10 = vsel %vm4229_vm2, %v4216_v49, %v4218_v26  ;;  %v4273_v2 = vsel %vm4229_vm2, %v4218_v26, %v4220_v28  ;;  %v7487_v9 = vld [vmem:[#allocation5 + $0x3b0] sm:$0xff]  ;;  %v10723_v7 = vld [vmem:[#allocation10_spill] sm:$0xff]  ;;  %v4463_v32 = vmax.f32 %v4427_v20, %v10166_v45 }
0x2fd9   :  { %v4368_v41 = vmax.f32 %v10720_v6, %v4272_v10  ;;  %v4369_v4 = vmax.f32 %v10721_v19, %v4273_v2  ;;  %5892 = vmatpush.bf16.msrb.mxu2 %v7477_v8  ;;  %v4495_v1 = vadd.f32 %v10061_v57, %v4459_v18  ;;  %5397 = vmatmul.bf16.vlgmr.msrb.gmra.mxu3 %v4512_v51  ;;  %v7475_v49 = vld [vmem:[#allocation5 + $0x350] sm:$0xff]  ;;  %v7474_v26 = vld [vmem:[#allocation5 + $0x348] sm:$0xff]  ;;  %v7465_v2 = vld [vmem:[#allocation5 + $0x300] sm:$0xff] }
0x2fda   :  { %v4496_v43 = vadd.f32 %v10044_v48, %v4460_v31  ;;  %5458 = vmatpush.bf16.msra.mxu0 %v7412_v23  ;;  %5880 = vmatpush.bf16.msra.mxu1 %v7468_v59  ;;  %v5474_v8 = vadd.f32 %v5468_v62, %v10083_v54  ;;  %v7410_v54 = vld [vmem:[#allocation5 + $0x148] sm:$0xff]  ;;  %v4504_v62 = vadd.f32 %v4498_v37, %v10185_v5  ;;  %v10725_v59 = vld [vmem:[#allocation9_spill] sm:$0xff]  ;;  %v10726_v31 = vld [vmem:[#allocation64_spill] sm:$0xff] }
0x2fdb   :  { %v4416_v50 = vmax.f32 %v4368_v41, %v10721_v19  ;;  %v4417_v61 = vmax.f32 %v4369_v4, %v10722_v47  ;;  %5902 = vmatpush.bf16.msrb.mxu3 %v7488_v12  ;;  %v4501_v57 = vadd.f32 %v4495_v1, %v10063_v33  ;;  %v10724_v51 = vld [vmem:[#allocation58_spill] sm:$0xff]  ;;  %v5469_v18 = vadd.f32 %v10723_v7, %v10046_v34  ;;  %v7496_v6 = vld [vmem:[#allocation5 + $0x3f8] sm:$0xff] }
0x2fdc   :  { %v4502_v48 = vadd.f32 %v4496_v43, %v10046_v34  ;;  %5436 = vmatmul.bf16.vlgmr.msra.gmra.mxu2 %v4515_v38  ;;  %v4454_v12 = vmax.f32 %v10725_v59, %v10724_v51  ;;  %v4510_v41 = vadd.f32 %v4504_v62, %v10218_v13  ;;  %v10727_v19 = vld [vmem:[#allocation36_spill] sm:$0xff]  ;;  %v7473_v43 = vld [vmem:[#allocation5 + $0x340] sm:$0xff] }
0x2fdd   :  { %v4488_v0 = vmax.f32 %v4452_v35, %v4416_v50  ;;  %v4489_v60 = vmax.f32 %v4453_v53, %v4417_v61  ;;  %5893 = vmatpush.bf16.msrb.mxu2 %v7476_v46  ;;  %v4507_v17 = vadd.f32 %v4501_v57, %v10075_v30  ;;  %v4499_v35 = vadd.f32 %v10236_v21, %v4463_v32  ;;  %v7485_v53 = vld [vmem:[#allocation5 + $0x3a0] sm:$0xff]  ;;  %v7504_v1 = vld [vmem:[#allocation5 + $0x438] sm:$0xff]  ;;  %v4226_v38 = vpop.permute.xlu1 %4225  ;;  %v7503_v57 = vld [vmem:[#allocation5 + $0x430] sm:$0xff] }
0x2fde   :  { %5459 = vmatpush.bf16.msra.mxu0 %v7411_v40  ;;  %v4508_v23 = vadd.f32 %v4502_v48, %v10723_v7  ;;  %5881 = vmatpush.bf16.msra.mxu1 %v7467_v42  ;;  %v5475_v4 = vadd.f32 %v5469_v18, %v10727_v19  ;;  %v7512_v34 = vld [vmem:[#allocation5 + $0x478] sm:$0xff]  ;;  %v7495_v42 = vld [vmem:[#allocation5 + $0x3f0] sm:$0xff]  ;;  %v7494_v7 = vld [vmem:[#allocation5 + $0x3e8] sm:$0xff]  ;;  %v4457_v19 = vmax.f32 %v10206_v14, %v10250_v44 }
0x2fdf   :  { %v10322_v52 = vadd.f32 %v5473_v11, %v4488_v0  ;;  %v10324_v33 = vadd.f32 %v5474_v8, %v4489_v60  ;;  %5903 = vmatpush.bf16.msrb.mxu3 %v7487_v9  ;;  %v10326_v63 = vpop.permute.xlu0 %4221  ;;  %v4513_v30 = vpack.c.bf16 %v4507_v17, %v4507_v17  ;;  %v4505_v21 = vadd.f32 %v4499_v35, %v10222_v39  ;;  %v7484_v61 = vld [vmem:[#allocation5 + $0x398] sm:$0xff]  ;;  %v10728_v9 = vld [vmem:[#allocation55_spill] sm:$0xff]  ;;  %v10729_v60 = vld [vmem:[#allocation53_spill] sm:$0xff] }
0x2fe0   :  { %v4274_v22 = vsel %vm4229_vm2, %v4220_v28, %v10326_v63  ;;  %v4514_v58 = vpack.c.bf16 %v4508_v23, %v4508_v23  ;;  %v7409_v28 = vld [vmem:[#allocation5 + $0x140] sm:$0xff]  ;;  %v7511_v48 = vld [vmem:[#allocation5 + $0x470] sm:$0xff]  ;;  %v4456_v11 = vmax.f32 %v10194_v24, %v10232_v55  ;;  %v5471_v8 = vadd.f32 %v10218_v13, %v10185_v5  ;;  %v7502_v24 = vld [vmem:[#allocation5 + $0x428] sm:$0xff] }
0x2fe1   :  { %v4370_v45 = vmax.f32 %v10722_v47, %v4274_v22  ;;  %5894 = vmatpush.bf16.msrb.mxu2 %v7475_v49  ;;  %5410 = vmatmul.bf16.vlgmr.msrb.gmra.mxu0 %v4513_v30  ;;  %v4516_v47 = vpack.c.bf16 %v4510_v41, %v4510_v41  ;;  %v5486_v0 = vpack.c.bf16 %v10324_v33, %v10324_v33  ;;  %v7483_v17 = vld [vmem:[#allocation5 + $0x390] sm:$0xff]  ;;  %v7510_v55 = vld [vmem:[#allocation5 + $0x468] sm:$0xff]  ;;  %v7501_v22 = vld [vmem:[#allocation5 + $0x420] sm:$0xff] }
0x2fe2   :  { %5423 = vmatmul.bf16.vlgmr.msrb.gmra.mxu1 %v4514_v58  ;;  %5460 = vmatpush.bf16.msra.mxu0 %v7410_v54  ;;  %v4511_v23 = vadd.f32 %v4505_v21, %v10239_v15  ;;  %v5477_v32 = vadd.f32 %v5471_v8, %v10245_v29  ;;  %v7482_v33 = vld [vmem:[#allocation5 + $0x388] sm:$0xff]  ;;  %v5485_v62 = vpack.c.bf16 %v10322_v52, %v10322_v52  ;;  %v7509_v30 = vld [vmem:[#allocation5 + $0x460] sm:$0xff]  ;;  %v4228_v58 = vpop.permute.xlu2 %4227  ;;  %v7500_v52 = vld [vmem:[#allocation5 + $0x418] sm:$0xff] }
0x2fe3   :  { %v4418_v10 = vmax.f32 %v4370_v45, %v10726_v31  ;;  %5882 = vmatpush.bf16.msra.mxu1 %v7466_v16  ;;  %5904 = vmatpush.bf16.msrb.mxu3 %v7486_v3  ;;  %v7493_v16 = vld [vmem:[#allocation5 + $0x3e0] sm:$0xff]  ;;  %v4277_v3 = vsel %vm4229_vm2, %v4226_v38, %v4228_v58  ;;  %v7508_v59 = vld [vmem:[#allocation5 + $0x458] sm:$0xff]  ;;  %v10730_v35 = vld [vmem:[#allocation35_spill] sm:$0xff]  ;;  %v5470_v41 = vadd.f32 %v10215_v25, %v10178_v56 }
0x2fe4   :  { %v4517_v13 = vpack.c.bf16 %v4511_v23, %v4511_v23  ;;  %v7481_v45 = vld [vmem:[#allocation5 + $0x380] sm:$0xff] }
0x2fe5   :  { %v4490_v46 = vmax.f32 %v4454_v12, %v4418_v10  ;;  %5895 = vmatpush.bf16.msrb.mxu2 %v7474_v26  ;;  %v7492_v26 = vld [vmem:[#allocation5 + $0x3d8] sm:$0xff]  ;;  %v4373_v12 = vmax.f32 %v10729_v60, %v4277_v3  ;;  %v7497_v56 = vld [vmem:[#allocation5 + $0x400] sm:$0xff] }
0x2fe6   :  { %5461 = vmatpush.bf16.msra.mxu0 %v7409_v28  ;;  %v7499_v28 = vld [vmem:[#allocation5 + $0x410] sm:$0xff]  ;;  %v7505_v14 = vld [vmem:[#allocation5 + $0x440] sm:$0xff] }
0x2fe7   :  { %v10340_v40 = vadd.f32 %v5475_v4, %v4490_v46  ;;  %5883 = vmatpush.bf16.msra.mxu1 %v7465_v2  ;;  %v4224_v20 = vpop.permute.xlu0 %4223  ;;  %5905 = vmatpush.bf16.msrb.mxu3 %v7485_v53  ;;  %v7507_v2 = vld [vmem:[#allocation5 + $0x450] sm:$0xff]  ;;  %v4421_v53 = vmax.f32 %v4373_v12, %v10730_v35  ;;  %v7498_v46 = vld [vmem:[#allocation5 + $0x408] sm:$0xff] }
0x2fe8   :  { %v4276_v50 = vsel %vm4229_vm2, %v4224_v20, %v4226_v38  ;;  %v4275_v29 = vsel %vm4229_vm2, %v10326_v63, %v4224_v20  ;;  %v7491_v63 = vld [vmem:[#allocation5 + $0x3d0] sm:$0xff]  ;;  %v7489_v38 = vld [vmem:[#allocation5 + $0x3c0] sm:$0xff] }
0x2fe9   :  { %v4372_v37 = vmax.f32 %v10728_v9, %v4276_v50  ;;  %5896 = vmatpush.bf16.msrb.mxu2 %v7473_v43  ;;  %5449 = vmatmul.bf16.vlgmr.msra.gmra.mxu3 %v4516_v47  ;;  %v4371_v51 = vmax.f32 %v10726_v31, %v4275_v29  ;;  %v5487_v18 = vpack.c.bf16 %v10340_v40, %v10340_v40  ;;  %v10731_v43 = vld [vmem:[#allocation23_spill] sm:$0xff]  ;;  %v10732_v40 = vld [vmem:[#allocation46_spill] sm:$0xff] }
0x2fea   :  { %5915 = vmatpush.bf16.msrb.mxu0 %v7496_v6  ;;  %v4455_v31 = vmax.f32 %v10191_v27, %v10229_v36  ;;  %v7490_v6 = vld [vmem:[#allocation5 + $0x3c8] sm:$0xff]  ;;  %v5472_v27 = vadd.f32 %v10239_v15, %v10222_v39  ;;  %v4493_v36 = vmax.f32 %v4457_v19, %v4421_v53 }
0x2feb   :  { %5928 = vmatpush.bf16.msrb.mxu1 %v7504_v1  ;;  %v4420_v49 = vmax.f32 %v4372_v37, %v10729_v60  ;;  %5906 = vmatpush.bf16.msrb.mxu3 %v7484_v61  ;;  %v4419_v10 = vmax.f32 %v4371_v51, %v10728_v9  ;;  %v7506_v1 = vld [vmem:[#allocation5 + $0x448] sm:$0xff] }
0x2fec   :  { %5897 = vmatmul.bf16.vlgmr.msrb.gmra.mxu2 %v5486_v0  ;;  %v5478_v20 = vadd.f32 %v5472_v27, %v10732_v40 }
0x2fed   :  { %5941 = vmatpush.bf16.msra.mxu2 %v7512_v34  ;;  %v4492_v54 = vmax.f32 %v4456_v11, %v4420_v49  ;;  %v4491_v4 = vmax.f32 %v4455_v31, %v4419_v10  ;;  %v5476_v34 = vadd.f32 %v5470_v41, %v10731_v43 }
0x2fee   :  { %5916 = vmatpush.bf16.msrb.mxu0 %v7495_v42  ;;  %v5484_v25 = vadd.f32 %v5478_v20, %v4493_v36  ;;  %v7769_v20 = vmov 0.0  }
0x2fef   :  { %5929 = vmatpush.bf16.msrb.mxu1 %v7503_v57  ;;  %v10354_v5 = vadd.f32 %v5477_v32, %v4492_v54  ;;  %5907 = vmatpush.bf16.msrb.mxu3 %v7483_v17  ;;  %v5482_v21 = vadd.f32 %v5476_v34, %v4491_v4 }
0x2ff0   :  { %v5490_v47 = vpack.c.bf16 %v5484_v25, %v5484_v25 }
0x2ff1   :  { %5942 = vmatpush.bf16.msra.mxu2 %v7511_v48  ;;  %5462 = vmatmul.bf16.vlgmr.msra.gmra.mxu0 %v4517_v13  ;;  %v5488_v44 = vpack.c.bf16 %v5482_v21, %v5482_v21  ;;  %v5489_v50 = vpack.c.bf16 %v10354_v5, %v10354_v5 }
0x2ff2   :  { %5917 = vmatpush.bf16.msrb.mxu0 %v7494_v7  ;;  %5884 = vmatmul.bf16.vlgmr.msra.gmra.mxu1 %v5485_v62 }
0x2ff3   :  { %5930 = vmatpush.bf16.msrb.mxu1 %v7502_v24  ;;  %5908 = vmatpush.bf16.msrb.mxu3 %v7482_v33 }
0x2ff5   :  { %5943 = vmatpush.bf16.msra.mxu2 %v7510_v55 }
0x2ff6   :  { %5918 = vmatpush.bf16.msrb.mxu0 %v7493_v16 }
0x2ff7   :  { %5931 = vmatpush.bf16.msrb.mxu1 %v7501_v22  ;;  %5909 = vmatpush.bf16.msrb.mxu3 %v7481_v45 }
0x2ff9   :  { %5944 = vmatpush.bf16.msra.mxu2 %v7509_v30 }
0x2ffa   :  { %5919 = vmatpush.bf16.msrb.mxu0 %v7492_v26  ;;  %5910 = vmatmul.bf16.vlgmr.msrb.gmra.mxu3 %v5487_v18 }
0x2ffb   :  { %5932 = vmatpush.bf16.msrb.mxu1 %v7500_v52 }
0x2ffd   :  { %5945 = vmatpush.bf16.msra.mxu2 %v7508_v59 }
0x2ffe   :  { %5920 = vmatpush.bf16.msrb.mxu0 %v7491_v63 }
0x2fff   :  { %5933 = vmatpush.bf16.msrb.mxu1 %v7499_v28 }
0x3001   :  { %5946 = vmatpush.bf16.msra.mxu2 %v7507_v2 }
0x3002   :  { %5921 = vmatpush.bf16.msrb.mxu0 %v7490_v6  ;;  %v5961_v6 = vlaneseq }
0x3003   :  { %5934 = vmatpush.bf16.msrb.mxu1 %v7498_v46 }
0x3004   :  { %v5962_v4 = vshrl.u32 %v5961_v6, 7 }
0x3005   :  { %5947 = vmatpush.bf16.msra.mxu2 %v7506_v1 }
0x3006   :  { %5922 = vmatpush.bf16.msrb.mxu0 %v7489_v38  ;;  %v7534_v38 = vld [vmem:[%s10433_s12] ss:$0 sm:$0xff]  ;;  %vm5963_vm3 = vcmp.lt.s32.totalorder %v5962_v4, 2 }
0x3007   :  { %5935 = vmatpush.bf16.msrb.mxu1 %v7497_v56  ;;  %v7249_v21 = vsel %vm5963_vm3, 1.0, %v7769_v20 }
0x3009   :  { %5948 = vmatpush.bf16.msra.mxu2 %v7505_v14  ;;  %5923 = vmatmul.bf16.vlgmr.msrb.gmra.mxu0 %v5488_v44  ;;  %v7520_v44 = vld [vmem:[%s10436_s15 + $0x38] sm:$0xff] }
0x300a   :  { %5936 = vmatmul.bf16.vlgmr.msrb.gmra.mxu1 %v5489_v50  ;;  %6075 = vmatpush.bf16.msra.mxu3 %v7520_v44 }
0x300c   :  { %5949 = vmatmul.bf16.vlgmr.msra.gmra.mxu2 %v5490_v47  ;;  %v5032_v39 = vpop.f32.mrf.mxu2 }
0x3014   :  { %v5034_v15 = vpop.f32.mrf.mxu2 }
0x3016   :  { %v5058_v61 = vpop.f32.mrf.mxu3 }
0x301c   :  { %v5045_v42 = vpop.f32.mrf.mxu2 }
0x301d   :  { %v5046_v9 = vadd.f32 %v5045_v42, %v5032_v39  ;;  %v7519_v39 = vld [vmem:[%s10436_s15 + $0x30] sm:$0xff]  ;;  %v7518_v42 = vld [vmem:[%s10436_s15 + $0x28] sm:$0xff] }
0x301e   :  { %v5060_v37 = vpop.f32.mrf.mxu3  ;;  %6076 = vmatpush.bf16.msra.mxu3 %v7519_v39 }
0x301f   :  { %v5059_v57 = vadd.f32 %v5058_v61, %v5046_v9 }
0x3022   :  { %6077 = vmatpush.bf16.msra.mxu3 %v7518_v42 }
0x3024   :  { %v5047_v48 = vpop.f32.mrf.mxu2 }
0x3046   :  { %v5071_v11 = vpop.f32.mrf.mxu0  ;;  %v5084_v8 = vpop.f32.mrf.mxu1 }
0x3047   :  { %v5072_v29 = vadd.f32 %v5071_v11, %v5059_v57  ;;  %v7517_v57 = vld [vmem:[%s10436_s15 + $0x20] sm:$0xff] }
0x3048   :  { %6078 = vmatpush.bf16.msra.mxu3 %v7517_v57 }
0x3049   :  { %v5085_v58 = vadd.f32 %v5084_v8, %v5072_v29  ;;  %v7516_v8 = vld [vmem:[%s10436_s15 + $0x18] sm:$0xff] }
0x304c   :  { %6079 = vmatpush.bf16.msra.mxu3 %v7516_v8 }
0x304e   :  { %v5073_v0 = vpop.f32.mrf.mxu0  ;;  %v5086_v60 = vpop.f32.mrf.mxu1 }
0x304f   :  { %v5097_v49 = vpop.f32.mrf.mxu2 }
0x3050   :  { %v5098_v51 = vadd.f32 %v5097_v49, %v5085_v58  ;;  %v7515_v49 = vld [vmem:[%s10436_s15 + $0x10] sm:$0xff] }
0x3051   :  { %6080 = vmatpush.bf16.msra.mxu3 %v7515_v49 }
0x3057   :  { %v5099_v17 = vpop.f32.mrf.mxu2 }
0x305c   :  { %v5398_v7 = vpop.f32.mrf.mxu3 }
0x305d   :  { %v5399_v52 = vadd.f32 %v5398_v7, %v5098_v51  ;;  %v7536_v51 = vld [vmem:[%s10435_s14] ss:$0 sm:$0xff] }
0x305e   :  { %v5411_v23 = vpop.f32.mrf.mxu0 }
0x305f   :  { %v5424_v32 = vpop.f32.mrf.mxu1  ;;  %v5437_v54 = vpop.f32.mrf.mxu2  ;;  %v5412_v12 = vadd.f32 %v5411_v23, %v5399_v52  ;;  %v7514_v23 = vld [vmem:[%s10436_s15 + $0x8] sm:$0xff] }
0x3060   :  { %6081 = vmatpush.bf16.msra.mxu3 %v7514_v23 }
0x3061   :  { %v5425_v63 = vadd.f32 %v5424_v32, %v5412_v12 }
0x3063   :  { %v5438_v35 = vadd.f32 %v5437_v54, %v5425_v63  ;;  %v7513_v54 = vld [vmem:[%s10436_s15] sm:$0xff] }
0x3064   :  { %v5400_v24 = vpop.f32.mrf.mxu3  ;;  %6082 = vmatpush.bf16.msra.mxu3 %v7513_v54  ;;  %v7537_v63 = vld [vmem:[%s10437_s16] ss:$0 sm:$0xff] }
0x3066   :  { %v5413_v55 = vpop.f32.mrf.mxu0 }
0x3067   :  { %v5426_v5 = vpop.f32.mrf.mxu1  ;;  %v5439_v13 = vpop.f32.mrf.mxu2 }
0x306c   :  { %v5450_v33 = vpop.f32.mrf.mxu3 }
0x306d   :  { %v5451_v41 = vadd.f32 %v5450_v33, %v5438_v35 }
0x306e   :  { %v5463_v16 = vpop.f32.mrf.mxu0 }
0x306f   :  { %v5885_v62 = vpop.f32.mrf.mxu1  ;;  %v5898_v22 = vpop.f32.mrf.mxu2  ;;  %v5464_v43 = vadd.f32 %v5463_v16, %v5451_v41 }
0x3070   :  { %v5899_v18 = vadd.f32 %v5898_v22, %v5885_v62 }
0x3074   :  { %v5452_v30 = vpop.f32.mrf.mxu3 }
0x3076   :  { %v5465_v3 = vpop.f32.mrf.mxu0 }
0x3077   :  { %v5887_v45 = vpop.f32.mrf.mxu1  ;;  %v5900_v26 = vpop.f32.mrf.mxu2  ;;  %v7535_v3 = vld [vmem:[%s10434_s13] ss:$0 sm:$0xff] }
0x307d   :  { %v5911_v59 = vpop.f32.mrf.mxu3 }
0x307e   :  { %v5912_v28 = vadd.f32 %v5911_v59, %v5899_v18 }
0x3085   :  { %v5913_v31 = vpop.f32.mrf.mxu3 }
0x3086   :  { %v5924_v10 = vpop.f32.mrf.mxu0 }
0x3087   :  { %v5937_v2 = vpop.f32.mrf.mxu1  ;;  %v5925_v53 = vadd.f32 %v5924_v10, %v5912_v28 }
0x3089   :  { %v5938_v19 = vadd.f32 %v5937_v2, %v5925_v53 }
0x308e   :  { %v5926_v46 = vpop.f32.mrf.mxu0 }
0x308f   :  { %v5950_v1 = vpop.f32.mrf.mxu2  ;;  %v5939_v34 = vpop.f32.mrf.mxu1 }
0x3090   :  { %v5951_v27 = vadd.f32 %v5950_v1, %v5938_v19 }
0x3092   :  { %v5954_v36 = vadd.f32 %v5951_v27, %v5464_v43 }
0x3094   :  { %v5955_v40 = vmul.f32 0.025, %v5954_v36 }
0x3096   :  { %v5960_v56 = vadd.f32 %v7534_v38, %v5955_v40 }
0x3097   :  { %v5952_v14 = vpop.f32.mrf.mxu2 }
0x3098   :  { %v5966_v25 = vmul.f32 %v7249_v21, %v5960_v56 }
0x309a   :  { %v5967_v50 = vrot.slane %v5966_v25, 4 }
0x309c   :  { %v5968_v47 = vadd.f32 %v5967_v50, %v5966_v25 }
0x309e   :  { %v5969_v15 = vrot.slane %v5968_v47, 2 }
0x30a0   :  { %v5970_v61 = vadd.f32 %v5969_v15, %v5968_v47 }
0x30a2   :  { %v5971_v9 = vrot.slane %v5970_v61, 1 }
0x30a4   :  { %v5972_v37 = vadd.f32 %v5971_v9, %v5970_v61 }
0x30a6   :  { %v5973_v48 = vmul.f32 0.5, %v5972_v37 }
0x30a8   :  { %v5974_v11 = vsub.f32 %v5960_v56, %v5973_v48 }
0x30aa   :  { %v5975_v0 = vmul.f32 %v5974_v11, %v5974_v11 }
0x30ac   :  { %v5976_v60 = vmul.f32 %v7249_v21, %v5975_v0 }
0x30ae   :  { %v5977_v17 = vrot.slane %v5976_v60, 4 }
0x30b0   :  { %v5978_v7 = vadd.f32 %v5977_v17, %v5976_v60 }
0x30b2   :  { %v5979_v32 = vrot.slane %v5978_v7, 2 }
0x30b4   :  { %v5980_v24 = vadd.f32 %v5979_v32, %v5978_v7 }
0x30b6   :  { %v5981_v55 = vrot.slane %v5980_v24, 1 }
0x30b8   :  { %v5982_v5 = vadd.f32 %v5981_v55, %v5980_v24 }
0x30ba   :  { %v5983_v13 = vmul.f32 0.5, %v5982_v5 }
0x30bc   :  { %v5984_v33 = vadd.f32 1e-05, %v5983_v13 }
0x30be   :  { %7690 = vrsqrt.f32 %v5984_v33  ;;  %vm5991_vm5 = vweird.f32 %v5984_v33 }
0x30c4   :  { %v7691_v16 = vpop.eup %7690 }
0x30c5   :  { %v5986_v62 = vmul.f32 %v7691_v16, %v5984_v33  ;;  %vm5992_vm4 = vweird.f32 %v7691_v16 }
0x30c6   :  { %vm5993_vm6 = vmor %vm5991_vm5, %vm5992_vm4 }
0x30c7   :  { %v5987_v22 = vmul.f32 %v7691_v16, %v5986_v62 }
0x30c9   :  { %v5988_v29 = vmul.f32 0.5, %v5987_v22 }
0x30cb   :  { %v5989_v30 = vsub.f32 1.5, %v5988_v29 }
0x30cd   :  { %v5990_v58 = vmul.f32 %v7691_v16, %v5989_v30 }
0x30cf   :  { %v5994_v45 = vsel %vm5993_vm6, %v7691_v16, %v5990_v58 }
0x30d0   :  { %v5995_v26 = vmul.f32 %v5994_v45, %v5974_v11 }
0x30d2   :  { %v6000_v52 = vmul.f32 %v7535_v3, %v5995_v26 }
0x30d4   :  { %v6005_v59 = vadd.f32 %v7536_v51, %v6000_v52 }
0x30d6   :  { %v6006_v12 = vpack.c.bf16 %v6005_v59, %v6005_v59 }
0x30d8   :  { %6083 = vmatmul.bf16.vlgmr.msra.gmra.mxu3 %v6006_v12 }
0x315b   :  { %v6084_v18 = vpop.f32.mrf.mxu3 }
0x315c   :  { %v6085_v10 = vadd.f32 %v7537_v63, %v6084_v18 }
0x315e   :  { %v6089_v28 = vsel %vm6088_vm7, %v6085_v10, -inf }
0x315f   :  { %6090 = vmax.xlane.f32.xlu1 %v6089_v28 }
0x3163   :  { %v6086_v2 = vpop.f32.mrf.mxu3 }
0x31d2   :  { %v6091_v31 = vpop.xlane.xlu1 %6090 }
0x31d3   :  { %v6092_v35 = vsub.f32 %v6085_v10, %v6091_v31 }
0x31d5   :  { %v6093_v53 = vmul.f32 1.442695, %v6092_v35 }
0x31d7   :  { %7692 = vpow2.f32 %v6093_v53 }
0x31dd   :  { %v7693_v6 = vpop.eup %7692 }
0x31de   :  { %v6095_v41 = vsel %vm6088_vm7, %v7693_v6, 0.0 }
0x31df   :  { %6096 = vadd.xlane.f32.xlu2 %v6095_v41 }
0x3252   :  { %v6097_v19 = vpop.xlane.xlu2 %6096 }
0x3253   :  { %7694 = vrcp.f32 %v6097_v19  ;;  %v6109_v43 = vand.u32 2147483648, %v6097_v19  ;;  %v6107_v27 = vand.u32 2147483647, %v6097_v19  ;;  %vm6103_vm9 = vweird.f32 %v6097_v19 }
0x3255   :  { %v6110_v38 = vor.u32 1.1754944e-38, %v6109_v43  ;;  %vm6108_vm11 = vcmp.eq.f32.partialorder %v6107_v27, 8.507059e+37 }
0x3259   :  { %v7695_v4 = vpop.eup %7694 }
0x325a   :  { %v6099_v46 = vmul.f32 %v7695_v4, %v6097_v19  ;;  %vm6104_vm8 = vweird.f32 %v7695_v4 }
0x325b   :  { %vm6105_vm10 = vmor %vm6103_vm9, %vm6104_vm8 }
0x325c   :  { %v6100_v1 = vsub.f32 1.0, %v6099_v46 }
0x325e   :  { %v6101_v34 = vmul.f32 %v7695_v4, %v6100_v1 }
0x3260   :  { %v6102_v36 = vadd.f32 %v7695_v4, %v6101_v34 }
0x3262   :  { %v6106_v40 = vsel %vm6105_vm10, %v7695_v4, %v6102_v36 }
0x3263   :  { %v6111_v20 = vsel %vm6108_vm11, %v6110_v38, %v6106_v40 }
0x3264   :  { %v6112_v21 = vmul.f32 %v7693_v6, %v6111_v20 }
0x3266   :  { %6113 = vst.msk [vmem:[%s10438_s17] sm:$0xff] %vm6088_vm7, %v6112_v21 }
0x3267   :  { %6118 = vsyncpa [#allocation4], 1 }
0x3268   :  { %6119 = vsyncpa [#allocation6], 1 }

</bundles_post_ra>
